<compile_context>
chip_gen: v7x
topology: tpu7x:2x2x1
jax: 0.10.0
libtpu: 0.0.40
codegen_flags: <defaults>
</compile_context>

<pallas_src>
import functools
import math

import jax
import jax.numpy as jnp
from jax.experimental import pallas as pl
from jax.experimental.pallas import tpu as pltpu


# ------------------------- fused conv3x3 + BN kernel -------------------------


def _conv3x3_bn_kernel(*refs, stride, dil, pad, relu, has_skip, single_row_tile):
    # refs (in order): x, [skip], w2 (9*Cin, Cout), scale (1,Cout), bias (1,Cout),
    #                  out (1, Hb, Wout, Cout), scratch xpad (Hpad, Wpad, Cin)
    if has_skip:
        x_ref, s_ref, w_ref, scale_ref, bias_ref, o_ref, xpad_ref = refs
    else:
        x_ref, w_ref, scale_ref, bias_ref, o_ref, xpad_ref = refs
        s_ref = None

    H, W, Cin = x_ref.shape[1], x_ref.shape[2], x_ref.shape[3]
    Hb, Wout, Cout = o_ref.shape[1], o_ref.shape[2], o_ref.shape[3]

    def init_scratch():
        # Fused prologue: skip-add / ReLU, then zero-pad into VMEM scratch.
        xin = x_ref[0]
        if has_skip:
            xin = xin + s_ref[0]
        if relu:
            xin = jnp.maximum(xin, 0.0)
        if pad > 0:
            xpad_ref[...] = jnp.zeros_like(xpad_ref)
            xpad_ref[pad:pad + H, pad:pad + W, :] = xin
        else:
            xpad_ref[...] = xin

    if single_row_tile:
        init_scratch()
        row0 = 0
    else:
        r = pl.program_id(1)

        @pl.when(r == 0)
        def _():
            init_scratch()

        row0 = pl.multiple_of(r * (Hb * stride), Hb * stride)

    # im2col: 9 shifted (strided) windows concatenated along channels, then one
    # (Hb*Wout, 9*Cin) @ (9*Cin, Cout) MXU contraction.
    cols = []
    for ky in range(3):
        for kx in range(3):
            h_start = row0 + ky * dil
            w_start = kx * dil
            if stride == 1:
                hsl = pl.ds(h_start, Hb)
                wsl = pl.ds(w_start, Wout)
            else:
                hsl = pl.ds(h_start, Hb, stride)
                wsl = pl.ds(w_start, Wout, stride)
            cols.append(xpad_ref[hsl, wsl, :])            # (Hb, Wout, Cin)

    patches = jnp.concatenate(cols, axis=-1)              # (Hb, Wout, 9*Cin)
    patches = patches.reshape(Hb * Wout, 9 * Cin)
    acc = jnp.dot(patches, w_ref[...], preferred_element_type=jnp.float32)
    acc = acc * scale_ref[...] + bias_ref[...]            # folded BN (f32 epilogue)
    o_ref[0] = acc.reshape(Hb, Wout, Cout).astype(o_ref.dtype)


def _row_block(hout, target=256):
    hb = min(hout, target)
    while hout % hb:
        hb -= 1
    return hb


def conv3x3_bn(x, w, scale, bias, *, stride, pad, dil, skip=None, relu=False):
    """Fused [skip-add / ReLU] -> 3x3 conv (bias-free) -> folded BatchNorm.

    x, skip: NHWC.  w: HWIO (3, 3, Cin, Cout).  Returns NHWC.
    """
    N, H, W, Cin = x.shape
    Cout = w.shape[-1]
    Hout = (H + 2 * pad - dil * 2 - 1) // stride + 1
    Wout = (W + 2 * pad - dil * 2 - 1) // stride + 1
    Hpad, Wpad = H + 2 * pad, W + 2 * pad
    Hb = _row_block(Hout)
    R = Hout // Hb

    w2 = w.reshape(9 * Cin, Cout)
    scale2 = scale.reshape(1, Cout).astype(jnp.float32)
    bias2 = bias.reshape(1, Cout).astype(jnp.float32)

    kern = functools.partial(
        _conv3x3_bn_kernel, stride=stride, dil=dil, pad=pad, relu=relu,
        has_skip=skip is not None, single_row_tile=(R == 1))

    img_spec = pl.BlockSpec((1, H, W, Cin), lambda n, r: (n, 0, 0, 0))
    in_specs = [img_spec]
    inputs = [x]
    if skip is not None:
        in_specs.append(img_spec)
        inputs.append(skip)
    in_specs += [
        pl.BlockSpec((9 * Cin, Cout), lambda n, r: (0, 0)),
        pl.BlockSpec((1, Cout), lambda n, r: (0, 0)),
        pl.BlockSpec((1, Cout), lambda n, r: (0, 0)),
    ]
    inputs += [w2, scale2, bias2]

    return pl.pallas_call(
        kern,
        out_shape=jax.ShapeDtypeStruct((N, Hout, Wout, Cout), x.dtype),
        grid=(N, R),
        in_specs=in_specs,
        out_specs=pl.BlockSpec((1, Hb, Wout, Cout), lambda n, r: (n, r, 0, 0)),
        scratch_shapes=[pltpu.VMEM((Hpad, Wpad, Cin), x.dtype)],
        compiler_params=pltpu.CompilerParams(
            dimension_semantics=("parallel", "arbitrary")),
    )(*inputs)


# --------------------- separable bilinear resize kernel ----------------------


def _interp_matrix(out_size, in_size, dtype=jnp.float32):
    """1-D bilinear (align_corners=True) interpolation matrix (out, in)."""
    if out_size == 1:
        coords = jnp.zeros((1,), jnp.float32)
    else:
        coords = jnp.arange(out_size, dtype=jnp.float32) * (
            (in_size - 1) / (out_size - 1))
    lo = jnp.clip(jnp.floor(coords).astype(jnp.int32), 0, in_size - 1)
    hi = jnp.clip(lo + 1, 0, in_size - 1)
    frac = coords - lo.astype(jnp.float32)
    eye = jnp.eye(in_size, dtype=dtype)
    return (1.0 - frac)[:, None] * eye[lo] + frac[:, None] * eye[hi]


def _bilinear_kernel(x_ref, ah_ref, bw_ref, o_ref):
    # x_ref: (1, Hi, Wi*C); ah_ref: (Ho, Hi); bw_ref: (Wi*C, Wo*C); o_ref: (1, Ho, Wo*C)
    xw = jnp.dot(x_ref[0], bw_ref[...], preferred_element_type=jnp.float32)
    out = jnp.dot(ah_ref[...], xw, preferred_element_type=jnp.float32)
    o_ref[0] = out.astype(o_ref.dtype)


def bilinear_resize(x, out_hw):
    """Bilinear, align_corners=True, separable (H and W applied as two matmuls).

    x: NHWC -> (N, Ho, Wo, C).
    """
    N, Hi, Wi, C = x.shape
    Ho, Wo = out_hw
    if (Ho, Wo) == (Hi, Wi):
        return x  # align_corners=True same-size resize is the identity
    Ah = _interp_matrix(Ho, Hi)                                   # (Ho, Hi)
    Aw = _interp_matrix(Wo, Wi)                                   # (Wo, Wi)
    Bw = jnp.kron(Aw.T, jnp.eye(C, dtype=Aw.dtype))               # (Wi*C, Wo*C)
    x2 = x.reshape(N, Hi, Wi * C)                                 # lane-dense slab
    out = pl.pallas_call(
        _bilinear_kernel,
        out_shape=jax.ShapeDtypeStruct((N, Ho, Wo * C), x.dtype),
        grid=(N,),
        in_specs=[
            pl.BlockSpec((1, Hi, Wi * C), lambda n: (n, 0, 0)),
            pl.BlockSpec((Ho, Hi), lambda n: (0, 0)),
            pl.BlockSpec((Wi * C, Wo * C), lambda n: (0, 0)),
        ],
        out_specs=pl.BlockSpec((1, Ho, Wo * C), lambda n: (n, 0, 0)),
        compiler_params=pltpu.CompilerParams(dimension_semantics=("parallel",)),
    )(x2, Ah, Bw)
    return out.reshape(N, Ho, Wo, C)


# ------------------------------- parameters ----------------------------------


def init_params(key, channel):
    """Deterministic synthetic params for the 6 BasicConv blocks (BN folded)."""
    names = ["conv1", "conv2", "conv3", "conv_rev1", "conv_rev2", "conv_sum"]
    params = {}
    eps = 1e-5
    for i, name in enumerate(names):
        kw, kg, kb, km, kv = jax.random.split(jax.random.fold_in(key, i), 5)
        w = jax.random.normal(kw, (3, 3, channel, channel), jnp.float32)
        w = w * (1.0 / math.sqrt(9 * channel))
        gamma = 1.0 + 0.1 * jax.random.normal(kg, (channel,), jnp.float32)
        beta = 0.1 * jax.random.normal(kb, (channel,), jnp.float32)
        rmean = 0.1 * jax.random.normal(km, (channel,), jnp.float32)
        rvar = 1.0 + 0.1 * jax.random.uniform(kv, (channel,), jnp.float32)
        scale = gamma / jnp.sqrt(rvar + eps)       # fold BN into affine
        bias = beta - rmean * scale
        params[name] = (w, scale, bias)
    return params


# --------------------------------- forward -----------------------------------


def usrm3_forward(x_nchw, params):
    x = jnp.transpose(x_nchw, (0, 2, 3, 1))  # NCHW -> NHWC

    y1 = conv3x3_bn(x, *params["conv1"], stride=2, pad=1, dil=1)
    y2 = conv3x3_bn(y1, *params["conv2"], stride=2, pad=1, dil=1)
    y3 = conv3x3_bn(y2, *params["conv3"], stride=1, pad=2, dil=2)

    y2up = bilinear_resize(y3, y2.shape[1:3])
    y2 = conv3x3_bn(y2, *params["conv_rev1"], stride=1, pad=1, dil=1, skip=y2up)

    y1up = bilinear_resize(y2, y1.shape[1:3])
    y1 = conv3x3_bn(y1, *params["conv_rev2"], stride=1, pad=1, dil=1, skip=y1up)

    y = bilinear_resize(y1, x.shape[1:3])
    out = conv3x3_bn(x, *params["conv_sum"], stride=1, pad=1, dil=1,
                     skip=y, relu=True)

    return jnp.transpose(out, (0, 3, 1, 2))  # NHWC -> NCHW


# ----------------------------------- main -------------------------------------


if __name__ == "__main__":
    key = jax.random.PRNGKey(0)
    kx, kp = jax.random.split(key)

    N, C, H, W = 2, 4, 16, 16
    x = jax.random.normal(kx, (N, C, H, W), jnp.float32)
    params = init_params(kp, C)

    out = jax.jit(usrm3_forward)(x, params)
    out = jax.block_until_ready(out)

    assert out.shape == (N, C, H, W), out.shape
    assert bool(jnp.all(jnp.isfinite(out)))
    print("KERNEL_OK")
</pallas_src>

<mosaic_0001>
module attributes {stable_mosaic.version = 11 : i64} {
  func.func @_conv3x3_bn_kernel(%arg0: i32, %arg1: i32, %arg2: memref<1x16x16x4xf32, #tpu.memory_space<vmem>>, %arg3: memref<36x4xf32, #tpu.memory_space<vmem>>, %arg4: memref<1x4xf32, #tpu.memory_space<vmem>>, %arg5: memref<1x4xf32, #tpu.memory_space<vmem>>, %arg6: memref<1x8x8x4xf32, #tpu.memory_space<vmem>>, %arg7: memref<18x18x4xf32, #tpu.memory_space<vmem>>) attributes {dimension_semantics = [#tpu.dimension_semantics<parallel>, #tpu.dimension_semantics<arbitrary>], iteration_bounds = array<i64: 2, 1>, scalar_prefetch = 0 : i64, scratch_operands = 1 : i64, tpu.core_type = #tpu.core_type<tc>, window_params = [{transform_indices = @transform_0, window_bounds = array<i64: 1, 16, 16, 4>}, {pipeline_mode = #tpu.pipeline_mode<synchronous>, transform_indices = @transform_1, window_bounds = array<i64: 36, 4>}, {pipeline_mode = #tpu.pipeline_mode<synchronous>, transform_indices = @transform_2, window_bounds = array<i64: 1, 4>}, {pipeline_mode = #tpu.pipeline_mode<synchronous>, transform_indices = @transform_3, window_bounds = array<i64: 1, 4>}, {transform_indices = @transform_4, window_bounds = array<i64: 1, 8, 8, 4>}]} {
    %c0 = arith.constant 0 : index
    %c0_0 = arith.constant 0 : index
    %c0_1 = arith.constant 0 : index
    %c0_2 = arith.constant 0 : index
    %0 = vector.load %arg2[%c0, %c0_0, %c0_1, %c0_2] : memref<1x16x16x4xf32, #tpu.memory_space<vmem>>, vector<1x16x16x4xf32>
    %1 = vector.shape_cast %0 : vector<1x16x16x4xf32> to vector<16x16x4xf32>
    %cst = arith.constant 0.000000e+00 : f32
    %2 = vector.broadcast %cst : f32 to vector<18x18x4xf32>
    %c0_3 = arith.constant 0 : index
    %c0_4 = arith.constant 0 : index
    %c0_5 = arith.constant 0 : index
    %3 = vector.load %arg7[%c0_3, %c0_4, %c0_5] : memref<18x18x4xf32, #tpu.memory_space<vmem>>, vector<18x18x4xf32>
    tpu.vector_store %arg7[%c0_3, %c0_4, %c0_5], %2 {strides = array<i32>} : memref<18x18x4xf32, #tpu.memory_space<vmem>>, vector<18x18x4xf32>,
    %c1 = arith.constant 1 : index
    %c1_6 = arith.constant 1 : index
    %c0_7 = arith.constant 0 : index
    %4 = vector.load %arg7[%c1, %c1_6, %c0_7] : memref<18x18x4xf32, #tpu.memory_space<vmem>>, vector<16x16x4xf32>
    tpu.vector_store %arg7[%c1, %c1_6, %c0_7], %1 {strides = array<i32>} : memref<18x18x4xf32, #tpu.memory_space<vmem>>, vector<16x16x4xf32>,
    %c0_8 = arith.constant 0 : index
    %c0_9 = arith.constant 0 : index
    %c0_10 = arith.constant 0 : index
    %5 = tpu.strided_load %arg7[%c0_8, %c0_9, %c0_10] {strides = array<i32: 2, 2, 1>} : memref<18x18x4xf32, #tpu.memory_space<vmem>>, vector<8x8x4xf32>
    %c0_11 = arith.constant 0 : index
    %c1_12 = arith.constant 1 : index
    %c0_13 = arith.constant 0 : index
    %6 = tpu.strided_load %arg7[%c0_11, %c1_12, %c0_13] {strides = array<i32: 2, 2, 1>} : memref<18x18x4xf32, #tpu.memory_space<vmem>>, vector<8x8x4xf32>
    %c0_14 = arith.constant 0 : index
    %c2 = arith.constant 2 : index
    %c0_15 = arith.constant 0 : index
    %7 = tpu.strided_load %arg7[%c0_14, %c2, %c0_15] {strides = array<i32: 2, 2, 1>} : memref<18x18x4xf32, #tpu.memory_space<vmem>>, vector<8x8x4xf32>
    %c1_16 = arith.constant 1 : index
    %c0_17 = arith.constant 0 : index
    %c0_18 = arith.constant 0 : index
    %8 = tpu.strided_load %arg7[%c1_16, %c0_17, %c0_18] {strides = array<i32: 2, 2, 1>} : memref<18x18x4xf32, #tpu.memory_space<vmem>>, vector<8x8x4xf32>
    %c1_19 = arith.constant 1 : index
    %c1_20 = arith.constant 1 : index
    %c0_21 = arith.constant 0 : index
    %9 = tpu.strided_load %arg7[%c1_19, %c1_20, %c0_21] {strides = array<i32: 2, 2, 1>} : memref<18x18x4xf32, #tpu.memory_space<vmem>>, vector<8x8x4xf32>
    %c1_22 = arith.constant 1 : index
    %c2_23 = arith.constant 2 : index
    %c0_24 = arith.constant 0 : index
    %10 = tpu.strided_load %arg7[%c1_22, %c2_23, %c0_24] {strides = array<i32: 2, 2, 1>} : memref<18x18x4xf32, #tpu.memory_space<vmem>>, vector<8x8x4xf32>
    %c2_25 = arith.constant 2 : index
    %c0_26 = arith.constant 0 : index
    %c0_27 = arith.constant 0 : index
    %11 = tpu.strided_load %arg7[%c2_25, %c0_26, %c0_27] {strides = array<i32: 2, 2, 1>} : memref<18x18x4xf32, #tpu.memory_space<vmem>>, vector<8x8x4xf32>
    %c2_28 = arith.constant 2 : index
    %c1_29 = arith.constant 1 : index
    %c0_30 = arith.constant 0 : index
    %12 = tpu.strided_load %arg7[%c2_28, %c1_29, %c0_30] {strides = array<i32: 2, 2, 1>} : memref<18x18x4xf32, #tpu.memory_space<vmem>>, vector<8x8x4xf32>
    %c2_31 = arith.constant 2 : index
    %c2_32 = arith.constant 2 : index
    %c0_33 = arith.constant 0 : index
    %13 = tpu.strided_load %arg7[%c2_31, %c2_32, %c0_33] {strides = array<i32: 2, 2, 1>} : memref<18x18x4xf32, #tpu.memory_space<vmem>>, vector<8x8x4xf32>
    %14 = tpu.concatenate %5, %6, %7, %8, %9, %10, %11, %12, %13 in 2 : vector<8x8x4xf32>, vector<8x8x4xf32>, vector<8x8x4xf32>, vector<8x8x4xf32>, vector<8x8x4xf32>, vector<8x8x4xf32>, vector<8x8x4xf32>, vector<8x8x4xf32>, vector<8x8x4xf32> -> vector<8x8x36xf32>
    %15 = vector.shape_cast %14 : vector<8x8x36xf32> to vector<64x36xf32>
    %c0_34 = arith.constant 0 : index
    %c0_35 = arith.constant 0 : index
    %16 = vector.load %arg3[%c0_34, %c0_35] : memref<36x4xf32, #tpu.memory_space<vmem>>, vector<36x4xf32>
    %cst_36 = arith.constant dense<0.000000e+00> : vector<64x4xf32>
    %17 = tpu.matmul %15, %16, %cst_36 {dimension_numbers = #tpu.dot_dimension_numbers<[1], [0], [0], [1], [0, 0, 1, 1], [], []>} : vector<64x36xf32>, vector<36x4xf32>, vector<64x4xf32> -> vector<64x4xf32>
    %c0_37 = arith.constant 0 : index
    %c0_38 = arith.constant 0 : index
    %18 = vector.load %arg4[%c0_37, %c0_38] : memref<1x4xf32, #tpu.memory_space<vmem>>, vector<1x4xf32>
    %19 = vector.broadcast %18 : vector<1x4xf32> to vector<64x4xf32>
    %20 = arith.mulf %17, %19 : vector<64x4xf32>
    %c0_39 = arith.constant 0 : index
    %c0_40 = arith.constant 0 : index
    %21 = vector.load %arg5[%c0_39, %c0_40] : memref<1x4xf32, #tpu.memory_space<vmem>>, vector<1x4xf32>
    %22 = vector.broadcast %21 : vector<1x4xf32> to vector<64x4xf32>
    %23 = arith.addf %20, %22 : vector<64x4xf32>
    %24 = vector.shape_cast %23 : vector<64x4xf32> to vector<8x8x4xf32>
    %c0_41 = arith.constant 0 : index
    %c0_42 = arith.constant 0 : index
    %c0_43 = arith.constant 0 : index
    %c0_44 = arith.constant 0 : index
    %25 = vector.load %arg6[%c0_41, %c0_42, %c0_43, %c0_44] : memref<1x8x8x4xf32, #tpu.memory_space<vmem>>, vector<1x8x8x4xf32>
    %26 = vector.shape_cast %25 : vector<1x8x8x4xf32> to vector<8x8x4xf32>
    %27 = vector.shape_cast %24 : vector<8x8x4xf32> to vector<1x8x8x4xf32>
    tpu.vector_store %arg6[%c0_41, %c0_42, %c0_43, %c0_44], %27 {strides = array<i32>} : memref<1x8x8x4xf32, #tpu.memory_space<vmem>>, vector<1x8x8x4xf32>,
    return
  }
  func.func @transform_0(%arg0: i32, %arg1: i32) -> (i32, i32, i32, i32) {
    %c0_i32 = arith.constant 0 : i32
    %c0_i32_0 = arith.constant 0 : i32
    %c0_i32_1 = arith.constant 0 : i32
    %c0_i32_2 = arith.constant 0 : i32
    return %arg0, %c0_i32, %c0_i32_0, %c0_i32_1 : i32, i32, i32, i32
  }
  func.func @transform_1(%arg0: i32, %arg1: i32) -> (i32, i32) {
    %c0_i32 = arith.constant 0 : i32
    %c0_i32_0 = arith.constant 0 : i32
    %c0_i32_1 = arith.constant 0 : i32
    return %c0_i32, %c0_i32_0 : i32, i32
  }
  func.func @transform_2(%arg0: i32, %arg1: i32) -> (i32, i32) {
    %c0_i32 = arith.constant 0 : i32
    %c0_i32_0 = arith.constant 0 : i32
    %c0_i32_1 = arith.constant 0 : i32
    return %c0_i32, %c0_i32_0 : i32, i32
  }
  func.func @transform_3(%arg0: i32, %arg1: i32) -> (i32, i32) {
    %c0_i32 = arith.constant 0 : i32
    %c0_i32_0 = arith.constant 0 : i32
    %c0_i32_1 = arith.constant 0 : i32
    return %c0_i32, %c0_i32_0 : i32, i32
  }
  func.func @transform_4(%arg0: i32, %arg1: i32) -> (i32, i32, i32, i32) {
    %c0_i32 = arith.constant 0 : i32
    %c0_i32_0 = arith.constant 0 : i32
    %c0_i32_1 = arith.constant 0 : i32
    return %arg0, %arg1, %c0_i32, %c0_i32_0 : i32, i32, i32, i32
  }
}

module attributes {stable_mosaic.version = 11 : i64} {
  func.func @_conv3x3_bn_kernel(%arg0: i32, %arg1: i32, %arg2: memref<1x8x8x4xf32, #tpu.memory_space<vmem>>, %arg3: memref<36x4xf32, #tpu.memory_space<vmem>>, %arg4: memref<1x4xf32, #tpu.memory_space<vmem>>, %arg5: memref<1x4xf32, #tpu.memory_space<vmem>>, %arg6: memref<1x4x4x4xf32, #tpu.memory_space<vmem>>, %arg7: memref<10x10x4xf32, #tpu.memory_space<vmem>>) attributes {dimension_semantics = [#tpu.dimension_semantics<parallel>, #tpu.dimension_semantics<arbitrary>], iteration_bounds = array<i64: 2, 1>, scalar_prefetch = 0 : i64, scratch_operands = 1 : i64, tpu.core_type = #tpu.core_type<tc>, window_params = [{transform_indices = @transform_0, window_bounds = array<i64: 1, 8, 8, 4>}, {pipeline_mode = #tpu.pipeline_mode<synchronous>, transform_indices = @transform_1, window_bounds = array<i64: 36, 4>}, {pipeline_mode = #tpu.pipeline_mode<synchronous>, transform_indices = @transform_2, window_bounds = array<i64: 1, 4>}, {pipeline_mode = #tpu.pipeline_mode<synchronous>, transform_indices = @transform_3, window_bounds = array<i64: 1, 4>}, {transform_indices = @transform_4, window_bounds = array<i64: 1, 4, 4, 4>}]} {
    %c0 = arith.constant 0 : index
    %c0_0 = arith.constant 0 : index
    %c0_1 = arith.constant 0 : index
    %c0_2 = arith.constant 0 : index
    %0 = vector.load %arg2[%c0, %c0_0, %c0_1, %c0_2] : memref<1x8x8x4xf32, #tpu.memory_space<vmem>>, vector<1x8x8x4xf32>
    %1 = vector.shape_cast %0 : vector<1x8x8x4xf32> to vector<8x8x4xf32>
    %cst = arith.constant 0.000000e+00 : f32
    %2 = vector.broadcast %cst : f32 to vector<10x10x4xf32>
    %c0_3 = arith.constant 0 : index
    %c0_4 = arith.constant 0 : index
    %c0_5 = arith.constant 0 : index
    %3 = vector.load %arg7[%c0_3, %c0_4, %c0_5] : memref<10x10x4xf32, #tpu.memory_space<vmem>>, vector<10x10x4xf32>
    tpu.vector_store %arg7[%c0_3, %c0_4, %c0_5], %2 {strides = array<i32>} : memref<10x10x4xf32, #tpu.memory_space<vmem>>, vector<10x10x4xf32>,
    %c1 = arith.constant 1 : index
    %c1_6 = arith.constant 1 : index
    %c0_7 = arith.constant 0 : index
    %4 = vector.load %arg7[%c1, %c1_6, %c0_7] : memref<10x10x4xf32, #tpu.memory_space<vmem>>, vector<8x8x4xf32>
    tpu.vector_store %arg7[%c1, %c1_6, %c0_7], %1 {strides = array<i32>} : memref<10x10x4xf32, #tpu.memory_space<vmem>>, vector<8x8x4xf32>,
    %c0_8 = arith.constant 0 : index
    %c0_9 = arith.constant 0 : index
    %c0_10 = arith.constant 0 : index
    %5 = tpu.strided_load %arg7[%c0_8, %c0_9, %c0_10] {strides = array<i32: 2, 2, 1>} : memref<10x10x4xf32, #tpu.memory_space<vmem>>, vector<4x4x4xf32>
    %c0_11 = arith.constant 0 : index
    %c1_12 = arith.constant 1 : index
    %c0_13 = arith.constant 0 : index
    %6 = tpu.strided_load %arg7[%c0_11, %c1_12, %c0_13] {strides = array<i32: 2, 2, 1>} : memref<10x10x4xf32, #tpu.memory_space<vmem>>, vector<4x4x4xf32>
    %c0_14 = arith.constant 0 : index
    %c2 = arith.constant 2 : index
    %c0_15 = arith.constant 0 : index
    %7 = tpu.strided_load %arg7[%c0_14, %c2, %c0_15] {strides = array<i32: 2, 2, 1>} : memref<10x10x4xf32, #tpu.memory_space<vmem>>, vector<4x4x4xf32>
    %c1_16 = arith.constant 1 : index
    %c0_17 = arith.constant 0 : index
    %c0_18 = arith.constant 0 : index
    %8 = tpu.strided_load %arg7[%c1_16, %c0_17, %c0_18] {strides = array<i32: 2, 2, 1>} : memref<10x10x4xf32, #tpu.memory_space<vmem>>, vector<4x4x4xf32>
    %c1_19 = arith.constant 1 : index
    %c1_20 = arith.constant 1 : index
    %c0_21 = arith.constant 0 : index
    %9 = tpu.strided_load %arg7[%c1_19, %c1_20, %c0_21] {strides = array<i32: 2, 2, 1>} : memref<10x10x4xf32, #tpu.memory_space<vmem>>, vector<4x4x4xf32>
    %c1_22 = arith.constant 1 : index
    %c2_23 = arith.constant 2 : index
    %c0_24 = arith.constant 0 : index
    %10 = tpu.strided_load %arg7[%c1_22, %c2_23, %c0_24] {strides = array<i32: 2, 2, 1>} : memref<10x10x4xf32, #tpu.memory_space<vmem>>, vector<4x4x4xf32>
    %c2_25 = arith.constant 2 : index
    %c0_26 = arith.constant 0 : index
    %c0_27 = arith.constant 0 : index
    %11 = tpu.strided_load %arg7[%c2_25, %c0_26, %c0_27] {strides = array<i32: 2, 2, 1>} : memref<10x10x4xf32, #tpu.memory_space<vmem>>, vector<4x4x4xf32>
    %c2_28 = arith.constant 2 : index
    %c1_29 = arith.constant 1 : index
    %c0_30 = arith.constant 0 : index
    %12 = tpu.strided_load %arg7[%c2_28, %c1_29, %c0_30] {strides = array<i32: 2, 2, 1>} : memref<10x10x4xf32, #tpu.memory_space<vmem>>, vector<4x4x4xf32>
    %c2_31 = arith.constant 2 : index
    %c2_32 = arith.constant 2 : index
    %c0_33 = arith.constant 0 : index
    %13 = tpu.strided_load %arg7[%c2_31, %c2_32, %c0_33] {strides = array<i32: 2, 2, 1>} : memref<10x10x4xf32, #tpu.memory_space<vmem>>, vector<4x4x4xf32>
    %14 = tpu.concatenate %5, %6, %7, %8, %9, %10, %11, %12, %13 in 2 : vector<4x4x4xf32>, vector<4x4x4xf32>, vector<4x4x4xf32>, vector<4x4x4xf32>, vector<4x4x4xf32>, vector<4x4x4xf32>, vector<4x4x4xf32>, vector<4x4x4xf32>, vector<4x4x4xf32> -> vector<4x4x36xf32>
    %15 = vector.shape_cast %14 : vector<4x4x36xf32> to vector<16x36xf32>
    %c0_34 = arith.constant 0 : index
    %c0_35 = arith.constant 0 : index
    %16 = vector.load %arg3[%c0_34, %c0_35] : memref<36x4xf32, #tpu.memory_space<vmem>>, vector<36x4xf32>
    %cst_36 = arith.constant dense<0.000000e+00> : vector<16x4xf32>
    %17 = tpu.matmul %15, %16, %cst_36 {dimension_numbers = #tpu.dot_dimension_numbers<[1], [0], [0], [1], [0, 0, 1, 1], [], []>} : vector<16x36xf32>, vector<36x4xf32>, vector<16x4xf32> -> vector<16x4xf32>
    %c0_37 = arith.constant 0 : index
    %c0_38 = arith.constant 0 : index
    %18 = vector.load %arg4[%c0_37, %c0_38] : memref<1x4xf32, #tpu.memory_space<vmem>>, vector<1x4xf32>
    %19 = vector.broadcast %18 : vector<1x4xf32> to vector<16x4xf32>
    %20 = arith.mulf %17, %19 : vector<16x4xf32>
    %c0_39 = arith.constant 0 : index
    %c0_40 = arith.constant 0 : index
    %21 = vector.load %arg5[%c0_39, %c0_40] : memref<1x4xf32, #tpu.memory_space<vmem>>, vector<1x4xf32>
    %22 = vector.broadcast %21 : vector<1x4xf32> to vector<16x4xf32>
    %23 = arith.addf %20, %22 : vector<16x4xf32>
    %24 = vector.shape_cast %23 : vector<16x4xf32> to vector<4x4x4xf32>
    %c0_41 = arith.constant 0 : index
    %c0_42 = arith.constant 0 : index
    %c0_43 = arith.constant 0 : index
    %c0_44 = arith.constant 0 : index
    %25 = vector.load %arg6[%c0_41, %c0_42, %c0_43, %c0_44] : memref<1x4x4x4xf32, #tpu.memory_space<vmem>>, vector<1x4x4x4xf32>
    %26 = vector.shape_cast %25 : vector<1x4x4x4xf32> to vector<4x4x4xf32>
    %27 = vector.shape_cast %24 : vector<4x4x4xf32> to vector<1x4x4x4xf32>
    tpu.vector_store %arg6[%c0_41, %c0_42, %c0_43, %c0_44], %27 {strides = array<i32>} : memref<1x4x4x4xf32, #tpu.memory_space<vmem>>, vector<1x4x4x4xf32>,
    return
  }
  func.func @transform_0(%arg0: i32, %arg1: i32) -> (i32, i32, i32, i32) {
    %c0_i32 = arith.constant 0 : i32
    %c0_i32_0 = arith.constant 0 : i32
    %c0_i32_1 = arith.constant 0 : i32
    %c0_i32_2 = arith.constant 0 : i32
    return %arg0, %c0_i32, %c0_i32_0, %c0_i32_1 : i32, i32, i32, i32
  }
  func.func @transform_1(%arg0: i32, %arg1: i32) -> (i32, i32) {
    %c0_i32 = arith.constant 0 : i32
    %c0_i32_0 = arith.constant 0 : i32
    %c0_i32_1 = arith.constant 0 : i32
    return %c0_i32, %c0_i32_0 : i32, i32
  }
  func.func @transform_2(%arg0: i32, %arg1: i32) -> (i32, i32) {
    %c0_i32 = arith.constant 0 : i32
    %c0_i32_0 = arith.constant 0 : i32
    %c0_i32_1 = arith.constant 0 : i32
    return %c0_i32, %c0_i32_0 : i32, i32
  }
  func.func @transform_3(%arg0: i32, %arg1: i32) -> (i32, i32) {
    %c0_i32 = arith.constant 0 : i32
    %c0_i32_0 = arith.constant 0 : i32
    %c0_i32_1 = arith.constant 0 : i32
    return %c0_i32, %c0_i32_0 : i32, i32
  }
  func.func @transform_4(%arg0: i32, %arg1: i32) -> (i32, i32, i32, i32) {
    %c0_i32 = arith.constant 0 : i32
    %c0_i32_0 = arith.constant 0 : i32
    %c0_i32_1 = arith.constant 0 : i32
    return %arg0, %arg1, %c0_i32, %c0_i32_0 : i32, i32, i32, i32
  }
}

module attributes {stable_mosaic.version = 11 : i64} {
  func.func @_conv3x3_bn_kernel(%arg0: i32, %arg1: i32, %arg2: memref<1x4x4x4xf32, #tpu.memory_space<vmem>>, %arg3: memref<36x4xf32, #tpu.memory_space<vmem>>, %arg4: memref<1x4xf32, #tpu.memory_space<vmem>>, %arg5: memref<1x4xf32, #tpu.memory_space<vmem>>, %arg6: memref<1x4x4x4xf32, #tpu.memory_space<vmem>>, %arg7: memref<8x8x4xf32, #tpu.memory_space<vmem>>) attributes {dimension_semantics = [#tpu.dimension_semantics<parallel>, #tpu.dimension_semantics<arbitrary>], iteration_bounds = array<i64: 2, 1>, scalar_prefetch = 0 : i64, scratch_operands = 1 : i64, tpu.core_type = #tpu.core_type<tc>, window_params = [{transform_indices = @transform_0, window_bounds = array<i64: 1, 4, 4, 4>}, {pipeline_mode = #tpu.pipeline_mode<synchronous>, transform_indices = @transform_1, window_bounds = array<i64: 36, 4>}, {pipeline_mode = #tpu.pipeline_mode<synchronous>, transform_indices = @transform_2, window_bounds = array<i64: 1, 4>}, {pipeline_mode = #tpu.pipeline_mode<synchronous>, transform_indices = @transform_3, window_bounds = array<i64: 1, 4>}, {transform_indices = @transform_4, window_bounds = array<i64: 1, 4, 4, 4>}]} {
    %c0 = arith.constant 0 : index
    %c0_0 = arith.constant 0 : index
    %c0_1 = arith.constant 0 : index
    %c0_2 = arith.constant 0 : index
    %0 = vector.load %arg2[%c0, %c0_0, %c0_1, %c0_2] : memref<1x4x4x4xf32, #tpu.memory_space<vmem>>, vector<1x4x4x4xf32>
    %1 = vector.shape_cast %0 : vector<1x4x4x4xf32> to vector<4x4x4xf32>
    %cst = arith.constant 0.000000e+00 : f32
    %2 = vector.broadcast %cst : f32 to vector<8x8x4xf32>
    %c0_3 = arith.constant 0 : index
    %c0_4 = arith.constant 0 : index
    %c0_5 = arith.constant 0 : index
    %3 = vector.load %arg7[%c0_3, %c0_4, %c0_5] : memref<8x8x4xf32, #tpu.memory_space<vmem>>, vector<8x8x4xf32>
    tpu.vector_store %arg7[%c0_3, %c0_4, %c0_5], %2 {strides = array<i32>} : memref<8x8x4xf32, #tpu.memory_space<vmem>>, vector<8x8x4xf32>,
    %c2 = arith.constant 2 : index
    %c2_6 = arith.constant 2 : index
    %c0_7 = arith.constant 0 : index
    %4 = vector.load %arg7[%c2, %c2_6, %c0_7] : memref<8x8x4xf32, #tpu.memory_space<vmem>>, vector<4x4x4xf32>
    tpu.vector_store %arg7[%c2, %c2_6, %c0_7], %1 {strides = array<i32>} : memref<8x8x4xf32, #tpu.memory_space<vmem>>, vector<4x4x4xf32>,
    %c0_8 = arith.constant 0 : index
    %c0_9 = arith.constant 0 : index
    %c0_10 = arith.constant 0 : index
    %5 = vector.load %arg7[%c0_8, %c0_9, %c0_10] : memref<8x8x4xf32, #tpu.memory_space<vmem>>, vector<4x4x4xf32>
    %c0_11 = arith.constant 0 : index
    %c2_12 = arith.constant 2 : index
    %c0_13 = arith.constant 0 : index
    %6 = vector.load %arg7[%c0_11, %c2_12, %c0_13] : memref<8x8x4xf32, #tpu.memory_space<vmem>>, vector<4x4x4xf32>
    %c0_14 = arith.constant 0 : index
    %c4 = arith.constant 4 : index
    %c0_15 = arith.constant 0 : index
    %7 = vector.load %arg7[%c0_14, %c4, %c0_15] : memref<8x8x4xf32, #tpu.memory_space<vmem>>, vector<4x4x4xf32>
    %c2_16 = arith.constant 2 : index
    %c0_17 = arith.constant 0 : index
    %c0_18 = arith.constant 0 : index
    %8 = vector.load %arg7[%c2_16, %c0_17, %c0_18] : memref<8x8x4xf32, #tpu.memory_space<vmem>>, vector<4x4x4xf32>
    %c2_19 = arith.constant 2 : index
    %c2_20 = arith.constant 2 : index
    %c0_21 = arith.constant 0 : index
    %9 = vector.load %arg7[%c2_19, %c2_20, %c0_21] : memref<8x8x4xf32, #tpu.memory_space<vmem>>, vector<4x4x4xf32>
    %c2_22 = arith.constant 2 : index
    %c4_23 = arith.constant 4 : index
    %c0_24 = arith.constant 0 : index
    %10 = vector.load %arg7[%c2_22, %c4_23, %c0_24] : memref<8x8x4xf32, #tpu.memory_space<vmem>>, vector<4x4x4xf32>
    %c4_25 = arith.constant 4 : index
    %c0_26 = arith.constant 0 : index
    %c0_27 = arith.constant 0 : index
    %11 = vector.load %arg7[%c4_25, %c0_26, %c0_27] : memref<8x8x4xf32, #tpu.memory_space<vmem>>, vector<4x4x4xf32>
    %c4_28 = arith.constant 4 : index
    %c2_29 = arith.constant 2 : index
    %c0_30 = arith.constant 0 : index
    %12 = vector.load %arg7[%c4_28, %c2_29, %c0_30] : memref<8x8x4xf32, #tpu.memory_space<vmem>>, vector<4x4x4xf32>
    %c4_31 = arith.constant 4 : index
    %c4_32 = arith.constant 4 : index
    %c0_33 = arith.constant 0 : index
    %13 = vector.load %arg7[%c4_31, %c4_32, %c0_33] : memref<8x8x4xf32, #tpu.memory_space<vmem>>, vector<4x4x4xf32>
    %14 = tpu.concatenate %5, %6, %7, %8, %9, %10, %11, %12, %13 in 2 : vector<4x4x4xf32>, vector<4x4x4xf32>, vector<4x4x4xf32>, vector<4x4x4xf32>, vector<4x4x4xf32>, vector<4x4x4xf32>, vector<4x4x4xf32>, vector<4x4x4xf32>, vector<4x4x4xf32> -> vector<4x4x36xf32>
    %15 = vector.shape_cast %14 : vector<4x4x36xf32> to vector<16x36xf32>
    %c0_34 = arith.constant 0 : index
    %c0_35 = arith.constant 0 : index
    %16 = vector.load %arg3[%c0_34, %c0_35] : memref<36x4xf32, #tpu.memory_space<vmem>>, vector<36x4xf32>
    %cst_36 = arith.constant dense<0.000000e+00> : vector<16x4xf32>
    %17 = tpu.matmul %15, %16, %cst_36 {dimension_numbers = #tpu.dot_dimension_numbers<[1], [0], [0], [1], [0, 0, 1, 1], [], []>} : vector<16x36xf32>, vector<36x4xf32>, vector<16x4xf32> -> vector<16x4xf32>
    %c0_37 = arith.constant 0 : index
    %c0_38 = arith.constant 0 : index
    %18 = vector.load %arg4[%c0_37, %c0_38] : memref<1x4xf32, #tpu.memory_space<vmem>>, vector<1x4xf32>
    %19 = vector.broadcast %18 : vector<1x4xf32> to vector<16x4xf32>
    %20 = arith.mulf %17, %19 : vector<16x4xf32>
    %c0_39 = arith.constant 0 : index
    %c0_40 = arith.constant 0 : index
    %21 = vector.load %arg5[%c0_39, %c0_40] : memref<1x4xf32, #tpu.memory_space<vmem>>, vector<1x4xf32>
    %22 = vector.broadcast %21 : vector<1x4xf32> to vector<16x4xf32>
    %23 = arith.addf %20, %22 : vector<16x4xf32>
    %24 = vector.shape_cast %23 : vector<16x4xf32> to vector<4x4x4xf32>
    %c0_41 = arith.constant 0 : index
    %c0_42 = arith.constant 0 : index
    %c0_43 = arith.constant 0 : index
    %c0_44 = arith.constant 0 : index
    %25 = vector.load %arg6[%c0_41, %c0_42, %c0_43, %c0_44] : memref<1x4x4x4xf32, #tpu.memory_space<vmem>>, vector<1x4x4x4xf32>
    %26 = vector.shape_cast %25 : vector<1x4x4x4xf32> to vector<4x4x4xf32>
    %27 = vector.shape_cast %24 : vector<4x4x4xf32> to vector<1x4x4x4xf32>
    tpu.vector_store %arg6[%c0_41, %c0_42, %c0_43, %c0_44], %27 {strides = array<i32>} : memref<1x4x4x4xf32, #tpu.memory_space<vmem>>, vector<1x4x4x4xf32>,
    return
  }
  func.func @transform_0(%arg0: i32, %arg1: i32) -> (i32, i32, i32, i32) {
    %c0_i32 = arith.constant 0 : i32
    %c0_i32_0 = arith.constant 0 : i32
    %c0_i32_1 = arith.constant 0 : i32
    %c0_i32_2 = arith.constant 0 : i32
    return %arg0, %c0_i32, %c0_i32_0, %c0_i32_1 : i32, i32, i32, i32
  }
  func.func @transform_1(%arg0: i32, %arg1: i32) -> (i32, i32) {
    %c0_i32 = arith.constant 0 : i32
    %c0_i32_0 = arith.constant 0 : i32
    %c0_i32_1 = arith.constant 0 : i32
    return %c0_i32, %c0_i32_0 : i32, i32
  }
  func.func @transform_2(%arg0: i32, %arg1: i32) -> (i32, i32) {
    %c0_i32 = arith.constant 0 : i32
    %c0_i32_0 = arith.constant 0 : i32
    %c0_i32_1 = arith.constant 0 : i32
    return %c0_i32, %c0_i32_0 : i32, i32
  }
  func.func @transform_3(%arg0: i32, %arg1: i32) -> (i32, i32) {
    %c0_i32 = arith.constant 0 : i32
    %c0_i32_0 = arith.constant 0 : i32
    %c0_i32_1 = arith.constant 0 : i32
    return %c0_i32, %c0_i32_0 : i32, i32
  }
  func.func @transform_4(%arg0: i32, %arg1: i32) -> (i32, i32, i32, i32) {
    %c0_i32 = arith.constant 0 : i32
    %c0_i32_0 = arith.constant 0 : i32
    %c0_i32_1 = arith.constant 0 : i32
    return %arg0, %arg1, %c0_i32, %c0_i32_0 : i32, i32, i32, i32
  }
}

module attributes {stable_mosaic.version = 11 : i64} {
  func.func @_conv3x3_bn_kernel(%arg0: i32, %arg1: i32, %arg2: memref<1x4x4x4xf32, #tpu.memory_space<vmem>>, %arg3: memref<1x4x4x4xf32, #tpu.memory_space<vmem>>, %arg4: memref<36x4xf32, #tpu.memory_space<vmem>>, %arg5: memref<1x4xf32, #tpu.memory_space<vmem>>, %arg6: memref<1x4xf32, #tpu.memory_space<vmem>>, %arg7: memref<1x4x4x4xf32, #tpu.memory_space<vmem>>, %arg8: memref<6x6x4xf32, #tpu.memory_space<vmem>>) attributes {dimension_semantics = [#tpu.dimension_semantics<parallel>, #tpu.dimension_semantics<arbitrary>], iteration_bounds = array<i64: 2, 1>, scalar_prefetch = 0 : i64, scratch_operands = 1 : i64, tpu.core_type = #tpu.core_type<tc>, window_params = [{transform_indices = @transform_0, window_bounds = array<i64: 1, 4, 4, 4>}, {transform_indices = @transform_1, window_bounds = array<i64: 1, 4, 4, 4>}, {pipeline_mode = #tpu.pipeline_mode<synchronous>, transform_indices = @transform_2, window_bounds = array<i64: 36, 4>}, {pipeline_mode = #tpu.pipeline_mode<synchronous>, transform_indices = @transform_3, window_bounds = array<i64: 1, 4>}, {pipeline_mode = #tpu.pipeline_mode<synchronous>, transform_indices = @transform_4, window_bounds = array<i64: 1, 4>}, {transform_indices = @transform_5, window_bounds = array<i64: 1, 4, 4, 4>}]} {
    %c0 = arith.constant 0 : index
    %c0_0 = arith.constant 0 : index
    %c0_1 = arith.constant 0 : index
    %c0_2 = arith.constant 0 : index
    %0 = vector.load %arg2[%c0, %c0_0, %c0_1, %c0_2] : memref<1x4x4x4xf32, #tpu.memory_space<vmem>>, vector<1x4x4x4xf32>
    %1 = vector.shape_cast %0 : vector<1x4x4x4xf32> to vector<4x4x4xf32>
    %c0_3 = arith.constant 0 : index
    %c0_4 = arith.constant 0 : index
    %c0_5 = arith.constant 0 : index
    %c0_6 = arith.constant 0 : index
    %2 = vector.load %arg3[%c0_3, %c0_4, %c0_5, %c0_6] : memref<1x4x4x4xf32, #tpu.memory_space<vmem>>, vector<1x4x4x4xf32>
    %3 = vector.shape_cast %2 : vector<1x4x4x4xf32> to vector<4x4x4xf32>
    %4 = arith.addf %1, %3 : vector<4x4x4xf32>
    %cst = arith.constant 0.000000e+00 : f32
    %5 = vector.broadcast %cst : f32 to vector<6x6x4xf32>
    %c0_7 = arith.constant 0 : index
    %c0_8 = arith.constant 0 : index
    %c0_9 = arith.constant 0 : index
    %6 = vector.load %arg8[%c0_7, %c0_8, %c0_9] : memref<6x6x4xf32, #tpu.memory_space<vmem>>, vector<6x6x4xf32>
    tpu.vector_store %arg8[%c0_7, %c0_8, %c0_9], %5 {strides = array<i32>} : memref<6x6x4xf32, #tpu.memory_space<vmem>>, vector<6x6x4xf32>,
    %c1 = arith.constant 1 : index
    %c1_10 = arith.constant 1 : index
    %c0_11 = arith.constant 0 : index
    %7 = vector.load %arg8[%c1, %c1_10, %c0_11] : memref<6x6x4xf32, #tpu.memory_space<vmem>>, vector<4x4x4xf32>
    tpu.vector_store %arg8[%c1, %c1_10, %c0_11], %4 {strides = array<i32>} : memref<6x6x4xf32, #tpu.memory_space<vmem>>, vector<4x4x4xf32>,
    %c0_12 = arith.constant 0 : index
    %c0_13 = arith.constant 0 : index
    %c0_14 = arith.constant 0 : index
    %8 = vector.load %arg8[%c0_12, %c0_13, %c0_14] : memref<6x6x4xf32, #tpu.memory_space<vmem>>, vector<4x4x4xf32>
    %c0_15 = arith.constant 0 : index
    %c1_16 = arith.constant 1 : index
    %c0_17 = arith.constant 0 : index
    %9 = vector.load %arg8[%c0_15, %c1_16, %c0_17] : memref<6x6x4xf32, #tpu.memory_space<vmem>>, vector<4x4x4xf32>
    %c0_18 = arith.constant 0 : index
    %c2 = arith.constant 2 : index
    %c0_19 = arith.constant 0 : index
    %10 = vector.load %arg8[%c0_18, %c2, %c0_19] : memref<6x6x4xf32, #tpu.memory_space<vmem>>, vector<4x4x4xf32>
    %c1_20 = arith.constant 1 : index
    %c0_21 = arith.constant 0 : index
    %c0_22 = arith.constant 0 : index
    %11 = vector.load %arg8[%c1_20, %c0_21, %c0_22] : memref<6x6x4xf32, #tpu.memory_space<vmem>>, vector<4x4x4xf32>
    %c1_23 = arith.constant 1 : index
    %c1_24 = arith.constant 1 : index
    %c0_25 = arith.constant 0 : index
    %12 = vector.load %arg8[%c1_23, %c1_24, %c0_25] : memref<6x6x4xf32, #tpu.memory_space<vmem>>, vector<4x4x4xf32>
    %c1_26 = arith.constant 1 : index
    %c2_27 = arith.constant 2 : index
    %c0_28 = arith.constant 0 : index
    %13 = vector.load %arg8[%c1_26, %c2_27, %c0_28] : memref<6x6x4xf32, #tpu.memory_space<vmem>>, vector<4x4x4xf32>
    %c2_29 = arith.constant 2 : index
    %c0_30 = arith.constant 0 : index
    %c0_31 = arith.constant 0 : index
    %14 = vector.load %arg8[%c2_29, %c0_30, %c0_31] : memref<6x6x4xf32, #tpu.memory_space<vmem>>, vector<4x4x4xf32>
    %c2_32 = arith.constant 2 : index
    %c1_33 = arith.constant 1 : index
    %c0_34 = arith.constant 0 : index
    %15 = vector.load %arg8[%c2_32, %c1_33, %c0_34] : memref<6x6x4xf32, #tpu.memory_space<vmem>>, vector<4x4x4xf32>
    %c2_35 = arith.constant 2 : index
    %c2_36 = arith.constant 2 : index
    %c0_37 = arith.constant 0 : index
    %16 = vector.load %arg8[%c2_35, %c2_36, %c0_37] : memref<6x6x4xf32, #tpu.memory_space<vmem>>, vector<4x4x4xf32>
    %17 = tpu.concatenate %8, %9, %10, %11, %12, %13, %14, %15, %16 in 2 : vector<4x4x4xf32>, vector<4x4x4xf32>, vector<4x4x4xf32>, vector<4x4x4xf32>, vector<4x4x4xf32>, vector<4x4x4xf32>, vector<4x4x4xf32>, vector<4x4x4xf32>, vector<4x4x4xf32> -> vector<4x4x36xf32>
    %18 = vector.shape_cast %17 : vector<4x4x36xf32> to vector<16x36xf32>
    %c0_38 = arith.constant 0 : index
    %c0_39 = arith.constant 0 : index
    %19 = vector.load %arg4[%c0_38, %c0_39] : memref<36x4xf32, #tpu.memory_space<vmem>>, vector<36x4xf32>
    %cst_40 = arith.constant dense<0.000000e+00> : vector<16x4xf32>
    %20 = tpu.matmul %18, %19, %cst_40 {dimension_numbers = #tpu.dot_dimension_numbers<[1], [0], [0], [1], [0, 0, 1, 1], [], []>} : vector<16x36xf32>, vector<36x4xf32>, vector<16x4xf32> -> vector<16x4xf32>
    %c0_41 = arith.constant 0 : index
    %c0_42 = arith.constant 0 : index
    %21 = vector.load %arg5[%c0_41, %c0_42] : memref<1x4xf32, #tpu.memory_space<vmem>>, vector<1x4xf32>
    %22 = vector.broadcast %21 : vector<1x4xf32> to vector<16x4xf32>
    %23 = arith.mulf %20, %22 : vector<16x4xf32>
    %c0_43 = arith.constant 0 : index
    %c0_44 = arith.constant 0 : index
    %24 = vector.load %arg6[%c0_43, %c0_44] : memref<1x4xf32, #tpu.memory_space<vmem>>, vector<1x4xf32>
    %25 = vector.broadcast %24 : vector<1x4xf32> to vector<16x4xf32>
    %26 = arith.addf %23, %25 : vector<16x4xf32>
    %27 = vector.shape_cast %26 : vector<16x4xf32> to vector<4x4x4xf32>
    %c0_45 = arith.constant 0 : index
    %c0_46 = arith.constant 0 : index
    %c0_47 = arith.constant 0 : index
    %c0_48 = arith.constant 0 : index
    %28 = vector.load %arg7[%c0_45, %c0_46, %c0_47, %c0_48] : memref<1x4x4x4xf32, #tpu.memory_space<vmem>>, vector<1x4x4x4xf32>
    %29 = vector.shape_cast %28 : vector<1x4x4x4xf32> to vector<4x4x4xf32>
    %30 = vector.shape_cast %27 : vector<4x4x4xf32> to vector<1x4x4x4xf32>
    tpu.vector_store %arg7[%c0_45, %c0_46, %c0_47, %c0_48], %30 {strides = array<i32>} : memref<1x4x4x4xf32, #tpu.memory_space<vmem>>, vector<1x4x4x4xf32>,
    return
  }
  func.func @transform_0(%arg0: i32, %arg1: i32) -> (i32, i32, i32, i32) {
    %c0_i32 = arith.constant 0 : i32
    %c0_i32_0 = arith.constant 0 : i32
    %c0_i32_1 = arith.constant 0 : i32
    %c0_i32_2 = arith.constant 0 : i32
    return %arg0, %c0_i32, %c0_i32_0, %c0_i32_1 : i32, i32, i32, i32
  }
  func.func @transform_1(%arg0: i32, %arg1: i32) -> (i32, i32, i32, i32) {
    %c0_i32 = arith.constant 0 : i32
    %c0_i32_0 = arith.constant 0 : i32
    %c0_i32_1 = arith.constant 0 : i32
    %c0_i32_2 = arith.constant 0 : i32
    return %arg0, %c0_i32, %c0_i32_0, %c0_i32_1 : i32, i32, i32, i32
  }
  func.func @transform_2(%arg0: i32, %arg1: i32) -> (i32, i32) {
    %c0_i32 = arith.constant 0 : i32
    %c0_i32_0 = arith.constant 0 : i32
    %c0_i32_1 = arith.constant 0 : i32
    return %c0_i32, %c0_i32_0 : i32, i32
  }
  func.func @transform_3(%arg0: i32, %arg1: i32) -> (i32, i32) {
    %c0_i32 = arith.constant 0 : i32
    %c0_i32_0 = arith.constant 0 : i32
    %c0_i32_1 = arith.constant 0 : i32
    return %c0_i32, %c0_i32_0 : i32, i32
  }
  func.func @transform_4(%arg0: i32, %arg1: i32) -> (i32, i32) {
    %c0_i32 = arith.constant 0 : i32
    %c0_i32_0 = arith.constant 0 : i32
    %c0_i32_1 = arith.constant 0 : i32
    return %c0_i32, %c0_i32_0 : i32, i32
  }
  func.func @transform_5(%arg0: i32, %arg1: i32) -> (i32, i32, i32, i32) {
    %c0_i32 = arith.constant 0 : i32
    %c0_i32_0 = arith.constant 0 : i32
    %c0_i32_1 = arith.constant 0 : i32
    return %arg0, %arg1, %c0_i32, %c0_i32_0 : i32, i32, i32, i32
  }
}

module attributes {stable_mosaic.version = 11 : i64} {
  func.func @_bilinear_kernel(%arg0: i32, %arg1: memref<1x4x16xf32, #tpu.memory_space<vmem>>, %arg2: memref<8x4xf32, #tpu.memory_space<vmem>>, %arg3: memref<16x32xf32, #tpu.memory_space<vmem>>, %arg4: memref<1x8x32xf32, #tpu.memory_space<vmem>>) attributes {dimension_semantics = [#tpu.dimension_semantics<parallel>], iteration_bounds = array<i64: 2>, scalar_prefetch = 0 : i64, scratch_operands = 0 : i64, tpu.core_type = #tpu.core_type<tc>, window_params = [{transform_indices = @transform_0, window_bounds = array<i64: 1, 4, 16>}, {pipeline_mode = #tpu.pipeline_mode<synchronous>, transform_indices = @transform_1, window_bounds = array<i64: 8, 4>}, {pipeline_mode = #tpu.pipeline_mode<synchronous>, transform_indices = @transform_2, window_bounds = array<i64: 16, 32>}, {transform_indices = @transform_3, window_bounds = array<i64: 1, 8, 32>}]} {
    %c0 = arith.constant 0 : index
    %c0_0 = arith.constant 0 : index
    %c0_1 = arith.constant 0 : index
    %0 = vector.load %arg1[%c0, %c0_0, %c0_1] : memref<1x4x16xf32, #tpu.memory_space<vmem>>, vector<1x4x16xf32>
    %1 = vector.shape_cast %0 : vector<1x4x16xf32> to vector<4x16xf32>
    %c0_2 = arith.constant 0 : index
    %c0_3 = arith.constant 0 : index
    %2 = vector.load %arg3[%c0_2, %c0_3] : memref<16x32xf32, #tpu.memory_space<vmem>>, vector<16x32xf32>
    %cst = arith.constant dense<0.000000e+00> : vector<4x32xf32>
    %3 = tpu.matmul %1, %2, %cst {dimension_numbers = #tpu.dot_dimension_numbers<[1], [0], [0], [1], [0, 0, 1, 1], [], []>} : vector<4x16xf32>, vector<16x32xf32>, vector<4x32xf32> -> vector<4x32xf32>
    %c0_4 = arith.constant 0 : index
    %c0_5 = arith.constant 0 : index
    %4 = vector.load %arg2[%c0_4, %c0_5] : memref<8x4xf32, #tpu.memory_space<vmem>>, vector<8x4xf32>
    %cst_6 = arith.constant dense<0.000000e+00> : vector<8x32xf32>
    %5 = tpu.matmul %4, %3, %cst_6 {dimension_numbers = #tpu.dot_dimension_numbers<[1], [0], [0], [1], [0, 0, 1, 1], [], []>} : vector<8x4xf32>, vector<4x32xf32>, vector<8x32xf32> -> vector<8x32xf32>
    %c0_7 = arith.constant 0 : index
    %c0_8 = arith.constant 0 : index
    %c0_9 = arith.constant 0 : index
    %6 = vector.load %arg4[%c0_7, %c0_8, %c0_9] : memref<1x8x32xf32, #tpu.memory_space<vmem>>, vector<1x8x32xf32>
    %7 = vector.shape_cast %6 : vector<1x8x32xf32> to vector<8x32xf32>
    %8 = vector.shape_cast %5 : vector<8x32xf32> to vector<1x8x32xf32>
    tpu.vector_store %arg4[%c0_7, %c0_8, %c0_9], %8 {strides = array<i32>} : memref<1x8x32xf32, #tpu.memory_space<vmem>>, vector<1x8x32xf32>,
    return
  }
  func.func @transform_0(%arg0: i32) -> (i32, i32, i32) {
    %c0_i32 = arith.constant 0 : i32
    %c0_i32_0 = arith.constant 0 : i32
    %c0_i32_1 = arith.constant 0 : i32
    return %arg0, %c0_i32, %c0_i32_0 : i32, i32, i32
  }
  func.func @transform_1(%arg0: i32) -> (i32, i32) {
    %c0_i32 = arith.constant 0 : i32
    %c0_i32_0 = arith.constant 0 : i32
    %c0_i32_1 = arith.constant 0 : i32
    return %c0_i32, %c0_i32_0 : i32, i32
  }
  func.func @transform_2(%arg0: i32) -> (i32, i32) {
    %c0_i32 = arith.constant 0 : i32
    %c0_i32_0 = arith.constant 0 : i32
    %c0_i32_1 = arith.constant 0 : i32
    return %c0_i32, %c0_i32_0 : i32, i32
  }
  func.func @transform_3(%arg0: i32) -> (i32, i32, i32) {
    %c0_i32 = arith.constant 0 : i32
    %c0_i32_0 = arith.constant 0 : i32
    %c0_i32_1 = arith.constant 0 : i32
    return %arg0, %c0_i32, %c0_i32_0 : i32, i32, i32
  }
}

module attributes {stable_mosaic.version = 11 : i64} {
  func.func @_conv3x3_bn_kernel(%arg0: i32, %arg1: i32, %arg2: memref<1x8x8x4xf32, #tpu.memory_space<vmem>>, %arg3: memref<1x8x8x4xf32, #tpu.memory_space<vmem>>, %arg4: memref<36x4xf32, #tpu.memory_space<vmem>>, %arg5: memref<1x4xf32, #tpu.memory_space<vmem>>, %arg6: memref<1x4xf32, #tpu.memory_space<vmem>>, %arg7: memref<1x8x8x4xf32, #tpu.memory_space<vmem>>, %arg8: memref<10x10x4xf32, #tpu.memory_space<vmem>>) attributes {dimension_semantics = [#tpu.dimension_semantics<parallel>, #tpu.dimension_semantics<arbitrary>], iteration_bounds = array<i64: 2, 1>, scalar_prefetch = 0 : i64, scratch_operands = 1 : i64, tpu.core_type = #tpu.core_type<tc>, window_params = [{transform_indices = @transform_0, window_bounds = array<i64: 1, 8, 8, 4>}, {transform_indices = @transform_1, window_bounds = array<i64: 1, 8, 8, 4>}, {pipeline_mode = #tpu.pipeline_mode<synchronous>, transform_indices = @transform_2, window_bounds = array<i64: 36, 4>}, {pipeline_mode = #tpu.pipeline_mode<synchronous>, transform_indices = @transform_3, window_bounds = array<i64: 1, 4>}, {pipeline_mode = #tpu.pipeline_mode<synchronous>, transform_indices = @transform_4, window_bounds = array<i64: 1, 4>}, {transform_indices = @transform_5, window_bounds = array<i64: 1, 8, 8, 4>}]} {
    %c0 = arith.constant 0 : index
    %c0_0 = arith.constant 0 : index
    %c0_1 = arith.constant 0 : index
    %c0_2 = arith.constant 0 : index
    %0 = vector.load %arg2[%c0, %c0_0, %c0_1, %c0_2] : memref<1x8x8x4xf32, #tpu.memory_space<vmem>>, vector<1x8x8x4xf32>
    %1 = vector.shape_cast %0 : vector<1x8x8x4xf32> to vector<8x8x4xf32>
    %c0_3 = arith.constant 0 : index
    %c0_4 = arith.constant 0 : index
    %c0_5 = arith.constant 0 : index
    %c0_6 = arith.constant 0 : index
    %2 = vector.load %arg3[%c0_3, %c0_4, %c0_5, %c0_6] : memref<1x8x8x4xf32, #tpu.memory_space<vmem>>, vector<1x8x8x4xf32>
    %3 = vector.shape_cast %2 : vector<1x8x8x4xf32> to vector<8x8x4xf32>
    %4 = arith.addf %1, %3 : vector<8x8x4xf32>
    %cst = arith.constant 0.000000e+00 : f32
    %5 = vector.broadcast %cst : f32 to vector<10x10x4xf32>
    %c0_7 = arith.constant 0 : index
    %c0_8 = arith.constant 0 : index
    %c0_9 = arith.constant 0 : index
    %6 = vector.load %arg8[%c0_7, %c0_8, %c0_9] : memref<10x10x4xf32, #tpu.memory_space<vmem>>, vector<10x10x4xf32>
    tpu.vector_store %arg8[%c0_7, %c0_8, %c0_9], %5 {strides = array<i32>} : memref<10x10x4xf32, #tpu.memory_space<vmem>>, vector<10x10x4xf32>,
    %c1 = arith.constant 1 : index
    %c1_10 = arith.constant 1 : index
    %c0_11 = arith.constant 0 : index
    %7 = vector.load %arg8[%c1, %c1_10, %c0_11] : memref<10x10x4xf32, #tpu.memory_space<vmem>>, vector<8x8x4xf32>
    tpu.vector_store %arg8[%c1, %c1_10, %c0_11], %4 {strides = array<i32>} : memref<10x10x4xf32, #tpu.memory_space<vmem>>, vector<8x8x4xf32>,
    %c0_12 = arith.constant 0 : index
    %c0_13 = arith.constant 0 : index
    %c0_14 = arith.constant 0 : index
    %8 = vector.load %arg8[%c0_12, %c0_13, %c0_14] : memref<10x10x4xf32, #tpu.memory_space<vmem>>, vector<8x8x4xf32>
    %c0_15 = arith.constant 0 : index
    %c1_16 = arith.constant 1 : index
    %c0_17 = arith.constant 0 : index
    %9 = vector.load %arg8[%c0_15, %c1_16, %c0_17] : memref<10x10x4xf32, #tpu.memory_space<vmem>>, vector<8x8x4xf32>
    %c0_18 = arith.constant 0 : index
    %c2 = arith.constant 2 : index
    %c0_19 = arith.constant 0 : index
    %10 = vector.load %arg8[%c0_18, %c2, %c0_19] : memref<10x10x4xf32, #tpu.memory_space<vmem>>, vector<8x8x4xf32>
    %c1_20 = arith.constant 1 : index
    %c0_21 = arith.constant 0 : index
    %c0_22 = arith.constant 0 : index
    %11 = vector.load %arg8[%c1_20, %c0_21, %c0_22] : memref<10x10x4xf32, #tpu.memory_space<vmem>>, vector<8x8x4xf32>
    %c1_23 = arith.constant 1 : index
    %c1_24 = arith.constant 1 : index
    %c0_25 = arith.constant 0 : index
    %12 = vector.load %arg8[%c1_23, %c1_24, %c0_25] : memref<10x10x4xf32, #tpu.memory_space<vmem>>, vector<8x8x4xf32>
    %c1_26 = arith.constant 1 : index
    %c2_27 = arith.constant 2 : index
    %c0_28 = arith.constant 0 : index
    %13 = vector.load %arg8[%c1_26, %c2_27, %c0_28] : memref<10x10x4xf32, #tpu.memory_space<vmem>>, vector<8x8x4xf32>
    %c2_29 = arith.constant 2 : index
    %c0_30 = arith.constant 0 : index
    %c0_31 = arith.constant 0 : index
    %14 = vector.load %arg8[%c2_29, %c0_30, %c0_31] : memref<10x10x4xf32, #tpu.memory_space<vmem>>, vector<8x8x4xf32>
    %c2_32 = arith.constant 2 : index
    %c1_33 = arith.constant 1 : index
    %c0_34 = arith.constant 0 : index
    %15 = vector.load %arg8[%c2_32, %c1_33, %c0_34] : memref<10x10x4xf32, #tpu.memory_space<vmem>>, vector<8x8x4xf32>
    %c2_35 = arith.constant 2 : index
    %c2_36 = arith.constant 2 : index
    %c0_37 = arith.constant 0 : index
    %16 = vector.load %arg8[%c2_35, %c2_36, %c0_37] : memref<10x10x4xf32, #tpu.memory_space<vmem>>, vector<8x8x4xf32>
    %17 = tpu.concatenate %8, %9, %10, %11, %12, %13, %14, %15, %16 in 2 : vector<8x8x4xf32>, vector<8x8x4xf32>, vector<8x8x4xf32>, vector<8x8x4xf32>, vector<8x8x4xf32>, vector<8x8x4xf32>, vector<8x8x4xf32>, vector<8x8x4xf32>, vector<8x8x4xf32> -> vector<8x8x36xf32>
    %18 = vector.shape_cast %17 : vector<8x8x36xf32> to vector<64x36xf32>
    %c0_38 = arith.constant 0 : index
    %c0_39 = arith.constant 0 : index
    %19 = vector.load %arg4[%c0_38, %c0_39] : memref<36x4xf32, #tpu.memory_space<vmem>>, vector<36x4xf32>
    %cst_40 = arith.constant dense<0.000000e+00> : vector<64x4xf32>
    %20 = tpu.matmul %18, %19, %cst_40 {dimension_numbers = #tpu.dot_dimension_numbers<[1], [0], [0], [1], [0, 0, 1, 1], [], []>} : vector<64x36xf32>, vector<36x4xf32>, vector<64x4xf32> -> vector<64x4xf32>
    %c0_41 = arith.constant 0 : index
    %c0_42 = arith.constant 0 : index
    %21 = vector.load %arg5[%c0_41, %c0_42] : memref<1x4xf32, #tpu.memory_space<vmem>>, vector<1x4xf32>
    %22 = vector.broadcast %21 : vector<1x4xf32> to vector<64x4xf32>
    %23 = arith.mulf %20, %22 : vector<64x4xf32>
    %c0_43 = arith.constant 0 : index
    %c0_44 = arith.constant 0 : index
    %24 = vector.load %arg6[%c0_43, %c0_44] : memref<1x4xf32, #tpu.memory_space<vmem>>, vector<1x4xf32>
    %25 = vector.broadcast %24 : vector<1x4xf32> to vector<64x4xf32>
    %26 = arith.addf %23, %25 : vector<64x4xf32>
    %27 = vector.shape_cast %26 : vector<64x4xf32> to vector<8x8x4xf32>
    %c0_45 = arith.constant 0 : index
    %c0_46 = arith.constant 0 : index
    %c0_47 = arith.constant 0 : index
    %c0_48 = arith.constant 0 : index
    %28 = vector.load %arg7[%c0_45, %c0_46, %c0_47, %c0_48] : memref<1x8x8x4xf32, #tpu.memory_space<vmem>>, vector<1x8x8x4xf32>
    %29 = vector.shape_cast %28 : vector<1x8x8x4xf32> to vector<8x8x4xf32>
    %30 = vector.shape_cast %27 : vector<8x8x4xf32> to vector<1x8x8x4xf32>
    tpu.vector_store %arg7[%c0_45, %c0_46, %c0_47, %c0_48], %30 {strides = array<i32>} : memref<1x8x8x4xf32, #tpu.memory_space<vmem>>, vector<1x8x8x4xf32>,
    return
  }
  func.func @transform_0(%arg0: i32, %arg1: i32) -> (i32, i32, i32, i32) {
    %c0_i32 = arith.constant 0 : i32
    %c0_i32_0 = arith.constant 0 : i32
    %c0_i32_1 = arith.constant 0 : i32
    %c0_i32_2 = arith.constant 0 : i32
    return %arg0, %c0_i32, %c0_i32_0, %c0_i32_1 : i32, i32, i32, i32
  }
  func.func @transform_1(%arg0: i32, %arg1: i32) -> (i32, i32, i32, i32) {
    %c0_i32 = arith.constant 0 : i32
    %c0_i32_0 = arith.constant 0 : i32
    %c0_i32_1 = arith.constant 0 : i32
    %c0_i32_2 = arith.constant 0 : i32
    return %arg0, %c0_i32, %c0_i32_0, %c0_i32_1 : i32, i32, i32, i32
  }
  func.func @transform_2(%arg0: i32, %arg1: i32) -> (i32, i32) {
    %c0_i32 = arith.constant 0 : i32
    %c0_i32_0 = arith.constant 0 : i32
    %c0_i32_1 = arith.constant 0 : i32
    return %c0_i32, %c0_i32_0 : i32, i32
  }
  func.func @transform_3(%arg0: i32, %arg1: i32) -> (i32, i32) {
    %c0_i32 = arith.constant 0 : i32
    %c0_i32_0 = arith.constant 0 : i32
    %c0_i32_1 = arith.constant 0 : i32
    return %c0_i32, %c0_i32_0 : i32, i32
  }
  func.func @transform_4(%arg0: i32, %arg1: i32) -> (i32, i32) {
    %c0_i32 = arith.constant 0 : i32
    %c0_i32_0 = arith.constant 0 : i32
    %c0_i32_1 = arith.constant 0 : i32
    return %c0_i32, %c0_i32_0 : i32, i32
  }
  func.func @transform_5(%arg0: i32, %arg1: i32) -> (i32, i32, i32, i32) {
    %c0_i32 = arith.constant 0 : i32
    %c0_i32_0 = arith.constant 0 : i32
    %c0_i32_1 = arith.constant 0 : i32
    return %arg0, %arg1, %c0_i32, %c0_i32_0 : i32, i32, i32, i32
  }
}

module attributes {stable_mosaic.version = 11 : i64} {
  func.func @_bilinear_kernel(%arg0: i32, %arg1: memref<1x8x32xf32, #tpu.memory_space<vmem>>, %arg2: memref<16x8xf32, #tpu.memory_space<vmem>>, %arg3: memref<32x64xf32, #tpu.memory_space<vmem>>, %arg4: memref<1x16x64xf32, #tpu.memory_space<vmem>>) attributes {dimension_semantics = [#tpu.dimension_semantics<parallel>], iteration_bounds = array<i64: 2>, scalar_prefetch = 0 : i64, scratch_operands = 0 : i64, tpu.core_type = #tpu.core_type<tc>, window_params = [{transform_indices = @transform_0, window_bounds = array<i64: 1, 8, 32>}, {pipeline_mode = #tpu.pipeline_mode<synchronous>, transform_indices = @transform_1, window_bounds = array<i64: 16, 8>}, {pipeline_mode = #tpu.pipeline_mode<synchronous>, transform_indices = @transform_2, window_bounds = array<i64: 32, 64>}, {transform_indices = @transform_3, window_bounds = array<i64: 1, 16, 64>}]} {
    %c0 = arith.constant 0 : index
    %c0_0 = arith.constant 0 : index
    %c0_1 = arith.constant 0 : index
    %0 = vector.load %arg1[%c0, %c0_0, %c0_1] : memref<1x8x32xf32, #tpu.memory_space<vmem>>, vector<1x8x32xf32>
    %1 = vector.shape_cast %0 : vector<1x8x32xf32> to vector<8x32xf32>
    %c0_2 = arith.constant 0 : index
    %c0_3 = arith.constant 0 : index
    %2 = vector.load %arg3[%c0_2, %c0_3] : memref<32x64xf32, #tpu.memory_space<vmem>>, vector<32x64xf32>
    %cst = arith.constant dense<0.000000e+00> : vector<8x64xf32>
    %3 = tpu.matmul %1, %2, %cst {dimension_numbers = #tpu.dot_dimension_numbers<[1], [0], [0], [1], [0, 0, 1, 1], [], []>} : vector<8x32xf32>, vector<32x64xf32>, vector<8x64xf32> -> vector<8x64xf32>
    %c0_4 = arith.constant 0 : index
    %c0_5 = arith.constant 0 : index
    %4 = vector.load %arg2[%c0_4, %c0_5] : memref<16x8xf32, #tpu.memory_space<vmem>>, vector<16x8xf32>
    %cst_6 = arith.constant dense<0.000000e+00> : vector<16x64xf32>
    %5 = tpu.matmul %4, %3, %cst_6 {dimension_numbers = #tpu.dot_dimension_numbers<[1], [0], [0], [1], [0, 0, 1, 1], [], []>} : vector<16x8xf32>, vector<8x64xf32>, vector<16x64xf32> -> vector<16x64xf32>
    %c0_7 = arith.constant 0 : index
    %c0_8 = arith.constant 0 : index
    %c0_9 = arith.constant 0 : index
    %6 = vector.load %arg4[%c0_7, %c0_8, %c0_9] : memref<1x16x64xf32, #tpu.memory_space<vmem>>, vector<1x16x64xf32>
    %7 = vector.shape_cast %6 : vector<1x16x64xf32> to vector<16x64xf32>
    %8 = vector.shape_cast %5 : vector<16x64xf32> to vector<1x16x64xf32>
    tpu.vector_store %arg4[%c0_7, %c0_8, %c0_9], %8 {strides = array<i32>} : memref<1x16x64xf32, #tpu.memory_space<vmem>>, vector<1x16x64xf32>,
    return
  }
  func.func @transform_0(%arg0: i32) -> (i32, i32, i32) {
    %c0_i32 = arith.constant 0 : i32
    %c0_i32_0 = arith.constant 0 : i32
    %c0_i32_1 = arith.constant 0 : i32
    return %arg0, %c0_i32, %c0_i32_0 : i32, i32, i32
  }
  func.func @transform_1(%arg0: i32) -> (i32, i32) {
    %c0_i32 = arith.constant 0 : i32
    %c0_i32_0 = arith.constant 0 : i32
    %c0_i32_1 = arith.constant 0 : i32
    return %c0_i32, %c0_i32_0 : i32, i32
  }
  func.func @transform_2(%arg0: i32) -> (i32, i32) {
    %c0_i32 = arith.constant 0 : i32
    %c0_i32_0 = arith.constant 0 : i32
    %c0_i32_1 = arith.constant 0 : i32
    return %c0_i32, %c0_i32_0 : i32, i32
  }
  func.func @transform_3(%arg0: i32) -> (i32, i32, i32) {
    %c0_i32 = arith.constant 0 : i32
    %c0_i32_0 = arith.constant 0 : i32
    %c0_i32_1 = arith.constant 0 : i32
    return %arg0, %c0_i32, %c0_i32_0 : i32, i32, i32
  }
}

module attributes {stable_mosaic.version = 11 : i64} {
  func.func @_conv3x3_bn_kernel(%arg0: i32, %arg1: i32, %arg2: memref<1x16x16x4xf32, #tpu.memory_space<vmem>>, %arg3: memref<1x16x16x4xf32, #tpu.memory_space<vmem>>, %arg4: memref<36x4xf32, #tpu.memory_space<vmem>>, %arg5: memref<1x4xf32, #tpu.memory_space<vmem>>, %arg6: memref<1x4xf32, #tpu.memory_space<vmem>>, %arg7: memref<1x16x16x4xf32, #tpu.memory_space<vmem>>, %arg8: memref<18x18x4xf32, #tpu.memory_space<vmem>>) attributes {dimension_semantics = [#tpu.dimension_semantics<parallel>, #tpu.dimension_semantics<arbitrary>], iteration_bounds = array<i64: 2, 1>, scalar_prefetch = 0 : i64, scratch_operands = 1 : i64, tpu.core_type = #tpu.core_type<tc>, window_params = [{transform_indices = @transform_0, window_bounds = array<i64: 1, 16, 16, 4>}, {transform_indices = @transform_1, window_bounds = array<i64: 1, 16, 16, 4>}, {pipeline_mode = #tpu.pipeline_mode<synchronous>, transform_indices = @transform_2, window_bounds = array<i64: 36, 4>}, {pipeline_mode = #tpu.pipeline_mode<synchronous>, transform_indices = @transform_3, window_bounds = array<i64: 1, 4>}, {pipeline_mode = #tpu.pipeline_mode<synchronous>, transform_indices = @transform_4, window_bounds = array<i64: 1, 4>}, {transform_indices = @transform_5, window_bounds = array<i64: 1, 16, 16, 4>}]} {
    %c0 = arith.constant 0 : index
    %c0_0 = arith.constant 0 : index
    %c0_1 = arith.constant 0 : index
    %c0_2 = arith.constant 0 : index
    %0 = vector.load %arg2[%c0, %c0_0, %c0_1, %c0_2] : memref<1x16x16x4xf32, #tpu.memory_space<vmem>>, vector<1x16x16x4xf32>
    %1 = vector.shape_cast %0 : vector<1x16x16x4xf32> to vector<16x16x4xf32>
    %c0_3 = arith.constant 0 : index
    %c0_4 = arith.constant 0 : index
    %c0_5 = arith.constant 0 : index
    %c0_6 = arith.constant 0 : index
    %2 = vector.load %arg3[%c0_3, %c0_4, %c0_5, %c0_6] : memref<1x16x16x4xf32, #tpu.memory_space<vmem>>, vector<1x16x16x4xf32>
    %3 = vector.shape_cast %2 : vector<1x16x16x4xf32> to vector<16x16x4xf32>
    %4 = arith.addf %1, %3 : vector<16x16x4xf32>
    %cst = arith.constant 0.000000e+00 : f32
    %5 = vector.broadcast %cst : f32 to vector<16x16x4xf32>
    %6 = arith.maximumf %4, %5 : vector<16x16x4xf32>
    %cst_7 = arith.constant 0.000000e+00 : f32
    %7 = vector.broadcast %cst_7 : f32 to vector<18x18x4xf32>
    %c0_8 = arith.constant 0 : index
    %c0_9 = arith.constant 0 : index
    %c0_10 = arith.constant 0 : index
    %8 = vector.load %arg8[%c0_8, %c0_9, %c0_10] : memref<18x18x4xf32, #tpu.memory_space<vmem>>, vector<18x18x4xf32>
    tpu.vector_store %arg8[%c0_8, %c0_9, %c0_10], %7 {strides = array<i32>} : memref<18x18x4xf32, #tpu.memory_space<vmem>>, vector<18x18x4xf32>,
    %c1 = arith.constant 1 : index
    %c1_11 = arith.constant 1 : index
    %c0_12 = arith.constant 0 : index
    %9 = vector.load %arg8[%c1, %c1_11, %c0_12] : memref<18x18x4xf32, #tpu.memory_space<vmem>>, vector<16x16x4xf32>
    tpu.vector_store %arg8[%c1, %c1_11, %c0_12], %6 {strides = array<i32>} : memref<18x18x4xf32, #tpu.memory_space<vmem>>, vector<16x16x4xf32>,
    %c0_13 = arith.constant 0 : index
    %c0_14 = arith.constant 0 : index
    %c0_15 = arith.constant 0 : index
    %10 = vector.load %arg8[%c0_13, %c0_14, %c0_15] : memref<18x18x4xf32, #tpu.memory_space<vmem>>, vector<16x16x4xf32>
    %c0_16 = arith.constant 0 : index
    %c1_17 = arith.constant 1 : index
    %c0_18 = arith.constant 0 : index
    %11 = vector.load %arg8[%c0_16, %c1_17, %c0_18] : memref<18x18x4xf32, #tpu.memory_space<vmem>>, vector<16x16x4xf32>
    %c0_19 = arith.constant 0 : index
    %c2 = arith.constant 2 : index
    %c0_20 = arith.constant 0 : index
    %12 = vector.load %arg8[%c0_19, %c2, %c0_20] : memref<18x18x4xf32, #tpu.memory_space<vmem>>, vector<16x16x4xf32>
    %c1_21 = arith.constant 1 : index
    %c0_22 = arith.constant 0 : index
    %c0_23 = arith.constant 0 : index
    %13 = vector.load %arg8[%c1_21, %c0_22, %c0_23] : memref<18x18x4xf32, #tpu.memory_space<vmem>>, vector<16x16x4xf32>
    %c1_24 = arith.constant 1 : index
    %c1_25 = arith.constant 1 : index
    %c0_26 = arith.constant 0 : index
    %14 = vector.load %arg8[%c1_24, %c1_25, %c0_26] : memref<18x18x4xf32, #tpu.memory_space<vmem>>, vector<16x16x4xf32>
    %c1_27 = arith.constant 1 : index
    %c2_28 = arith.constant 2 : index
    %c0_29 = arith.constant 0 : index
    %15 = vector.load %arg8[%c1_27, %c2_28, %c0_29] : memref<18x18x4xf32, #tpu.memory_space<vmem>>, vector<16x16x4xf32>
    %c2_30 = arith.constant 2 : index
    %c0_31 = arith.constant 0 : index
    %c0_32 = arith.constant 0 : index
    %16 = vector.load %arg8[%c2_30, %c0_31, %c0_32] : memref<18x18x4xf32, #tpu.memory_space<vmem>>, vector<16x16x4xf32>
    %c2_33 = arith.constant 2 : index
    %c1_34 = arith.constant 1 : index
    %c0_35 = arith.constant 0 : index
    %17 = vector.load %arg8[%c2_33, %c1_34, %c0_35] : memref<18x18x4xf32, #tpu.memory_space<vmem>>, vector<16x16x4xf32>
    %c2_36 = arith.constant 2 : index
    %c2_37 = arith.constant 2 : index
    %c0_38 = arith.constant 0 : index
    %18 = vector.load %arg8[%c2_36, %c2_37, %c0_38] : memref<18x18x4xf32, #tpu.memory_space<vmem>>, vector<16x16x4xf32>
    %19 = tpu.concatenate %10, %11, %12, %13, %14, %15, %16, %17, %18 in 2 : vector<16x16x4xf32>, vector<16x16x4xf32>, vector<16x16x4xf32>, vector<16x16x4xf32>, vector<16x16x4xf32>, vector<16x16x4xf32>, vector<16x16x4xf32>, vector<16x16x4xf32>, vector<16x16x4xf32> -> vector<16x16x36xf32>
    %20 = vector.shape_cast %19 : vector<16x16x36xf32> to vector<256x36xf32>
    %c0_39 = arith.constant 0 : index
    %c0_40 = arith.constant 0 : index
    %21 = vector.load %arg4[%c0_39, %c0_40] : memref<36x4xf32, #tpu.memory_space<vmem>>, vector<36x4xf32>
    %cst_41 = arith.constant dense<0.000000e+00> : vector<256x4xf32>
    %22 = tpu.matmul %20, %21, %cst_41 {dimension_numbers = #tpu.dot_dimension_numbers<[1], [0], [0], [1], [0, 0, 1, 1], [], []>} : vector<256x36xf32>, vector<36x4xf32>, vector<256x4xf32> -> vector<256x4xf32>
    %c0_42 = arith.constant 0 : index
    %c0_43 = arith.constant 0 : index
    %23 = vector.load %arg5[%c0_42, %c0_43] : memref<1x4xf32, #tpu.memory_space<vmem>>, vector<1x4xf32>
    %24 = vector.broadcast %23 : vector<1x4xf32> to vector<256x4xf32>
    %25 = arith.mulf %22, %24 : vector<256x4xf32>
    %c0_44 = arith.constant 0 : index
    %c0_45 = arith.constant 0 : index
    %26 = vector.load %arg6[%c0_44, %c0_45] : memref<1x4xf32, #tpu.memory_space<vmem>>, vector<1x4xf32>
    %27 = vector.broadcast %26 : vector<1x4xf32> to vector<256x4xf32>
    %28 = arith.addf %25, %27 : vector<256x4xf32>
    %29 = vector.shape_cast %28 : vector<256x4xf32> to vector<16x16x4xf32>
    %c0_46 = arith.constant 0 : index
    %c0_47 = arith.constant 0 : index
    %c0_48 = arith.constant 0 : index
    %c0_49 = arith.constant 0 : index
    %30 = vector.load %arg7[%c0_46, %c0_47, %c0_48, %c0_49] : memref<1x16x16x4xf32, #tpu.memory_space<vmem>>, vector<1x16x16x4xf32>
    %31 = vector.shape_cast %30 : vector<1x16x16x4xf32> to vector<16x16x4xf32>
    %32 = vector.shape_cast %29 : vector<16x16x4xf32> to vector<1x16x16x4xf32>
    tpu.vector_store %arg7[%c0_46, %c0_47, %c0_48, %c0_49], %32 {strides = array<i32>} : memref<1x16x16x4xf32, #tpu.memory_space<vmem>>, vector<1x16x16x4xf32>,
    return
  }
  func.func @transform_0(%arg0: i32, %arg1: i32) -> (i32, i32, i32, i32) {
    %c0_i32 = arith.constant 0 : i32
    %c0_i32_0 = arith.constant 0 : i32
    %c0_i32_1 = arith.constant 0 : i32
    %c0_i32_2 = arith.constant 0 : i32
    return %arg0, %c0_i32, %c0_i32_0, %c0_i32_1 : i32, i32, i32, i32
  }
  func.func @transform_1(%arg0: i32, %arg1: i32) -> (i32, i32, i32, i32) {
    %c0_i32 = arith.constant 0 : i32
    %c0_i32_0 = arith.constant 0 : i32
    %c0_i32_1 = arith.constant 0 : i32
    %c0_i32_2 = arith.constant 0 : i32
    return %arg0, %c0_i32, %c0_i32_0, %c0_i32_1 : i32, i32, i32, i32
  }
  func.func @transform_2(%arg0: i32, %arg1: i32) -> (i32, i32) {
    %c0_i32 = arith.constant 0 : i32
    %c0_i32_0 = arith.constant 0 : i32
    %c0_i32_1 = arith.constant 0 : i32
    return %c0_i32, %c0_i32_0 : i32, i32
  }
  func.func @transform_3(%arg0: i32, %arg1: i32) -> (i32, i32) {
    %c0_i32 = arith.constant 0 : i32
    %c0_i32_0 = arith.constant 0 : i32
    %c0_i32_1 = arith.constant 0 : i32
    return %c0_i32, %c0_i32_0 : i32, i32
  }
  func.func @transform_4(%arg0: i32, %arg1: i32) -> (i32, i32) {
    %c0_i32 = arith.constant 0 : i32
    %c0_i32_0 = arith.constant 0 : i32
    %c0_i32_1 = arith.constant 0 : i32
    return %c0_i32, %c0_i32_0 : i32, i32
  }
  func.func @transform_5(%arg0: i32, %arg1: i32) -> (i32, i32, i32, i32) {
    %c0_i32 = arith.constant 0 : i32
    %c0_i32_0 = arith.constant 0 : i32
    %c0_i32_1 = arith.constant 0 : i32
    return %arg0, %arg1, %c0_i32, %c0_i32_0 : i32, i32, i32, i32
  }
}

</mosaic_0001>

<bundles_post_ra>
// kernel: usrm3_forward.9
= control target key start
LH: loop header
LB: loop body
LE: loop exit
PB: predicated region body
PF: predicated region fallthrough
CT: control target
= control target key end

     0   :  { %s861_s15 = smov 0   ;;  %s863_s16 = smov 0   ;;  %s983_s0 = inlined_call_operand.vmem [shape: f32[2,8,8,4], index: 0, kind: input, shape index: {}]   ;;  %s984_s1 = inlined_call_operand.vmem [shape: f32[36,4], index: 1, kind: input, shape index: {}]   ;;  %s985_s2 = inlined_call_operand.vmem [shape: f32[1,4], index: 2, kind: input, shape index: {}]   ;;  %s986_s3 = inlined_call_operand.vmem [shape: f32[1,4], index: 3, kind: input, shape index: {}]   ;;  %s987_s4 = inlined_call_operand.vmem [shape: f32[2,4,4,4], index: 4, kind: output, shape index: {}]  }
   0x1   :  { %s865_s17 = smov 0  }
   0x2 LB: > { %s26_s18 = sadd.s32 1, %s821_s16  ;;  %p728_p0 = scmp.ge.s32.totalorder %s825_s17, 1  ;;  %s825_s17 = sphi %s865_s17, %s14_s17   ;;  %s821_s16 = sphi %s863_s16, %s989_s16   ;;  %s817_s15 = sphi %s861_s15, %s988_s15  }
   0x3   : > { %p28_p1 = scmp.ge.s32.totalorder %s26_s18, 2  ;;  %p176_p2 = scmp.lt.s32.totalorder %s825_s17, 3 }
   0x5   : > { %s991_s18 = smov (%p28_p1, %s26_s18), 0  ;;  %p177_p3 = pnand %p728_p0, %p176_p2 }
   0x6   : > { %vm229_vm0 = vcmask (!%p177_p3), 31744   ;;  %vm231_vm1 = vcmask (!%p177_p3), 25600   ;;  %v827_v0 = vmov (!%p177_p3), 0.0   ;;  %p206_p4 = scmp.lt.s32.totalorder (!%p177_p3), %s817_s15, 1  ;;  %s828_s23 = smov (!%p177_p3), 4   ;;  %v497_v32 = vld [vmem:[%s984_s1] sm:$0xff] (!%p177_p3) }
   0x7   : > { %180 = sbr.rel (%p177_p3) target bundleno = 424 (0x1a8), region = 36  ;;  %230 = vst.msk [vmem:[#allocation2] sm:$0xff] (!%p177_p3), %vm229_vm0, %v827_v0  ;;  %233 = vst.msk [vmem:[#allocation2 + $0x10] sm:$0xff] (!%p177_p3), %vm229_vm0, %v827_v0  ;;  %s829_s24 = smov (!%p177_p3), 8   ;;  %v498_v33 = vld [vmem:[%s984_s1 + $0x8] sm:$0xff] (!%p177_p3)  ;;  %v499_v37 = vld [vmem:[%s984_s1 + $0x10] sm:$0xff] (!%p177_p3) }
   0x8   : > { %235 = vst.msk [vmem:[#allocation2 + $0x20] sm:$0xff] (!%p177_p3), %vm229_vm0, %v827_v0  ;;  %237 = vst.msk [vmem:[#allocation2 + $0x30] sm:$0xff] (!%p177_p3), %vm229_vm0, %v827_v0  ;;  %s830_s25 = smov (!%p177_p3), 12   ;;  %s831_s26 = smov (!%p177_p3), 16   ;;  %v762_v35 = vpack.c.bf16 (!%p177_p3), %v498_v33, %v497_v32  ;;  %v500_v38 = vld [vmem:[%s984_s1 + $0x18] sm:$0xff] (!%p177_p3)  ;;  %vm513_vm2 = vcmask (!%p177_p3), 1043456  }
   0x9   : > { %239 = vst.msk [vmem:[#allocation2 + $0x40] sm:$0xff] (!%p177_p3), %vm229_vm0, %v827_v0  ;;  %241 = vst.msk [vmem:[#allocation2 + $0x50] sm:$0xff] (!%p177_p3), %vm229_vm0, %v827_v0  ;;  %s832_s27 = smov (!%p177_p3), 20   ;;  %s833_s28 = smov (!%p177_p3), 24   ;;  %v766_v40 = vpack.c.bf16 (!%p177_p3), %v500_v38, %v499_v37  ;;  %v501_v43 = vld [vmem:[%s984_s1 + $0x20] sm:$0xf] (!%p177_p3) }
   0xa   : > { %243 = vst.msk [vmem:[#allocation2 + $0x60] sm:$0xff] (!%p177_p3), %vm229_vm0, %v827_v0  ;;  %245 = vst.msk [vmem:[#allocation2 + $0x70] sm:$0xff] (!%p177_p3), %vm229_vm0, %v827_v0  ;;  %763 = vmatprep.subr.bf16.mxu0 (!%p177_p3), %v762_v35  ;;  %s834_s7 = smov (!%p177_p3), 28   ;;  %s835_s14 = smov (!%p177_p3), 32   ;;  %vm462_vm3 = vcmask (!%p177_p3), 64512   ;;  %vm467_vm4 = vcmask (!%p177_p3), 97280  }
   0xb   : > { %247 = vst.msk [vmem:[#allocation2 + $0x80] sm:$0xff] (!%p177_p3), %vm229_vm0, %v827_v0  ;;  %765 = vmatpush3.bf16.msra.mxu0 (!%p177_p3), %v762_v35  ;;  %vm472_vm5 = vcmask (!%p177_p3), 130048   ;;  %vm477_vm6 = vcmask (!%p177_p3), 162816   ;;  %vm482_vm7 = vcmask (!%p177_p3), 195584   ;;  %vm487_vm8 = vcmask (!%p177_p3), 228352  }
   0xc   : > { %232 = vst.msk [vmem:[#allocation2 + $0x8] sm:$0x3] (!%p177_p3), %vm231_vm1, %v827_v0  ;;  %234 = vst.msk [vmem:[#allocation2 + $0x18] sm:$0x3] (!%p177_p3), %vm231_vm1, %v827_v0  ;;  %767 = vmatprep.subr.bf16.mxu0 (!%p177_p3), %v766_v40  ;;  %vm492_vm9 = vcmask (!%p177_p3), 261120   ;;  %vm508_vm10 = vcmask (!%p177_p3), 293888  }
   0xd   : > { %236 = vst.msk [vmem:[#allocation2 + $0x28] sm:$0x3] (!%p177_p3), %vm231_vm1, %v827_v0  ;;  %238 = vst.msk [vmem:[#allocation2 + $0x38] sm:$0x3] (!%p177_p3), %vm231_vm1, %v827_v0  ;;  %vm616_vm11 = vcmask (!%p177_p3), 27648  }
   0xe   : > { %240 = vst.msk [vmem:[#allocation2 + $0x48] sm:$0x3] %vm231_vm1, %v827_v0  ;;  %242 = vst.msk [vmem:[#allocation2 + $0x58] sm:$0x3] %vm231_vm1, %v827_v0  ;;  %s993_s15 = smov (!%p206_p4, %s817_s15), 1 }
   0xf   : > { %244 = vst.msk [vmem:[#allocation2 + $0x68] sm:$0x3] %vm231_vm1, %v827_v0  ;;  %246 = vst.msk [vmem:[#allocation2 + $0x78] sm:$0x3] %vm231_vm1, %v827_v0  ;;  %s740_s19 = sshll.u32 %s993_s15, 6  ;;  %769 = vmatpush3.bf16.msra.mxu0 %v766_v40  ;;  %s741_s21 = sshll.u32 %s993_s15, 4 }
  0x10   : > { %248 = vst.msk [vmem:[#allocation2 + $0x88] sm:$0x3] %vm231_vm1, %v827_v0  ;;  %s210_s22 = scalar_lea.vmem %s983_s0, %s740_s19  ;;  %v268_v4 = vld [vmem:[#allocation2 + $0x1] ss:$2 sm:$0xf]  ;;  %757 = vmatprep.subr.msk.mxu0 %vm513_vm2, %v501_v43 }
  0x11   : > { %v224_v1 = vld [vmem:[%s210_s22 + $0x18] sm:$0xff]  ;;  %v222_v2 = vld [vmem:[%s210_s22 + $0x8] sm:$0xff]  ;;  %334 = vrot.lane.b32.xlu0 %v268_v4, %s828_s23  ;;  %v221_v5 = vld [vmem:[%s210_s22] sm:$0xff] }
  0x12   : > { %v226_v3 = vld [vmem:[%s210_s22 + $0x28] sm:$0xff]  ;;  %255 = vst.msk [vmem:[#allocation2 + $0x41] sm:$0xff] %vm229_vm0, %v224_v1  ;;  %253 = vst.msk [vmem:[#allocation2 + $0x21] sm:$0xff] %vm229_vm0, %v222_v2  ;;  %v225_v6 = vld [vmem:[%s210_s22 + $0x20] sm:$0xff] }
  0x13   : > { %257 = vst.msk [vmem:[#allocation2 + $0x61] sm:$0xff] %vm229_vm0, %v226_v3  ;;  %v223_v7 = vld [vmem:[%s210_s22 + $0x10] sm:$0xff]  ;;  %v276_v8 = vld [vmem:[#allocation2 + $0x2] ss:$2 sm:$0xf]  ;;  %252 = vst.msk [vmem:[#allocation2 + $0x11] sm:$0xff] %vm229_vm0, %v221_v5  ;;  %758 = vmatpush3.msk.msra.mxu0 %vm513_vm2, %v501_v43 }
  0x14   : > { %256 = vst.msk [vmem:[#allocation2 + $0x51] sm:$0xff] %vm229_vm0, %v225_v6  ;;  %254 = vst.msk [vmem:[#allocation2 + $0x31] sm:$0xff] %vm229_vm0, %v223_v7  ;;  %v227_v9 = vld [vmem:[%s210_s22 + $0x30] sm:$0xff]  ;;  %v228_v10 = vld [vmem:[%s210_s22 + $0x38] sm:$0xff] }
  0x15   : > { %258 = vst.msk [vmem:[#allocation2 + $0x71] sm:$0xff] %vm229_vm0, %v227_v9  ;;  %259 = vst.msk [vmem:[#allocation2 + $0x81] sm:$0xff] %vm229_vm0, %v228_v10  ;;  %350 = vrot.lane.b32.xlu0 %v276_v8, %s829_s24  ;;  %v260_v9 = vld [vmem:[#allocation2] ss:$2 sm:$0xf] }
  0x19   : > { %v272_v11 = vld [vmem:[#allocation2 + $0x41] ss:$2 sm:$0xf]  ;;  %v280_v14 = vld [vmem:[#allocation2 + $0x42] ss:$2 sm:$0xf] }
  0x1a   : > { %v270_v12 = vld [vmem:[#allocation2 + $0x21] ss:$2 sm:$0xf]  ;;  %338 = vrot.lane.b32.xlu1 %v272_v11, %s828_s23  ;;  %v278_v15 = vld [vmem:[#allocation2 + $0x22] ss:$2 sm:$0xf] }
  0x1b   : > { %336 = vrot.lane.b32.xlu0 %v270_v12, %s828_s23  ;;  %v274_v13 = vld [vmem:[#allocation2 + $0x61] ss:$2 sm:$0xf]  ;;  %v283_v16 = vld [vmem:[#allocation2 + $0x10] ss:$2 sm:$0xf] }
  0x1c   : > { %v282_v17 = vld [vmem:[#allocation2 + $0x62] ss:$2 sm:$0xf]  ;;  %v287_v18 = vld [vmem:[#allocation2 + $0x50] ss:$2 sm:$0xf] }
  0x1d   : > { %v285_v19 = vld [vmem:[#allocation2 + $0x30] ss:$2 sm:$0xf]  ;;  %v291_v20 = vld [vmem:[#allocation2 + $0x11] ss:$2 sm:$0xf] }
  0x1e   : > { %340 = vrot.lane.b32.xlu1 %v274_v13, %s828_s23  ;;  %v289_v21 = vld [vmem:[#allocation2 + $0x70] ss:$2 sm:$0xf]  ;;  %v295_v22 = vld [vmem:[#allocation2 + $0x51] ss:$2 sm:$0xf] }
  0x1f   : > { %354 = vrot.lane.b32.xlu0 %v280_v14, %s829_s24  ;;  %v293_v23 = vld [vmem:[#allocation2 + $0x31] ss:$2 sm:$0xf]  ;;  %v299_v24 = vld [vmem:[#allocation2 + $0x12] ss:$2 sm:$0xf] }
  0x20   : > { %v297_v25 = vld [vmem:[#allocation2 + $0x71] ss:$2 sm:$0xf]  ;;  %v303_v26 = vld [vmem:[#allocation2 + $0x52] ss:$2 sm:$0xf] }
  0x21   : > { %v301_v27 = vld [vmem:[#allocation2 + $0x32] ss:$2 sm:$0xf]  ;;  %v307_v28 = vld [vmem:[#allocation2 + $0x20] ss:$2 sm:$0xf] }
  0x22   : > { %352 = vrot.lane.b32.xlu1 %v278_v15, %s829_s24  ;;  %v305_v29 = vld [vmem:[#allocation2 + $0x72] ss:$2 sm:$0xf]  ;;  %v311_v30 = vld [vmem:[#allocation2 + $0x60] ss:$2 sm:$0xf] }
  0x23   : > { %366 = vrot.lane.b32.xlu0 %v283_v16, %s830_s25  ;;  %v309_v31 = vld [vmem:[#allocation2 + $0x40] ss:$2 sm:$0xf]  ;;  %v315_v34 = vld [vmem:[#allocation2 + $0x21] ss:$2 sm:$0xf] }
  0x24   : > { %v313_v36 = vld [vmem:[#allocation2 + $0x80] ss:$2 sm:$0xf]  ;;  %v319_v39 = vld [vmem:[#allocation2 + $0x61] ss:$2 sm:$0xf] }
  0x25   : > { %v317_v41 = vld [vmem:[#allocation2 + $0x41] ss:$2 sm:$0xf]  ;;  %v323_v42 = vld [vmem:[#allocation2 + $0x22] ss:$2 sm:$0xf] }
  0x26   : > { %356 = vrot.lane.b32.xlu1 %v282_v17, %s829_s24  ;;  %v321_v44 = vld [vmem:[#allocation2 + $0x81] ss:$2 sm:$0xf]  ;;  %v327_v45 = vld [vmem:[#allocation2 + $0x62] ss:$2 sm:$0xf] }
  0x27   : > { %370 = vrot.lane.b32.xlu0 %v287_v18, %s830_s25  ;;  %v325_v46 = vld [vmem:[#allocation2 + $0x42] ss:$2 sm:$0xf] }
  0x28   : > { %v329_v47 = vld [vmem:[#allocation2 + $0x82] ss:$2 sm:$0xf] }
  0x29   : > { %v262_v10 = vld [vmem:[#allocation2 + $0x20] ss:$2 sm:$0xf] }
  0x2a   : > { %368 = vrot.lane.b32.xlu1 %v285_v19, %s830_s25  ;;  %v264_v15 = vld [vmem:[#allocation2 + $0x40] ss:$2 sm:$0xf] }
  0x2b   : > { %382 = vrot.lane.b32.xlu0 %v291_v20, %s831_s26  ;;  %v266_v17 = vld [vmem:[#allocation2 + $0x60] ss:$2 sm:$0xf] }
  0x2e   : > { %372 = vrot.lane.b32.xlu1 %v289_v21, %s830_s25 }
  0x2f   : > { %386 = vrot.lane.b32.xlu0 %v295_v22, %s831_s26 }
  0x32   : > { %384 = vrot.lane.b32.xlu1 %v293_v23, %s831_s26 }
  0x33   : > { %398 = vrot.lane.b32.xlu0 %v299_v24, %s832_s27 }
  0x36   : > { %388 = vrot.lane.b32.xlu1 %v297_v25, %s831_s26  ;;  %s219_s26 = scalar_lea.vmem %s987_s4, %s741_s21 }
  0x37   : > { %402 = vrot.lane.b32.xlu0 %v303_v26, %s832_s27 }
  0x3a   : > { %400 = vrot.lane.b32.xlu1 %v301_v27, %s832_s27 }
  0x3b   : > { %414 = vrot.lane.b32.xlu0 %v307_v28, %s833_s28 }
  0x3e   : > { %404 = vrot.lane.b32.xlu1 %v305_v29, %s832_s27 }
  0x3f   : > { %418 = vrot.lane.b32.xlu0 %v311_v30, %s833_s28 }
  0x42   : > { %416 = vrot.lane.b32.xlu1 %v309_v31, %s833_s28 }
  0x43   : > { %430 = vrot.lane.b32.xlu0 %v315_v34, %s834_s7 }
  0x46   : > { %420 = vrot.lane.b32.xlu1 %v313_v36, %s833_s28 }
  0x47   : > { %434 = vrot.lane.b32.xlu0 %v319_v39, %s834_s7 }
  0x4a   : > { %432 = vrot.lane.b32.xlu1 %v317_v41, %s834_s7 }
  0x4b   : > { %446 = vrot.lane.b32.xlu0 %v323_v42, %s835_s14 }
  0x4e   : > { %436 = vrot.lane.b32.xlu1 %v321_v44, %s834_s7 }
  0x4f   : > { %450 = vrot.lane.b32.xlu0 %v327_v45, %s835_s14 }
  0x52   : > { %448 = vrot.lane.b32.xlu1 %v325_v46, %s835_s14 }
  0x56   : > { %452 = vrot.lane.b32.xlu1 %v329_v47, %s835_s14 }
  0x83   : > { %v335_v48 = vpop.permute.xlu0 %334 }
  0x84   : > { %v458_v12 = vsel %vm229_vm0, %v260_v9, %v335_v48 }
  0x87   : > { %v351_v49 = vpop.permute.xlu0 %350 }
  0x88   : > { %v463_v16 = vsel %vm462_vm3, %v458_v12, %v351_v49 }
  0x8c   : > { %v339_v50 = vpop.permute.xlu1 %338 }
  0x8d   : > { %v337_v51 = vpop.permute.xlu0 %336  ;;  %v460_v25 = vsel %vm229_vm0, %v264_v15, %v339_v50 }
  0x8e   : > { %v459_v13 = vsel %vm229_vm0, %v262_v10, %v337_v51 }
  0x90   : > { %v341_v52 = vpop.permute.xlu1 %340 }
  0x91   : > { %v355_v53 = vpop.permute.xlu0 %354  ;;  %v461_v26 = vsel %vm229_vm0, %v266_v17, %v341_v52 }
  0x92   : > { %v465_v29 = vsel %vm462_vm3, %v460_v25, %v355_v53 }
  0x94   : > { %v353_v54 = vpop.permute.xlu1 %352 }
  0x95   : > { %v367_v55 = vpop.permute.xlu0 %366  ;;  %v464_v18 = vsel %vm462_vm3, %v459_v13, %v353_v54  ;;  %v736_v54 = vld [vmem:[%s985_s2] ss:$0 sm:$0xff] }
  0x96   : > { %v468_v19 = vsel %vm467_vm4, %v463_v16, %v367_v55 }
  0x98   : > { %v357_v56 = vpop.permute.xlu1 %356 }
  0x99   : > { %v371_v57 = vpop.permute.xlu0 %370  ;;  %v466_v30 = vsel %vm462_vm3, %v461_v26, %v357_v56  ;;  %v737_v56 = vld [vmem:[%s986_s3] ss:$0 sm:$0xff] }
  0x9a   : > { %v470_v33 = vsel %vm467_vm4, %v465_v29, %v371_v57 }
  0x9c   : > { %v369_v58 = vpop.permute.xlu1 %368 }
  0x9d   : > { %v383_v59 = vpop.permute.xlu0 %382  ;;  %v469_v20 = vsel %vm467_vm4, %v464_v18, %v369_v58 }
  0x9e   : > { %v473_v23 = vsel %vm472_vm5, %v468_v19, %v383_v59 }
  0xa0   : > { %v373_v60 = vpop.permute.xlu1 %372 }
  0xa1   : > { %v387_v61 = vpop.permute.xlu0 %386  ;;  %v471_v34 = vsel %vm467_vm4, %v466_v30, %v373_v60 }
  0xa2   : > { %v475_v38 = vsel %vm472_vm5, %v470_v33, %v387_v61 }
  0xa4   : > { %v385_v62 = vpop.permute.xlu1 %384 }
  0xa5   : > { %v399_v63 = vpop.permute.xlu0 %398  ;;  %v474_v24 = vsel %vm472_vm5, %v469_v20, %v385_v62 }
  0xa6   : > { %v478_v27 = vsel %vm477_vm6, %v473_v23, %v399_v63 }
  0xa8   : > { %v389_v0 = vpop.permute.xlu1 %388 }
  0xa9   : > { %v403_v1 = vpop.permute.xlu0 %402  ;;  %v476_v39 = vsel %vm472_vm5, %v471_v34, %v389_v0 }
  0xaa   : > { %v480_v42 = vsel %vm477_vm6, %v475_v38, %v403_v1 }
  0xac   : > { %v401_v2 = vpop.permute.xlu1 %400 }
  0xad   : > { %v415_v3 = vpop.permute.xlu0 %414  ;;  %v479_v28 = vsel %vm477_vm6, %v474_v24, %v401_v2 }
  0xae   : > { %v483_v31 = vsel %vm482_vm7, %v478_v27, %v415_v3 }
  0xb0   : > { %v405_v4 = vpop.permute.xlu1 %404 }
  0xb1   : > { %v419_v5 = vpop.permute.xlu0 %418  ;;  %v481_v43 = vsel %vm477_vm6, %v476_v39, %v405_v4 }
  0xb2   : > { %v485_v46 = vsel %vm482_vm7, %v480_v42, %v419_v5 }
  0xb4   : > { %v417_v6 = vpop.permute.xlu1 %416 }
  0xb5   : > { %v431_v7 = vpop.permute.xlu0 %430  ;;  %v484_v32 = vsel %vm482_vm7, %v479_v28, %v417_v6 }
  0xb6   : > { %v488_v35 = vsel %vm487_vm8, %v483_v31, %v431_v7 }
  0xb8   : > { %v421_v8 = vpop.permute.xlu1 %420 }
  0xb9   : > { %v435_v11 = vpop.permute.xlu0 %434  ;;  %v486_v47 = vsel %vm482_vm7, %v481_v43, %v421_v8 }
  0xba   : > { %v490_v48 = vsel %vm487_vm8, %v485_v46, %v435_v11 }
  0xbc   : > { %v433_v14 = vpop.permute.xlu1 %432 }
  0xbd   : > { %v447_v21 = vpop.permute.xlu0 %446  ;;  %v489_v36 = vsel %vm487_vm8, %v484_v32, %v433_v14 }
  0xbe   : > { %v493_v40 = vsel %vm492_vm9, %v488_v35, %v447_v21 }
  0xc0   : > { %v437_v22 = vpop.permute.xlu1 %436 }
  0xc1   : > { %v451_v44 = vpop.permute.xlu0 %450  ;;  %v491_v49 = vsel %vm487_vm8, %v486_v47, %v437_v22 }
  0xc2   : > { %v495_v51 = vsel %vm492_vm9, %v490_v48, %v451_v44 }
  0xc4   : > { %v449_v37 = vpop.permute.xlu1 %448 }
  0xc5   : > { %v494_v41 = vsel %vm492_vm9, %v489_v36, %v449_v37 }
  0xc6   : > { %v506_v45 = vcombine.low %v493_v40, %v494_v41 }
  0xc8   : > { %v453_v50 = vpop.permute.xlu1 %452  ;;  %759 = vmatprep.mubr.msk.f32.mxu0 %vm508_vm10, %v506_v45 }
  0xc9   : > { %v496_v52 = vsel %vm492_vm9, %v491_v49, %v453_v50 }
  0xca   : > { %v507_v53 = vcombine.low %v495_v51, %v496_v52 }
  0xcc   : > { %760 = vmatmul.mubr.msk.f32.vlgmr.msra.gmra.mrb[0].mxu0 %vm508_vm10, %v507_v53 }
 0x19f   : > { %v761_v55 = vpop.f32.mrb[0].mxu0 }
 0x1a0   : > { %v600_v57 = vmul.f32 %v761_v55, %v736_v54  ;;  %v583_v58 = vpop.f32.mrb[1].mxu0 }
 0x1a1   : > { %v599_v59 = vmul.f32 %v736_v54, %v583_v58 }
 0x1a2   : > { %v609_v60 = vadd.f32 %v737_v56, %v600_v57 }
 0x1a3   : > { %v608_v61 = vadd.f32 %v737_v56, %v599_v59 }
 0x1a4   : > { %v613_v62 = vcombine.high %v609_v60, %v609_v60  ;;  %619 = vst.msk [vmem:[%s219_s26 + $0x8] sm:$0xf] %vm616_vm11, %v609_v60 }
 0x1a5   : > { %v612_v63 = vcombine.high %v608_v61, %v608_v61  ;;  %617 = vst.msk [vmem:[%s219_s26] sm:$0xf] %vm616_vm11, %v608_v61 }
 0x1a6   : > { %620 = vst.msk [vmem:[%s219_s26 + $0xc] sm:$0xf] %vm616_vm11, %v613_v62 }
 0x1a7   : > { %618 = vst.msk [vmem:[%s219_s26 + $0x4] sm:$0xf] %vm616_vm11, %v612_v63 }
 0x1a8 PF: > { %s14_s17 = sadd.s32 1, %s825_s17   ;;  %s988_s15 = smov %s821_s16 }
 0x1a9   : > { %p11_p5 = scmp.ge.s32.totalorder %s14_s17, 4   ;;  %s989_s16 = smov %s991_s18 }
 0x1ab   :  { %13 = sbr.rel (!%p11_p5) target bundleno = 2 (0x2), region = 101 }

// kernel: usrm3_forward.10
= control target key start
LH: loop header
LB: loop body
LE: loop exit
PB: predicated region body
PF: predicated region fallthrough
CT: control target
= control target key end

     0   :  { %s785_s15 = smov 0   ;;  %s787_s16 = smov 0   ;;  %s896_s0 = inlined_call_operand.vmem [shape: f32[2,4,4,4], index: 0, kind: input, shape index: {}]   ;;  %s897_s1 = inlined_call_operand.vmem [shape: f32[36,4], index: 1, kind: input, shape index: {}]   ;;  %s898_s2 = inlined_call_operand.vmem [shape: f32[1,4], index: 2, kind: input, shape index: {}]   ;;  %s899_s3 = inlined_call_operand.vmem [shape: f32[1,4], index: 3, kind: input, shape index: {}]   ;;  %s900_s4 = inlined_call_operand.vmem [shape: f32[2,4,4,4], index: 4, kind: output, shape index: {}]  }
   0x1   :  { %s789_s17 = smov 0  }
   0x2 LB: > { %s26_s18 = sadd.s32 1, %s745_s16  ;;  %p652_p0 = scmp.ge.s32.totalorder %s749_s17, 1  ;;  %s749_s17 = sphi %s789_s17, %s14_s17   ;;  %s745_s16 = sphi %s787_s16, %s902_s16   ;;  %s741_s15 = sphi %s785_s15, %s901_s15  }
   0x3   : > { %p28_p1 = scmp.ge.s32.totalorder %s26_s18, 2  ;;  %p176_p2 = scmp.lt.s32.totalorder %s749_s17, 3 }
   0x5   : > { %s904_s18 = smov (%p28_p1, %s26_s18), 0  ;;  %p177_p3 = pnand %p652_p0, %p176_p2 }
   0x6   : > { %vm225_vm0 = vcmask (!%p177_p3), 31744   ;;  %v751_v0 = vmov (!%p177_p3), 0.0   ;;  %p206_p4 = scmp.lt.s32.totalorder (!%p177_p3), %s741_s15, 1  ;;  %vm235_vm1 = vcmask (!%p177_p3), 27648   ;;  %s752_s23 = smov (!%p177_p3), 4   ;;  %v444_v27 = vld [vmem:[%s897_s1] sm:$0xff] (!%p177_p3) }
   0x7   : > { %180 = sbr.rel (%p177_p3) target bundleno = 420 (0x1a4), region = 36  ;;  %226 = vst.msk [vmem:[#allocation2] sm:$0xff] (!%p177_p3), %vm225_vm0, %v751_v0  ;;  %227 = vst.msk [vmem:[#allocation2 + $0x8] sm:$0xff] (!%p177_p3), %vm225_vm0, %v751_v0  ;;  %s753_s24 = smov (!%p177_p3), 8   ;;  %v445_v28 = vld [vmem:[%s897_s1 + $0x8] sm:$0xff] (!%p177_p3)  ;;  %v446_v32 = vld [vmem:[%s897_s1 + $0x10] sm:$0xff] (!%p177_p3) }
   0x8   : > { %228 = vst.msk [vmem:[#allocation2 + $0x10] sm:$0xff] (!%p177_p3), %vm225_vm0, %v751_v0  ;;  %229 = vst.msk [vmem:[#allocation2 + $0x18] sm:$0xff] (!%p177_p3), %vm225_vm0, %v751_v0  ;;  %s754_s25 = smov (!%p177_p3), 12   ;;  %s755_s26 = smov (!%p177_p3), 16   ;;  %v686_v30 = vpack.c.bf16 (!%p177_p3), %v445_v28, %v444_v27  ;;  %v447_v33 = vld [vmem:[%s897_s1 + $0x18] sm:$0xff] (!%p177_p3)  ;;  %vm460_vm2 = vcmask (!%p177_p3), 1043456  }
   0x9   : > { %230 = vst.msk [vmem:[#allocation2 + $0x20] sm:$0xff] (!%p177_p3), %vm225_vm0, %v751_v0  ;;  %231 = vst.msk [vmem:[#allocation2 + $0x28] sm:$0xff] (!%p177_p3), %vm225_vm0, %v751_v0  ;;  %s756_s27 = smov (!%p177_p3), 20   ;;  %s757_s28 = smov (!%p177_p3), 24   ;;  %v690_v35 = vpack.c.bf16 (!%p177_p3), %v447_v33, %v446_v32  ;;  %v448_v38 = vld [vmem:[%s897_s1 + $0x20] sm:$0xf] (!%p177_p3) }
   0xa   : > { %232 = vst.msk [vmem:[#allocation2 + $0x30] sm:$0xff] (!%p177_p3), %vm225_vm0, %v751_v0  ;;  %233 = vst.msk [vmem:[#allocation2 + $0x38] sm:$0xff] (!%p177_p3), %vm225_vm0, %v751_v0  ;;  %687 = vmatprep.subr.bf16.mxu0 (!%p177_p3), %v686_v30  ;;  %s758_s11 = smov (!%p177_p3), 28   ;;  %s759_s14 = smov (!%p177_p3), 32   ;;  %vm409_vm3 = vcmask (!%p177_p3), 64512   ;;  %vm414_vm4 = vcmask (!%p177_p3), 97280  }
   0xb   : > { %689 = vmatpush3.bf16.msra.mxu0 (!%p177_p3), %v686_v30  ;;  %vm419_vm5 = vcmask (!%p177_p3), 130048   ;;  %vm424_vm6 = vcmask (!%p177_p3), 162816   ;;  %vm429_vm7 = vcmask (!%p177_p3), 195584   ;;  %vm434_vm8 = vcmask (!%p177_p3), 228352  }
   0xc   : > { %691 = vmatprep.subr.bf16.mxu0 (!%p177_p3), %v690_v35  ;;  %vm439_vm9 = vcmask (!%p177_p3), 261120   ;;  %vm455_vm10 = vcmask (!%p177_p3), 293888  }
   0xe   : > { %s906_s15 = smov (!%p206_p4, %s741_s15), 1  ;;  %v244_v4 = vld [vmem:[#allocation2 + $0x2] sm:$0xf]  ;;  %v249_v5 = vld [vmem:[#allocation2 + $0xc] sm:$0xf] }
   0xf   : > { %s664_s19 = sshll.u32 %s906_s15, 4  ;;  %281 = vrot.lane.b32.xlu0 %v244_v4, %s752_s23  ;;  %299 = vrot.lane.b32.xlu1 %v249_v5, %s753_s24  ;;  %v245_v7 = vld [vmem:[#allocation2 + $0xa] sm:$0xf]  ;;  %v248_v8 = vld [vmem:[#allocation2 + $0x4] sm:$0xf] }
  0x10   : > { %s210_s22 = scalar_lea.vmem %s896_s0, %s664_s19  ;;  %693 = vmatpush3.bf16.msra.mxu0 %v690_v35  ;;  %v241_v4 = vld [vmem:[#allocation2 + $0x8] sm:$0xf] }
  0x11   : > { %v221_v1 = vld [vmem:[%s210_s22] sm:$0xf]  ;;  %v222_v2 = vld [vmem:[%s210_s22 + $0x4] sm:$0xf]  ;;  %v223_v3 = vld [vmem:[%s210_s22 + $0x8] sm:$0xf]  ;;  %681 = vmatprep.subr.msk.mxu0 %vm460_vm2, %v448_v38 }
  0x12   : > { %236 = vst.msk [vmem:[#allocation2 + $0x12] sm:$0xf] %vm235_vm1, %v221_v1  ;;  %237 = vst.msk [vmem:[#allocation2 + $0x1a] sm:$0xf] %vm235_vm1, %v222_v2  ;;  %v224_v6 = vld [vmem:[%s210_s22 + $0xc] sm:$0xf] }
  0x13   : > { %238 = vst.msk [vmem:[#allocation2 + $0x22] sm:$0xf] %vm235_vm1, %v223_v3  ;;  %239 = vst.msk [vmem:[#allocation2 + $0x2a] sm:$0xf] %vm235_vm1, %v224_v6  ;;  %283 = vrot.lane.b32.xlu0 %v245_v7, %s752_s23  ;;  %v267_v29 = vld [vmem:[#allocation2 + $0x30] sm:$0xf] }
  0x14   : > { %v268_v31 = vld [vmem:[#allocation2 + $0x38] sm:$0xf]  ;;  %v271_v37 = vld [vmem:[#allocation2 + $0x32] sm:$0xf]  ;;  %682 = vmatpush3.msk.msra.mxu0 %vm460_vm2, %v448_v38  ;;  %v276_v43 = vld [vmem:[#allocation2 + $0x3c] sm:$0xf] }
  0x15   : > { %v272_v39 = vld [vmem:[#allocation2 + $0x3a] sm:$0xf]  ;;  %v275_v42 = vld [vmem:[#allocation2 + $0x34] sm:$0xf]  ;;  %v240_v6 = vld [vmem:[#allocation2] sm:$0xf] }
  0x17   : > { %297 = vrot.lane.b32.xlu0 %v248_v8, %s753_s24 }
  0x19   : > { %v246_v9 = vld [vmem:[#allocation2 + $0x12] sm:$0xf]  ;;  %v247_v10 = vld [vmem:[#allocation2 + $0x1a] sm:$0xf] }
  0x1a   : > { %285 = vrot.lane.b32.xlu1 %v246_v9, %s752_s23  ;;  %v250_v11 = vld [vmem:[#allocation2 + $0x14] sm:$0xf]  ;;  %v251_v12 = vld [vmem:[#allocation2 + $0x1c] sm:$0xf]  ;;  %v252_v13 = vld [vmem:[#allocation2 + $0x10] sm:$0xf] }
  0x1b   : > { %301 = vrot.lane.b32.xlu0 %v250_v11, %s753_s24  ;;  %v253_v14 = vld [vmem:[#allocation2 + $0x18] sm:$0xf]  ;;  %v254_v15 = vld [vmem:[#allocation2 + $0x20] sm:$0xf]  ;;  %v255_v16 = vld [vmem:[#allocation2 + $0x28] sm:$0xf] }
  0x1c   : > { %v256_v17 = vld [vmem:[#allocation2 + $0x12] sm:$0xf]  ;;  %v257_v18 = vld [vmem:[#allocation2 + $0x1a] sm:$0xf]  ;;  %v258_v19 = vld [vmem:[#allocation2 + $0x22] sm:$0xf] }
  0x1d   : > { %v259_v20 = vld [vmem:[#allocation2 + $0x2a] sm:$0xf]  ;;  %v260_v21 = vld [vmem:[#allocation2 + $0x14] sm:$0xf]  ;;  %v261_v22 = vld [vmem:[#allocation2 + $0x1c] sm:$0xf] }
  0x1e   : > { %287 = vrot.lane.b32.xlu1 %v247_v10, %s752_s23  ;;  %v262_v23 = vld [vmem:[#allocation2 + $0x24] sm:$0xf]  ;;  %v263_v24 = vld [vmem:[#allocation2 + $0x2c] sm:$0xf]  ;;  %v265_v25 = vld [vmem:[#allocation2 + $0x20] sm:$0xf] }
  0x1f   : > { %313 = vrot.lane.b32.xlu0 %v252_v13, %s754_s25  ;;  %v266_v26 = vld [vmem:[#allocation2 + $0x28] sm:$0xf]  ;;  %v269_v34 = vld [vmem:[#allocation2 + $0x22] sm:$0xf]  ;;  %v274_v41 = vld [vmem:[#allocation2 + $0x2c] sm:$0xf] }
  0x20   : > { %v270_v36 = vld [vmem:[#allocation2 + $0x2a] sm:$0xf]  ;;  %v273_v40 = vld [vmem:[#allocation2 + $0x24] sm:$0xf]  ;;  %v242_v11 = vld [vmem:[#allocation2 + $0x10] sm:$0xf] }
  0x21   : > { %v243_v13 = vld [vmem:[#allocation2 + $0x18] sm:$0xf] }
  0x22   : > { %303 = vrot.lane.b32.xlu1 %v251_v12, %s753_s24 }
  0x23   : > { %317 = vrot.lane.b32.xlu0 %v254_v15, %s754_s25 }
  0x26   : > { %315 = vrot.lane.b32.xlu1 %v253_v14, %s754_s25 }
  0x27   : > { %329 = vrot.lane.b32.xlu0 %v256_v17, %s755_s26 }
  0x2a   : > { %319 = vrot.lane.b32.xlu1 %v255_v16, %s754_s25 }
  0x2b   : > { %333 = vrot.lane.b32.xlu0 %v258_v19, %s755_s26 }
  0x2e   : > { %331 = vrot.lane.b32.xlu1 %v257_v18, %s755_s26 }
  0x2f   : > { %345 = vrot.lane.b32.xlu0 %v260_v21, %s756_s27 }
  0x32   : > { %335 = vrot.lane.b32.xlu1 %v259_v20, %s755_s26  ;;  %s219_s26 = scalar_lea.vmem %s900_s4, %s664_s19 }
  0x33   : > { %349 = vrot.lane.b32.xlu0 %v262_v23, %s756_s27 }
  0x36   : > { %347 = vrot.lane.b32.xlu1 %v261_v22, %s756_s27 }
  0x37   : > { %361 = vrot.lane.b32.xlu0 %v265_v25, %s757_s28 }
  0x3a   : > { %351 = vrot.lane.b32.xlu1 %v263_v24, %s756_s27 }
  0x3b   : > { %365 = vrot.lane.b32.xlu0 %v267_v29, %s757_s28 }
  0x3e   : > { %363 = vrot.lane.b32.xlu1 %v266_v26, %s757_s28 }
  0x3f   : > { %377 = vrot.lane.b32.xlu0 %v269_v34, %s758_s11 }
  0x42   : > { %367 = vrot.lane.b32.xlu1 %v268_v31, %s757_s28 }
  0x43   : > { %381 = vrot.lane.b32.xlu0 %v271_v37, %s758_s11 }
  0x46   : > { %379 = vrot.lane.b32.xlu1 %v270_v36, %s758_s11 }
  0x47   : > { %393 = vrot.lane.b32.xlu0 %v273_v40, %s759_s14 }
  0x4a   : > { %383 = vrot.lane.b32.xlu1 %v272_v39, %s758_s11 }
  0x4b   : > { %397 = vrot.lane.b32.xlu0 %v275_v42, %s759_s14 }
  0x4e   : > { %395 = vrot.lane.b32.xlu1 %v274_v41, %s759_s14 }
  0x52   : > { %399 = vrot.lane.b32.xlu1 %v276_v43, %s759_s14 }
  0x81   : > { %v282_v44 = vpop.permute.xlu0 %281  ;;  %v300_v45 = vpop.permute.xlu1 %299 }
  0x82   : > { %v405_v10 = vsel %vm225_vm0, %v240_v6, %v282_v44 }
  0x85   : > { %v284_v46 = vpop.permute.xlu0 %283 }
  0x86   : > { %v406_v7 = vsel %vm225_vm0, %v241_v4, %v284_v46 }
  0x87   : > { %v411_v14 = vsel %vm409_vm3, %v406_v7, %v300_v45 }
  0x89   : > { %v298_v48 = vpop.permute.xlu0 %297 }
  0x8a   : > { %v410_v12 = vsel %vm409_vm3, %v405_v10, %v298_v48 }
  0x8c   : > { %v286_v47 = vpop.permute.xlu1 %285 }
  0x8d   : > { %v302_v50 = vpop.permute.xlu0 %301  ;;  %v407_v21 = vsel %vm225_vm0, %v242_v11, %v286_v47 }
  0x8e   : > { %v412_v25 = vsel %vm409_vm3, %v407_v21, %v302_v50  ;;  %v660_v50 = vld [vmem:[%s898_s2] ss:$0 sm:$0xff] }
  0x90   : > { %v288_v49 = vpop.permute.xlu1 %287 }
  0x91   : > { %v314_v52 = vpop.permute.xlu0 %313  ;;  %v408_v22 = vsel %vm225_vm0, %v243_v13, %v288_v49 }
  0x92   : > { %v415_v15 = vsel %vm414_vm4, %v410_v12, %v314_v52  ;;  %v661_v52 = vld [vmem:[%s899_s3] ss:$0 sm:$0xff] }
  0x94   : > { %v304_v51 = vpop.permute.xlu1 %303 }
  0x95   : > { %v318_v54 = vpop.permute.xlu0 %317  ;;  %v413_v26 = vsel %vm409_vm3, %v408_v22, %v304_v51 }
  0x96   : > { %v417_v29 = vsel %vm414_vm4, %v412_v25, %v318_v54 }
  0x98   : > { %v316_v53 = vpop.permute.xlu1 %315 }
  0x99   : > { %v330_v56 = vpop.permute.xlu0 %329  ;;  %v416_v16 = vsel %vm414_vm4, %v411_v14, %v316_v53 }
  0x9a   : > { %v420_v18 = vsel %vm419_vm5, %v415_v15, %v330_v56 }
  0x9c   : > { %v320_v55 = vpop.permute.xlu1 %319 }
  0x9d   : > { %v334_v58 = vpop.permute.xlu0 %333  ;;  %v418_v30 = vsel %vm414_vm4, %v413_v26, %v320_v55 }
  0x9e   : > { %v422_v34 = vsel %vm419_vm5, %v417_v29, %v334_v58 }
  0xa0   : > { %v332_v57 = vpop.permute.xlu1 %331 }
  0xa1   : > { %v346_v60 = vpop.permute.xlu0 %345  ;;  %v421_v19 = vsel %vm419_vm5, %v416_v16, %v332_v57 }
  0xa2   : > { %v425_v23 = vsel %vm424_vm6, %v420_v18, %v346_v60 }
  0xa4   : > { %v336_v59 = vpop.permute.xlu1 %335 }
  0xa5   : > { %v350_v62 = vpop.permute.xlu0 %349  ;;  %v423_v35 = vsel %vm419_vm5, %v418_v30, %v336_v59 }
  0xa6   : > { %v427_v38 = vsel %vm424_vm6, %v422_v34, %v350_v62 }
  0xa8   : > { %v348_v61 = vpop.permute.xlu1 %347 }
  0xa9   : > { %v362_v0 = vpop.permute.xlu0 %361  ;;  %v426_v24 = vsel %vm424_vm6, %v421_v19, %v348_v61 }
  0xaa   : > { %v430_v27 = vsel %vm429_vm7, %v425_v23, %v362_v0 }
  0xac   : > { %v352_v63 = vpop.permute.xlu1 %351 }
  0xad   : > { %v366_v2 = vpop.permute.xlu0 %365  ;;  %v428_v39 = vsel %vm424_vm6, %v423_v35, %v352_v63 }
  0xae   : > { %v432_v42 = vsel %vm429_vm7, %v427_v38, %v366_v2 }
  0xb0   : > { %v364_v1 = vpop.permute.xlu1 %363 }
  0xb1   : > { %v378_v5 = vpop.permute.xlu0 %377  ;;  %v431_v28 = vsel %vm429_vm7, %v426_v24, %v364_v1 }
  0xb2   : > { %v435_v31 = vsel %vm434_vm8, %v430_v27, %v378_v5 }
  0xb4   : > { %v368_v3 = vpop.permute.xlu1 %367 }
  0xb5   : > { %v382_v9 = vpop.permute.xlu0 %381  ;;  %v433_v43 = vsel %vm429_vm7, %v428_v39, %v368_v3 }
  0xb6   : > { %v437_v44 = vsel %vm434_vm8, %v432_v42, %v382_v9 }
  0xb8   : > { %v380_v8 = vpop.permute.xlu1 %379 }
  0xb9   : > { %v394_v20 = vpop.permute.xlu0 %393  ;;  %v436_v32 = vsel %vm434_vm8, %v431_v28, %v380_v8 }
  0xba   : > { %v440_v36 = vsel %vm439_vm9, %v435_v31, %v394_v20 }
  0xbc   : > { %v384_v17 = vpop.permute.xlu1 %383 }
  0xbd   : > { %v398_v40 = vpop.permute.xlu0 %397  ;;  %v438_v45 = vsel %vm434_vm8, %v433_v43, %v384_v17 }
  0xbe   : > { %v442_v47 = vsel %vm439_vm9, %v437_v44, %v398_v40 }
  0xc0   : > { %v396_v33 = vpop.permute.xlu1 %395 }
  0xc1   : > { %v441_v37 = vsel %vm439_vm9, %v436_v32, %v396_v33 }
  0xc2   : > { %v453_v41 = vcombine.low %v440_v36, %v441_v37 }
  0xc4   : > { %683 = vmatprep.mubr.msk.f32.mxu0 %vm455_vm10, %v453_v41  ;;  %v400_v46 = vpop.permute.xlu1 %399 }
  0xc5   : > { %v443_v48 = vsel %vm439_vm9, %v438_v45, %v400_v46 }
  0xc6   : > { %v454_v49 = vcombine.low %v442_v47, %v443_v48 }
  0xc8   : > { %684 = vmatmul.mubr.msk.f32.vlgmr.msra.gmra.mrb[0].mxu0 %vm455_vm10, %v454_v49 }
 0x19b   : > { %v685_v51 = vpop.f32.mrb[0].mxu0 }
 0x19c   : > { %v547_v53 = vmul.f32 %v685_v51, %v660_v50  ;;  %v530_v54 = vpop.f32.mrb[1].mxu0 }
 0x19d   : > { %v546_v55 = vmul.f32 %v660_v50, %v530_v54 }
 0x19e   : > { %v556_v56 = vadd.f32 %v661_v52, %v547_v53 }
 0x19f   : > { %v555_v57 = vadd.f32 %v661_v52, %v546_v55 }
 0x1a0   : > { %v560_v58 = vcombine.high %v556_v56, %v556_v56  ;;  %565 = vst.msk [vmem:[%s219_s26 + $0x8] sm:$0xf] %vm235_vm1, %v556_v56 }
 0x1a1   : > { %v559_v59 = vcombine.high %v555_v57, %v555_v57  ;;  %563 = vst.msk [vmem:[%s219_s26] sm:$0xf] %vm235_vm1, %v555_v57 }
 0x1a2   : > { %566 = vst.msk [vmem:[%s219_s26 + $0xc] sm:$0xf] %vm235_vm1, %v560_v58 }
 0x1a3   : > { %564 = vst.msk [vmem:[%s219_s26 + $0x4] sm:$0xf] %vm235_vm1, %v559_v59 }
 0x1a4 PF: > { %s14_s17 = sadd.s32 1, %s749_s17   ;;  %s901_s15 = smov %s745_s16 }
 0x1a5   : > { %p11_p5 = scmp.ge.s32.totalorder %s14_s17, 4   ;;  %s902_s16 = smov %s904_s18 }
 0x1a7   :  { %13 = sbr.rel (!%p11_p5) target bundleno = 2 (0x2), region = 68 }

// kernel: usrm3_forward.8
= control target key start
LH: loop header
LB: loop body
LE: loop exit
PB: predicated region body
PF: predicated region fallthrough
CT: control target
= control target key end

     0   :  { %s1279_s15 = smov 0   ;;  %s1281_s16 = smov 0   ;;  %s1641_s0 = inlined_call_operand.vmem [shape: f32[2,16,16,4], index: 0, kind: input, shape index: {}]   ;;  %s1642_s1 = inlined_call_operand.vmem [shape: f32[36,4], index: 1, kind: input, shape index: {}]   ;;  %s1643_s2 = inlined_call_operand.vmem [shape: f32[1,4], index: 2, kind: input, shape index: {}]   ;;  %s1644_s3 = inlined_call_operand.vmem [shape: f32[1,4], index: 3, kind: input, shape index: {}]   ;;  %s1645_s4 = inlined_call_operand.vmem [shape: f32[2,8,8,4], index: 4, kind: output, shape index: {}]  }
   0x1   :  { %s1283_s17 = smov 0  }
   0x2 LB: > { %s26_s18 = sadd.s32 1, %s1239_s16  ;;  %p1119_p0 = scmp.ge.s32.totalorder %s1243_s17, 1  ;;  %s1243_s17 = sphi %s1283_s17, %s14_s17   ;;  %s1239_s16 = sphi %s1281_s16, %s1647_s16   ;;  %s1235_s15 = sphi %s1279_s15, %s1646_s15  }
   0x3   : > { %p28_p1 = scmp.ge.s32.totalorder %s26_s18, 2  ;;  %p176_p2 = scmp.lt.s32.totalorder %s1243_s17, 3 }
   0x5   : > { %s1649_s18 = smov (%p28_p1, %s26_s18), 0  ;;  %p177_p3 = pnand %p1119_p0, %p176_p2 }
   0x6   : > { %vm253_vm0 = vcmask (!%p177_p3), 31744   ;;  %vm256_vm1 = vcmask (!%p177_p3), 25600   ;;  %v1245_v0 = vmov (!%p177_p3), 0.0   ;;  %p206_p4 = scmp.lt.s32.totalorder (!%p177_p3), %s1235_s15, 1  ;;  %s1246_s23 = smov (!%p177_p3), 4   ;;  %vm841_vm2 = vcmask (!%p177_p3), 1043456  }
   0x7   : > { %180 = sbr.rel (%p177_p3) target bundleno = 499 (0x1f3), region = 36  ;;  %254 = vst.msk [vmem:[#allocation2] sm:$0xff] (!%p177_p3), %vm253_vm0, %v1245_v0  ;;  %255 = vst.msk [vmem:[#allocation2 + $0x8] sm:$0xff] (!%p177_p3), %vm253_vm0, %v1245_v0  ;;  %s1247_s24 = smov (!%p177_p3), 8   ;;  %vm748_vm3 = vcmask (!%p177_p3), 64512   ;;  %vm757_vm4 = vcmask (!%p177_p3), 97280  }
   0x8   : > { %258 = vst.msk [vmem:[#allocation2 + $0x18] sm:$0xff] (!%p177_p3), %vm253_vm0, %v1245_v0  ;;  %259 = vst.msk [vmem:[#allocation2 + $0x20] sm:$0xff] (!%p177_p3), %vm253_vm0, %v1245_v0  ;;  %s1248_s25 = smov (!%p177_p3), 12   ;;  %s1249_s26 = smov (!%p177_p3), 16   ;;  %vm766_vm5 = vcmask (!%p177_p3), 130048   ;;  %vm775_vm6 = vcmask (!%p177_p3), 162816  }
   0x9   : > { %261 = vst.msk [vmem:[#allocation2 + $0x30] sm:$0xff] (!%p177_p3), %vm253_vm0, %v1245_v0  ;;  %262 = vst.msk [vmem:[#allocation2 + $0x38] sm:$0xff] (!%p177_p3), %vm253_vm0, %v1245_v0  ;;  %s1250_s27 = smov (!%p177_p3), 20   ;;  %s1251_s28 = smov (!%p177_p3), 24   ;;  %vm784_vm7 = vcmask (!%p177_p3), 195584   ;;  %vm793_vm8 = vcmask (!%p177_p3), 228352  }
   0xa   : > { %264 = vst.msk [vmem:[#allocation2 + $0x48] sm:$0xff] (!%p177_p3), %vm253_vm0, %v1245_v0  ;;  %265 = vst.msk [vmem:[#allocation2 + $0x50] sm:$0xff] (!%p177_p3), %vm253_vm0, %v1245_v0  ;;  %s1252_s29 = smov (!%p177_p3), 28   ;;  %s1253_s14 = smov (!%p177_p3), 32   ;;  %vm802_vm9 = vcmask (!%p177_p3), 261120   ;;  %vm816_vm10 = vcmask (!%p177_p3), 293888  }
   0xb   : > { %267 = vst.msk [vmem:[#allocation2 + $0x60] sm:$0xff] (!%p177_p3), %vm253_vm0, %v1245_v0  ;;  %268 = vst.msk [vmem:[#allocation2 + $0x68] sm:$0xff] (!%p177_p3), %vm253_vm0, %v1245_v0 }
   0xc   : > { %270 = vst.msk [vmem:[#allocation2 + $0x78] sm:$0xff] (!%p177_p3), %vm253_vm0, %v1245_v0  ;;  %271 = vst.msk [vmem:[#allocation2 + $0x80] sm:$0xff] (!%p177_p3), %vm253_vm0, %v1245_v0 }
   0xd   : > { %273 = vst.msk [vmem:[#allocation2 + $0x90] sm:$0xff] (!%p177_p3), %vm253_vm0, %v1245_v0  ;;  %274 = vst.msk [vmem:[#allocation2 + $0x98] sm:$0xff] (!%p177_p3), %vm253_vm0, %v1245_v0 }
   0xe   : > { %276 = vst.msk [vmem:[#allocation2 + $0xa8] sm:$0xff] %vm253_vm0, %v1245_v0  ;;  %277 = vst.msk [vmem:[#allocation2 + $0xb0] sm:$0xff] %vm253_vm0, %v1245_v0  ;;  %s1651_s15 = smov (!%p206_p4, %s1235_s15), 1  ;;  %v358_v4 = vld [vmem:[#allocation2 + $0x1] ss:$2 sm:$0xff] }
   0xf   : > { %279 = vst.msk [vmem:[#allocation2 + $0xc0] sm:$0xff] %vm253_vm0, %v1245_v0  ;;  %280 = vst.msk [vmem:[#allocation2 + $0xc8] sm:$0xff] %vm253_vm0, %v1245_v0  ;;  %s1137_s19 = sshll.u32 %s1651_s15, 8  ;;  %492 = vrot.lane.b32.xlu0 %v358_v4, %s1246_s23  ;;  %s1138_s21 = sshll.u32 %s1651_s15, 6 }
  0x10   : > { %282 = vst.msk [vmem:[#allocation2 + $0xd8] sm:$0xff] %vm253_vm0, %v1245_v0  ;;  %283 = vst.msk [vmem:[#allocation2 + $0xe0] sm:$0xff] %vm253_vm0, %v1245_v0  ;;  %s1358_s22 = scalar_lea.vmem %s1641_s0, %s1137_s19 }
  0x11   : > { %285 = vst.msk [vmem:[#allocation2 + $0xf0] sm:$0xff] %vm253_vm0, %v1245_v0  ;;  %286 = vst.msk [vmem:[#allocation2 + $0xf8] sm:$0xff] %vm253_vm0, %v1245_v0  ;;  %v223_v1 = vld [vmem:[%s1358_s22 + $0x10] sm:$0xff]  ;;  %v224_v2 = vld [vmem:[%s1358_s22 + $0x18] sm:$0xff] }
  0x12   : > { %288 = vst.msk [vmem:[#allocation2 + $0x108] sm:$0xff] %vm253_vm0, %v1245_v0  ;;  %289 = vst.msk [vmem:[#allocation2 + $0x110] sm:$0xff] %vm253_vm0, %v1245_v0  ;;  %v235_v3 = vld [vmem:[%s1358_s22 + $0x70] sm:$0xff]  ;;  %v236_v6 = vld [vmem:[%s1358_s22 + $0x78] sm:$0xff] }
  0x13   : > { %291 = vst.msk [vmem:[#allocation2 + $0x120] sm:$0xff] %vm253_vm0, %v1245_v0  ;;  %292 = vst.msk [vmem:[#allocation2 + $0x128] sm:$0xff] %vm253_vm0, %v1245_v0  ;;  %v239_v7 = vld [vmem:[%s1358_s22 + $0x90] sm:$0xff]  ;;  %v240_v8 = vld [vmem:[%s1358_s22 + $0x98] sm:$0xff] }
  0x14   : > { %294 = vst.msk [vmem:[#allocation2 + $0x138] sm:$0xff] %vm253_vm0, %v1245_v0  ;;  %295 = vst.msk [vmem:[#allocation2 + $0x140] sm:$0xff] %vm253_vm0, %v1245_v0  ;;  %v221_v9 = vld [vmem:[%s1358_s22] sm:$0xff]  ;;  %v222_v10 = vld [vmem:[%s1358_s22 + $0x8] sm:$0xff] }
  0x15   : > { %297 = vst.msk [vmem:[#allocation2 + $0x150] sm:$0xff] %vm253_vm0, %v1245_v0  ;;  %298 = vst.msk [vmem:[#allocation2 + $0x158] sm:$0xff] %vm253_vm0, %v1245_v0  ;;  %v225_v11 = vld [vmem:[%s1358_s22 + $0x20] sm:$0xff]  ;;  %v226_v12 = vld [vmem:[%s1358_s22 + $0x28] sm:$0xff] }
  0x16   : > { %300 = vst.msk [vmem:[#allocation2 + $0x168] sm:$0xff] %vm253_vm0, %v1245_v0  ;;  %301 = vst.msk [vmem:[#allocation2 + $0x170] sm:$0xff] %vm253_vm0, %v1245_v0  ;;  %v237_v13 = vld [vmem:[%s1358_s22 + $0x80] sm:$0xff]  ;;  %v238_v14 = vld [vmem:[%s1358_s22 + $0x88] sm:$0xff] }
  0x17   : > { %303 = vst.msk [vmem:[#allocation2 + $0x180] sm:$0xff] %vm253_vm0, %v1245_v0  ;;  %304 = vst.msk [vmem:[#allocation2 + $0x188] sm:$0xff] %vm253_vm0, %v1245_v0  ;;  %v241_v15 = vld [vmem:[%s1358_s22 + $0xa0] sm:$0xff]  ;;  %v242_v16 = vld [vmem:[%s1358_s22 + $0xa8] sm:$0xff] }
  0x18   : > { %257 = vst.msk [vmem:[#allocation2 + $0x10] sm:$0x3] %vm256_vm1, %v1245_v0  ;;  %260 = vst.msk [vmem:[#allocation2 + $0x28] sm:$0x3] %vm256_vm1, %v1245_v0  ;;  %v227_v17 = vld [vmem:[%s1358_s22 + $0x30] sm:$0xff]  ;;  %v228_v18 = vld [vmem:[%s1358_s22 + $0x38] sm:$0xff] }
  0x19   : > { %263 = vst.msk [vmem:[#allocation2 + $0x40] sm:$0x3] %vm256_vm1, %v1245_v0  ;;  %266 = vst.msk [vmem:[#allocation2 + $0x58] sm:$0x3] %vm256_vm1, %v1245_v0  ;;  %v243_v19 = vld [vmem:[%s1358_s22 + $0xb0] sm:$0xff]  ;;  %v244_v20 = vld [vmem:[%s1358_s22 + $0xb8] sm:$0xff] }
  0x1a   : > { %269 = vst.msk [vmem:[#allocation2 + $0x70] sm:$0x3] %vm256_vm1, %v1245_v0  ;;  %272 = vst.msk [vmem:[#allocation2 + $0x88] sm:$0x3] %vm256_vm1, %v1245_v0  ;;  %v231_v21 = vld [vmem:[%s1358_s22 + $0x50] sm:$0xff]  ;;  %v232_v22 = vld [vmem:[%s1358_s22 + $0x58] sm:$0xff] }
  0x1b   : > { %275 = vst.msk [vmem:[#allocation2 + $0xa0] sm:$0x3] %vm256_vm1, %v1245_v0  ;;  %278 = vst.msk [vmem:[#allocation2 + $0xb8] sm:$0x3] %vm256_vm1, %v1245_v0  ;;  %v247_v23 = vld [vmem:[%s1358_s22 + $0xd0] sm:$0xff]  ;;  %v248_v24 = vld [vmem:[%s1358_s22 + $0xd8] sm:$0xff] }
  0x1c   : > { %281 = vst.msk [vmem:[#allocation2 + $0xd0] sm:$0x3] %vm256_vm1, %v1245_v0  ;;  %284 = vst.msk [vmem:[#allocation2 + $0xe8] sm:$0x3] %vm256_vm1, %v1245_v0  ;;  %v229_v27 = vld [vmem:[%s1358_s22 + $0x40] sm:$0xff]  ;;  %v230_v32 = vld [vmem:[%s1358_s22 + $0x48] sm:$0xff] }
  0x1d   : > { %287 = vst.msk [vmem:[#allocation2 + $0x100] sm:$0x3] %vm256_vm1, %v1245_v0  ;;  %290 = vst.msk [vmem:[#allocation2 + $0x118] sm:$0x3] %vm256_vm1, %v1245_v0  ;;  %v245_v34 = vld [vmem:[%s1358_s22 + $0xc0] sm:$0xff]  ;;  %v246_v35 = vld [vmem:[%s1358_s22 + $0xc8] sm:$0xff] }
  0x1e   : > { %293 = vst.msk [vmem:[#allocation2 + $0x130] sm:$0x3] %vm256_vm1, %v1245_v0  ;;  %296 = vst.msk [vmem:[#allocation2 + $0x148] sm:$0x3] %vm256_vm1, %v1245_v0  ;;  %v233_v37 = vld [vmem:[%s1358_s22 + $0x60] sm:$0xff]  ;;  %v234_v38 = vld [vmem:[%s1358_s22 + $0x68] sm:$0xff] }
  0x1f   : > { %299 = vst.msk [vmem:[#allocation2 + $0x160] sm:$0x3] %vm256_vm1, %v1245_v0  ;;  %302 = vst.msk [vmem:[#allocation2 + $0x178] sm:$0x3] %vm256_vm1, %v1245_v0  ;;  %v374_v5 = vld [vmem:[#allocation2 + $0x2] ss:$2 sm:$0xff] }
  0x20   : > { %305 = vst.msk [vmem:[#allocation2 + $0x190] sm:$0x3] %vm256_vm1, %v1245_v0  ;;  %524 = vrot.lane.b32.xlu0 %v374_v5, %s1247_s24  ;;  %v249_v39 = vld [vmem:[%s1358_s22 + $0xe0] sm:$0xff]  ;;  %v250_v40 = vld [vmem:[%s1358_s22 + $0xe8] sm:$0xff]  ;;  %v251_v45 = vld [vmem:[%s1358_s22 + $0xf0] sm:$0xff] }
  0x21   : > { %312 = vst.msk [vmem:[#allocation2 + $0x31] sm:$0xff] %vm253_vm0, %v223_v1  ;;  %313 = vst.msk [vmem:[#allocation2 + $0x39] sm:$0xff] %vm253_vm0, %v224_v2  ;;  %v252_v46 = vld [vmem:[%s1358_s22 + $0xf8] sm:$0xff] }
  0x22   : > { %324 = vst.msk [vmem:[#allocation2 + $0xc1] sm:$0xff] %vm253_vm0, %v235_v3  ;;  %325 = vst.msk [vmem:[#allocation2 + $0xc9] sm:$0xff] %vm253_vm0, %v236_v6  ;;  %v811_v6 = vld [vmem:[%s1642_s1] sm:$0xff] }
  0x23   : > { %328 = vst.msk [vmem:[#allocation2 + $0xf1] sm:$0xff] %vm253_vm0, %v239_v7  ;;  %329 = vst.msk [vmem:[#allocation2 + $0xf9] sm:$0xff] %vm253_vm0, %v240_v8  ;;  %v812_v7 = vld [vmem:[%s1642_s1 + $0x8] sm:$0xff] }
  0x24   : > { %310 = vst.msk [vmem:[#allocation2 + $0x19] sm:$0xff] %vm253_vm0, %v221_v9  ;;  %311 = vst.msk [vmem:[#allocation2 + $0x21] sm:$0xff] %vm253_vm0, %v222_v10  ;;  %v1174_v9 = vpack.c.bf16 %v812_v7, %v811_v6 }
  0x25   : > { %314 = vst.msk [vmem:[#allocation2 + $0x49] sm:$0xff] %vm253_vm0, %v225_v11  ;;  %315 = vst.msk [vmem:[#allocation2 + $0x51] sm:$0xff] %vm253_vm0, %v226_v12  ;;  %v813_v11 = vld [vmem:[%s1642_s1 + $0x10] sm:$0xff]  ;;  %v814_v12 = vld [vmem:[%s1642_s1 + $0x18] sm:$0xff] }
  0x26   : > { %326 = vst.msk [vmem:[#allocation2 + $0xd9] sm:$0xff] %vm253_vm0, %v237_v13  ;;  %327 = vst.msk [vmem:[#allocation2 + $0xe1] sm:$0xff] %vm253_vm0, %v238_v14  ;;  %1175 = vmatprep.subr.bf16.mxu0 %v1174_v9  ;;  %v1178_v14 = vpack.c.bf16 %v814_v12, %v813_v11  ;;  %1182 = vmatprep.subr.bf16.mxu1 %v1174_v9 }
  0x27   : > { %330 = vst.msk [vmem:[#allocation2 + $0x109] sm:$0xff] %vm253_vm0, %v241_v15  ;;  %331 = vst.msk [vmem:[#allocation2 + $0x111] sm:$0xff] %vm253_vm0, %v242_v16  ;;  %1177 = vmatpush3.bf16.msra.mxu0 %v1174_v9  ;;  %1185 = vmatpush3.bf16.msra.mxu1 %v1174_v9 }
  0x28   : > { %316 = vst.msk [vmem:[#allocation2 + $0x61] sm:$0xff] %vm253_vm0, %v227_v17  ;;  %317 = vst.msk [vmem:[#allocation2 + $0x69] sm:$0xff] %vm253_vm0, %v228_v18  ;;  %v360_v25 = vld [vmem:[#allocation2 + $0x31] ss:$2 sm:$0xff]  ;;  %v376_v29 = vld [vmem:[#allocation2 + $0x32] ss:$2 sm:$0xff]  ;;  %1179 = vmatprep.subr.bf16.mxu0 %v1178_v14  ;;  %1183 = vmatprep.subr.bf16.mxu1 %v1178_v14 }
  0x29   : > { %332 = vst.msk [vmem:[#allocation2 + $0x121] sm:$0xff] %vm253_vm0, %v243_v19  ;;  %333 = vst.msk [vmem:[#allocation2 + $0x129] sm:$0xff] %vm253_vm0, %v244_v20  ;;  %494 = vrot.lane.b32.xlu1 %v360_v25, %s1246_s23  ;;  %v366_v26 = vld [vmem:[#allocation2 + $0xc1] ss:$2 sm:$0xff]  ;;  %v382_v30 = vld [vmem:[#allocation2 + $0xc2] ss:$2 sm:$0xff] }
  0x2a   : > { %320 = vst.msk [vmem:[#allocation2 + $0x91] sm:$0xff] %vm253_vm0, %v231_v21  ;;  %321 = vst.msk [vmem:[#allocation2 + $0x99] sm:$0xff] %vm253_vm0, %v232_v22  ;;  %500 = vrot.lane.b32.xlu0 %v366_v26, %s1246_s23  ;;  %v368_v28 = vld [vmem:[#allocation2 + $0xf1] ss:$2 sm:$0xff]  ;;  %v384_v33 = vld [vmem:[#allocation2 + $0xf2] ss:$2 sm:$0xff] }
  0x2b   : > { %336 = vst.msk [vmem:[#allocation2 + $0x151] sm:$0xff] %vm253_vm0, %v247_v23  ;;  %337 = vst.msk [vmem:[#allocation2 + $0x159] sm:$0xff] %vm253_vm0, %v248_v24  ;;  %v389_v31 = vld [vmem:[#allocation2 + $0x18] ss:$2 sm:$0xff]  ;;  %v405_v42 = vld [vmem:[#allocation2 + $0x19] ss:$2 sm:$0xff]  ;;  %1181 = vmatpush3.bf16.msra.mxu0 %v1178_v14  ;;  %1186 = vmatpush3.bf16.msra.mxu1 %v1178_v14 }
  0x2c   : > { %318 = vst.msk [vmem:[#allocation2 + $0x79] sm:$0xff] %vm253_vm0, %v229_v27  ;;  %319 = vst.msk [vmem:[#allocation2 + $0x81] sm:$0xff] %vm253_vm0, %v230_v32  ;;  %v391_v36 = vld [vmem:[#allocation2 + $0x48] ss:$2 sm:$0xff]  ;;  %v407_v48 = vld [vmem:[#allocation2 + $0x49] ss:$2 sm:$0xff] }
  0x2d   : > { %502 = vrot.lane.b32.xlu1 %v368_v28, %s1246_s23  ;;  %334 = vst.msk [vmem:[#allocation2 + $0x139] sm:$0xff] %vm253_vm0, %v245_v34  ;;  %335 = vst.msk [vmem:[#allocation2 + $0x141] sm:$0xff] %vm253_vm0, %v246_v35  ;;  %v397_v41 = vld [vmem:[#allocation2 + $0xd8] ss:$2 sm:$0xff]  ;;  %v413_v47 = vld [vmem:[#allocation2 + $0xd9] ss:$2 sm:$0xff] }
  0x2e   : > { %526 = vrot.lane.b32.xlu0 %v376_v29, %s1247_s24  ;;  %322 = vst.msk [vmem:[#allocation2 + $0xa9] sm:$0xff] %vm253_vm0, %v233_v37  ;;  %323 = vst.msk [vmem:[#allocation2 + $0xb1] sm:$0xff] %vm253_vm0, %v234_v38  ;;  %v399_v43 = vld [vmem:[#allocation2 + $0x108] ss:$2 sm:$0xff]  ;;  %v415_v51 = vld [vmem:[#allocation2 + $0x109] ss:$2 sm:$0xff] }
  0x2f   : > { %338 = vst.msk [vmem:[#allocation2 + $0x169] sm:$0xff] %vm253_vm0, %v249_v39  ;;  %339 = vst.msk [vmem:[#allocation2 + $0x171] sm:$0xff] %vm253_vm0, %v250_v40  ;;  %v362_v44 = vld [vmem:[#allocation2 + $0x61] ss:$2 sm:$0xff]  ;;  %v421_v50 = vld [vmem:[#allocation2 + $0x1a] ss:$2 sm:$0xff] }
  0x30   : > { %340 = vst.msk [vmem:[#allocation2 + $0x181] sm:$0xff] %vm253_vm0, %v251_v45  ;;  %341 = vst.msk [vmem:[#allocation2 + $0x189] sm:$0xff] %vm253_vm0, %v252_v46  ;;  %v370_v49 = vld [vmem:[#allocation2 + $0x121] ss:$2 sm:$0xff]  ;;  %v429_v53 = vld [vmem:[#allocation2 + $0xda] ss:$2 sm:$0xff] }
  0x31   : > { %532 = vrot.lane.b32.xlu1 %v382_v30, %s1247_s24  ;;  %v364_v52 = vld [vmem:[#allocation2 + $0x91] ss:$2 sm:$0xff]  ;;  %v378_v54 = vld [vmem:[#allocation2 + $0x62] ss:$2 sm:$0xff]  ;;  %v380_v60 = vld [vmem:[#allocation2 + $0x92] ss:$2 sm:$0xff] }
  0x32   : > { %556 = vrot.lane.b32.xlu0 %v389_v31, %s1248_s25  ;;  %v372_v55 = vld [vmem:[#allocation2 + $0x151] ss:$2 sm:$0xff]  ;;  %v423_v56 = vld [vmem:[#allocation2 + $0x4a] ss:$2 sm:$0xff]  ;;  %v455_v13 = vld [vmem:[#allocation2 + $0x61] ss:$2 sm:$0xff] }
  0x33   : > { %v386_v57 = vld [vmem:[#allocation2 + $0x122] ss:$2 sm:$0xff]  ;;  %v388_v63 = vld [vmem:[#allocation2 + $0x152] ss:$2 sm:$0xff]  ;;  %v453_v2 = vld [vmem:[#allocation2 + $0x31] ss:$2 sm:$0xff] }
  0x34   : > { %v437_v58 = vld [vmem:[#allocation2 + $0x30] ss:$2 sm:$0xff]  ;;  %v439_v0 = vld [vmem:[#allocation2 + $0x60] ss:$2 sm:$0xff]  ;;  %v461_v5 = vld [vmem:[#allocation2 + $0xf1] ss:$2 sm:$0xff] }
  0x35   : > { %534 = vrot.lane.b32.xlu1 %v384_v33, %s1247_s24  ;;  %v431_v59 = vld [vmem:[#allocation2 + $0x10a] ss:$2 sm:$0xff]  ;;  %v409_v8 = vld [vmem:[#allocation2 + $0x79] ss:$2 sm:$0xff]  ;;  %v411_v19 = vld [vmem:[#allocation2 + $0xa9] ss:$2 sm:$0xff] }
  0x36   : > { %558 = vrot.lane.b32.xlu0 %v391_v36, %s1248_s25  ;;  %v445_v61 = vld [vmem:[#allocation2 + $0xf0] ss:$2 sm:$0xff]  ;;  %v447_v3 = vld [vmem:[#allocation2 + $0x120] ss:$2 sm:$0xff]  ;;  %v417_v15 = vld [vmem:[#allocation2 + $0x139] ss:$2 sm:$0xff] }
  0x37   : > { %v393_v62 = vld [vmem:[#allocation2 + $0x78] ss:$2 sm:$0xff]  ;;  %v395_v4 = vld [vmem:[#allocation2 + $0xa8] ss:$2 sm:$0xff]  ;;  %v463_v18 = vld [vmem:[#allocation2 + $0x121] ss:$2 sm:$0xff] }
  0x38   : > { %v401_v1 = vld [vmem:[#allocation2 + $0x138] ss:$2 sm:$0xff]  ;;  %v403_v10 = vld [vmem:[#allocation2 + $0x168] ss:$2 sm:$0xff]  ;;  %v419_v22 = vld [vmem:[#allocation2 + $0x169] ss:$2 sm:$0xff] }
  0x39   : > { %564 = vrot.lane.b32.xlu1 %v397_v41, %s1248_s25  ;;  %v469_v16 = vld [vmem:[#allocation2 + $0x32] ss:$2 sm:$0xff]  ;;  %v471_v23 = vld [vmem:[#allocation2 + $0x62] ss:$2 sm:$0xff]  ;;  %v457_v31 = vld [vmem:[#allocation2 + $0x91] ss:$2 sm:$0xff] }
  0x3a   : > { %588 = vrot.lane.b32.xlu0 %v405_v42, %s1249_s26  ;;  %v815_v17 = vld [vmem:[%s1642_s1 + $0x20] sm:$0xf]  ;;  %v427_v25 = vld [vmem:[#allocation2 + $0xaa] ss:$2 sm:$0xff]  ;;  %v465_v37 = vld [vmem:[#allocation2 + $0x151] ss:$2 sm:$0xff] }
  0x3b   : > { %1160 = vmatprep.subr.msk.mxu0 %vm841_vm2, %v815_v17  ;;  %1184 = vmatprep.subr.msk.mxu1 %vm841_vm2, %v815_v17  ;;  %v477_v20 = vld [vmem:[#allocation2 + $0xf2] ss:$2 sm:$0xff]  ;;  %v479_v26 = vld [vmem:[#allocation2 + $0x122] ss:$2 sm:$0xff]  ;;  %v459_v34 = vld [vmem:[#allocation2 + $0xc1] ss:$2 sm:$0xff] }
  0x3c   : > { %1161 = vmatpush3.msk.msra.mxu0 %vm841_vm2, %v815_v17  ;;  %1187 = vmatpush3.msk.msra.mxu1 %vm841_vm2, %v815_v17  ;;  %v425_v21 = vld [vmem:[#allocation2 + $0x7a] ss:$2 sm:$0xff]  ;;  %v435_v28 = vld [vmem:[#allocation2 + $0x16a] ss:$2 sm:$0xff]  ;;  %v467_v41 = vld [vmem:[#allocation2 + $0x181] ss:$2 sm:$0xff] }
  0x3d   : > { %566 = vrot.lane.b32.xlu1 %v399_v43, %s1248_s25  ;;  %v433_v24 = vld [vmem:[#allocation2 + $0x13a] ss:$2 sm:$0xff] }
  0x3e   : > { %496 = vrot.lane.b32.xlu0 %v362_v44, %s1246_s23  ;;  %v441_v27 = vld [vmem:[#allocation2 + $0x90] ss:$2 sm:$0xff]  ;;  %v443_v29 = vld [vmem:[#allocation2 + $0xc0] ss:$2 sm:$0xff] }
  0x3f   : > { %v449_v30 = vld [vmem:[#allocation2 + $0x150] ss:$2 sm:$0xff]  ;;  %v451_v32 = vld [vmem:[#allocation2 + $0x180] ss:$2 sm:$0xff] }
  0x40   : > { %v342_v33 = vld [vmem:[#allocation2] ss:$2 sm:$0xff]  ;;  %v344_v45 = vld [vmem:[#allocation2 + $0x30] ss:$2 sm:$0xff] }
  0x41   : > { %596 = vrot.lane.b32.xlu1 %v413_v47, %s1249_s26  ;;  %v473_v38 = vld [vmem:[#allocation2 + $0x92] ss:$2 sm:$0xff]  ;;  %v475_v43 = vld [vmem:[#allocation2 + $0xc2] ss:$2 sm:$0xff] }
  0x42   : > { %590 = vrot.lane.b32.xlu0 %v407_v48, %s1249_s26  ;;  %v350_v46 = vld [vmem:[#allocation2 + $0xc0] ss:$2 sm:$0xff] }
  0x43   : > { %v481_v47 = vld [vmem:[#allocation2 + $0x152] ss:$2 sm:$0xff] }
  0x45   : > { %504 = vrot.lane.b32.xlu1 %v370_v49, %s1246_s23 }
  0x46   : > { %620 = vrot.lane.b32.xlu0 %v421_v50, %s1250_s27 }
  0x49   : > { %598 = vrot.lane.b32.xlu1 %v415_v51, %s1249_s26 }
  0x4a   : > { %498 = vrot.lane.b32.xlu0 %v364_v52, %s1246_s23 }
  0x4d   : > { %628 = vrot.lane.b32.xlu1 %v429_v53, %s1250_s27  ;;  %v483_v53 = vld [vmem:[#allocation2 + $0x182] ss:$2 sm:$0xff] }
  0x4e   : > { %528 = vrot.lane.b32.xlu0 %v378_v54, %s1247_s24 }
  0x51   : > { %506 = vrot.lane.b32.xlu1 %v372_v55, %s1246_s23  ;;  %v352_v55 = vld [vmem:[#allocation2 + $0xf0] ss:$2 sm:$0xff] }
  0x52   : > { %622 = vrot.lane.b32.xlu0 %v423_v56, %s1250_s27 }
  0x55   : > { %536 = vrot.lane.b32.xlu1 %v386_v57, %s1247_s24 }
  0x56   : > { %652 = vrot.lane.b32.xlu0 %v437_v58, %s1251_s28 }
  0x59   : > { %630 = vrot.lane.b32.xlu1 %v431_v59, %s1250_s27 }
  0x5a   : > { %530 = vrot.lane.b32.xlu0 %v380_v60, %s1247_s24 }
  0x5d   : > { %660 = vrot.lane.b32.xlu1 %v445_v61, %s1251_s28 }
  0x5e   : > { %560 = vrot.lane.b32.xlu0 %v393_v62, %s1248_s25 }
  0x61   : > { %538 = vrot.lane.b32.xlu1 %v388_v63, %s1247_s24 }
  0x62   : > { %654 = vrot.lane.b32.xlu0 %v439_v0, %s1251_s28 }
  0x65   : > { %568 = vrot.lane.b32.xlu1 %v401_v1, %s1248_s25 }
  0x66   : > { %684 = vrot.lane.b32.xlu0 %v453_v2, %s1252_s29 }
  0x69   : > { %662 = vrot.lane.b32.xlu1 %v447_v3, %s1251_s28 }
  0x6a   : > { %562 = vrot.lane.b32.xlu0 %v395_v4, %s1248_s25 }
  0x6d   : > { %692 = vrot.lane.b32.xlu1 %v461_v5, %s1252_s29 }
  0x6e   : > { %592 = vrot.lane.b32.xlu0 %v409_v8, %s1249_s26 }
  0x71   : > { %570 = vrot.lane.b32.xlu1 %v403_v10, %s1248_s25  ;;  %v346_v10 = vld [vmem:[#allocation2 + $0x60] ss:$2 sm:$0xff] }
  0x72   : > { %686 = vrot.lane.b32.xlu0 %v455_v13, %s1252_s29 }
  0x75   : > { %600 = vrot.lane.b32.xlu1 %v417_v15, %s1249_s26 }
  0x76   : > { %716 = vrot.lane.b32.xlu0 %v469_v16, %s1253_s14  ;;  %v354_v16 = vld [vmem:[#allocation2 + $0x120] ss:$2 sm:$0xff] }
  0x79   : > { %694 = vrot.lane.b32.xlu1 %v463_v18, %s1252_s29 }
  0x7a   : > { %594 = vrot.lane.b32.xlu0 %v411_v19, %s1249_s26 }
  0x7d   : > { %724 = vrot.lane.b32.xlu1 %v477_v20, %s1253_s14 }
  0x7e   : > { %624 = vrot.lane.b32.xlu0 %v425_v21, %s1250_s27 }
  0x81   : > { %602 = vrot.lane.b32.xlu1 %v419_v22, %s1249_s26  ;;  %v493_v35 = vpop.permute.xlu0 %492  ;;  %s219_s26 = scalar_lea.vmem %s1645_s4, %s1138_s21 }
  0x82   : > { %718 = vrot.lane.b32.xlu0 %v471_v23, %s1253_s14  ;;  %v740_v36 = vsel %vm253_vm0, %v342_v33, %v493_v35 }
  0x85   : > { %632 = vrot.lane.b32.xlu1 %v433_v24, %s1250_s27 }
  0x86   : > { %626 = vrot.lane.b32.xlu0 %v427_v25, %s1250_s27 }
  0x89   : > { %726 = vrot.lane.b32.xlu1 %v479_v26, %s1253_s14 }
  0x8a   : > { %656 = vrot.lane.b32.xlu0 %v441_v27, %s1251_s28 }
  0x8d   : > { %634 = vrot.lane.b32.xlu1 %v435_v28, %s1250_s27 }
  0x8e   : > { %658 = vrot.lane.b32.xlu0 %v443_v29, %s1251_s28 }
  0x91   : > { %664 = vrot.lane.b32.xlu1 %v449_v30, %s1251_s28 }
  0x92   : > { %688 = vrot.lane.b32.xlu0 %v457_v31, %s1252_s29  ;;  %v525_v39 = vpop.permute.xlu0 %524 }
  0x93   : > { %v1499_v40 = vsel %vm748_vm3, %v740_v36, %v525_v39 }
  0x95   : > { %666 = vrot.lane.b32.xlu1 %v451_v32, %s1251_s28 }
  0x96   : > { %690 = vrot.lane.b32.xlu0 %v459_v34, %s1252_s29 }
  0x99   : > { %696 = vrot.lane.b32.xlu1 %v465_v37, %s1252_s29 }
  0x9a   : > { %720 = vrot.lane.b32.xlu0 %v473_v38, %s1253_s14 }
  0x9b   : > { %v495_v42 = vpop.permute.xlu1 %494 }
  0x9c   : > { %v501_v44 = vpop.permute.xlu0 %500  ;;  %v741_v49 = vsel %vm253_vm0, %v344_v45, %v495_v42 }
  0x9d   : > { %698 = vrot.lane.b32.xlu1 %v467_v41, %s1252_s29  ;;  %v744_v51 = vsel %vm253_vm0, %v350_v46, %v501_v44 }
  0x9e   : > { %722 = vrot.lane.b32.xlu0 %v475_v43, %s1253_s14 }
  0x9f   : > { %v503_v48 = vpop.permute.xlu1 %502 }
  0xa0   : > { %v527_v50 = vpop.permute.xlu0 %526  ;;  %v745_v58 = vsel %vm253_vm0, %v352_v55, %v503_v48 }
  0xa1   : > { %v750_v52 = vsel %vm748_vm3, %v741_v49, %v527_v50  ;;  %728 = vrot.lane.b32.xlu1 %v481_v47, %s1253_s14 }
  0xa3   : > { %v533_v54 = vpop.permute.xlu1 %532 }
  0xa4   : > { %v753_v56 = vsel %vm748_vm3, %v744_v51, %v533_v54  ;;  %v557_v57 = vpop.permute.xlu0 %556 }
  0xa5   : > { %730 = vrot.lane.b32.xlu1 %v483_v53, %s1253_s14  ;;  %v758_v35 = vsel %vm757_vm4, %v1499_v40, %v557_v57 }
  0xa7   : > { %v535_v59 = vpop.permute.xlu1 %534 }
  0xa8   : > { %v754_v60 = vsel %vm748_vm3, %v745_v58, %v535_v59  ;;  %v559_v61 = vpop.permute.xlu0 %558 }
  0xa9   : > { %v1514_v62 = vsel %vm757_vm4, %v750_v52, %v559_v61 }
  0xab   : > { %v565_v63 = vpop.permute.xlu1 %564 }
  0xac   : > { %v589_v0 = vpop.permute.xlu0 %588  ;;  %v762_v40 = vsel %vm757_vm4, %v753_v56, %v565_v63 }
  0xad   : > { %v767_v37 = vsel %vm766_vm5, %v758_v35, %v589_v0 }
  0xaf   : > { %v567_v1 = vpop.permute.xlu1 %566 }
  0xb0   : > { %v1517_v2 = vsel %vm757_vm4, %v754_v60, %v567_v1  ;;  %v497_v3 = vpop.permute.xlu0 %496 }
  0xb1   : > { %v742_v12 = vsel %vm253_vm0, %v346_v10, %v497_v3 }
  0xb3   : > { %v597_v4 = vpop.permute.xlu1 %596 }
  0xb4   : > { %v591_v5 = vpop.permute.xlu0 %590  ;;  %v771_v46 = vsel %vm766_vm5, %v762_v40, %v597_v4 }
  0xb5   : > { %v768_v54 = vsel %vm766_vm5, %v1514_v62, %v591_v5 }
  0xb7   : > { %v505_v6 = vpop.permute.xlu1 %504 }
  0xb8   : > { %v621_v7 = vpop.permute.xlu0 %620  ;;  %v746_v18 = vsel %vm253_vm0, %v354_v16, %v505_v6 }
  0xb9   : > { %v776_v38 = vsel %vm775_vm6, %v767_v37, %v621_v7 }
  0xbb   : > { %v1519_v8 = vpop.permute.xlu1 %598 }
  0xbc   : > { %v1521_v9 = vpop.permute.xlu0 %498  ;;  %v772_v63 = vsel %vm766_vm5, %v1517_v2, %v1519_v8 }
  0xbf   : > { %v629_v11 = vpop.permute.xlu1 %628 }
  0xc0   : > { %v529_v13 = vpop.permute.xlu0 %528  ;;  %v780_v48 = vsel %vm775_vm6, %v771_v46, %v629_v11 }
  0xc1   : > { %v1525_v14 = vsel %vm748_vm3, %v742_v12, %v529_v13  ;;  %v348_v13 = vld [vmem:[#allocation2 + $0x90] ss:$2 sm:$0xff] }
  0xc3   : > { %v1527_v15 = vpop.permute.xlu1 %506 }
  0xc4   : > { %v623_v17 = vpop.permute.xlu0 %622 }
  0xc5   : > { %v777_v55 = vsel %vm775_vm6, %v768_v54, %v623_v17 }
  0xc7   : > { %v537_v19 = vpop.permute.xlu1 %536 }
  0xc8   : > { %v1531_v20 = vsel %vm748_vm3, %v746_v18, %v537_v19  ;;  %v653_v21 = vpop.permute.xlu0 %652  ;;  %v743_v18 = vsel %vm253_vm0, %v348_v13, %v1521_v9 }
  0xc9   : > { %v785_v39 = vsel %vm784_vm7, %v776_v38, %v653_v21 }
  0xcb   : > { %v631_v22 = vpop.permute.xlu1 %630 }
  0xcc   : > { %v1533_v23 = vpop.permute.xlu0 %530  ;;  %v781_v0 = vsel %vm775_vm6, %v772_v63, %v631_v22 }
  0xcd   : > { %v752_v21 = vsel %vm748_vm3, %v743_v18, %v1533_v23 }
  0xcf   : > { %v661_v24 = vpop.permute.xlu1 %660 }
  0xd0   : > { %v561_v25 = vpop.permute.xlu0 %560  ;;  %v789_v49 = vsel %vm784_vm7, %v780_v48, %v661_v24 }
  0xd1   : > { %v760_v2 = vsel %vm757_vm4, %v1525_v14, %v561_v25 }
  0xd3   : > { %v1535_v26 = vpop.permute.xlu1 %538 }
  0xd4   : > { %v655_v27 = vpop.permute.xlu0 %654 }
  0xd5   : > { %v786_v56 = vsel %vm784_vm7, %v777_v55, %v655_v27 }
  0xd7   : > { %v1537_v28 = vpop.permute.xlu1 %568 }
  0xd8   : > { %v685_v29 = vpop.permute.xlu0 %684  ;;  %v764_v23 = vsel %vm757_vm4, %v1531_v20, %v1537_v28 }
  0xd9   : > { %v794_v42 = vsel %vm793_vm8, %v785_v39, %v685_v29 }
  0xdb   : > { %v663_v30 = vpop.permute.xlu1 %662 }
  0xdc   : > { %v1539_v31 = vpop.permute.xlu0 %562  ;;  %v790_v1 = vsel %vm784_vm7, %v781_v0, %v663_v30 }
  0xdd   : > { %v761_v27 = vsel %vm757_vm4, %v752_v21, %v1539_v31 }
  0xdf   : > { %v693_v32 = vpop.permute.xlu1 %692 }
  0xe0   : > { %v593_v33 = vpop.permute.xlu0 %592  ;;  %v798_v50 = vsel %vm793_vm8, %v789_v49, %v693_v32  ;;  %v356_v32 = vld [vmem:[#allocation2 + $0x150] ss:$2 sm:$0xff] }
  0xe1   : > { %v769_v17 = vsel %vm766_vm5, %v760_v2, %v593_v33  ;;  %v747_v38 = vsel %vm253_vm0, %v356_v32, %v1527_v15 }
  0xe3   : > { %v1541_v34 = vpop.permute.xlu1 %570 }
  0xe4   : > { %v687_v36 = vpop.permute.xlu0 %686 }
  0xe5   : > { %v795_v58 = vsel %vm793_vm8, %v786_v56, %v687_v36 }
  0xe7   : > { %v601_v41 = vpop.permute.xlu1 %600 }
  0xe8   : > { %v717_v43 = vpop.permute.xlu0 %716  ;;  %v773_v31 = vsel %vm766_vm5, %v764_v23, %v601_v41 }
  0xe9   : > { %v803_v44 = vsel %vm802_vm9, %v794_v42, %v717_v43  ;;  %v756_v43 = vsel %vm748_vm3, %v747_v38, %v1535_v26 }
  0xea   : > { %1162 = vmatprep.mubr.msk.f32.mxu0 %vm816_vm10, %v803_v44  ;;  %v765_v28 = vsel %vm757_vm4, %v756_v43, %v1541_v34  ;;  %v1133_v34 = vld [vmem:[%s1643_s2] ss:$0 sm:$0xff] }
  0xeb   : > { %v695_v45 = vpop.permute.xlu1 %694 }
  0xec   : > { %v595_v47 = vpop.permute.xlu0 %594  ;;  %v799_v3 = vsel %vm793_vm8, %v790_v1, %v695_v45 }
  0xed   : > { %v770_v25 = vsel %vm766_vm5, %v761_v27, %v595_v47 }
  0xef   : > { %v725_v51 = vpop.permute.xlu1 %724 }
  0xf0   : > { %v807_v52 = vsel %vm802_vm9, %v798_v50, %v725_v51  ;;  %v625_v53 = vpop.permute.xlu0 %624  ;;  %v1134_v50 = vld [vmem:[%s1644_s3] ss:$0 sm:$0xff] }
  0xf1   : > { %1168 = vmatprep.mubr.msk.f32.mxu1 %vm816_vm10, %v807_v52  ;;  %v778_v19 = vsel %vm775_vm6, %v769_v17, %v625_v53 }
  0xf3   : > { %v603_v57 = vpop.permute.xlu1 %602 }
  0xf4   : > { %v719_v59 = vpop.permute.xlu0 %718  ;;  %v774_v15 = vsel %vm766_vm5, %v765_v28, %v603_v57 }
  0xf5   : > { %v804_v60 = vsel %vm802_vm9, %v795_v58, %v719_v59 }
  0xf6   : > { %1163 = vmatmul.mubr.msk.f32.vlgmr.msra.gmra.mrb[0].mxu0 %vm816_vm10, %v804_v60 }
  0xf7   : > { %v633_v61 = vpop.permute.xlu1 %632 }
  0xf8   : > { %v627_v62 = vpop.permute.xlu0 %626  ;;  %v782_v39 = vsel %vm775_vm6, %v773_v31, %v633_v61 }
  0xf9   : > { %v779_v9 = vsel %vm775_vm6, %v770_v25, %v627_v62 }
  0xfb   : > { %v727_v4 = vpop.permute.xlu1 %726 }
  0xfc   : > { %v808_v5 = vsel %vm802_vm9, %v799_v3, %v727_v4  ;;  %v657_v6 = vpop.permute.xlu0 %656 }
  0xfd   : > { %1169 = vmatmul.mubr.msk.f32.vlgmr.msra.gmra.mrb[0].mxu1 %vm816_vm10, %v808_v5  ;;  %v787_v22 = vsel %vm784_vm7, %v778_v19, %v657_v6 }
  0xff   : > { %v635_v7 = vpop.permute.xlu1 %634 }
 0x100   : > { %v659_v10 = vpop.permute.xlu0 %658  ;;  %v783_v45 = vsel %vm775_vm6, %v774_v15, %v635_v7 }
 0x101   : > { %v788_v33 = vsel %vm784_vm7, %v779_v9, %v659_v10 }
 0x103   : > { %v665_v11 = vpop.permute.xlu1 %664 }
 0x104   : > { %v689_v12 = vpop.permute.xlu0 %688  ;;  %v791_v20 = vsel %vm784_vm7, %v782_v39, %v665_v11 }
 0x105   : > { %v796_v29 = vsel %vm793_vm8, %v787_v22, %v689_v12 }
 0x107   : > { %v667_v16 = vpop.permute.xlu1 %666 }
 0x108   : > { %v691_v8 = vpop.permute.xlu0 %690  ;;  %v792_v26 = vsel %vm784_vm7, %v783_v45, %v667_v16 }
 0x109   : > { %v797_v36 = vsel %vm793_vm8, %v788_v33, %v691_v8 }
 0x10b   : > { %v697_v24 = vpop.permute.xlu1 %696 }
 0x10c   : > { %v721_v14 = vpop.permute.xlu0 %720  ;;  %v800_v41 = vsel %vm793_vm8, %v791_v20, %v697_v24 }
 0x10d   : > { %v805_v30 = vsel %vm802_vm9, %v796_v29, %v721_v14 }
 0x10e   : > { %1165 = vmatprep.mubr.msk.f32.mxu0 %vm816_vm10, %v805_v30 }
 0x10f   : > { %v699_v35 = vpop.permute.xlu1 %698 }
 0x110   : > { %v723_v37 = vpop.permute.xlu0 %722  ;;  %v801_v46 = vsel %vm793_vm8, %v792_v26, %v699_v35 }
 0x111   : > { %v806_v42 = vsel %vm802_vm9, %v797_v36, %v723_v37 }
 0x112   : > { %1166 = vmatmul.mubr.msk.f32.gmra.mrb[2].mxu0 %vm816_vm10, %v806_v42 }
 0x113   : > { %v729_v44 = vpop.permute.xlu1 %728 }
 0x114   : > { %v809_v40 = vsel %vm802_vm9, %v800_v41, %v729_v44 }
 0x115   : > { %1171 = vmatprep.mubr.msk.f32.mxu1 %vm816_vm10, %v809_v40 }
 0x117   : > { %v731_v47 = vpop.permute.xlu1 %730 }
 0x118   : > { %v810_v48 = vsel %vm802_vm9, %v801_v46, %v731_v47 }
 0x119   : > { %1172 = vmatmul.mubr.msk.f32.gmra.mrb[2].mxu1 %vm816_vm10, %v810_v48 }
 0x1c9   : > { %v1164_v49 = vpop.f32.mrb[0].mxu0 }
 0x1ca   : > { %v958_v51 = vmul.f32 %v1164_v49, %v1133_v34  ;;  %v911_v52 = vpop.f32.mrb[1].mxu0 }
 0x1cb   : > { %v957_v53 = vmul.f32 %v1133_v34, %v911_v52 }
 0x1cc   : > { %v973_v54 = vadd.f32 %v1134_v50, %v958_v51 }
 0x1cd   : > { %v972_v55 = vadd.f32 %v1134_v50, %v957_v53 }
 0x1ce   : > { %981 = vst.msk [vmem:[%s219_s26 + $0x8] sm:$0xff] %vm253_vm0, %v973_v54 }
 0x1cf   : > { %980 = vst.msk [vmem:[%s219_s26] sm:$0xff] %vm253_vm0, %v972_v55 }
 0x1d0   : > { %v1170_v56 = vpop.f32.mrb[0].mxu1 }
 0x1d1   : > { %v962_v57 = vmul.f32 %v1170_v56, %v1133_v34  ;;  %v931_v58 = vpop.f32.mrb[1].mxu1 }
 0x1d2   : > { %v961_v59 = vmul.f32 %v1133_v34, %v931_v58 }
 0x1d3   : > { %v977_v60 = vadd.f32 %v1134_v50, %v962_v57 }
 0x1d4   : > { %v976_v61 = vadd.f32 %v1134_v50, %v961_v59 }
 0x1d5   : > { %985 = vst.msk [vmem:[%s219_s26 + $0x28] sm:$0xff] %vm253_vm0, %v977_v60 }
 0x1d6   : > { %984 = vst.msk [vmem:[%s219_s26 + $0x20] sm:$0xff] %vm253_vm0, %v976_v61 }
 0x1e5   : > { %v1167_v63 = vpop.f32.mrb[2].mxu0 }
 0x1e6   : > { %v960_v62 = vmul.f32 %v1167_v63, %v1133_v34  ;;  %v921_v0 = vpop.f32.mrb[3].mxu0 }
 0x1e7   : > { %v959_v1 = vmul.f32 %v1133_v34, %v921_v0 }
 0x1e8   : > { %v975_v3 = vadd.f32 %v1134_v50, %v960_v62 }
 0x1e9   : > { %v974_v4 = vadd.f32 %v1134_v50, %v959_v1 }
 0x1ea   : > { %983 = vst.msk [vmem:[%s219_s26 + $0x18] sm:$0xff] %vm253_vm0, %v975_v3 }
 0x1eb   : > { %982 = vst.msk [vmem:[%s219_s26 + $0x10] sm:$0xff] %vm253_vm0, %v974_v4 }
 0x1ec   : > { %v1173_v5 = vpop.f32.mrb[2].mxu1 }
 0x1ed   : > { %v964_v6 = vmul.f32 %v1173_v5, %v1133_v34  ;;  %v941_v7 = vpop.f32.mrb[3].mxu1 }
 0x1ee   : > { %v963_v10 = vmul.f32 %v1133_v34, %v941_v7 }
 0x1ef   : > { %v979_v11 = vadd.f32 %v1134_v50, %v964_v6 }
 0x1f0   : > { %v978_v12 = vadd.f32 %v1134_v50, %v963_v10 }
 0x1f1   : > { %987 = vst.msk [vmem:[%s219_s26 + $0x38] sm:$0xff] %vm253_vm0, %v979_v11 }
 0x1f2   : > { %986 = vst.msk [vmem:[%s219_s26 + $0x30] sm:$0xff] %vm253_vm0, %v978_v12 }
 0x1f3 PF: > { %s14_s17 = sadd.s32 1, %s1243_s17   ;;  %s1646_s15 = smov %s1239_s16 }
 0x1f4   : > { %p11_p5 = scmp.ge.s32.totalorder %s14_s17, 4   ;;  %s1647_s16 = smov %s1649_s18 }
 0x1f6   :  { %13 = sbr.rel (!%p11_p5) target bundleno = 2 (0x2), region = 137 }

// kernel: usrm3_forward.11
= control target key start
LH: loop header
LB: loop body
LE: loop exit
PB: predicated region body
PF: predicated region fallthrough
CT: control target
= control target key end

     0   :  { %s859_s18 = smov 0   ;;  %s861_s19 = smov 0   ;;  %s963_s0 = inlined_call_operand.vmem [shape: f32[2,4,4,4], index: 0, kind: input, shape index: {}]   ;;  %s964_s1 = inlined_call_operand.vmem [shape: f32[2,4,4,4], index: 1, kind: input, shape index: {}]   ;;  %s965_s2 = inlined_call_operand.vmem [shape: f32[36,4], index: 2, kind: input, shape index: {}]   ;;  %s966_s3 = inlined_call_operand.vmem [shape: f32[1,4], index: 3, kind: input, shape index: {}]   ;;  %s967_s4 = inlined_call_operand.vmem [shape: f32[1,4], index: 4, kind: input, shape index: {}]   ;;  %s968_s5 = inlined_call_operand.vmem [shape: f32[2,4,4,4], index: 5, kind: output, shape index: {}]  }
   0x1   :  { %s863_s20 = smov 0  }
   0x2 LB: > { %s27_s21 = sadd.s32 1, %s814_s19  ;;  %p718_p0 = scmp.ge.s32.totalorder %s818_s20, 1  ;;  %s818_s20 = sphi %s863_s20, %s15_s20   ;;  %s814_s19 = sphi %s861_s19, %s970_s19   ;;  %s810_s18 = sphi %s859_s18, %s969_s18  }
   0x3   : > { %p29_p1 = scmp.ge.s32.totalorder %s27_s21, 2  ;;  %p211_p2 = scmp.lt.s32.totalorder %s818_s20, 3 }
   0x5   : > { %s972_s21 = smov (%p29_p1, %s27_s21), 0  ;;  %p212_p3 = pnand %p718_p0, %p211_p2 }
   0x6   : > { %vm280_vm0 = vcmask (!%p212_p3), 29696   ;;  %v820_v0 = vmov (!%p212_p3), 0.0   ;;  %p248_p4 = scmp.lt.s32.totalorder (!%p212_p3), %s810_s18, 1  ;;  %vm288_vm1 = vcmask (!%p212_p3), 27648   ;;  %s821_s29 = smov (!%p212_p3), 4   ;;  %v498_v37 = vld [vmem:[%s965_s2] sm:$0xff] (!%p212_p3) }
   0x7   : > { %215 = sbr.rel (%p212_p3) target bundleno = 427 (0x1ab), region = 40  ;;  %281 = vst.msk [vmem:[#allocation2] sm:$0x3f] (!%p212_p3), %vm280_vm0, %v820_v0  ;;  %282 = vst.msk [vmem:[#allocation2 + $0x8] sm:$0x3f] (!%p212_p3), %vm280_vm0, %v820_v0  ;;  %s822_s30 = smov (!%p212_p3), 8  }
   0x8   : > { %283 = vst.msk [vmem:[#allocation2 + $0x10] sm:$0x3f] (!%p212_p3), %vm280_vm0, %v820_v0  ;;  %284 = vst.msk [vmem:[#allocation2 + $0x18] sm:$0x3f] (!%p212_p3), %vm280_vm0, %v820_v0  ;;  %s823_s6 = smov (!%p212_p3), 12   ;;  %s824_s7 = smov (!%p212_p3), 16  }
   0x9   : > { %285 = vst.msk [vmem:[#allocation2 + $0x20] sm:$0x3f] (!%p212_p3), %vm280_vm0, %v820_v0  ;;  %286 = vst.msk [vmem:[#allocation2 + $0x28] sm:$0x3f] (!%p212_p3), %vm280_vm0, %v820_v0  ;;  %s825_s8 = smov (!%p212_p3), 20   ;;  %s826_s9 = smov (!%p212_p3), 24  }
   0xa   : > { %v499_v38 = vld [vmem:[%s965_s2 + $0x8] sm:$0xff] (!%p212_p3)  ;;  %s827_s14 = smov (!%p212_p3), 28   ;;  %v500_v42 = vld [vmem:[%s965_s2 + $0x10] sm:$0xff] (!%p212_p3)  ;;  %v501_v43 = vld [vmem:[%s965_s2 + $0x18] sm:$0xff] (!%p212_p3)  ;;  %vm514_vm2 = vcmask (!%p212_p3), 1043456   ;;  %vm458_vm3 = vcmask (!%p212_p3), 31744  }
   0xb   : > { %v755_v39 = vpack.c.bf16 (!%p212_p3), %v499_v38, %v498_v37  ;;  %v759_v44 = vpack.c.bf16 (!%p212_p3), %v501_v43, %v500_v42  ;;  %v502_v47 = vld [vmem:[%s965_s2 + $0x20] sm:$0xf] (!%p212_p3)  ;;  %vm463_vm4 = vcmask (!%p212_p3), 64512   ;;  %vm468_vm5 = vcmask (!%p212_p3), 97280  }
   0xc   : > { %vm473_vm6 = vcmask (!%p212_p3), 130048   ;;  %vm478_vm7 = vcmask (!%p212_p3), 162816   ;;  %vm483_vm8 = vcmask (!%p212_p3), 195584   ;;  %vm488_vm9 = vcmask (!%p212_p3), 228352  }
   0xd   : > { %756 = vmatprep.subr.bf16.mxu0 (!%p212_p3), %v755_v39  ;;  %vm493_vm10 = vcmask (!%p212_p3), 261120   ;;  %vm509_vm11 = vcmask (!%p212_p3), 293888  }
   0xe   : > { %s974_s18 = smov (!%p248_p4, %s810_s18), 1  ;;  %v297_v4 = vld [vmem:[#allocation2 + $0x1] sm:$0xf]  ;;  %758 = vmatpush3.bf16.msra.mxu0 %v755_v39 }
   0xf   : > { %s877_s22 = sshll.u32 %s974_s18, 4  ;;  %334 = vrot.lane.b32.xlu0 %v297_v4, %s821_s29  ;;  %v301_v11 = vld [vmem:[#allocation2 + $0x2] sm:$0xf]  ;;  %760 = vmatprep.subr.bf16.mxu0 %v759_v44 }
  0x10   : > { %s252_s25 = scalar_lea.vmem %s963_s0, %s877_s22  ;;  %s257_s28 = scalar_lea.vmem %s964_s1, %s877_s22  ;;  %v321_v40 = vld [vmem:[#allocation2 + $0x28] sm:$0xf] }
  0x11   : > { %v269_v1 = vld [vmem:[%s252_s25 + $0x4] sm:$0xf]  ;;  %v268_v3 = vld [vmem:[%s252_s25] sm:$0xf]  ;;  %v270_v8 = vld [vmem:[%s252_s25 + $0x8] sm:$0xf] }
  0x12   : > { %v273_v2 = vld [vmem:[%s257_s28 + $0x4] sm:$0xf]  ;;  %v272_v6 = vld [vmem:[%s257_s28] sm:$0xf]  ;;  %v274_v9 = vld [vmem:[%s257_s28 + $0x8] sm:$0xf]  ;;  %762 = vmatpush3.bf16.msra.mxu0 %v759_v44 }
  0x13   : > { %v277_v5 = vadd.f32 %v273_v2, %v269_v1  ;;  %v276_v7 = vadd.f32 %v272_v6, %v268_v3  ;;  %v271_v10 = vld [vmem:[%s252_s25 + $0xc] sm:$0xf]  ;;  %v278_v12 = vadd.f32 %v274_v9, %v270_v8  ;;  %350 = vrot.lane.b32.xlu0 %v301_v11, %s822_s30  ;;  %s828_s25 = smov 32   ;;  %750 = vmatprep.subr.msk.mxu0 %vm514_vm2, %v502_v47 }
  0x14   : > { %v275_v13 = vld [vmem:[%s257_s28 + $0xc] sm:$0xf] }
  0x15   : > { %290 = vst.msk [vmem:[#allocation2 + $0x11] sm:$0xf] %vm288_vm1, %v277_v5  ;;  %289 = vst.msk [vmem:[#allocation2 + $0x9] sm:$0xf] %vm288_vm1, %v276_v7  ;;  %v279_v14 = vadd.f32 %v275_v13, %v271_v10  ;;  %v325_v48 = vld [vmem:[#allocation2 + $0x29] sm:$0xf] }
  0x16   : > { %291 = vst.msk [vmem:[#allocation2 + $0x19] sm:$0xf] %vm288_vm1, %v278_v12  ;;  %751 = vmatpush3.msk.msra.mxu0 %vm514_vm2, %v502_v47  ;;  %v329_v51 = vld [vmem:[#allocation2 + $0x2a] sm:$0xf]  ;;  %v293_v13 = vld [vmem:[#allocation2] sm:$0xf] }
  0x17   : > { %292 = vst.msk [vmem:[#allocation2 + $0x21] sm:$0xf] %vm288_vm1, %v279_v14 }
  0x1c   : > { %v299_v15 = vld [vmem:[#allocation2 + $0x11] sm:$0xf]  ;;  %v298_v16 = vld [vmem:[#allocation2 + $0x9] sm:$0xf] }
  0x1d   : > { %338 = vrot.lane.b32.xlu1 %v299_v15, %s821_s29  ;;  %336 = vrot.lane.b32.xlu0 %v298_v16, %s821_s29  ;;  %v300_v17 = vld [vmem:[#allocation2 + $0x19] sm:$0xf]  ;;  %v303_v18 = vld [vmem:[#allocation2 + $0x12] sm:$0xf]  ;;  %v302_v19 = vld [vmem:[#allocation2 + $0xa] sm:$0xf] }
  0x1e   : > { %v305_v20 = vld [vmem:[#allocation2 + $0x8] sm:$0xf]  ;;  %v304_v21 = vld [vmem:[#allocation2 + $0x1a] sm:$0xf]  ;;  %v306_v23 = vld [vmem:[#allocation2 + $0x10] sm:$0xf] }
  0x1f   : > { %v307_v22 = vld [vmem:[#allocation2 + $0x18] sm:$0xf]  ;;  %v309_v24 = vld [vmem:[#allocation2 + $0x9] sm:$0xf]  ;;  %v308_v25 = vld [vmem:[#allocation2 + $0x20] sm:$0xf] }
  0x20   : > { %v311_v26 = vld [vmem:[#allocation2 + $0x19] sm:$0xf]  ;;  %v310_v27 = vld [vmem:[#allocation2 + $0x11] sm:$0xf]  ;;  %v313_v28 = vld [vmem:[#allocation2 + $0xa] sm:$0xf] }
  0x21   : > { %340 = vrot.lane.b32.xlu1 %v300_v17, %s821_s29  ;;  %354 = vrot.lane.b32.xlu0 %v303_v18, %s822_s30  ;;  %v312_v29 = vld [vmem:[#allocation2 + $0x21] sm:$0xf]  ;;  %v315_v30 = vld [vmem:[#allocation2 + $0x1a] sm:$0xf]  ;;  %v314_v31 = vld [vmem:[#allocation2 + $0x12] sm:$0xf] }
  0x22   : > { %v318_v32 = vld [vmem:[#allocation2 + $0x10] sm:$0xf]  ;;  %v316_v33 = vld [vmem:[#allocation2 + $0x22] sm:$0xf]  ;;  %v319_v35 = vld [vmem:[#allocation2 + $0x18] sm:$0xf] }
  0x23   : > { %v320_v34 = vld [vmem:[#allocation2 + $0x20] sm:$0xf]  ;;  %v322_v36 = vld [vmem:[#allocation2 + $0x11] sm:$0xf]  ;;  %v323_v45 = vld [vmem:[#allocation2 + $0x19] sm:$0xf] }
  0x24   : > { %v324_v41 = vld [vmem:[#allocation2 + $0x21] sm:$0xf]  ;;  %v326_v46 = vld [vmem:[#allocation2 + $0x12] sm:$0xf]  ;;  %v327_v50 = vld [vmem:[#allocation2 + $0x1a] sm:$0xf] }
  0x25   : > { %352 = vrot.lane.b32.xlu1 %v302_v19, %s822_s30  ;;  %366 = vrot.lane.b32.xlu0 %v305_v20, %s823_s6  ;;  %v328_v49 = vld [vmem:[#allocation2 + $0x22] sm:$0xf]  ;;  %v294_v14 = vld [vmem:[#allocation2 + $0x8] sm:$0xf]  ;;  %v295_v20 = vld [vmem:[#allocation2 + $0x10] sm:$0xf] }
  0x29   : > { %356 = vrot.lane.b32.xlu1 %v304_v21, %s822_s30  ;;  %370 = vrot.lane.b32.xlu0 %v307_v22, %s823_s6  ;;  %v296_v21 = vld [vmem:[#allocation2 + $0x18] sm:$0xf] }
  0x2d   : > { %368 = vrot.lane.b32.xlu1 %v306_v23, %s823_s6  ;;  %382 = vrot.lane.b32.xlu0 %v309_v24, %s824_s7 }
  0x31   : > { %372 = vrot.lane.b32.xlu1 %v308_v25, %s823_s6  ;;  %386 = vrot.lane.b32.xlu0 %v311_v26, %s824_s7 }
  0x35   : > { %384 = vrot.lane.b32.xlu1 %v310_v27, %s824_s7  ;;  %398 = vrot.lane.b32.xlu0 %v313_v28, %s825_s8 }
  0x39   : > { %388 = vrot.lane.b32.xlu1 %v312_v29, %s824_s7  ;;  %402 = vrot.lane.b32.xlu0 %v315_v30, %s825_s8  ;;  %s266_s7 = scalar_lea.vmem %s968_s5, %s877_s22 }
  0x3d   : > { %400 = vrot.lane.b32.xlu1 %v314_v31, %s825_s8  ;;  %414 = vrot.lane.b32.xlu0 %v318_v32, %s826_s9 }
  0x41   : > { %404 = vrot.lane.b32.xlu1 %v316_v33, %s825_s8  ;;  %418 = vrot.lane.b32.xlu0 %v320_v34, %s826_s9 }
  0x45   : > { %416 = vrot.lane.b32.xlu1 %v319_v35, %s826_s9  ;;  %430 = vrot.lane.b32.xlu0 %v322_v36, %s827_s14 }
  0x49   : > { %420 = vrot.lane.b32.xlu1 %v321_v40, %s826_s9  ;;  %434 = vrot.lane.b32.xlu0 %v324_v41, %s827_s14 }
  0x4d   : > { %432 = vrot.lane.b32.xlu1 %v323_v45, %s827_s14  ;;  %446 = vrot.lane.b32.xlu0 %v326_v46, %s828_s25 }
  0x51   : > { %436 = vrot.lane.b32.xlu1 %v325_v48, %s827_s14  ;;  %450 = vrot.lane.b32.xlu0 %v328_v49, %s828_s25 }
  0x55   : > { %448 = vrot.lane.b32.xlu1 %v327_v50, %s828_s25 }
  0x59   : > { %452 = vrot.lane.b32.xlu1 %v329_v51, %s828_s25 }
  0x81   : > { %v335_v52 = vpop.permute.xlu0 %334 }
  0x82   : > { %v459_v16 = vsel %vm458_vm3, %v293_v13, %v335_v52 }
  0x85   : > { %v351_v53 = vpop.permute.xlu0 %350 }
  0x86   : > { %v464_v19 = vsel %vm463_vm4, %v459_v16, %v351_v53 }
  0x8f   : > { %v339_v54 = vpop.permute.xlu1 %338  ;;  %v337_v55 = vpop.permute.xlu0 %336 }
  0x90   : > { %v460_v17 = vsel %vm458_vm3, %v294_v14, %v337_v55  ;;  %v461_v29 = vsel %vm458_vm3, %v295_v20, %v339_v54 }
  0x93   : > { %v341_v56 = vpop.permute.xlu1 %340  ;;  %v355_v57 = vpop.permute.xlu0 %354 }
  0x94   : > { %v462_v30 = vsel %vm458_vm3, %v296_v21, %v341_v56  ;;  %v466_v33 = vsel %vm463_vm4, %v461_v29, %v355_v57 }
  0x97   : > { %v353_v58 = vpop.permute.xlu1 %352  ;;  %v367_v59 = vpop.permute.xlu0 %366 }
  0x98   : > { %v465_v22 = vsel %vm463_vm4, %v460_v17, %v353_v58  ;;  %v469_v23 = vsel %vm468_vm5, %v464_v19, %v367_v59  ;;  %v728_v58 = vld [vmem:[%s966_s3] ss:$0 sm:$0xff] }
  0x9b   : > { %v357_v60 = vpop.permute.xlu1 %356  ;;  %v371_v61 = vpop.permute.xlu0 %370 }
  0x9c   : > { %v467_v34 = vsel %vm463_vm4, %v462_v30, %v357_v60  ;;  %v471_v37 = vsel %vm468_vm5, %v466_v33, %v371_v61  ;;  %v729_v60 = vld [vmem:[%s967_s4] ss:$0 sm:$0xff] }
  0x9f   : > { %v369_v62 = vpop.permute.xlu1 %368  ;;  %v383_v63 = vpop.permute.xlu0 %382 }
  0xa0   : > { %v470_v24 = vsel %vm468_vm5, %v465_v22, %v369_v62  ;;  %v474_v27 = vsel %vm473_vm6, %v469_v23, %v383_v63 }
  0xa3   : > { %v373_v0 = vpop.permute.xlu1 %372  ;;  %v387_v1 = vpop.permute.xlu0 %386 }
  0xa4   : > { %v472_v38 = vsel %vm468_vm5, %v467_v34, %v373_v0  ;;  %v476_v42 = vsel %vm473_vm6, %v471_v37, %v387_v1 }
  0xa7   : > { %v385_v2 = vpop.permute.xlu1 %384  ;;  %v399_v3 = vpop.permute.xlu0 %398 }
  0xa8   : > { %v475_v28 = vsel %vm473_vm6, %v470_v24, %v385_v2  ;;  %v479_v31 = vsel %vm478_vm7, %v474_v27, %v399_v3 }
  0xab   : > { %v389_v4 = vpop.permute.xlu1 %388  ;;  %v403_v5 = vpop.permute.xlu0 %402 }
  0xac   : > { %v477_v43 = vsel %vm473_vm6, %v472_v38, %v389_v4  ;;  %v481_v46 = vsel %vm478_vm7, %v476_v42, %v403_v5 }
  0xaf   : > { %v401_v6 = vpop.permute.xlu1 %400  ;;  %v415_v7 = vpop.permute.xlu0 %414 }
  0xb0   : > { %v480_v32 = vsel %vm478_vm7, %v475_v28, %v401_v6  ;;  %v484_v35 = vsel %vm483_vm8, %v479_v31, %v415_v7 }
  0xb3   : > { %v405_v8 = vpop.permute.xlu1 %404  ;;  %v419_v9 = vpop.permute.xlu0 %418 }
  0xb4   : > { %v482_v47 = vsel %vm478_vm7, %v477_v43, %v405_v8  ;;  %v486_v50 = vsel %vm483_vm8, %v481_v46, %v419_v9 }
  0xb7   : > { %v417_v10 = vpop.permute.xlu1 %416  ;;  %v431_v11 = vpop.permute.xlu0 %430 }
  0xb8   : > { %v485_v36 = vsel %vm483_vm8, %v480_v32, %v417_v10  ;;  %v489_v39 = vsel %vm488_vm9, %v484_v35, %v431_v11 }
  0xbb   : > { %v421_v12 = vpop.permute.xlu1 %420  ;;  %v435_v15 = vpop.permute.xlu0 %434 }
  0xbc   : > { %v487_v51 = vsel %vm483_vm8, %v482_v47, %v421_v12  ;;  %v491_v52 = vsel %vm488_vm9, %v486_v50, %v435_v15 }
  0xbf   : > { %v433_v18 = vpop.permute.xlu1 %432  ;;  %v447_v25 = vpop.permute.xlu0 %446 }
  0xc0   : > { %v490_v40 = vsel %vm488_vm9, %v485_v36, %v433_v18  ;;  %v494_v44 = vsel %vm493_vm10, %v489_v39, %v447_v25 }
  0xc3   : > { %v437_v26 = vpop.permute.xlu1 %436  ;;  %v451_v48 = vpop.permute.xlu0 %450 }
  0xc4   : > { %v492_v53 = vsel %vm488_vm9, %v487_v51, %v437_v26  ;;  %v496_v55 = vsel %vm493_vm10, %v491_v52, %v451_v48 }
  0xc7   : > { %v449_v41 = vpop.permute.xlu1 %448 }
  0xc8   : > { %v495_v45 = vsel %vm493_vm10, %v490_v40, %v449_v41 }
  0xc9   : > { %v507_v49 = vcombine.low %v494_v44, %v495_v45 }
  0xcb   : > { %v453_v54 = vpop.permute.xlu1 %452  ;;  %752 = vmatprep.mubr.msk.f32.mxu0 %vm509_vm11, %v507_v49 }
  0xcc   : > { %v497_v56 = vsel %vm493_vm10, %v492_v53, %v453_v54 }
  0xcd   : > { %v508_v57 = vcombine.low %v496_v55, %v497_v56 }
  0xcf   : > { %753 = vmatmul.mubr.msk.f32.vlgmr.msra.gmra.mrb[0].mxu0 %vm509_vm11, %v508_v57 }
 0x1a2   : > { %v754_v59 = vpop.f32.mrb[0].mxu0 }
 0x1a3   : > { %v601_v61 = vmul.f32 %v754_v59, %v728_v58  ;;  %v584_v62 = vpop.f32.mrb[1].mxu0 }
 0x1a4   : > { %v600_v63 = vmul.f32 %v728_v58, %v584_v62 }
 0x1a5   : > { %v610_v0 = vadd.f32 %v729_v60, %v601_v61 }
 0x1a6   : > { %v609_v1 = vadd.f32 %v729_v60, %v600_v63 }
 0x1a7   : > { %v614_v2 = vcombine.high %v610_v0, %v610_v0  ;;  %619 = vst.msk [vmem:[%s266_s7 + $0x8] sm:$0xf] %vm288_vm1, %v610_v0 }
 0x1a8   : > { %v613_v3 = vcombine.high %v609_v1, %v609_v1  ;;  %617 = vst.msk [vmem:[%s266_s7] sm:$0xf] %vm288_vm1, %v609_v1 }
 0x1a9   : > { %620 = vst.msk [vmem:[%s266_s7 + $0xc] sm:$0xf] %vm288_vm1, %v614_v2 }
 0x1aa   : > { %618 = vst.msk [vmem:[%s266_s7 + $0x4] sm:$0xf] %vm288_vm1, %v613_v3 }
 0x1ab PF: > { %s15_s20 = sadd.s32 1, %s818_s20   ;;  %s969_s18 = smov %s814_s19 }
 0x1ac   : > { %p12_p5 = scmp.ge.s32.totalorder %s15_s20, 4   ;;  %s970_s19 = smov %s972_s21 }
 0x1ae   :  { %14 = sbr.rel (!%p12_p5) target bundleno = 2 (0x2), region = 75 }

// kernel: usrm3_forward.12
= control target key start
LH: loop header
LB: loop body
LE: loop exit
PB: predicated region body
PF: predicated region fallthrough
CT: control target
= control target key end

     0   :  { %s451_s12 = smov 0   ;;  %s477_s0 = inlined_call_operand.vmem [shape: f32[2,4,16], index: 0, kind: input, shape index: {}]   ;;  %s478_s1 = inlined_call_operand.vmem [shape: f32[8,4], index: 1, kind: input, shape index: {}]   ;;  %s479_s2 = inlined_call_operand.vmem [shape: f32[16,32], index: 2, kind: input, shape index: {}]   ;;  %s480_s3 = inlined_call_operand.vmem [shape: f32[2,8,32], index: 3, kind: output, shape index: {}]  }
   0x1 LB: > { %s377_s13 = sadd.s32 4294967295, %s426_s12   ;;  %p381_p0 = scmp.ge.s32.totalorder %s426_s12, 1  ;;  %s426_s12 = sphi %s451_s12, %s13_s12  }
   0x2   : > { %p136_p1 = scmp.lt.s32.totalorder %s426_s12, 3 }
   0x4   : > { %p137_p2 = pnand %p381_p0, %p136_p1 }
   0x5   : > { %v167_v0 = vld [vmem:[%s479_s2] sm:$0xff] (!%p137_p2)  ;;  %v168_v1 = vld [vmem:[%s479_s2 + $0x8] sm:$0xff] (!%p137_p2)  ;;  %p158_p3 = scmp.lt.s32.totalorder (!%p137_p2), %s377_s13, 1  ;;  %v428_v2 = vmov (!%p137_p2), 0.0|0.0   ;;  %vm429_vm0 = vmmov (!%p137_p2), 0   ;;  %v430_v4 = vmov (!%p137_p2), 0.0  }
   0x6   : > { %140 = sbr.rel (%p137_p2) target bundleno = 443 (0x1bb), region = 32  ;;  %406 = vmatprep.subr.bf16.mxu0 (!%p137_p2), %v428_v2  ;;  %v407_v3 = vpack.c.bf16 (!%p137_p2), %v168_v1, %v167_v0  ;;  %398 = vmatprep.mubr.msk.f32.mxu0 (!%p137_p2), %vm429_vm0, %v430_v4  ;;  %vm169_vm1 = vcmask (!%p137_p2), 130048   ;;  %vm248_vm2 = vcmask (!%p137_p2), 1043456   ;;  %v243_v6 = vld [vmem:[%s478_s1] sm:$0xff] (!%p137_p2)  ;;  %vm244_vm3 = vcmask (!%p137_p2), 31744  }
   0x7   : > { %401 = vmatprep.subr.mxu1 (!%p137_p2), %v430_v4  ;;  %403 = vmatprep.mubr.msk.f32.mxu1 (!%p137_p2), %vm429_vm0, %v430_v4  ;;  %vm322_vm4 = vcmask (!%p137_p2), 261120  }
   0x8   : > { %408 = vmatpush3.bf16.msra.mxu0 (!%p137_p2), %v407_v3 }
   0xd   : > { %s482_s13 = smov (!%p158_p3, %s377_s13), 1 }
   0xe   : > { %s382_s18 = sshll.u32 %s482_s13, 2  ;;  %s383_s24 = sshll.u32 %s482_s13, 3 }
   0xf   : > { %s161_s21 = scalar_lea.vmem %s477_s0, %s382_s18  ;;  %s165_s27 = scalar_lea.vmem %s480_s3, %s383_s24 }
  0x10   : > { %v166_v5 = vld [vmem:[%s161_s21] sm:$0xf] }
  0x11   : > { %399 = vmatmul.mubr.msk.f32.vlgmr.msra.gmra.mrb[0].mxu0 %vm169_vm1, %v166_v5 }
  0xe4   : > { %v239_v7 = vpop.f32.mrb[0].mxu0 }
  0xe5   : > { %v400_v8 = vpop.f32.mrb[1].mxu0  ;;  %402 = vmatpush3.msk.msra.mxu1 %vm248_vm2, %v239_v7 }
  0xe6   : > { %404 = vmatmul.mubr.msk.f32.vlgmr.msra.gmra.mrb[0].mxu1 %vm244_vm3, %v243_v6 }
 0x1b9   : > { %v318_v9 = vpop.f32.mrb[0].mxu1 }
 0x1ba   : > { %323 = vst.msk [vmem:[%s165_s27] sm:$0xff] %vm322_vm4, %v318_v9  ;;  %v405_v10 = vpop.f32.mrb[1].mxu1 }
 0x1bb PF: > { %s13_s12 = sadd.s32 1, %s426_s12  }
 0x1bc   : > { %p10_p4 = scmp.ge.s32.totalorder %s13_s12, 4  }
 0x1be   :  { %12 = sbr.rel (!%p10_p4) target bundleno = 1 (0x1), region = 62 }

// kernel: usrm3_forward.14
= control target key start
LH: loop header
LB: loop body
LE: loop exit
PB: predicated region body
PF: predicated region fallthrough
CT: control target
= control target key end

     0   :  { %s475_s12 = smov 0   ;;  %s510_s0 = inlined_call_operand.vmem [shape: f32[2,8,32], index: 0, kind: input, shape index: {}]   ;;  %s511_s1 = inlined_call_operand.vmem [shape: f32[16,8], index: 1, kind: input, shape index: {}]   ;;  %s512_s2 = inlined_call_operand.vmem [shape: f32[32,64], index: 2, kind: input, shape index: {}]   ;;  %s513_s3 = inlined_call_operand.vmem [shape: f32[2,16,64], index: 3, kind: output, shape index: {}]  }
   0x1 LB: > { %s389_s13 = sadd.s32 4294967295, %s450_s12   ;;  %p393_p0 = scmp.ge.s32.totalorder %s450_s12, 1  ;;  %s450_s12 = sphi %s475_s12, %s13_s12  }
   0x2   : > { %p136_p1 = scmp.lt.s32.totalorder %s450_s12, 3 }
   0x4   : > { %p137_p2 = pnand %p393_p0, %p136_p1 }
   0x5   : > { %v169_v0 = vld [vmem:[%s512_s2] sm:$0xff] (!%p137_p2)  ;;  %v170_v1 = vld [vmem:[%s512_s2 + $0x8] sm:$0xff] (!%p137_p2)  ;;  %v171_v2 = vld [vmem:[%s512_s2 + $0x10] sm:$0xff] (!%p137_p2)  ;;  %v452_v3 = vmov (!%p137_p2), 0.0|0.0   ;;  %vm453_vm0 = vmmov (!%p137_p2), 0   ;;  %v454_v6 = vmov (!%p137_p2), 0.0  }
   0x6   : > { %140 = sbr.rel (%p137_p2) target bundleno = 445 (0x1bd), region = 32  ;;  %427 = vmatprep.subr.bf16.mxu0 (!%p137_p2), %v452_v3  ;;  %v428_v4 = vpack.c.bf16 (!%p137_p2), %v170_v1, %v169_v0  ;;  %v172_v5 = vld [vmem:[%s512_s2 + $0x18] sm:$0xff] (!%p137_p2)  ;;  %419 = vmatprep.mubr.msk.f32.mxu0 (!%p137_p2), %vm453_vm0, %v454_v6  ;;  %p159_p3 = scmp.lt.s32.totalorder (!%p137_p2), %s389_s13, 1  ;;  %vm173_vm1 = vcmask (!%p137_p2), 261120   ;;  %v247_v9 = vld [vmem:[%s511_s1] sm:$0xff] (!%p137_p2)  ;;  %vm249_vm2 = vcmask (!%p137_p2), 64512  }
   0x7   : > { %v431_v7 = vpack.c.bf16 (!%p137_p2), %v172_v5, %v171_v2  ;;  %424 = vmatprep.mubr.msk.f32.mxu1 (!%p137_p2), %vm249_vm2, %v247_v9  ;;  %v248_v11 = vld [vmem:[%s511_s1 + $0x8] sm:$0xff] (!%p137_p2)  ;;  %vm331_vm3 = vcmask (!%p137_p2), 523264  }
   0x8   : > { %429 = vmatpush3.bf16.msra.mxu0 (!%p137_p2), %v428_v4 }
   0x9   : > { %430 = vmatprep.subr.bf16.mxu0 (!%p137_p2), %v452_v3 }
   0xc   : > { %432 = vmatpush3.bf16.msra.mxu0 (!%p137_p2), %v431_v7 }
   0xd   : > { %s515_s13 = smov (!%p159_p3, %s389_s13), 1 }
   0xe   : > { %s394_s22 = sshll.u32 %s515_s13, 3  ;;  %s402_s30 = sshll.u32 %s515_s13, 4 }
   0xf   : > { %s162_s25 = scalar_lea.vmem %s510_s0, %s394_s22  ;;  %s167_s6 = scalar_lea.vmem %s513_s3, %s402_s30 }
  0x10   : > { %v168_v8 = vld [vmem:[%s162_s25] sm:$0xff] }
  0x11   : > { %420 = vmatmul.mubr.msk.f32.vlgmr.msra.gmra.mrb[0].mxu0 %vm173_vm1, %v168_v8 }
  0xe4   : > { %v243_v10 = vpop.f32.mrb[0].mxu0 }
  0xe5   : > { %v421_v12 = vpop.f32.mrb[1].mxu0  ;;  %422 = vmatprep.subr.mxu1 %v243_v10 }
  0xe6   : > { %423 = vmatpush3.msra.mxu1 %v243_v10 }
  0xe7   : > { %425 = vmatmul.mubr.msk.f32.vlgmr.msra.gmra.mrb[0].mxu1 %vm249_vm2, %v248_v11 }
 0x1ba   : > { %v426_v13 = vpop.f32.mrb[0].mxu1 }
 0x1bb   : > { %333 = vst.msk [vmem:[%s167_s6 + $0x8] sm:$0xff] %vm331_vm3, %v426_v13  ;;  %v322_v14 = vpop.f32.mrb[1].mxu1 }
 0x1bc   : > { %332 = vst.msk [vmem:[%s167_s6] sm:$0xff] %vm331_vm3, %v322_v14 }
 0x1bd PF: > { %s13_s12 = sadd.s32 1, %s450_s12  }
 0x1be   : > { %p10_p4 = scmp.ge.s32.totalorder %s13_s12, 4  }
 0x1c0   :  { %12 = sbr.rel (!%p10_p4) target bundleno = 1 (0x1), region = 62 }

// kernel: usrm3_forward.13
= control target key start
LH: loop header
LB: loop body
LE: loop exit
PB: predicated region body
PF: predicated region fallthrough
CT: control target
= control target key end

     0   :  { %s1165_s18 = smov 0   ;;  %s1167_s19 = smov 0   ;;  %s1482_s0 = inlined_call_operand.vmem [shape: f32[2,8,8,4], index: 0, kind: input, shape index: {}]   ;;  %s1483_s1 = inlined_call_operand.vmem [shape: f32[2,8,8,4], index: 1, kind: input, shape index: {}]   ;;  %s1484_s2 = inlined_call_operand.vmem [shape: f32[36,4], index: 2, kind: input, shape index: {}]   ;;  %s1485_s3 = inlined_call_operand.vmem [shape: f32[1,4], index: 3, kind: input, shape index: {}]   ;;  %s1486_s4 = inlined_call_operand.vmem [shape: f32[1,4], index: 4, kind: input, shape index: {}]   ;;  %s1487_s5 = inlined_call_operand.vmem [shape: f32[2,8,8,4], index: 5, kind: output, shape index: {}]  }
   0x1   :  { %s1169_s20 = smov 0  }
   0x2 LB: > { %s27_s21 = sadd.s32 1, %s1120_s19  ;;  %p997_p0 = scmp.ge.s32.totalorder %s1124_s20, 1  ;;  %s1124_s20 = sphi %s1169_s20, %s15_s20   ;;  %s1120_s19 = sphi %s1167_s19, %s1489_s19   ;;  %s1116_s18 = sphi %s1165_s18, %s1488_s18  }
   0x3   : > { %p29_p1 = scmp.ge.s32.totalorder %s27_s21, 2  ;;  %p211_p2 = scmp.lt.s32.totalorder %s1124_s20, 3 }
   0x5   : > { %s1491_s21 = smov (%p29_p1, %s27_s21), 0  ;;  %p212_p3 = pnand %p997_p0, %p211_p2 }
   0x6   : > { %vm292_vm0 = vcmask (!%p212_p3), 31744   ;;  %vm294_vm1 = vcmask (!%p212_p3), 25600   ;;  %v1126_v0 = vmov (!%p212_p3), 0.0   ;;  %p248_p4 = scmp.lt.s32.totalorder (!%p212_p3), %s1116_s18, 1  ;;  %s1127_s29 = smov (!%p212_p3), 4   ;;  %v723_v48 = vld [vmem:[%s1484_s2] sm:$0xff] (!%p212_p3) }
   0x7   : > { %215 = sbr.rel (%p212_p3) target bundleno = 487 (0x1e7), region = 40  ;;  %293 = vst.msk [vmem:[#allocation2] sm:$0xff] (!%p212_p3), %vm292_vm0, %v1126_v0  ;;  %296 = vst.msk [vmem:[#allocation2 + $0x10] sm:$0xff] (!%p212_p3), %vm292_vm0, %v1126_v0  ;;  %s1128_s30 = smov (!%p212_p3), 8   ;;  %v724_v49 = vld [vmem:[%s1484_s2 + $0x8] sm:$0xff] (!%p212_p3)  ;;  %v725_v51 = vld [vmem:[%s1484_s2 + $0x10] sm:$0xff] (!%p212_p3) }
   0x8   : > { %295 = vst.msk [vmem:[#allocation2 + $0x8] sm:$0x3] (!%p212_p3), %vm294_vm1, %v1126_v0  ;;  %297 = vst.msk [vmem:[#allocation2 + $0x18] sm:$0x3] (!%p212_p3), %vm294_vm1, %v1126_v0  ;;  %s1129_s6 = smov (!%p212_p3), 12   ;;  %s1130_s7 = smov (!%p212_p3), 16   ;;  %v1055_v50 = vpack.c.bf16 (!%p212_p3), %v724_v49, %v723_v48 }
   0x9   : > { %298 = vst.msk [vmem:[#allocation2 + $0x20] sm:$0xff] (!%p212_p3), %vm292_vm0, %v1126_v0  ;;  %300 = vst.msk [vmem:[#allocation2 + $0x30] sm:$0xff] (!%p212_p3), %vm292_vm0, %v1126_v0  ;;  %s1131_s8 = smov (!%p212_p3), 20   ;;  %s1132_s9 = smov (!%p212_p3), 24   ;;  %v726_v52 = vld [vmem:[%s1484_s2 + $0x18] sm:$0xff] (!%p212_p3)  ;;  %vm753_vm2 = vcmask (!%p212_p3), 1043456  }
   0xa   : > { %299 = vst.msk [vmem:[#allocation2 + $0x28] sm:$0x3] (!%p212_p3), %vm294_vm1, %v1126_v0  ;;  %301 = vst.msk [vmem:[#allocation2 + $0x38] sm:$0x3] (!%p212_p3), %vm294_vm1, %v1126_v0  ;;  %s1133_s10 = smov (!%p212_p3), 28   ;;  %1056 = vmatprep.subr.bf16.mxu0 (!%p212_p3), %v1055_v50  ;;  %1063 = vmatprep.subr.bf16.mxu1 (!%p212_p3), %v1055_v50  ;;  %v1059_v53 = vpack.c.bf16 (!%p212_p3), %v726_v52, %v725_v51  ;;  %vm660_vm3 = vcmask (!%p212_p3), 64512  }
   0xb   : > { %302 = vst.msk [vmem:[#allocation2 + $0x40] sm:$0xff] (!%p212_p3), %vm292_vm0, %v1126_v0  ;;  %304 = vst.msk [vmem:[#allocation2 + $0x50] sm:$0xff] (!%p212_p3), %vm292_vm0, %v1126_v0  ;;  %1058 = vmatpush3.bf16.msra.mxu0 (!%p212_p3), %v1055_v50  ;;  %1066 = vmatpush3.bf16.msra.mxu1 (!%p212_p3), %v1055_v50  ;;  %v727_v55 = vld [vmem:[%s1484_s2 + $0x20] sm:$0xf] (!%p212_p3)  ;;  %vm669_vm4 = vcmask (!%p212_p3), 97280   ;;  %vm678_vm5 = vcmask (!%p212_p3), 130048  }
   0xc   : > { %303 = vst.msk [vmem:[#allocation2 + $0x48] sm:$0x3] (!%p212_p3), %vm294_vm1, %v1126_v0  ;;  %305 = vst.msk [vmem:[#allocation2 + $0x58] sm:$0x3] (!%p212_p3), %vm294_vm1, %v1126_v0  ;;  %1060 = vmatprep.subr.bf16.mxu0 (!%p212_p3), %v1059_v53  ;;  %1064 = vmatprep.subr.bf16.mxu1 (!%p212_p3), %v1059_v53  ;;  %vm687_vm6 = vcmask (!%p212_p3), 162816   ;;  %vm696_vm7 = vcmask (!%p212_p3), 195584  }
   0xd   : > { %306 = vst.msk [vmem:[#allocation2 + $0x60] sm:$0xff] (!%p212_p3), %vm292_vm0, %v1126_v0  ;;  %308 = vst.msk [vmem:[#allocation2 + $0x70] sm:$0xff] (!%p212_p3), %vm292_vm0, %v1126_v0  ;;  %vm705_vm8 = vcmask (!%p212_p3), 228352   ;;  %vm714_vm9 = vcmask (!%p212_p3), 261120   ;;  %vm728_vm10 = vcmask (!%p212_p3), 293888  }
   0xe   : > { %307 = vst.msk [vmem:[#allocation2 + $0x68] sm:$0x3] %vm294_vm1, %v1126_v0  ;;  %309 = vst.msk [vmem:[#allocation2 + $0x78] sm:$0x3] %vm294_vm1, %v1126_v0  ;;  %s1493_s18 = smov (!%p248_p4, %s1116_s18), 1  ;;  %v323_v58 = vld [vmem:[#allocation2] sm:$0xff] }
   0xf   : > { %310 = vst.msk [vmem:[#allocation2 + $0x80] sm:$0xff] %vm292_vm0, %v1126_v0  ;;  %312 = vst.msk [vmem:[#allocation2 + $0x90] sm:$0xff] %vm292_vm0, %v1126_v0  ;;  %s1207_s22 = sshll.u32 %s1493_s18, 6  ;;  %v331_v4 = vld [vmem:[#allocation2 + $0x1] sm:$0xff]  ;;  %1062 = vmatpush3.bf16.msra.mxu0 %v1059_v53  ;;  %1067 = vmatpush3.bf16.msra.mxu1 %v1059_v53 }
  0x10   : > { %311 = vst.msk [vmem:[#allocation2 + $0x88] sm:$0x3] %vm294_vm1, %v1126_v0  ;;  %313 = vst.msk [vmem:[#allocation2 + $0x98] sm:$0x3] %vm294_vm1, %v1126_v0  ;;  %s252_s25 = scalar_lea.vmem %s1482_s0, %s1207_s22  ;;  %s257_s28 = scalar_lea.vmem %s1483_s1, %s1207_s22  ;;  %v339_v5 = vld [vmem:[#allocation2 + $0x2] sm:$0xff]  ;;  %404 = vrot.lane.b32.xlu0 %v331_v4, %s1127_s29  ;;  %1041 = vmatprep.subr.msk.mxu0 %vm753_vm2, %v727_v55 }
  0x11   : > { %v271_v1 = vld [vmem:[%s252_s25 + $0x18] sm:$0xff]  ;;  %v268_v3 = vld [vmem:[%s252_s25] sm:$0xff]  ;;  %v269_v11 = vld [vmem:[%s252_s25 + $0x8] sm:$0xff]  ;;  %1065 = vmatprep.subr.msk.mxu1 %vm753_vm2, %v727_v55 }
  0x12   : > { %v279_v2 = vld [vmem:[%s257_s28 + $0x18] sm:$0xff]  ;;  %v276_v7 = vld [vmem:[%s257_s28] sm:$0xff]  ;;  %v277_v13 = vld [vmem:[%s257_s28 + $0x8] sm:$0xff] }
  0x13   : > { %v287_v6 = vadd.f32 %v279_v2, %v271_v1  ;;  %v284_v8 = vadd.f32 %v276_v7, %v268_v3  ;;  %v272_v9 = vld [vmem:[%s252_s25 + $0x20] sm:$0xff]  ;;  %v273_v14 = vld [vmem:[%s252_s25 + $0x28] sm:$0xff]  ;;  %v285_v16 = vadd.f32 %v277_v13, %v269_v11  ;;  %v270_v18 = vld [vmem:[%s252_s25 + $0x10] sm:$0xff]  ;;  %1042 = vmatpush3.msk.msra.mxu0 %vm753_vm2, %v727_v55  ;;  %1068 = vmatpush3.msk.msra.mxu1 %vm753_vm2, %v727_v55 }
  0x14   : > { %v280_v10 = vld [vmem:[%s257_s28 + $0x20] sm:$0xff]  ;;  %v281_v15 = vld [vmem:[%s257_s28 + $0x28] sm:$0xff]  ;;  %v278_v19 = vld [vmem:[%s257_s28 + $0x10] sm:$0xff]  ;;  %436 = vrot.lane.b32.xlu0 %v339_v5, %s1128_s30 }
  0x15   : > { %318 = vst.msk [vmem:[#allocation2 + $0x41] sm:$0xff] %vm292_vm0, %v287_v6  ;;  %v288_v12 = vadd.f32 %v280_v10, %v272_v9  ;;  %315 = vst.msk [vmem:[#allocation2 + $0x11] sm:$0xff] %vm292_vm0, %v284_v8  ;;  %v289_v17 = vadd.f32 %v281_v15, %v273_v14  ;;  %v274_v20 = vld [vmem:[%s252_s25 + $0x30] sm:$0xff]  ;;  %v286_v21 = vadd.f32 %v278_v19, %v270_v18  ;;  %v275_v23 = vld [vmem:[%s252_s25 + $0x38] sm:$0xff]  ;;  %s1134_s25 = smov 32  }
  0x16   : > { %v282_v22 = vld [vmem:[%s257_s28 + $0x30] sm:$0xff]  ;;  %v283_v24 = vld [vmem:[%s257_s28 + $0x38] sm:$0xff]  ;;  %316 = vst.msk [vmem:[#allocation2 + $0x21] sm:$0xff] %vm292_vm0, %v285_v16 }
  0x17   : > { %319 = vst.msk [vmem:[#allocation2 + $0x51] sm:$0xff] %vm292_vm0, %v288_v12  ;;  %320 = vst.msk [vmem:[#allocation2 + $0x61] sm:$0xff] %vm292_vm0, %v289_v17  ;;  %v290_v25 = vadd.f32 %v282_v22, %v274_v20  ;;  %v291_v26 = vadd.f32 %v283_v24, %v275_v23  ;;  %v379_v60 = vld [vmem:[#allocation2 + $0x90] sm:$0xff] }
  0x18   : > { %317 = vst.msk [vmem:[#allocation2 + $0x31] sm:$0xff] %vm292_vm0, %v286_v21  ;;  %v387_v1 = vld [vmem:[#allocation2 + $0x91] sm:$0xff] }
  0x19   : > { %321 = vst.msk [vmem:[#allocation2 + $0x71] sm:$0xff] %vm292_vm0, %v290_v25  ;;  %322 = vst.msk [vmem:[#allocation2 + $0x81] sm:$0xff] %vm292_vm0, %v291_v26  ;;  %v395_v9 = vld [vmem:[#allocation2 + $0x92] sm:$0xff] }
  0x1c   : > { %v1227_v27 = vld [vmem:[#allocation2 + $0x41] sm:$0xff]  ;;  %v332_v28 = vld [vmem:[#allocation2 + $0x11] sm:$0xff] }
  0x1d   : > { %412 = vrot.lane.b32.xlu0 %v1227_v27, %s1127_s29  ;;  %406 = vrot.lane.b32.xlu1 %v332_v28, %s1127_s29  ;;  %v340_v29 = vld [vmem:[#allocation2 + $0x12] sm:$0xff]  ;;  %v1239_v32 = vld [vmem:[#allocation2 + $0x42] sm:$0xff] }
  0x1e   : > { %v1232_v30 = vld [vmem:[#allocation2 + $0x51] sm:$0xff]  ;;  %v1245_v33 = vld [vmem:[#allocation2 + $0x20] sm:$0xff] }
  0x1f   : > { %v1237_v31 = vld [vmem:[#allocation2 + $0x10] sm:$0xff]  ;;  %v333_v36 = vld [vmem:[#allocation2 + $0x21] sm:$0xff] }
  0x20   : > { %v1247_v34 = vld [vmem:[#allocation2 + $0x52] sm:$0xff]  ;;  %v1258_v37 = vld [vmem:[#allocation2 + $0x60] sm:$0xff] }
  0x21   : > { %438 = vrot.lane.b32.xlu0 %v340_v29, %s1128_s30  ;;  %414 = vrot.lane.b32.xlu1 %v1232_v30, %s1127_s29  ;;  %v1253_v35 = vld [vmem:[#allocation2 + $0x50] sm:$0xff]  ;;  %v337_v38 = vld [vmem:[#allocation2 + $0x61] sm:$0xff] }
  0x22   : > { %v334_v39 = vld [vmem:[#allocation2 + $0x31] sm:$0xff]  ;;  %v341_v40 = vld [vmem:[#allocation2 + $0x22] sm:$0xff] }
  0x23   : > { %v338_v41 = vld [vmem:[#allocation2 + $0x71] sm:$0xff]  ;;  %v345_v42 = vld [vmem:[#allocation2 + $0x62] sm:$0xff] }
  0x24   : > { %v342_v43 = vld [vmem:[#allocation2 + $0x32] sm:$0xff]  ;;  %v350_v47 = vld [vmem:[#allocation2 + $0x40] sm:$0xff] }
  0x25   : > { %468 = vrot.lane.b32.xlu0 %v1237_v31, %s1129_s6  ;;  %444 = vrot.lane.b32.xlu1 %v1239_v32, %s1128_s30  ;;  %v1280_v44 = vld [vmem:[#allocation2 + $0x30] sm:$0xff]  ;;  %v354_v54 = vld [vmem:[#allocation2 + $0x80] sm:$0xff] }
  0x26   : > { %v346_v45 = vld [vmem:[#allocation2 + $0x72] sm:$0xff]  ;;  %v362_v56 = vld [vmem:[#allocation2 + $0x81] sm:$0xff] }
  0x27   : > { %v1289_v46 = vld [vmem:[#allocation2 + $0x70] sm:$0xff]  ;;  %v370_v57 = vld [vmem:[#allocation2 + $0x82] sm:$0xff] }
  0x29   : > { %470 = vrot.lane.b32.xlu0 %v1245_v33, %s1129_s6  ;;  %446 = vrot.lane.b32.xlu1 %v1247_v34, %s1128_s30 }
  0x2d   : > { %500 = vrot.lane.b32.xlu0 %v332_v28, %s1130_s7  ;;  %476 = vrot.lane.b32.xlu1 %v1253_v35, %s1129_s6 }
  0x31   : > { %408 = vrot.lane.b32.xlu0 %v333_v36, %s1127_s29  ;;  %478 = vrot.lane.b32.xlu1 %v1258_v37, %s1129_s6 }
  0x35   : > { %502 = vrot.lane.b32.xlu0 %v333_v36, %s1130_s7  ;;  %508 = vrot.lane.b32.xlu1 %v1232_v30, %s1130_s7 }
  0x39   : > { %532 = vrot.lane.b32.xlu0 %v340_v29, %s1131_s8  ;;  %416 = vrot.lane.b32.xlu1 %v337_v38, %s1127_s29 }
  0x3d   : > { %410 = vrot.lane.b32.xlu0 %v334_v39, %s1127_s29  ;;  %510 = vrot.lane.b32.xlu1 %v337_v38, %s1130_s7 }
  0x41   : > { %440 = vrot.lane.b32.xlu0 %v341_v40, %s1128_s30  ;;  %540 = vrot.lane.b32.xlu1 %v1247_v34, %s1131_s8 }
  0x45   : > { %534 = vrot.lane.b32.xlu0 %v341_v40, %s1131_s8  ;;  %418 = vrot.lane.b32.xlu1 %v338_v41, %s1127_s29 }
  0x49   : > { %564 = vrot.lane.b32.xlu0 %v1245_v33, %s1132_s9  ;;  %448 = vrot.lane.b32.xlu1 %v345_v42, %s1128_s30 }
  0x4d   : > { %442 = vrot.lane.b32.xlu0 %v342_v43, %s1128_s30  ;;  %542 = vrot.lane.b32.xlu1 %v345_v42, %s1131_s8 }
  0x51   : > { %472 = vrot.lane.b32.xlu0 %v1280_v44, %s1129_s6  ;;  %572 = vrot.lane.b32.xlu1 %v1258_v37, %s1132_s9 }
  0x55   : > { %566 = vrot.lane.b32.xlu0 %v1280_v44, %s1132_s9  ;;  %450 = vrot.lane.b32.xlu1 %v346_v45, %s1128_s30 }
  0x59   : > { %596 = vrot.lane.b32.xlu0 %v333_v36, %s1133_s10  ;;  %480 = vrot.lane.b32.xlu1 %v1289_v46, %s1129_s6 }
  0x5d   : > { %474 = vrot.lane.b32.xlu0 %v350_v47, %s1129_s6  ;;  %574 = vrot.lane.b32.xlu1 %v1289_v46, %s1132_s9 }
  0x61   : > { %504 = vrot.lane.b32.xlu0 %v334_v39, %s1130_s7  ;;  %604 = vrot.lane.b32.xlu1 %v337_v38, %s1133_s10 }
  0x65   : > { %598 = vrot.lane.b32.xlu0 %v334_v39, %s1133_s10  ;;  %482 = vrot.lane.b32.xlu1 %v354_v54, %s1129_s6 }
  0x69   : > { %628 = vrot.lane.b32.xlu0 %v341_v40, %s1134_s25  ;;  %512 = vrot.lane.b32.xlu1 %v338_v41, %s1130_s7 }
  0x6d   : > { %506 = vrot.lane.b32.xlu0 %v1227_v27, %s1130_s7  ;;  %606 = vrot.lane.b32.xlu1 %v338_v41, %s1133_s10 }
  0x71   : > { %536 = vrot.lane.b32.xlu0 %v342_v43, %s1131_s8  ;;  %636 = vrot.lane.b32.xlu1 %v345_v42, %s1134_s25 }
  0x75   : > { %630 = vrot.lane.b32.xlu0 %v342_v43, %s1134_s25  ;;  %514 = vrot.lane.b32.xlu1 %v362_v56, %s1130_s7  ;;  %s266_s7 = scalar_lea.vmem %s1487_s5, %s1207_s22 }
  0x79   : > { %538 = vrot.lane.b32.xlu0 %v1239_v32, %s1131_s8  ;;  %544 = vrot.lane.b32.xlu1 %v346_v45, %s1131_s8 }
  0x7d   : > { %568 = vrot.lane.b32.xlu0 %v350_v47, %s1132_s9  ;;  %638 = vrot.lane.b32.xlu1 %v346_v45, %s1134_s25 }
  0x81   : > { %570 = vrot.lane.b32.xlu0 %v1253_v35, %s1132_s9  ;;  %546 = vrot.lane.b32.xlu1 %v370_v57, %s1131_s8 }
  0x82   : > { %v405_v59 = vpop.permute.xlu0 %404 }
  0x83   : > { %v652_v61 = vsel %vm292_vm0, %v323_v58, %v405_v59 }
  0x85   : > { %600 = vrot.lane.b32.xlu0 %v1227_v27, %s1133_s10  ;;  %576 = vrot.lane.b32.xlu1 %v354_v54, %s1132_s9 }
  0x86   : > { %v437_v62 = vpop.permute.xlu0 %436 }
  0x87   : > { %v661_v63 = vsel %vm660_vm3, %v652_v61, %v437_v62 }
  0x89   : > { %602 = vrot.lane.b32.xlu0 %v1232_v30, %s1133_s10  ;;  %578 = vrot.lane.b32.xlu1 %v379_v60, %s1132_s9 }
  0x8d   : > { %632 = vrot.lane.b32.xlu0 %v1239_v32, %s1134_s25  ;;  %608 = vrot.lane.b32.xlu1 %v362_v56, %s1133_s10 }
  0x8f   : > { %v413_v0 = vpop.permute.xlu0 %412  ;;  %v407_v3 = vpop.permute.xlu1 %406 }
  0x90   : > { %v656_v2 = vsel %vm292_vm0, %v350_v47, %v413_v0  ;;  %v653_v4 = vsel %vm292_vm0, %v1237_v31, %v407_v3 }
  0x91   : > { %634 = vrot.lane.b32.xlu0 %v1247_v34, %s1134_s25  ;;  %610 = vrot.lane.b32.xlu1 %v387_v1, %s1133_s10 }
  0x93   : > { %v439_v5 = vpop.permute.xlu0 %438  ;;  %v415_v7 = vpop.permute.xlu1 %414 }
  0x94   : > { %v662_v6 = vsel %vm660_vm3, %v653_v4, %v439_v5  ;;  %v657_v13 = vsel %vm292_vm0, %v1253_v35, %v415_v7 }
  0x95   : > { %640 = vrot.lane.b32.xlu1 %v370_v57, %s1134_s25 }
  0x97   : > { %v469_v8 = vpop.permute.xlu0 %468  ;;  %v445_v10 = vpop.permute.xlu1 %444 }
  0x98   : > { %v665_v11 = vsel %vm660_vm3, %v656_v2, %v445_v10  ;;  %v670_v52 = vsel %vm669_vm4, %v661_v63, %v469_v8 }
  0x99   : > { %642 = vrot.lane.b32.xlu1 %v395_v9, %s1134_s25 }
  0x9b   : > { %v471_v12 = vpop.permute.xlu0 %470  ;;  %v447_v15 = vpop.permute.xlu1 %446 }
  0x9c   : > { %v671_v14 = vsel %vm669_vm4, %v662_v6, %v471_v12  ;;  %v666_v16 = vsel %vm660_vm3, %v657_v13, %v447_v15 }
  0x9f   : > { %v501_v17 = vpop.permute.xlu0 %500  ;;  %v477_v18 = vpop.permute.xlu1 %476 }
  0xa0   : > { %v679_v54 = vsel %vm678_vm5, %v670_v52, %v501_v17  ;;  %v674_v63 = vsel %vm669_vm4, %v665_v11, %v477_v18 }
  0xa3   : > { %v409_v19 = vpop.permute.xlu0 %408  ;;  %v479_v20 = vpop.permute.xlu1 %478 }
  0xa4   : > { %v1359_v21 = vsel %vm669_vm4, %v666_v16, %v479_v20  ;;  %v654_v28 = vsel %vm292_vm0, %v1245_v33, %v409_v19 }
  0xa7   : > { %v503_v22 = vpop.permute.xlu0 %502  ;;  %v509_v23 = vpop.permute.xlu1 %508 }
  0xa8   : > { %v683_v1 = vsel %vm678_vm5, %v674_v63, %v509_v23  ;;  %v680_v5 = vsel %vm678_vm5, %v671_v14, %v503_v22 }
  0xab   : > { %v533_v24 = vpop.permute.xlu0 %532  ;;  %v417_v25 = vpop.permute.xlu1 %416 }
  0xac   : > { %v658_v36 = vsel %vm292_vm0, %v1258_v37, %v417_v25  ;;  %v688_v56 = vsel %vm687_vm6, %v679_v54, %v533_v24 }
  0xaf   : > { %v1361_v26 = vpop.permute.xlu0 %410  ;;  %v511_v27 = vpop.permute.xlu1 %510 }
  0xb0   : > { %v684_v17 = vsel %vm678_vm5, %v1359_v21, %v511_v27 }
  0xb3   : > { %v441_v29 = vpop.permute.xlu0 %440  ;;  %v541_v31 = vpop.permute.xlu1 %540 }
  0xb4   : > { %v1366_v30 = vsel %vm660_vm3, %v654_v28, %v441_v29  ;;  %v692_v2 = vsel %vm687_vm6, %v683_v1, %v541_v31 }
  0xb7   : > { %v535_v32 = vpop.permute.xlu0 %534  ;;  %v1368_v34 = vpop.permute.xlu1 %418 }
  0xb8   : > { %v689_v8 = vsel %vm687_vm6, %v680_v5, %v535_v32 }
  0xbb   : > { %v565_v35 = vpop.permute.xlu0 %564  ;;  %v449_v38 = vpop.permute.xlu1 %448 }
  0xbc   : > { %v1373_v39 = vsel %vm660_vm3, %v658_v36, %v449_v38  ;;  %v697_v57 = vsel %vm696_vm7, %v688_v56, %v565_v35  ;;  %v655_v36 = vsel %vm292_vm0, %v1280_v44, %v1361_v26  ;;  %v659_v56 = vsel %vm292_vm0, %v1289_v46, %v1368_v34 }
  0xbf   : > { %v1375_v40 = vpop.permute.xlu0 %442  ;;  %v543_v41 = vpop.permute.xlu1 %542 }
  0xc0   : > { %v693_v18 = vsel %vm687_vm6, %v684_v17, %v543_v41  ;;  %v664_v41 = vsel %vm660_vm3, %v655_v36, %v1375_v40 }
  0xc3   : > { %v473_v33 = vpop.permute.xlu0 %472  ;;  %v573_v42 = vpop.permute.xlu1 %572 }
  0xc4   : > { %v701_v3 = vsel %vm696_vm7, %v692_v2, %v573_v42  ;;  %v672_v32 = vsel %vm669_vm4, %v1366_v30, %v473_v33  ;;  %v1014_v2 = vld [vmem:[%s1486_s4] ss:$0 sm:$0xff] }
  0xc7   : > { %v567_v43 = vpop.permute.xlu0 %566  ;;  %v1377_v45 = vpop.permute.xlu1 %450 }
  0xc8   : > { %v698_v10 = vsel %vm696_vm7, %v689_v8, %v567_v43 }
  0xcb   : > { %v597_v47 = vpop.permute.xlu0 %596  ;;  %v1379_v48 = vpop.permute.xlu1 %480 }
  0xcc   : > { %v706_v58 = vsel %vm705_vm8, %v697_v57, %v597_v47 }
  0xcf   : > { %v1381_v49 = vpop.permute.xlu0 %474  ;;  %v575_v50 = vpop.permute.xlu1 %574 }
  0xd0   : > { %v702_v19 = vsel %vm696_vm7, %v693_v18, %v575_v50  ;;  %v673_v43 = vsel %vm669_vm4, %v664_v41, %v1381_v49  ;;  %v676_v49 = vsel %vm669_vm4, %v1373_v39, %v1379_v48 }
  0xd3   : > { %v505_v51 = vpop.permute.xlu0 %504  ;;  %v605_v37 = vpop.permute.xlu1 %604 }
  0xd4   : > { %v710_v6 = vsel %vm705_vm8, %v701_v3, %v605_v37  ;;  %v681_v27 = vsel %vm678_vm5, %v672_v32, %v505_v51 }
  0xd7   : > { %v599_v53 = vpop.permute.xlu0 %598  ;;  %v1385_v55 = vpop.permute.xlu1 %482 }
  0xd8   : > { %v707_v11 = vsel %vm705_vm8, %v698_v10, %v599_v53 }
  0xdb   : > { %v629_v59 = vpop.permute.xlu0 %628  ;;  %v513_v60 = vpop.permute.xlu1 %512 }
  0xdc   : > { %v715_v61 = vsel %vm714_vm9, %v706_v58, %v629_v59  ;;  %v685_v54 = vsel %vm678_vm5, %v676_v49, %v513_v60  ;;  %v668_v58 = vsel %vm660_vm3, %v659_v56, %v1377_v45 }
  0xdd   : > { %1043 = vmatprep.mubr.msk.f32.mxu0 %vm728_vm10, %v715_v61  ;;  %v677_v39 = vsel %vm669_vm4, %v668_v58, %v1385_v55  ;;  %v1013_v55 = vld [vmem:[%s1485_s3] ss:$0 sm:$0xff] }
  0xdf   : > { %v507_v62 = vpop.permute.xlu0 %506  ;;  %v607_v0 = vpop.permute.xlu1 %606 }
  0xe0   : > { %v711_v22 = vsel %vm705_vm8, %v702_v19, %v607_v0  ;;  %v682_v47 = vsel %vm678_vm5, %v673_v43, %v507_v62 }
  0xe3   : > { %v537_v4 = vpop.permute.xlu0 %536  ;;  %v637_v7 = vpop.permute.xlu1 %636 }
  0xe4   : > { %v719_v9 = vsel %vm714_vm9, %v710_v6, %v637_v7  ;;  %v690_v38 = vsel %vm687_vm6, %v681_v27, %v537_v4 }
  0xe5   : > { %1049 = vmatprep.mubr.msk.f32.mxu1 %vm728_vm10, %v719_v9 }
  0xe7   : > { %v631_v12 = vpop.permute.xlu0 %630  ;;  %v515_v15 = vpop.permute.xlu1 %514 }
  0xe8   : > { %v716_v13 = vsel %vm714_vm9, %v707_v11, %v631_v12  ;;  %v686_v61 = vsel %vm678_vm5, %v677_v39, %v515_v15 }
  0xe9   : > { %1044 = vmatmul.mubr.msk.f32.vlgmr.msra.gmra.mrb[0].mxu0 %vm728_vm10, %v716_v13 }
  0xeb   : > { %v539_v14 = vpop.permute.xlu0 %538  ;;  %v545_v16 = vpop.permute.xlu1 %544 }
  0xec   : > { %v691_v44 = vsel %vm687_vm6, %v682_v47, %v539_v14  ;;  %v694_v57 = vsel %vm687_vm6, %v685_v54, %v545_v16 }
  0xef   : > { %v569_v20 = vpop.permute.xlu0 %568  ;;  %v639_v23 = vpop.permute.xlu1 %638 }
  0xf0   : > { %v720_v24 = vsel %vm714_vm9, %v711_v22, %v639_v23  ;;  %v699_v42 = vsel %vm696_vm7, %v690_v38, %v569_v20 }
  0xf1   : > { %1050 = vmatmul.mubr.msk.f32.vlgmr.msra.gmra.mrb[0].mxu1 %vm728_vm10, %v720_v24 }
  0xf3   : > { %v571_v25 = vpop.permute.xlu0 %570  ;;  %v547_v28 = vpop.permute.xlu1 %546 }
  0xf4   : > { %v700_v26 = vsel %vm696_vm7, %v691_v44, %v571_v25  ;;  %v695_v46 = vsel %vm687_vm6, %v686_v61, %v547_v28 }
  0xf7   : > { %v601_v29 = vpop.permute.xlu0 %600  ;;  %v577_v31 = vpop.permute.xlu1 %576 }
  0xf8   : > { %v708_v30 = vsel %vm705_vm8, %v699_v42, %v601_v29  ;;  %v703_v59 = vsel %vm696_vm7, %v694_v57, %v577_v31 }
  0xfb   : > { %v603_v21 = vpop.permute.xlu0 %602  ;;  %v579_v35 = vpop.permute.xlu1 %578 }
  0xfc   : > { %v709_v40 = vsel %vm705_vm8, %v700_v26, %v603_v21  ;;  %v704_v34 = vsel %vm696_vm7, %v695_v46, %v579_v35 }
  0xff   : > { %v633_v33 = vpop.permute.xlu0 %632  ;;  %v609_v51 = vpop.permute.xlu1 %608 }
 0x100   : > { %v717_v50 = vsel %vm714_vm9, %v708_v30, %v633_v33  ;;  %v712_v48 = vsel %vm705_vm8, %v703_v59, %v609_v51 }
 0x101   : > { %1046 = vmatprep.mubr.msk.f32.mxu0 %vm728_vm10, %v717_v50 }
 0x103   : > { %v635_v37 = vpop.permute.xlu0 %634  ;;  %v611_v53 = vpop.permute.xlu1 %610 }
 0x104   : > { %v718_v52 = vsel %vm714_vm9, %v709_v40, %v635_v37  ;;  %v713_v45 = vsel %vm705_vm8, %v704_v34, %v611_v53 }
 0x105   : > { %1047 = vmatmul.mubr.msk.f32.gmra.mrb[2].mxu0 %vm728_vm10, %v718_v52 }
 0x107   : > { %v641_v60 = vpop.permute.xlu1 %640 }
 0x108   : > { %v721_v62 = vsel %vm714_vm9, %v712_v48, %v641_v60 }
 0x109   : > { %1052 = vmatprep.mubr.msk.f32.mxu1 %vm728_vm10, %v721_v62 }
 0x10b   : > { %v643_v63 = vpop.permute.xlu1 %642 }
 0x10c   : > { %v722_v0 = vsel %vm714_vm9, %v713_v45, %v643_v63 }
 0x10d   : > { %1053 = vmatmul.mubr.msk.f32.gmra.mrb[2].mxu1 %vm728_vm10, %v722_v0 }
 0x1bc   : > { %v1045_v1 = vpop.f32.mrb[0].mxu0 }
 0x1bd   : > { %v870_v3 = vmul.f32 %v1045_v1, %v1013_v55  ;;  %v823_v4 = vpop.f32.mrb[1].mxu0 }
 0x1be   : > { %v869_v5 = vmul.f32 %v1013_v55, %v823_v4 }
 0x1bf   : > { %v885_v6 = vadd.f32 %v1014_v2, %v870_v3 }
 0x1c0   : > { %v884_v7 = vadd.f32 %v1014_v2, %v869_v5 }
 0x1c1   : > { %893 = vst.msk [vmem:[%s266_s7 + $0x8] sm:$0xff] %vm292_vm0, %v885_v6 }
 0x1c2   : > { %892 = vst.msk [vmem:[%s266_s7] sm:$0xff] %vm292_vm0, %v884_v7 }
 0x1c4   : > { %v1051_v8 = vpop.f32.mrb[0].mxu1 }
 0x1c5   : > { %v874_v9 = vmul.f32 %v1051_v8, %v1013_v55  ;;  %v843_v10 = vpop.f32.mrb[1].mxu1 }
 0x1c6   : > { %v873_v11 = vmul.f32 %v1013_v55, %v843_v10 }
 0x1c7   : > { %v889_v12 = vadd.f32 %v1014_v2, %v874_v9 }
 0x1c8   : > { %v888_v13 = vadd.f32 %v1014_v2, %v873_v11 }
 0x1c9   : > { %897 = vst.msk [vmem:[%s266_s7 + $0x28] sm:$0xff] %vm292_vm0, %v889_v12 }
 0x1ca   : > { %896 = vst.msk [vmem:[%s266_s7 + $0x20] sm:$0xff] %vm292_vm0, %v888_v13 }
 0x1d8   : > { %v1048_v15 = vpop.f32.mrb[2].mxu0 }
 0x1d9   : > { %v872_v14 = vmul.f32 %v1048_v15, %v1013_v55  ;;  %v833_v16 = vpop.f32.mrb[3].mxu0 }
 0x1da   : > { %v871_v17 = vmul.f32 %v1013_v55, %v833_v16 }
 0x1db   : > { %v887_v18 = vadd.f32 %v1014_v2, %v872_v14 }
 0x1dc   : > { %v886_v19 = vadd.f32 %v1014_v2, %v871_v17 }
 0x1dd   : > { %895 = vst.msk [vmem:[%s266_s7 + $0x18] sm:$0xff] %vm292_vm0, %v887_v18 }
 0x1de   : > { %894 = vst.msk [vmem:[%s266_s7 + $0x10] sm:$0xff] %vm292_vm0, %v886_v19 }
 0x1e0   : > { %v1054_v20 = vpop.f32.mrb[2].mxu1 }
 0x1e1   : > { %v876_v22 = vmul.f32 %v1054_v20, %v1013_v55  ;;  %v853_v23 = vpop.f32.mrb[3].mxu1 }
 0x1e2   : > { %v875_v24 = vmul.f32 %v1013_v55, %v853_v23 }
 0x1e3   : > { %v891_v25 = vadd.f32 %v1014_v2, %v876_v22 }
 0x1e4   : > { %v890_v28 = vadd.f32 %v1014_v2, %v875_v24 }
 0x1e5   : > { %899 = vst.msk [vmem:[%s266_s7 + $0x38] sm:$0xff] %vm292_vm0, %v891_v25 }
 0x1e6   : > { %898 = vst.msk [vmem:[%s266_s7 + $0x30] sm:$0xff] %vm292_vm0, %v890_v28 }
 0x1e7 PF: > { %s15_s20 = sadd.s32 1, %s1124_s20   ;;  %s1488_s18 = smov %s1120_s19 }
 0x1e8   : > { %p12_p5 = scmp.ge.s32.totalorder %s15_s20, 4   ;;  %s1489_s19 = smov %s1491_s21 }
 0x1ea   :  { %14 = sbr.rel (!%p12_p5) target bundleno = 2 (0x2), region = 75 }

// kernel: usrm3_forward.15
= control target key start
LH: loop header
LB: loop body
LE: loop exit
PB: predicated region body
PF: predicated region fallthrough
CT: control target
= control target key end

     0   :  { %s2878_s18 = smov 0   ;;  %s2880_s19 = smov 0   ;;  %s4461_s0 = inlined_call_operand.vmem [shape: f32[2,16,16,4], index: 0, kind: input, shape index: {}]   ;;  %s4462_s1 = inlined_call_operand.vmem [shape: f32[2,16,16,4], index: 1, kind: input, shape index: {}]   ;;  %s4463_s2 = inlined_call_operand.vmem [shape: f32[36,4], index: 2, kind: input, shape index: {}]   ;;  %s4464_s3 = inlined_call_operand.vmem [shape: f32[1,4], index: 3, kind: input, shape index: {}]   ;;  %s4465_s4 = inlined_call_operand.vmem [shape: f32[1,4], index: 4, kind: input, shape index: {}]   ;;  %s4466_s5 = inlined_call_operand.vmem [shape: f32[2,16,16,4], index: 5, kind: output, shape index: {}]  }
   0x1   :  { %s2882_s20 = smov 0  }
   0x2 LB: > { %s27_s21 = sadd.s32 1, %s2833_s19  ;;  %p2607_p0 = scmp.ge.s32.totalorder %s2837_s20, 1  ;;  %s2837_s20 = sphi %s2882_s20, %s15_s20   ;;  %s2833_s19 = sphi %s2880_s19, %s4618_s19   ;;  %s2829_s18 = sphi %s2878_s18, %s4617_s18  }
   0x3   : > { %p29_p1 = scmp.ge.s32.totalorder %s27_s21, 2  ;;  %p211_p2 = scmp.lt.s32.totalorder %s2837_s20, 3 }
   0x5   : > { %s4620_s21 = smov (%p29_p1, %s27_s21), 0  ;;  %p212_p3 = pnand %p2607_p0, %p211_p2 }
   0x7   : > { %215 = sbr.rel (%p212_p3) target bundleno = 893 (0x37d), region = 40 }
   0xe   : > { %vm398_vm0 = vcmask 31744   ;;  %vm401_vm1 = vcmask 25600   ;;  %p249_p4 = scmp.lt.s32.totalorder %s2829_s18, 1  ;;  %v2839_v0 = vmov 0.0   ;;  %s2840_s29 = smov 4   ;;  %vm2165_vm2 = vcmask 1043456  }
   0xf   : > { %399 = vst.msk [vmem:[#allocation2] sm:$0xff] %vm398_vm0, %v2839_v0  ;;  %400 = vst.msk [vmem:[#allocation2 + $0x8] sm:$0xff] %vm398_vm0, %v2839_v0  ;;  %s2841_s30 = smov 8   ;;  %s2842_s6 = smov 12   ;;  %vm1832_vm3 = vcmask 64512   ;;  %vm1865_vm4 = vcmask 97280  }
  0x10   : > { %403 = vst.msk [vmem:[#allocation2 + $0x18] sm:$0xff] %vm398_vm0, %v2839_v0  ;;  %404 = vst.msk [vmem:[#allocation2 + $0x20] sm:$0xff] %vm398_vm0, %v2839_v0  ;;  %s4622_s18 = smov (!%p249_p4, %s2829_s18), 1  ;;  %s2843_s7 = smov 16   ;;  %vm1898_vm5 = vcmask 130048   ;;  %vm1931_vm6 = vcmask 162816  }
  0x11   : > { %406 = vst.msk [vmem:[#allocation2 + $0x30] sm:$0xff] %vm398_vm0, %v2839_v0  ;;  %407 = vst.msk [vmem:[#allocation2 + $0x38] sm:$0xff] %vm398_vm0, %v2839_v0  ;;  %s2956_s22 = sshll.u32 %s4622_s18, 8  ;;  %s2844_s8 = smov 20   ;;  %vm1964_vm7 = vcmask 195584   ;;  %vm2030_vm8 = vcmask 261120  }
  0x12   : > { %409 = vst.msk [vmem:[#allocation2 + $0x48] sm:$0xff] %vm398_vm0, %v2839_v0  ;;  %410 = vst.msk [vmem:[#allocation2 + $0x50] sm:$0xff] %vm398_vm0, %v2839_v0  ;;  %s2962_s25 = scalar_lea.vmem %s4461_s0, %s2956_s22  ;;  %s2968_s28 = scalar_lea.vmem %s4462_s1, %s2956_s22  ;;  %vm1997_vm9 = vcmask 228352   ;;  %vm2068_vm10 = vcmask 293888  }
  0x13   : > { %412 = vst.msk [vmem:[#allocation2 + $0x60] sm:$0xff] %vm398_vm0, %v2839_v0  ;;  %413 = vst.msk [vmem:[#allocation2 + $0x68] sm:$0xff] %vm398_vm0, %v2839_v0  ;;  %v272_v1 = vld [vmem:[%s2962_s25 + $0x10] sm:$0xff]  ;;  %v270_v3 = vld [vmem:[%s2962_s25] sm:$0xff]  ;;  %s2845_s9 = smov 24   ;;  %s2846_s14 = smov 28  }
  0x14   : > { %415 = vst.msk [vmem:[#allocation2 + $0x78] sm:$0xff] %vm398_vm0, %v2839_v0  ;;  %416 = vst.msk [vmem:[#allocation2 + $0x80] sm:$0xff] %vm398_vm0, %v2839_v0  ;;  %v304_v2 = vld [vmem:[%s2968_s28 + $0x10] sm:$0xff]  ;;  %v302_v5 = vld [vmem:[%s2968_s28] sm:$0xff] }
  0x15   : > { %418 = vst.msk [vmem:[#allocation2 + $0x90] sm:$0xff] %vm398_vm0, %v2839_v0  ;;  %419 = vst.msk [vmem:[#allocation2 + $0x98] sm:$0xff] %vm398_vm0, %v2839_v0  ;;  %v336_v4 = vadd.f32 %v304_v2, %v272_v1  ;;  %v274_v6 = vld [vmem:[%s2962_s25 + $0x20] sm:$0xff]  ;;  %v334_v10 = vadd.f32 %v302_v5, %v270_v3  ;;  %v271_v12 = vld [vmem:[%s2962_s25 + $0x8] sm:$0xff] }
  0x16   : > { %421 = vst.msk [vmem:[#allocation2 + $0xa8] sm:$0xff] %vm398_vm0, %v2839_v0  ;;  %422 = vst.msk [vmem:[#allocation2 + $0xb0] sm:$0xff] %vm398_vm0, %v2839_v0  ;;  %v306_v7 = vld [vmem:[%s2968_s28 + $0x20] sm:$0xff]  ;;  %v303_v14 = vld [vmem:[%s2968_s28 + $0x8] sm:$0xff] }
  0x17   : > { %424 = vst.msk [vmem:[#allocation2 + $0xc0] sm:$0xff] %vm398_vm0, %v2839_v0  ;;  %425 = vst.msk [vmem:[#allocation2 + $0xc8] sm:$0xff] %vm398_vm0, %v2839_v0  ;;  %v519_v8 = vld [vmem:[#allocation2 + $0x1] sm:$0xff]  ;;  %v338_v11 = vadd.f32 %v306_v7, %v274_v6  ;;  %v368_v13 = vmax.f32 %v336_v4, 0.0  ;;  %v276_v15 = vld [vmem:[%s2962_s25 + $0x30] sm:$0xff]  ;;  %v366_v17 = vmax.f32 %v334_v10, 0.0  ;;  %v335_v19 = vadd.f32 %v303_v14, %v271_v12 }
  0x18   : > { %427 = vst.msk [vmem:[#allocation2 + $0xd8] sm:$0xff] %vm398_vm0, %v2839_v0  ;;  %428 = vst.msk [vmem:[#allocation2 + $0xe0] sm:$0xff] %vm398_vm0, %v2839_v0  ;;  %808 = vrot.lane.b32.xlu0 %v519_v8, %s2840_s29  ;;  %v308_v16 = vld [vmem:[%s2968_s28 + $0x30] sm:$0xff]  ;;  %v273_v21 = vld [vmem:[%s2962_s25 + $0x18] sm:$0xff] }
  0x19   : > { %430 = vst.msk [vmem:[#allocation2 + $0xf0] sm:$0xff] %vm398_vm0, %v2839_v0  ;;  %431 = vst.msk [vmem:[#allocation2 + $0xf8] sm:$0xff] %vm398_vm0, %v2839_v0  ;;  %v370_v18 = vmax.f32 %v338_v11, 0.0  ;;  %v340_v20 = vadd.f32 %v308_v16, %v276_v15  ;;  %v305_v22 = vld [vmem:[%s2968_s28 + $0x18] sm:$0xff]  ;;  %v278_v23 = vld [vmem:[%s2962_s25 + $0x40] sm:$0xff]  ;;  %v367_v28 = vmax.f32 %v335_v19, 0.0 }
  0x1a   : > { %433 = vst.msk [vmem:[#allocation2 + $0x108] sm:$0xff] %vm398_vm0, %v2839_v0  ;;  %434 = vst.msk [vmem:[#allocation2 + $0x110] sm:$0xff] %vm398_vm0, %v2839_v0  ;;  %v337_v24 = vadd.f32 %v305_v22, %v273_v21  ;;  %v310_v25 = vld [vmem:[%s2968_s28 + $0x40] sm:$0xff]  ;;  %v275_v26 = vld [vmem:[%s2962_s25 + $0x28] sm:$0xff] }
  0x1b   : > { %436 = vst.msk [vmem:[#allocation2 + $0x120] sm:$0xff] %vm398_vm0, %v2839_v0  ;;  %437 = vst.msk [vmem:[#allocation2 + $0x128] sm:$0xff] %vm398_vm0, %v2839_v0  ;;  %v307_v27 = vld [vmem:[%s2968_s28 + $0x28] sm:$0xff]  ;;  %v372_v29 = vmax.f32 %v340_v20, 0.0  ;;  %v342_v30 = vadd.f32 %v310_v25, %v278_v23  ;;  %v280_v32 = vld [vmem:[%s2962_s25 + $0x50] sm:$0xff] }
  0x1c   : > { %439 = vst.msk [vmem:[#allocation2 + $0x138] sm:$0xff] %vm398_vm0, %v2839_v0  ;;  %440 = vst.msk [vmem:[#allocation2 + $0x140] sm:$0xff] %vm398_vm0, %v2839_v0  ;;  %v339_v31 = vadd.f32 %v307_v27, %v275_v26  ;;  %v312_v33 = vld [vmem:[%s2968_s28 + $0x50] sm:$0xff]  ;;  %v277_v34 = vld [vmem:[%s2962_s25 + $0x38] sm:$0xff]  ;;  %v369_v35 = vmax.f32 %v337_v24, 0.0 }
  0x1d   : > { %442 = vst.msk [vmem:[#allocation2 + $0x150] sm:$0xff] %vm398_vm0, %v2839_v0  ;;  %443 = vst.msk [vmem:[#allocation2 + $0x158] sm:$0xff] %vm398_vm0, %v2839_v0  ;;  %v344_v36 = vadd.f32 %v312_v33, %v280_v32  ;;  %v309_v37 = vld [vmem:[%s2968_s28 + $0x38] sm:$0xff]  ;;  %v282_v38 = vld [vmem:[%s2962_s25 + $0x60] sm:$0xff]  ;;  %v374_v40 = vmax.f32 %v342_v30, 0.0 }
  0x1e   : > { %445 = vst.msk [vmem:[#allocation2 + $0x168] sm:$0xff] %vm398_vm0, %v2839_v0  ;;  %446 = vst.msk [vmem:[#allocation2 + $0x170] sm:$0xff] %vm398_vm0, %v2839_v0  ;;  %v314_v39 = vld [vmem:[%s2968_s28 + $0x60] sm:$0xff]  ;;  %v371_v41 = vmax.f32 %v339_v31, 0.0  ;;  %v341_v42 = vadd.f32 %v309_v37, %v277_v34  ;;  %v279_v44 = vld [vmem:[%s2962_s25 + $0x48] sm:$0xff] }
  0x1f   : > { %448 = vst.msk [vmem:[#allocation2 + $0x180] sm:$0xff] %vm398_vm0, %v2839_v0  ;;  %449 = vst.msk [vmem:[#allocation2 + $0x188] sm:$0xff] %vm398_vm0, %v2839_v0  ;;  %v346_v43 = vadd.f32 %v314_v39, %v282_v38  ;;  %v311_v45 = vld [vmem:[%s2968_s28 + $0x48] sm:$0xff]  ;;  %v284_v46 = vld [vmem:[%s2962_s25 + $0x70] sm:$0xff]  ;;  %v376_v47 = vmax.f32 %v344_v36, 0.0 }
  0x20   : > { %451 = vst.msk [vmem:[#allocation2 + $0x198] sm:$0xff] %vm398_vm0, %v2839_v0  ;;  %452 = vst.msk [vmem:[#allocation2 + $0x1a0] sm:$0xff] %vm398_vm0, %v2839_v0  ;;  %v343_v48 = vadd.f32 %v311_v45, %v279_v44  ;;  %v316_v49 = vld [vmem:[%s2968_s28 + $0x70] sm:$0xff]  ;;  %v281_v50 = vld [vmem:[%s2962_s25 + $0x58] sm:$0xff]  ;;  %v373_v52 = vmax.f32 %v341_v42, 0.0 }
  0x21   : > { %402 = vst.msk [vmem:[#allocation2 + $0x10] sm:$0x3] %vm401_vm1, %v2839_v0  ;;  %405 = vst.msk [vmem:[#allocation2 + $0x28] sm:$0x3] %vm401_vm1, %v2839_v0  ;;  %v313_v51 = vld [vmem:[%s2968_s28 + $0x58] sm:$0xff]  ;;  %v378_v53 = vmax.f32 %v346_v43, 0.0  ;;  %v348_v54 = vadd.f32 %v316_v49, %v284_v46 }
  0x22   : > { %408 = vst.msk [vmem:[#allocation2 + $0x40] sm:$0x3] %vm401_vm1, %v2839_v0  ;;  %411 = vst.msk [vmem:[#allocation2 + $0x58] sm:$0x3] %vm401_vm1, %v2839_v0  ;;  %v345_v55 = vadd.f32 %v313_v51, %v281_v50  ;;  %v286_v56 = vld [vmem:[%s2962_s25 + $0x80] sm:$0xff]  ;;  %v283_v58 = vld [vmem:[%s2962_s25 + $0x68] sm:$0xff] }
  0x23   : > { %414 = vst.msk [vmem:[#allocation2 + $0x70] sm:$0x3] %vm401_vm1, %v2839_v0  ;;  %417 = vst.msk [vmem:[#allocation2 + $0x88] sm:$0x3] %vm401_vm1, %v2839_v0  ;;  %v318_v57 = vld [vmem:[%s2968_s28 + $0x80] sm:$0xff]  ;;  %v375_v59 = vmax.f32 %v343_v48, 0.0 }
  0x24   : > { %420 = vst.msk [vmem:[#allocation2 + $0xa0] sm:$0x3] %vm401_vm1, %v2839_v0  ;;  %423 = vst.msk [vmem:[#allocation2 + $0xb8] sm:$0x3] %vm401_vm1, %v2839_v0  ;;  %v350_v60 = vadd.f32 %v318_v57, %v286_v56  ;;  %v315_v61 = vld [vmem:[%s2968_s28 + $0x68] sm:$0xff]  ;;  %v288_v62 = vld [vmem:[%s2962_s25 + $0x90] sm:$0xff] }
  0x25   : > { %426 = vst.msk [vmem:[#allocation2 + $0xd0] sm:$0x3] %vm401_vm1, %v2839_v0  ;;  %429 = vst.msk [vmem:[#allocation2 + $0xe8] sm:$0x3] %vm401_vm1, %v2839_v0  ;;  %v320_v63 = vld [vmem:[%s2968_s28 + $0x90] sm:$0xff]  ;;  %v380_v1 = vmax.f32 %v348_v54, 0.0  ;;  %v347_v3 = vadd.f32 %v315_v61, %v283_v58 }
  0x26   : > { %432 = vst.msk [vmem:[#allocation2 + $0x100] sm:$0x3] %vm401_vm1, %v2839_v0  ;;  %435 = vst.msk [vmem:[#allocation2 + $0x118] sm:$0x3] %vm401_vm1, %v2839_v0  ;;  %v377_v2 = vmax.f32 %v345_v55, 0.0  ;;  %v352_v4 = vadd.f32 %v320_v63, %v288_v62  ;;  %v285_v5 = vld [vmem:[%s2962_s25 + $0x78] sm:$0xff] }
  0x27   : > { %438 = vst.msk [vmem:[#allocation2 + $0x130] sm:$0x3] %vm401_vm1, %v2839_v0  ;;  %441 = vst.msk [vmem:[#allocation2 + $0x148] sm:$0x3] %vm401_vm1, %v2839_v0  ;;  %v317_v6 = vld [vmem:[%s2968_s28 + $0x78] sm:$0xff]  ;;  %v290_v11 = vld [vmem:[%s2962_s25 + $0xa0] sm:$0xff] }
  0x28   : > { %444 = vst.msk [vmem:[#allocation2 + $0x160] sm:$0x3] %vm401_vm1, %v2839_v0  ;;  %447 = vst.msk [vmem:[#allocation2 + $0x178] sm:$0x3] %vm401_vm1, %v2839_v0  ;;  %v520_v9 = vld [vmem:[#allocation2 + $0x9] sm:$0xff]  ;;  %v349_v10 = vadd.f32 %v317_v6, %v285_v5  ;;  %v379_v12 = vmax.f32 %v347_v3, 0.0 }
  0x29   : > { %450 = vst.msk [vmem:[#allocation2 + $0x190] sm:$0x3] %vm401_vm1, %v2839_v0  ;;  %453 = vst.msk [vmem:[#allocation2 + $0x1a8] sm:$0x3] %vm401_vm1, %v2839_v0  ;;  %810 = vrot.lane.b32.xlu0 %v520_v9, %s2840_s29  ;;  %v382_v9 = vmax.f32 %v350_v60, 0.0  ;;  %v322_v14 = vld [vmem:[%s2968_s28 + $0xa0] sm:$0xff] }
  0x2a   : > { %457 = vst.msk [vmem:[#allocation2 + $0x31] sm:$0xff] %vm398_vm0, %v368_v13  ;;  %455 = vst.msk [vmem:[#allocation2 + $0x19] sm:$0xff] %vm398_vm0, %v366_v17  ;;  %v384_v13 = vmax.f32 %v352_v4, 0.0  ;;  %v287_v15 = vld [vmem:[%s2962_s25 + $0x88] sm:$0xff]  ;;  %v354_v19 = vadd.f32 %v322_v14, %v290_v11  ;;  %v292_v21 = vld [vmem:[%s2962_s25 + $0xb0] sm:$0xff] }
  0x2b   : > { %459 = vst.msk [vmem:[#allocation2 + $0x49] sm:$0xff] %vm398_vm0, %v370_v18  ;;  %456 = vst.msk [vmem:[#allocation2 + $0x21] sm:$0xff] %vm398_vm0, %v367_v28  ;;  %v319_v16 = vld [vmem:[%s2968_s28 + $0x88] sm:$0xff]  ;;  %v381_v18 = vmax.f32 %v349_v10, 0.0  ;;  %v324_v22 = vld [vmem:[%s2968_s28 + $0xb0] sm:$0xff] }
  0x2c   : > { %461 = vst.msk [vmem:[#allocation2 + $0x61] sm:$0xff] %vm398_vm0, %v372_v29  ;;  %458 = vst.msk [vmem:[#allocation2 + $0x39] sm:$0xff] %vm398_vm0, %v369_v35  ;;  %v351_v20 = vadd.f32 %v319_v16, %v287_v15  ;;  %v289_v23 = vld [vmem:[%s2962_s25 + $0x98] sm:$0xff]  ;;  %v386_v24 = vmax.f32 %v354_v19, 0.0  ;;  %v356_v26 = vadd.f32 %v324_v22, %v292_v21  ;;  %v294_v30 = vld [vmem:[%s2962_s25 + $0xc0] sm:$0xff] }
  0x2d   : > { %463 = vst.msk [vmem:[#allocation2 + $0x79] sm:$0xff] %vm398_vm0, %v374_v40  ;;  %460 = vst.msk [vmem:[#allocation2 + $0x51] sm:$0xff] %vm398_vm0, %v371_v41  ;;  %v321_v27 = vld [vmem:[%s2968_s28 + $0x98] sm:$0xff]  ;;  %v326_v31 = vld [vmem:[%s2968_s28 + $0xc0] sm:$0xff] }
  0x2e   : > { %465 = vst.msk [vmem:[#allocation2 + $0x91] sm:$0xff] %vm398_vm0, %v376_v47  ;;  %462 = vst.msk [vmem:[#allocation2 + $0x69] sm:$0xff] %vm398_vm0, %v373_v52  ;;  %v383_v25 = vmax.f32 %v351_v20, 0.0  ;;  %v353_v29 = vadd.f32 %v321_v27, %v289_v23  ;;  %v388_v33 = vmax.f32 %v356_v26, 0.0  ;;  %v358_v34 = vadd.f32 %v326_v31, %v294_v30  ;;  %v291_v35 = vld [vmem:[%s2962_s25 + $0xa8] sm:$0xff]  ;;  %v296_v38 = vld [vmem:[%s2962_s25 + $0xd0] sm:$0xff] }
  0x2f   : > { %467 = vst.msk [vmem:[#allocation2 + $0xa9] sm:$0xff] %vm398_vm0, %v378_v53  ;;  %464 = vst.msk [vmem:[#allocation2 + $0x81] sm:$0xff] %vm398_vm0, %v375_v59  ;;  %v323_v37 = vld [vmem:[%s2968_s28 + $0xa8] sm:$0xff]  ;;  %v328_v41 = vld [vmem:[%s2968_s28 + $0xd0] sm:$0xff] }
  0x30   : > { %469 = vst.msk [vmem:[#allocation2 + $0xc1] sm:$0xff] %vm398_vm0, %v380_v1  ;;  %466 = vst.msk [vmem:[#allocation2 + $0x99] sm:$0xff] %vm398_vm0, %v377_v2  ;;  %v385_v36 = vmax.f32 %v353_v29, 0.0  ;;  %v390_v39 = vmax.f32 %v358_v34, 0.0  ;;  %v355_v40 = vadd.f32 %v323_v37, %v291_v35  ;;  %v360_v43 = vadd.f32 %v328_v41, %v296_v38  ;;  %v293_v44 = vld [vmem:[%s2962_s25 + $0xb8] sm:$0xff]  ;;  %v298_v49 = vld [vmem:[%s2962_s25 + $0xe0] sm:$0xff] }
  0x31   : > { %v3015_v0 = vld [vmem:[#allocation2 + $0x31] sm:$0xff]  ;;  %v3023_v7 = vld [vmem:[#allocation2 + $0x19] sm:$0xff]  ;;  %471 = vst.msk [vmem:[#allocation2 + $0xd9] sm:$0xff] %vm398_vm0, %v382_v9  ;;  %468 = vst.msk [vmem:[#allocation2 + $0xb1] sm:$0xff] %vm398_vm0, %v379_v12 }
  0x32   : > { %816 = vrot.lane.b32.xlu0 %v3015_v0, %s2840_s29  ;;  %v3025_v8 = vld [vmem:[#allocation2 + $0x49] sm:$0xff]  ;;  %812 = vrot.lane.b32.xlu1 %v3023_v7, %s2840_s29  ;;  %v3036_v17 = vld [vmem:[#allocation2 + $0x21] sm:$0xff]  ;;  %473 = vst.msk [vmem:[#allocation2 + $0xf1] sm:$0xff] %vm398_vm0, %v384_v13  ;;  %470 = vst.msk [vmem:[#allocation2 + $0xc9] sm:$0xff] %vm398_vm0, %v381_v18  ;;  %v387_v47 = vmax.f32 %v355_v40, 0.0  ;;  %v392_v50 = vmax.f32 %v360_v43, 0.0 }
  0x33   : > { %v527_v28 = vld [vmem:[#allocation2 + $0x61] sm:$0xff]  ;;  %v3052_v32 = vld [vmem:[#allocation2 + $0x39] sm:$0xff]  ;;  %475 = vst.msk [vmem:[#allocation2 + $0x109] sm:$0xff] %vm398_vm0, %v386_v24  ;;  %472 = vst.msk [vmem:[#allocation2 + $0xe1] sm:$0xff] %vm398_vm0, %v383_v25 }
  0x34   : > { %477 = vst.msk [vmem:[#allocation2 + $0x121] sm:$0xff] %vm398_vm0, %v388_v33  ;;  %v529_v42 = vld [vmem:[#allocation2 + $0x79] sm:$0xff]  ;;  %474 = vst.msk [vmem:[#allocation2 + $0xf9] sm:$0xff] %vm398_vm0, %v385_v36  ;;  %v3067_v46 = vld [vmem:[#allocation2 + $0x51] sm:$0xff] }
  0x35   : > { %v325_v45 = vld [vmem:[%s2968_s28 + $0xb8] sm:$0xff]  ;;  %479 = vst.msk [vmem:[#allocation2 + $0x139] sm:$0xff] %vm398_vm0, %v390_v39  ;;  %v330_v51 = vld [vmem:[%s2968_s28 + $0xe0] sm:$0xff]  ;;  %v295_v52 = vld [vmem:[%s2962_s25 + $0xc8] sm:$0xff] }
  0x36   : > { %820 = vrot.lane.b32.xlu0 %v3025_v8, %s2840_s29  ;;  %814 = vrot.lane.b32.xlu1 %v3036_v17, %s2840_s29  ;;  %v357_v48 = vadd.f32 %v325_v45, %v293_v44  ;;  %476 = vst.msk [vmem:[#allocation2 + $0x111] sm:$0xff] %vm398_vm0, %v387_v47  ;;  %v362_v54 = vadd.f32 %v330_v51, %v298_v49  ;;  %v327_v55 = vld [vmem:[%s2968_s28 + $0xc8] sm:$0xff]  ;;  %v297_v56 = vld [vmem:[%s2962_s25 + $0xd8] sm:$0xff]  ;;  %481 = vst.msk [vmem:[#allocation2 + $0x151] sm:$0xff] %vm398_vm0, %v392_v50 }
  0x37   : > { %v531_v57 = vld [vmem:[#allocation2 + $0x91] sm:$0xff]  ;;  %v359_v58 = vadd.f32 %v327_v55, %v295_v52  ;;  %v528_v60 = vld [vmem:[#allocation2 + $0x69] sm:$0xff]  ;;  %v530_v9 = vld [vmem:[#allocation2 + $0x81] sm:$0xff] }
  0x38   : > { %v389_v53 = vmax.f32 %v357_v48, 0.0  ;;  %v329_v59 = vld [vmem:[%s2968_s28 + $0xd8] sm:$0xff]  ;;  %v394_v61 = vmax.f32 %v362_v54, 0.0  ;;  %v299_v63 = vld [vmem:[%s2962_s25 + $0xe8] sm:$0xff]  ;;  %v300_v21 = vld [vmem:[%s2962_s25 + $0xf0] sm:$0xff] }
  0x39   : > { %v361_v62 = vadd.f32 %v329_v59, %v297_v56  ;;  %v331_v1 = vld [vmem:[%s2968_s28 + $0xe8] sm:$0xff]  ;;  %v391_v2 = vmax.f32 %v359_v58, 0.0  ;;  %v532_v11 = vld [vmem:[#allocation2 + $0x99] sm:$0xff]  ;;  %v534_v13 = vld [vmem:[#allocation2 + $0xb1] sm:$0xff] }
  0x3a   : > { %824 = vrot.lane.b32.xlu0 %v527_v28, %s2840_s29  ;;  %818 = vrot.lane.b32.xlu1 %v3052_v32, %s2840_s29  ;;  %478 = vst.msk [vmem:[#allocation2 + $0x129] sm:$0xff] %vm398_vm0, %v389_v53  ;;  %v363_v3 = vadd.f32 %v331_v1, %v299_v63  ;;  %483 = vst.msk [vmem:[#allocation2 + $0x169] sm:$0xff] %vm398_vm0, %v394_v61  ;;  %v533_v5 = vld [vmem:[#allocation2 + $0xa9] sm:$0xff]  ;;  %v535_v10 = vld [vmem:[#allocation2 + $0xc1] sm:$0xff] }
  0x3b   : > { %v393_v4 = vmax.f32 %v361_v62, 0.0  ;;  %480 = vst.msk [vmem:[#allocation2 + $0x141] sm:$0xff] %vm398_vm0, %v391_v2  ;;  %v3094_v12 = vld [vmem:[#allocation2 + $0xd9] sm:$0xff]  ;;  %v3099_v14 = vld [vmem:[#allocation2 + $0xf1] sm:$0xff]  ;;  %v536_v15 = vld [vmem:[#allocation2 + $0xc9] sm:$0xff] }
  0x3c   : > { %v395_v6 = vmax.f32 %v363_v3, 0.0  ;;  %v3104_v16 = vld [vmem:[#allocation2 + $0x109] sm:$0xff]  ;;  %v3106_v18 = vld [vmem:[#allocation2 + $0xe1] sm:$0xff]  ;;  %v3112_v20 = vld [vmem:[#allocation2 + $0xf9] sm:$0xff] }
  0x3d   : > { %482 = vst.msk [vmem:[#allocation2 + $0x159] sm:$0xff] %vm398_vm0, %v393_v4  ;;  %v543_v19 = vld [vmem:[#allocation2 + $0x121] sm:$0xff]  ;;  %v332_v22 = vld [vmem:[%s2968_s28 + $0xf0] sm:$0xff]  ;;  %v545_v23 = vld [vmem:[#allocation2 + $0x139] sm:$0xff] }
  0x3e   : > { %828 = vrot.lane.b32.xlu0 %v529_v42, %s2840_s29  ;;  %822 = vrot.lane.b32.xlu1 %v3067_v46, %s2840_s29  ;;  %484 = vst.msk [vmem:[#allocation2 + $0x171] sm:$0xff] %vm398_vm0, %v395_v6  ;;  %v364_v24 = vadd.f32 %v332_v22, %v300_v21  ;;  %v3119_v25 = vld [vmem:[#allocation2 + $0x111] sm:$0xff]  ;;  %v551_v36 = vld [vmem:[#allocation2 + $0x2] sm:$0xff]  ;;  %v3134_v38 = vld [vmem:[#allocation2 + $0x1a] sm:$0xff] }
  0x3f   : > { %v547_v27 = vld [vmem:[#allocation2 + $0x151] sm:$0xff]  ;;  %v3146_v43 = vld [vmem:[#allocation2 + $0x22] sm:$0xff]  ;;  %v3154_v45 = vld [vmem:[#allocation2 + $0x3a] sm:$0xff] }
  0x40   : > { %v396_v26 = vmax.f32 %v364_v24, 0.0  ;;  %v301_v29 = vld [vmem:[%s2962_s25 + $0xf8] sm:$0xff]  ;;  %v552_v41 = vld [vmem:[#allocation2 + $0xa] sm:$0xff]  ;;  %v3152_v44 = vld [vmem:[#allocation2 + $0x62] sm:$0xff]  ;;  %s2847_s25 = smov 32  }
  0x41   : > { %v544_v28 = vld [vmem:[#allocation2 + $0x129] sm:$0xff]  ;;  %v333_v30 = vld [vmem:[%s2968_s28 + $0xf8] sm:$0xff] }
  0x42   : > { %832 = vrot.lane.b32.xlu0 %v531_v57, %s2840_s29  ;;  %826 = vrot.lane.b32.xlu1 %v528_v60, %s2840_s29  ;;  %485 = vst.msk [vmem:[#allocation2 + $0x181] sm:$0xff] %vm398_vm0, %v396_v26  ;;  %v549_v31 = vld [vmem:[#allocation2 + $0x169] sm:$0xff]  ;;  %v365_v33 = vadd.f32 %v333_v30, %v301_v29  ;;  %v546_v34 = vld [vmem:[#allocation2 + $0x141] sm:$0xff]  ;;  %v3139_v40 = vld [vmem:[#allocation2 + $0x32] sm:$0xff] }
  0x43   : > { %v3144_v42 = vld [vmem:[#allocation2 + $0x4a] sm:$0xff]  ;;  %v561_v47 = vld [vmem:[#allocation2 + $0x7a] sm:$0xff]  ;;  %v3160_v48 = vld [vmem:[#allocation2 + $0x52] sm:$0xff] }
  0x44   : > { %v397_v35 = vmax.f32 %v365_v33, 0.0  ;;  %v548_v37 = vld [vmem:[#allocation2 + $0x159] sm:$0xff]  ;;  %v3165_v50 = vld [vmem:[#allocation2 + $0x6a] sm:$0xff]  ;;  %v562_v52 = vld [vmem:[#allocation2 + $0x82] sm:$0xff] }
  0x45   : > { %v550_v39 = vld [vmem:[#allocation2 + $0x171] sm:$0xff]  ;;  %v567_v53 = vld [vmem:[#allocation2 + $0xc2] sm:$0xff]  ;;  %v564_v54 = vld [vmem:[#allocation2 + $0x9a] sm:$0xff] }
  0x46   : > { %836 = vrot.lane.b32.xlu0 %v533_v5, %s2840_s29  ;;  %830 = vrot.lane.b32.xlu1 %v530_v9, %s2840_s29  ;;  %486 = vst.msk [vmem:[#allocation2 + $0x189] sm:$0xff] %vm398_vm0, %v397_v35  ;;  %v563_v49 = vld [vmem:[#allocation2 + $0x92] sm:$0xff]  ;;  %v565_v51 = vld [vmem:[#allocation2 + $0xaa] sm:$0xff]  ;;  %v3174_v55 = vld [vmem:[#allocation2 + $0xda] sm:$0xff] }
  0x47   : > { %v566_v56 = vld [vmem:[#allocation2 + $0xb2] sm:$0xff]  ;;  %v568_v58 = vld [vmem:[#allocation2 + $0xca] sm:$0xff]  ;;  %v3186_v60 = vld [vmem:[#allocation2 + $0xe2] sm:$0xff] }
  0x48   : > { %v3179_v57 = vld [vmem:[#allocation2 + $0xf2] sm:$0xff]  ;;  %v3184_v59 = vld [vmem:[#allocation2 + $0x10a] sm:$0xff]  ;;  %v3192_v61 = vld [vmem:[#allocation2 + $0x122] sm:$0xff] }
  0x49   : > { %v3194_v62 = vld [vmem:[#allocation2 + $0xfa] sm:$0xff]  ;;  %v3202_v2 = vld [vmem:[#allocation2 + $0x112] sm:$0xff]  ;;  %v3209_v5 = vld [vmem:[#allocation2 + $0x12a] sm:$0xff] }
  0x4a   : > { %840 = vrot.lane.b32.xlu0 %v535_v10, %s2840_s29  ;;  %834 = vrot.lane.b32.xlu1 %v532_v11, %s2840_s29  ;;  %v577_v1 = vld [vmem:[#allocation2 + $0x13a] sm:$0xff]  ;;  %v579_v4 = vld [vmem:[#allocation2 + $0x152] sm:$0xff]  ;;  %v581_v6 = vld [vmem:[#allocation2 + $0x16a] sm:$0xff] }
  0x4b   : > { %v578_v10 = vld [vmem:[#allocation2 + $0x142] sm:$0xff]  ;;  %v3228_v22 = vld [vmem:[#allocation2 + $0x30] sm:$0xff]  ;;  %v3256_v35 = vld [vmem:[#allocation2 + $0x38] sm:$0xff] }
  0x4c   : > { %v582_v24 = vld [vmem:[#allocation2 + $0x172] sm:$0xff]  ;;  %v3244_v30 = vld [vmem:[#allocation2 + $0x20] sm:$0xff] }
  0x4d   : > { %4479 = vst [vmem:[#allocation11_spill] sm:$0xff] %v3244_v30 }
  0x4e   : > { %844 = vrot.lane.b32.xlu0 %v3094_v12, %s2840_s29  ;;  %838 = vrot.lane.b32.xlu1 %v534_v13, %s2840_s29 }
  0x52   : > { %848 = vrot.lane.b32.xlu0 %v3099_v14, %s2840_s29  ;;  %842 = vrot.lane.b32.xlu1 %v536_v15, %s2840_s29  ;;  %v580_v15 = vld [vmem:[#allocation2 + $0x15a] sm:$0xff] }
  0x56   : > { %852 = vrot.lane.b32.xlu0 %v3104_v16, %s2840_s29  ;;  %846 = vrot.lane.b32.xlu1 %v3106_v18, %s2840_s29 }
  0x5a   : > { %856 = vrot.lane.b32.xlu0 %v543_v19, %s2840_s29  ;;  %850 = vrot.lane.b32.xlu1 %v3112_v20, %s2840_s29  ;;  %v3222_v19 = vld [vmem:[#allocation2 + $0x18] sm:$0xff] }
  0x5b   : > { %4473 = vst [vmem:[#allocation5_spill] sm:$0xff] %v3222_v19 }
  0x5e   : > { %860 = vrot.lane.b32.xlu0 %v545_v23, %s2840_s29  ;;  %854 = vrot.lane.b32.xlu1 %v3119_v25, %s2840_s29 }
  0x62   : > { %864 = vrot.lane.b32.xlu0 %v547_v27, %s2840_s29  ;;  %858 = vrot.lane.b32.xlu1 %v544_v28, %s2840_s29  ;;  %v3237_v27 = vld [vmem:[#allocation2 + $0x48] sm:$0xff] }
  0x66   : > { %868 = vrot.lane.b32.xlu0 %v549_v31, %s2840_s29  ;;  %862 = vrot.lane.b32.xlu1 %v546_v34, %s2840_s29  ;;  %v3248_v31 = vld [vmem:[#allocation2 + $0x60] sm:$0xff] }
  0x6a   : > { %936 = vrot.lane.b32.xlu0 %v551_v36, %s2841_s30  ;;  %866 = vrot.lane.b32.xlu1 %v548_v37, %s2840_s29  ;;  %v3260_v36 = vld [vmem:[#allocation2 + $0x78] sm:$0xff] }
  0x6e   : > { %940 = vrot.lane.b32.xlu0 %v3134_v38, %s2841_s30  ;;  %870 = vrot.lane.b32.xlu1 %v550_v39, %s2840_s29 }
  0x72   : > { %944 = vrot.lane.b32.xlu0 %v3139_v40, %s2841_s30  ;;  %938 = vrot.lane.b32.xlu1 %v552_v41, %s2841_s30  ;;  %v3268_v41 = vld [vmem:[#allocation2 + $0x50] sm:$0xff] }
  0x76   : > { %948 = vrot.lane.b32.xlu0 %v3144_v42, %s2841_s30  ;;  %942 = vrot.lane.b32.xlu1 %v3146_v43, %s2841_s30 }
  0x7a   : > { %952 = vrot.lane.b32.xlu0 %v3152_v44, %s2841_s30  ;;  %946 = vrot.lane.b32.xlu1 %v3154_v45, %s2841_s30 }
  0x7e   : > { %956 = vrot.lane.b32.xlu0 %v561_v47, %s2841_s30  ;;  %950 = vrot.lane.b32.xlu1 %v3160_v48, %s2841_s30  ;;  %v499_v47 = vld [vmem:[#allocation2 + $0x90] sm:$0xff] }
  0x82   : > { %960 = vrot.lane.b32.xlu0 %v563_v49, %s2841_s30  ;;  %954 = vrot.lane.b32.xlu1 %v3165_v50, %s2841_s30 }
  0x86   : > { %964 = vrot.lane.b32.xlu0 %v565_v51, %s2841_s30  ;;  %958 = vrot.lane.b32.xlu1 %v562_v52, %s2841_s30  ;;  %v3278_v52 = vld [vmem:[#allocation2 + $0x68] sm:$0xff] }
  0x8a   : > { %968 = vrot.lane.b32.xlu0 %v567_v53, %s2841_s30  ;;  %962 = vrot.lane.b32.xlu1 %v564_v54, %s2841_s30  ;;  %v3198_v63 = vpop.permute.xlu0 %808  ;;  %v501_v53 = vld [vmem:[#allocation2 + $0xa8] sm:$0xff] }
  0x8e   : > { %972 = vrot.lane.b32.xlu0 %v3174_v55, %s2841_s30  ;;  %966 = vrot.lane.b32.xlu1 %v566_v56, %s2841_s30 }
  0x92   : > { %976 = vrot.lane.b32.xlu0 %v3179_v57, %s2841_s30  ;;  %970 = vrot.lane.b32.xlu1 %v568_v58, %s2841_s30  ;;  %v3287_v58 = vld [vmem:[#allocation2 + $0x80] sm:$0xff] }
  0x96   : > { %980 = vrot.lane.b32.xlu0 %v3184_v59, %s2841_s30  ;;  %974 = vrot.lane.b32.xlu1 %v3186_v60, %s2841_s30 }
  0x9a   : > { %984 = vrot.lane.b32.xlu0 %v3192_v61, %s2841_s30  ;;  %978 = vrot.lane.b32.xlu1 %v3194_v62, %s2841_s30 }
  0x9b   : > { %v3205_v3 = vpop.permute.xlu0 %810 }
  0x9e   : > { %988 = vrot.lane.b32.xlu0 %v577_v1, %s2841_s30  ;;  %982 = vrot.lane.b32.xlu1 %v3202_v2, %s2841_s30  ;;  %v3290_v1 = vld [vmem:[#allocation2 + $0xc0] sm:$0xff] }
  0xa2   : > { %992 = vrot.lane.b32.xlu0 %v579_v4, %s2841_s30  ;;  %986 = vrot.lane.b32.xlu1 %v3209_v5, %s2841_s30 }
  0xa4   : > { %v3214_v9 = vpop.permute.xlu0 %816  ;;  %v3216_v11 = vpop.permute.xlu1 %812 }
  0xa5   : > { %4471 = vst [vmem:[#allocation3_spill] sm:$0xff] %v3214_v9  ;;  %v3374_v9 = vld [vmem:[#allocation2 + $0x140] sm:$0xff] }
  0xa6   : > { %996 = vrot.lane.b32.xlu0 %v581_v6, %s2841_s30  ;;  %990 = vrot.lane.b32.xlu1 %v578_v10, %s2841_s30  ;;  %v500_v10 = vld [vmem:[#allocation2 + $0x98] sm:$0xff] }
  0xa8   : > { %v3220_v13 = vpop.permute.xlu0 %820  ;;  %v3224_v21 = vpop.permute.xlu1 %814 }
  0xa9   : > { %4472 = vst [vmem:[#allocation4_spill] sm:$0xff] %v3220_v13  ;;  %4474 = vst [vmem:[#allocation6_spill] sm:$0xff] %v3224_v21  ;;  %v3352_v13 = vld [vmem:[#allocation2 + $0x110] sm:$0xff] }
  0xaa   : > { %1064 = vrot.lane.b32.xlu0 %v3222_v19, %s2842_s6  ;;  %994 = vrot.lane.b32.xlu1 %v580_v15, %s2841_s30  ;;  %v3300_v15 = vld [vmem:[#allocation2 + $0xd8] sm:$0xff] }
  0xac   : > { %v3231_v23 = vpop.permute.xlu0 %824  ;;  %v3233_v26 = vpop.permute.xlu1 %818 }
  0xad   : > { %4475 = vst [vmem:[#allocation7_spill] sm:$0xff] %v3231_v23  ;;  %4476 = vst [vmem:[#allocation8_spill] sm:$0xff] %v3233_v26  ;;  %v3364_v26 = vld [vmem:[#allocation2 + $0x128] sm:$0xff] }
  0xae   : > { %1068 = vrot.lane.b32.xlu0 %v3228_v22, %s2842_s6  ;;  %998 = vrot.lane.b32.xlu1 %v582_v24, %s2841_s30 }
  0xb0   : > { %v3240_v28 = vpop.permute.xlu0 %828  ;;  %v3242_v29 = vpop.permute.xlu1 %822 }
  0xb1   : > { %4477 = vst [vmem:[#allocation9_spill] sm:$0xff] %v3240_v28  ;;  %4478 = vst [vmem:[#allocation10_spill] sm:$0xff] %v3242_v29  ;;  %v3340_v29 = vld [vmem:[#allocation2 + $0xf8] sm:$0xff] }
  0xb2   : > { %1072 = vrot.lane.b32.xlu0 %v3237_v27, %s2842_s6  ;;  %1066 = vrot.lane.b32.xlu1 %v3244_v30, %s2842_s6  ;;  %v3383_v30 = vld [vmem:[#allocation2 + $0x158] sm:$0xff] }
  0xb4   : > { %v3252_v33 = vpop.permute.xlu0 %832  ;;  %v3254_v34 = vpop.permute.xlu1 %826 }
  0xb5   : > { %4480 = vst [vmem:[#allocation12_spill] sm:$0xff] %v3252_v33  ;;  %4481 = vst [vmem:[#allocation13_spill] sm:$0xff] %v3254_v34  ;;  %v3316_v33 = vld [vmem:[#allocation2 + $0xc8] sm:$0xff]  ;;  %v3328_v34 = vld [vmem:[#allocation2 + $0xe0] sm:$0xff] }
  0xb6   : > { %1076 = vrot.lane.b32.xlu0 %v3248_v31, %s2842_s6  ;;  %1070 = vrot.lane.b32.xlu1 %v3256_v35, %s2842_s6  ;;  %4494 = vst [vmem:[#allocation26_spill] sm:$0xff] %v3328_v34 }
  0xb8   : > { %v3264_v37 = vpop.permute.xlu0 %836  ;;  %v3266_v39 = vpop.permute.xlu1 %830 }
  0xb9   : > { %4482 = vst [vmem:[#allocation14_spill] sm:$0xff] %v3264_v37  ;;  %4483 = vst [vmem:[#allocation15_spill] sm:$0xff] %v3266_v39 }
  0xba   : > { %1080 = vrot.lane.b32.xlu0 %v3260_v36, %s2842_s6  ;;  %1074 = vrot.lane.b32.xlu1 %v3268_v41, %s2842_s6 }
  0xbc   : > { %v3274_v49 = vpop.permute.xlu0 %840  ;;  %v3276_v51 = vpop.permute.xlu1 %834 }
  0xbd   : > { %4484 = vst [vmem:[#allocation16_spill] sm:$0xff] %v3276_v51 }
  0xbe   : > { %1084 = vrot.lane.b32.xlu0 %v499_v47, %s2842_s6  ;;  %1078 = vrot.lane.b32.xlu1 %v3278_v52, %s2842_s6 }
  0xc0   : > { %v3283_v54 = vpop.permute.xlu0 %844  ;;  %v3285_v56 = vpop.permute.xlu1 %838 }
  0xc1   : > { %4485 = vst [vmem:[#allocation17_spill] sm:$0xff] %v3285_v56  ;;  %v3309_v56 = vld [vmem:[#allocation2 + $0xf0] sm:$0xff] }
  0xc2   : > { %1088 = vrot.lane.b32.xlu0 %v501_v53, %s2842_s6  ;;  %1082 = vrot.lane.b32.xlu1 %v3287_v58, %s2842_s6  ;;  %v502_v53 = vld [vmem:[#allocation2 + $0xb0] sm:$0xff] }
  0xc4   : > { %v3294_v4 = vpop.permute.xlu0 %848  ;;  %v3296_v6 = vpop.permute.xlu1 %842 }
  0xc5   : > { %4486 = vst [vmem:[#allocation18_spill] sm:$0xff] %v3294_v4 }
  0xc6   : > { %1092 = vrot.lane.b32.xlu0 %v3290_v1, %s2842_s6  ;;  %1086 = vrot.lane.b32.xlu1 %v500_v10, %s2842_s6  ;;  %v3320_v10 = vld [vmem:[#allocation2 + $0x108] sm:$0xff] }
  0xc7   : > { %4491 = vst [vmem:[#allocation23_spill] sm:$0xff] %v3320_v10 }
  0xc8   : > { %v3303_v24 = vpop.permute.xlu0 %852  ;;  %v3305_v47 = vpop.permute.xlu1 %846 }
  0xc9   : > { %4487 = vst [vmem:[#allocation19_spill] sm:$0xff] %v3303_v24  ;;  %4488 = vst [vmem:[#allocation20_spill] sm:$0xff] %v3305_v47 }
  0xca   : > { %1096 = vrot.lane.b32.xlu0 %v3300_v15, %s2842_s6  ;;  %1090 = vrot.lane.b32.xlu1 %v502_v53, %s2842_s6  ;;  %v3332_v53 = vld [vmem:[#allocation2 + $0x120] sm:$0xff] }
  0xcc   : > { %v3312_v37 = vpop.permute.xlu0 %856  ;;  %v3314_v51 = vpop.permute.xlu1 %850 }
  0xcd   : > { %4489 = vst [vmem:[#allocation21_spill] sm:$0xff] %v3312_v37  ;;  %4490 = vst [vmem:[#allocation22_spill] sm:$0xff] %v3314_v51 }
  0xce   : > { %1100 = vrot.lane.b32.xlu0 %v3309_v56, %s2842_s6  ;;  %1094 = vrot.lane.b32.xlu1 %v3316_v33, %s2842_s6 }
  0xd0   : > { %v3324_v39 = vpop.permute.xlu0 %860  ;;  %v3326_v28 = vpop.permute.xlu1 %854 }
  0xd1   : > { %4492 = vst [vmem:[#allocation24_spill] sm:$0xff] %v3324_v39  ;;  %4493 = vst [vmem:[#allocation25_spill] sm:$0xff] %v3326_v28  ;;  %v3344_v39 = vld [vmem:[#allocation2 + $0x138] sm:$0xff] }
  0xd2   : > { %1104 = vrot.lane.b32.xlu0 %v3320_v10, %s2842_s6  ;;  %1098 = vrot.lane.b32.xlu1 %v3328_v34, %s2842_s6 }
  0xd4   : > { %v3336_v37 = vpop.permute.xlu0 %864  ;;  %v3338_v23 = vpop.permute.xlu1 %858 }
  0xd5   : > { %4495 = vst [vmem:[#allocation27_spill] sm:$0xff] %v3336_v37  ;;  %4496 = vst [vmem:[#allocation28_spill] sm:$0xff] %v3338_v23  ;;  %v3356_v37 = vld [vmem:[#allocation2 + $0x150] sm:$0xff] }
  0xd6   : > { %1108 = vrot.lane.b32.xlu0 %v3332_v53, %s2842_s6  ;;  %1102 = vrot.lane.b32.xlu1 %v3340_v29, %s2842_s6 }
  0xd8   : > { %v3348_v28 = vpop.permute.xlu0 %868  ;;  %v3350_v24 = vpop.permute.xlu1 %862 }
  0xd9   : > { %4497 = vst [vmem:[#allocation29_spill] sm:$0xff] %v3348_v28  ;;  %4498 = vst [vmem:[#allocation30_spill] sm:$0xff] %v3350_v24  ;;  %v517_v28 = vld [vmem:[#allocation2 + $0x168] sm:$0xff] }
  0xda   : > { %1112 = vrot.lane.b32.xlu0 %v3344_v39, %s2842_s6  ;;  %1106 = vrot.lane.b32.xlu1 %v3352_v13, %s2842_s6 }
  0xdc   : > { %v3360_v23 = vpop.permute.xlu0 %936  ;;  %v3362_v51 = vpop.permute.xlu1 %866 }
  0xdd   : > { %4499 = vst [vmem:[#allocation31_spill] sm:$0xff] %v3362_v51  ;;  %v613_v51 = vld [vmem:[#allocation2 + $0x180] sm:$0xff] }
  0xde   : > { %1116 = vrot.lane.b32.xlu0 %v3356_v37, %s2842_s6  ;;  %1110 = vrot.lane.b32.xlu1 %v3364_v26, %s2842_s6 }
  0xe0   : > { %v3370_v24 = vpop.permute.xlu0 %940  ;;  %v3372_v4 = vpop.permute.xlu1 %870 }
  0xe1   : > { %4500 = vst [vmem:[#allocation32_spill] sm:$0xff] %v3370_v24  ;;  %4501 = vst [vmem:[#allocation33_spill] sm:$0xff] %v3372_v4  ;;  %v614_v24 = vld [vmem:[#allocation2 + $0x188] sm:$0xff] }
  0xe2   : > { %1120 = vrot.lane.b32.xlu0 %v517_v28, %s2842_s6  ;;  %1114 = vrot.lane.b32.xlu1 %v3374_v9, %s2842_s6  ;;  %v518_v28 = vld [vmem:[#allocation2 + $0x170] sm:$0xff] }
  0xe4   : > { %v3379_v34 = vpop.permute.xlu0 %944  ;;  %v3381_v47 = vpop.permute.xlu1 %938 }
  0xe5   : > { %4502 = vst [vmem:[#allocation34_spill] sm:$0xff] %v3379_v34 }
  0xe6   : > { %1124 = vrot.lane.b32.xlu0 %v613_v51, %s2842_s6  ;;  %1118 = vrot.lane.b32.xlu1 %v3383_v30, %s2842_s6 }
  0xe8   : > { %v3388_v4 = vpop.permute.xlu0 %948  ;;  %v3390_v21 = vpop.permute.xlu1 %942 }
  0xe9   : > { %4503 = vst [vmem:[#allocation35_spill] sm:$0xff] %v3388_v4 }
  0xea   : > { %1192 = vrot.lane.b32.xlu0 %v3023_v7, %s2843_s7  ;;  %1122 = vrot.lane.b32.xlu1 %v518_v28, %s2842_s6 }
  0xec   : > { %v3395_v34 = vpop.permute.xlu0 %952  ;;  %v3397_v19 = vpop.permute.xlu1 %946 }
  0xed   : > { %4504 = vst [vmem:[#allocation36_spill] sm:$0xff] %v3395_v34 }
  0xee   : > { %1196 = vrot.lane.b32.xlu0 %v3015_v0, %s2843_s7  ;;  %1126 = vrot.lane.b32.xlu1 %v614_v24, %s2842_s6 }
  0xf0   : > { %v3402_v51 = vpop.permute.xlu0 %956  ;;  %v3404_v4 = vpop.permute.xlu1 %950 }
  0xf1   : > { %4505 = vst [vmem:[#allocation37_spill] sm:$0xff] %v3402_v51  ;;  %4506 = vst [vmem:[#allocation38_spill] sm:$0xff] %v3404_v4 }
  0xf2   : > { %1200 = vrot.lane.b32.xlu0 %v3025_v8, %s2843_s7  ;;  %1194 = vrot.lane.b32.xlu1 %v3036_v17, %s2843_s7 }
  0xf4   : > { %v3410_v7 = vpop.permute.xlu0 %960  ;;  %v3412_v28 = vpop.permute.xlu1 %954 }
  0xf5   : > { %4507 = vst [vmem:[#allocation39_spill] sm:$0xff] %v3410_v7  ;;  %4508 = vst [vmem:[#allocation40_spill] sm:$0xff] %v3412_v28 }
  0xf6   : > { %1224 = vrot.lane.b32.xlu0 %v3094_v12, %s2843_s7  ;;  %1198 = vrot.lane.b32.xlu1 %v3052_v32, %s2843_s7 }
  0xf8   : > { %v3418_v0 = vpop.permute.xlu0 %964  ;;  %v3420_v24 = vpop.permute.xlu1 %958 }
  0xf9   : > { %4509 = vst [vmem:[#allocation41_spill] sm:$0xff] %v3418_v0  ;;  %4510 = vst [vmem:[#allocation42_spill] sm:$0xff] %v3420_v24  ;;  %v2065_v24 = vld [vmem:[%s4463_s2 + $0x10] sm:$0xff] }
  0xfa   : > { %1320 = vrot.lane.b32.xlu0 %v3134_v38, %s2844_s8  ;;  %1202 = vrot.lane.b32.xlu1 %v3067_v46, %s2843_s7 }
  0xfc   : > { %v3426_v8 = vpop.permute.xlu0 %968  ;;  %v3428_v17 = vpop.permute.xlu1 %962 }
  0xfd   : > { %4511 = vst [vmem:[#allocation43_spill] sm:$0xff] %v3428_v17 }
  0xfe   : > { %1322 = vrot.lane.b32.xlu0 %v3146_v43, %s2844_s8  ;;  %1226 = vrot.lane.b32.xlu1 %v3106_v18, %s2843_s7  ;;  %v2063_v18 = vld [vmem:[%s4463_s2] sm:$0xff]  ;;  %v2064_v43 = vld [vmem:[%s4463_s2 + $0x8] sm:$0xff] }
 0x100   : > { %v3434_v12 = vpop.permute.xlu0 %972  ;;  %v3436_v0 = vpop.permute.xlu1 %966 }
 0x101   : > { %4512 = vst [vmem:[#allocation44_spill] sm:$0xff] %v3436_v0  ;;  %v712_v0 = vld [vmem:[#allocation2 + $0x31] sm:$0xff] }
 0x102   : > { %1448 = vrot.lane.b32.xlu0 %v3228_v22, %s2845_s9  ;;  %1352 = vrot.lane.b32.xlu1 %v3174_v55, %s2844_s8  ;;  %v2749_v55 = vpack.c.bf16 %v2064_v43, %v2063_v18 }
 0x104   : > { %v3442_v46 = vpop.permute.xlu0 %976  ;;  %v3444_v38 = vpop.permute.xlu1 %970  ;;  %2750 = vmatprep.subr.bf16.mxu0 %v2749_v55  ;;  %2757 = vmatprep.subr.bf16.mxu1 %v2749_v55 }
 0x105   : > { %2752 = vmatpush3.bf16.msra.mxu0 %v2749_v55  ;;  %2760 = vmatpush3.bf16.msra.mxu1 %v2749_v55 }
 0x106   : > { %1450 = vrot.lane.b32.xlu0 %v3256_v35, %s2845_s9  ;;  %1354 = vrot.lane.b32.xlu1 %v3186_v60, %s2844_s8  ;;  %v2066_v60 = vld [vmem:[%s4463_s2 + $0x18] sm:$0xff] }
 0x107   : > { %v2753_v18 = vpack.c.bf16 %v2066_v60, %v2065_v24 }
 0x108   : > { %v3456_v17 = vpop.permute.xlu0 %980  ;;  %v3458_v7 = vpop.permute.xlu1 %974 }
 0x109   : > { %4513 = vst [vmem:[#allocation45_spill] sm:$0xff] %v3456_v17  ;;  %2754 = vmatprep.subr.bf16.mxu0 %v2753_v18  ;;  %2758 = vmatprep.subr.bf16.mxu1 %v2753_v18 }
 0x10a   : > { %1576 = vrot.lane.b32.xlu0 %v712_v0, %s2846_s14  ;;  %1480 = vrot.lane.b32.xlu1 %v3309_v56, %s2845_s9  ;;  %v2067_v0 = vld [vmem:[%s4463_s2 + $0x20] sm:$0xf] }
 0x10b   : > { %2756 = vmatpush3.bf16.msra.mxu0 %v2753_v18  ;;  %2761 = vmatpush3.bf16.msra.mxu1 %v2753_v18 }
 0x10c   : > { %v3469_v43 = vpop.permute.xlu0 %984  ;;  %v3471_v51 = vpop.permute.xlu1 %978  ;;  %2699 = vmatprep.subr.msk.mxu0 %vm2165_vm2, %v2067_v0  ;;  %2759 = vmatprep.subr.msk.mxu1 %vm2165_vm2, %v2067_v0 }
 0x10d   : > { %4514 = vst [vmem:[#allocation46_spill] sm:$0xff] %v3469_v43 }
 0x10e   : > { %1228 = vrot.lane.b32.xlu0 %v3099_v14, %s2843_s7  ;;  %1482 = vrot.lane.b32.xlu1 %v3340_v29, %s2845_s9 }
 0x10f   : > { %2700 = vmatpush3.msk.msra.mxu0 %vm2165_vm2, %v2067_v0  ;;  %2762 = vmatpush3.msk.msra.mxu1 %vm2165_vm2, %v2067_v0 }
 0x110   : > { %v3480_v24 = vpop.permute.xlu0 %988  ;;  %v3482_v55 = vpop.permute.xlu1 %982 }
 0x111   : > { %4515 = vst [vmem:[#allocation47_spill] sm:$0xff] %v3480_v24  ;;  %4516 = vst [vmem:[#allocation48_spill] sm:$0xff] %v3482_v55 }
 0x112   : > { %1610 = vrot.lane.b32.xlu0 %v3112_v20, %s2846_s14  ;;  %1608 = vrot.lane.b32.xlu1 %v3099_v14, %s2846_s14 }
 0x114   : > { %v3488_v60 = vpop.permute.xlu0 %992  ;;  %v3490_v28 = vpop.permute.xlu1 %986 }
 0x115   : > { %4517 = vst [vmem:[#allocation49_spill] sm:$0xff] %v3488_v60  ;;  %4518 = vst [vmem:[#allocation50_spill] sm:$0xff] %v3490_v28 }
 0x116   : > { %1736 = vrot.lane.b32.xlu0 %v3179_v57, %s2847_s25  ;;  %1578 = vrot.lane.b32.xlu1 %v3052_v32, %s2846_s14 }
 0x118   : > { %v3496_v18 = vpop.permute.xlu0 %996  ;;  %v3498_v24 = vpop.permute.xlu1 %990 }
 0x119   : > { %4519 = vst [vmem:[#allocation51_spill] sm:$0xff] %v3496_v18  ;;  %4520 = vst [vmem:[#allocation52_spill] sm:$0xff] %v3498_v24 }
 0x11a   : > { %1324 = vrot.lane.b32.xlu0 %v3139_v40, %s2844_s8  ;;  %1704 = vrot.lane.b32.xlu1 %v3139_v40, %s2847_s25 }
 0x11c   : > { %v3504_v14 = vpop.permute.xlu0 %1064  ;;  %v3506_v0 = vpop.permute.xlu1 %994 }
 0x11d   : > { %4521 = vst [vmem:[#allocation53_spill] sm:$0xff] %v3506_v0 }
 0x11e   : > { %1706 = vrot.lane.b32.xlu0 %v3154_v45, %s2847_s25  ;;  %1230 = vrot.lane.b32.xlu1 %v3112_v20, %s2843_s7 }
 0x120   : > { %v3512_v32 = vpop.permute.xlu0 %1068  ;;  %v3514_v18 = vpop.permute.xlu1 %998 }
 0x121   : > { %4522 = vst [vmem:[#allocation54_spill] sm:$0xff] %v3514_v18 }
 0x122   : > { %1326 = vrot.lane.b32.xlu0 %v3154_v45, %s2844_s8  ;;  %1356 = vrot.lane.b32.xlu1 %v3179_v57, %s2844_s8  ;;  %v714_v45 = vld [vmem:[#allocation2 + $0x49] sm:$0xff] }
 0x124   : > { %v3520_v40 = vpop.permute.xlu0 %1072  ;;  %v3522_v60 = vpop.permute.xlu1 %1066 }
 0x126   : > { %1452 = vrot.lane.b32.xlu0 %v3237_v27, %s2845_s9  ;;  %1738 = vrot.lane.b32.xlu1 %v3194_v62, %s2847_s25 }
 0x128   : > { %v3528_v20 = vpop.permute.xlu0 %1076  ;;  %v3530_v0 = vpop.permute.xlu1 %1070 }
 0x129   : > { %4523 = vst [vmem:[#allocation55_spill] sm:$0xff] %v3528_v20 }
 0x12a   : > { %1454 = vrot.lane.b32.xlu0 %v3268_v41, %s2845_s9  ;;  %1358 = vrot.lane.b32.xlu1 %v3194_v62, %s2844_s8 }
 0x12c   : > { %v3536_v57 = vpop.permute.xlu0 %1080  ;;  %v3538_v18 = vpop.permute.xlu1 %1074 }
 0x12d   : > { %4524 = vst [vmem:[#allocation56_spill] sm:$0xff] %v3536_v57 }
 0x12e   : > { %1580 = vrot.lane.b32.xlu0 %v714_v45, %s2846_s14  ;;  %1484 = vrot.lane.b32.xlu1 %v3320_v10, %s2845_s9 }
 0x130   : > { %v3543_v27 = vpop.permute.xlu0 %1084  ;;  %v3545_v24 = vpop.permute.xlu1 %1078 }
 0x131   : > { %4525 = vst [vmem:[#allocation57_spill] sm:$0xff] %v3543_v27  ;;  %4526 = vst [vmem:[#allocation58_spill] sm:$0xff] %v3545_v24  ;;  %v715_v27 = vld [vmem:[#allocation2 + $0x51] sm:$0xff] }
 0x132   : > { %1232 = vrot.lane.b32.xlu0 %v3104_v16, %s2843_s7  ;;  %1486 = vrot.lane.b32.xlu1 %v3352_v13, %s2845_s9 }
 0x134   : > { %v3551_v62 = vpop.permute.xlu0 %1088  ;;  %v3553_v41 = vpop.permute.xlu1 %1082 }
 0x135   : > { %4527 = vst [vmem:[#allocation59_spill] sm:$0xff] %v3551_v62  ;;  %4528 = vst [vmem:[#allocation60_spill] sm:$0xff] %v3553_v41 }
 0x136   : > { %1614 = vrot.lane.b32.xlu0 %v3119_v25, %s2846_s14  ;;  %1612 = vrot.lane.b32.xlu1 %v3104_v16, %s2846_s14 }
 0x138   : > { %v3559_v45 = vpop.permute.xlu0 %1092  ;;  %v3561_v28 = vpop.permute.xlu1 %1086 }
 0x139   : > { %4529 = vst [vmem:[#allocation61_spill] sm:$0xff] %v3559_v45  ;;  %4530 = vst [vmem:[#allocation62_spill] sm:$0xff] %v3561_v28 }
 0x13a   : > { %1740 = vrot.lane.b32.xlu0 %v3184_v59, %s2847_s25  ;;  %1582 = vrot.lane.b32.xlu1 %v715_v27, %s2846_s14 }
 0x13c   : > { %v3566_v13 = vpop.permute.xlu0 %1096  ;;  %v3568_v62 = vpop.permute.xlu1 %1090 }
 0x13d   : > { %4531 = vst [vmem:[#allocation63_spill] sm:$0xff] %v3568_v62 }
 0x13e   : > { %1328 = vrot.lane.b32.xlu0 %v3144_v42, %s2844_s8  ;;  %1708 = vrot.lane.b32.xlu1 %v3144_v42, %s2847_s25 }
 0x140   : > { %v3574_v16 = vpop.permute.xlu0 %1100  ;;  %v3576_v45 = vpop.permute.xlu1 %1094 }
 0x141   : > { %4532 = vst [vmem:[#allocation64_spill] sm:$0xff] %v3576_v45 }
 0x142   : > { %1710 = vrot.lane.b32.xlu0 %v3160_v48, %s2847_s25  ;;  %1234 = vrot.lane.b32.xlu1 %v3119_v25, %s2843_s7 }
 0x144   : > { %v3582_v27 = vpop.permute.xlu0 %1104  ;;  %v3584_v28 = vpop.permute.xlu1 %1098 }
 0x146   : > { %1330 = vrot.lane.b32.xlu0 %v3160_v48, %s2844_s8  ;;  %1360 = vrot.lane.b32.xlu1 %v3184_v59, %s2844_s8  ;;  %v716_v48 = vld [vmem:[#allocation2 + $0x61] sm:$0xff] }
 0x148   : > { %v3590_v42 = vpop.permute.xlu0 %1108  ;;  %v3592_v62 = vpop.permute.xlu1 %1102 }
 0x149   : > { %4533 = vst [vmem:[#allocation65_spill] sm:$0xff] %v3590_v42  ;;  %v1816_v42 = vsel %vm398_vm0, %v3290_v1, %v3274_v49 }
 0x14a   : > { %1456 = vrot.lane.b32.xlu0 %v3248_v31, %s2845_s9  ;;  %1742 = vrot.lane.b32.xlu1 %v3202_v2, %s2847_s25 }
 0x14c   : > { %v3598_v25 = vpop.permute.xlu0 %1112  ;;  %v3600_v45 = vpop.permute.xlu1 %1106 }
 0x14d   : > { %4534 = vst [vmem:[#allocation66_spill] sm:$0xff] %v3598_v25  ;;  %4535 = vst [vmem:[#allocation67_spill] sm:$0xff] %v3600_v45 }
 0x14e   : > { %1458 = vrot.lane.b32.xlu0 %v3278_v52, %s2845_s9  ;;  %1362 = vrot.lane.b32.xlu1 %v3202_v2, %s2844_s8  ;;  %v717_v2 = vld [vmem:[#allocation2 + $0x69] sm:$0xff] }
 0x150   : > { %v3606_v59 = vpop.permute.xlu0 %1116  ;;  %v3608_v41 = vpop.permute.xlu1 %1110 }
 0x151   : > { %4536 = vst [vmem:[#allocation68_spill] sm:$0xff] %v3606_v59  ;;  %4537 = vst [vmem:[#allocation69_spill] sm:$0xff] %v3608_v41  ;;  %v732_v59 = vld [vmem:[#allocation2 + $0x121] sm:$0xff] }
 0x152   : > { %1584 = vrot.lane.b32.xlu0 %v716_v48, %s2846_s14  ;;  %1488 = vrot.lane.b32.xlu1 %v3332_v53, %s2845_s9 }
 0x154   : > { %v3613_v31 = vpop.permute.xlu0 %1120  ;;  %v3615_v25 = vpop.permute.xlu1 %1114 }
 0x155   : > { %4538 = vst [vmem:[#allocation70_spill] sm:$0xff] %v3613_v31  ;;  %4539 = vst [vmem:[#allocation71_spill] sm:$0xff] %v3615_v25 }
 0x156   : > { %1204 = vrot.lane.b32.xlu0 %v716_v48, %s2843_s7  ;;  %1490 = vrot.lane.b32.xlu1 %v3364_v26, %s2845_s9  ;;  %v733_v48 = vld [vmem:[#allocation2 + $0x129] sm:$0xff] }
 0x158   : > { %v3620_v52 = vpop.permute.xlu0 %1124  ;;  %v3622_v43 = vpop.permute.xlu1 %1118 }
 0x159   : > { %4540 = vst [vmem:[#allocation72_spill] sm:$0xff] %v3620_v52  ;;  %4541 = vst [vmem:[#allocation73_spill] sm:$0xff] %v3622_v43 }
 0x15a   : > { %1586 = vrot.lane.b32.xlu0 %v717_v2, %s2846_s14  ;;  %1616 = vrot.lane.b32.xlu1 %v732_v59, %s2846_s14 }
 0x15c   : > { %v3626_v53 = vpop.permute.xlu0 %1192  ;;  %v3628_v31 = vpop.permute.xlu1 %1122 }
 0x15d   : > { %4542 = vst [vmem:[#allocation74_spill] sm:$0xff] %v3628_v31 }
 0x15e   : > { %1712 = vrot.lane.b32.xlu0 %v3152_v44, %s2847_s25  ;;  %1236 = vrot.lane.b32.xlu1 %v732_v59, %s2843_s7 }
 0x160   : > { %v3633_v26 = vpop.permute.xlu0 %1196  ;;  %v3635_v52 = vpop.permute.xlu1 %1126 }
 0x161   : > { %4543 = vst [vmem:[#allocation75_spill] sm:$0xff] %v3635_v52 }
 0x162   : > { %1206 = vrot.lane.b32.xlu0 %v717_v2, %s2843_s7  ;;  %1618 = vrot.lane.b32.xlu1 %v733_v48, %s2846_s14 }
 0x164   : > { %v3639_v43 = vpop.permute.xlu0 %1200  ;;  %v3641_v25 = vpop.permute.xlu1 %1194 }
 0x166   : > { %1332 = vrot.lane.b32.xlu0 %v3152_v44, %s2844_s8  ;;  %1744 = vrot.lane.b32.xlu1 %v3192_v61, %s2847_s25 }
 0x168   : > { %v1225_v59 = vpop.permute.xlu0 %1224  ;;  %v3647_v31 = vpop.permute.xlu1 %1198 }
 0x16a   : > { %1714 = vrot.lane.b32.xlu0 %v3165_v50, %s2847_s25  ;;  %1238 = vrot.lane.b32.xlu1 %v733_v48, %s2843_s7 }
 0x16c   : > { %v1321_v2 = vpop.permute.xlu0 %1320  ;;  %v3652_v52 = vpop.permute.xlu1 %1202 }
 0x16e   : > { %1334 = vrot.lane.b32.xlu0 %v3165_v50, %s2844_s8  ;;  %1364 = vrot.lane.b32.xlu1 %v3192_v61, %s2844_s8  ;;  %v718_v50 = vld [vmem:[#allocation2 + $0x79] sm:$0xff] }
 0x170   : > { %v3658_v44 = vpop.permute.xlu0 %1322  ;;  %v3660_v57 = vpop.permute.xlu1 %1226 }
 0x172   : > { %1460 = vrot.lane.b32.xlu0 %v3260_v36, %s2845_s9  ;;  %1746 = vrot.lane.b32.xlu1 %v3209_v5, %s2847_s25 }
 0x174   : > { %v1449_v48 = vpop.permute.xlu0 %1448  ;;  %v1353_v34 = vpop.permute.xlu1 %1352 }
 0x176   : > { %1462 = vrot.lane.b32.xlu0 %v3287_v58, %s2845_s9  ;;  %1366 = vrot.lane.b32.xlu1 %v3209_v5, %s2844_s8  ;;  %v719_v58 = vld [vmem:[#allocation2 + $0x81] sm:$0xff]  ;;  %v734_v5 = vld [vmem:[#allocation2 + $0x139] sm:$0xff] }
 0x178   : > { %v1451_v61 = vpop.permute.xlu0 %1450  ;;  %v3670_v41 = vpop.permute.xlu1 %1354 }
 0x17a   : > { %1588 = vrot.lane.b32.xlu0 %v718_v50, %s2846_s14  ;;  %1492 = vrot.lane.b32.xlu1 %v3344_v39, %s2845_s9  ;;  %v1849_v39 = vsel %vm1832_vm3, %v1816_v42, %v3426_v8  ;;  %v488_v42 = vld [vmem:[#allocation2 + $0x8] sm:$0xff] }
 0x17b   : > { %v1882_v17 = vsel %vm1865_vm4, %v1849_v39, %v3566_v13 }
 0x17c   : > { %v1577_v36 = vpop.permute.xlu0 %1576  ;;  %v1481_v55 = vpop.permute.xlu1 %1480  ;;  %v1915_v20 = vsel %vm1898_vm5, %v1882_v17, %v1225_v59 }
 0x17d   : > { %v1948_v1 = vsel %vm1931_vm6, %v1915_v20, %v1353_v34  ;;  %v735_v34 = vld [vmem:[#allocation2 + $0x141] sm:$0xff] }
 0x17e   : > { %1208 = vrot.lane.b32.xlu0 %v718_v50, %s2843_s7  ;;  %1494 = vrot.lane.b32.xlu1 %v3374_v9, %s2845_s9  ;;  %v750_v9 = vld [vmem:[#allocation2 + $0x7a] sm:$0xff]  ;;  %v1981_v13 = vsel %vm1964_vm7, %v1948_v1, %v1481_v55 }
 0x17f   : > { %v487_v50 = vld [vmem:[#allocation2] sm:$0xff] }
 0x180   : > { %v3678_v24 = vpop.permute.xlu0 %1228  ;;  %v3680_v4 = vpop.permute.xlu1 %1482  ;;  %v1800_v8 = vsel %vm398_vm0, %v487_v50, %v3198_v63  ;;  %v1801_v50 = vsel %vm398_vm0, %v488_v42, %v3205_v3  ;;  %v766_v1 = vld [vmem:[#allocation2 + $0x13a] sm:$0xff] }
 0x181   : > { %v1833_v17 = vsel %vm1832_vm3, %v1800_v8, %v3360_v23  ;;  %v1834_v23 = vsel %vm1832_vm3, %v1801_v50, %v3381_v47 }
 0x182   : > { %1590 = vrot.lane.b32.xlu0 %v719_v58, %s2846_s14  ;;  %1620 = vrot.lane.b32.xlu1 %v734_v5, %s2846_s14  ;;  %v1866_v20 = vsel %vm1865_vm4, %v1833_v17, %v3504_v14  ;;  %v1867_v14 = vsel %vm1865_vm4, %v1834_v23, %v3522_v60 }
 0x183   : > { %v1899_v55 = vsel %vm1898_vm5, %v1866_v20, %v3626_v53  ;;  %v1900_v53 = vsel %vm1898_vm5, %v1867_v14, %v3641_v25  ;;  %v1818_v14 = vsel %vm398_vm0, %v3300_v15, %v3283_v54  ;;  %v4544_v15 = vld [vmem:[#allocation5_spill] sm:$0xff] }
 0x184   : > { %v3691_v10 = vpop.permute.xlu0 %1610  ;;  %v1609_v49 = vpop.permute.xlu1 %1608  ;;  %v1933_v47 = vsel %vm1931_vm6, %v1900_v53, %v3658_v44  ;;  %v1817_v44 = vsel %vm398_vm0, %v3316_v33, %v3296_v6  ;;  %v688_v33 = vld [vmem:[#allocation2 + $0x90] sm:$0xff] }
 0x185   : > { %v2014_v59 = vsel %vm1997_vm9, %v1981_v13, %v1609_v49  ;;  %v1966_v60 = vsel %vm1964_vm7, %v1933_v47, %v1451_v61  ;;  %v1850_v61 = vsel %vm1832_vm3, %v1817_v44, %v3444_v38  ;;  %v4546_v44 = vld [vmem:[#allocation6_spill] sm:$0xff] }
 0x186   : > { %1716 = vrot.lane.b32.xlu0 %v750_v9, %s2847_s25  ;;  %1240 = vrot.lane.b32.xlu1 %v734_v5, %s2843_s7  ;;  %v1932_v5 = vsel %vm1931_vm6, %v1899_v55, %v1321_v2 }
 0x187   : > { %v1965_v49 = vsel %vm1964_vm7, %v1932_v5, %v1449_v48  ;;  %v751_v48 = vld [vmem:[#allocation2 + $0x82] sm:$0xff] }
 0x188   : > { %v1737_v39 = vpop.permute.xlu0 %1736  ;;  %v1579_v45 = vpop.permute.xlu1 %1578 }
 0x189   : > { %v2047_v63 = vsel %vm2030_vm8, %v2014_v59, %v1737_v39  ;;  %v1999_v42 = vsel %vm1997_vm9, %v1966_v60, %v1579_v45  ;;  %v1883_v45 = vsel %vm1865_vm4, %v1850_v61, %v3584_v28  ;;  %v4547_v61 = vld [vmem:[#allocation11_spill] sm:$0xff] }
 0x18a   : > { %1210 = vrot.lane.b32.xlu0 %v719_v58, %s2843_s7  ;;  %2725 = vmatprep.mubr.msk.f32.mxu1 %vm2068_vm10, %v2047_v63  ;;  %v1998_v58 = vsel %vm1997_vm9, %v1965_v49, %v1577_v36  ;;  %v1916_v59 = vsel %vm1898_vm5, %v1883_v45, %v3660_v57  ;;  %v689_v57 = vld [vmem:[#allocation2 + $0x98] sm:$0xff]  ;;  %v1851_v49 = vsel %vm1832_vm3, %v1818_v14, %v3434_v12 }
 0x18b   : > { %1622 = vrot.lane.b32.xlu1 %v735_v34, %s2846_s14  ;;  %v1949_v39 = vsel %vm1931_vm6, %v1916_v59, %v3670_v41  ;;  %v1884_v53 = vsel %vm1865_vm4, %v1851_v49, %v3574_v16  ;;  %v1802_v12 = vsel %vm398_vm0, %v4544_v15, %v3216_v11  ;;  %v4545_v16 = vld [vmem:[#allocation32_spill] sm:$0xff]  ;;  %v1803_v11 = vsel %vm398_vm0, %v4547_v61, %v4546_v44 }
 0x18c   : > { %v3719_v3 = vpop.permute.xlu0 %1324  ;;  %v1705_v8 = vpop.permute.xlu1 %1704  ;;  %v1982_v6 = vsel %vm1964_vm7, %v1949_v39, %v3680_v4  ;;  %v720_v4 = vld [vmem:[#allocation2 + $0x91] sm:$0xff]  ;;  %v1835_v60 = vsel %vm1832_vm3, %v1802_v12, %v4545_v16  ;;  %v769_v12 = vld [vmem:[#allocation2 + $0x15a] sm:$0xff] }
 0x18d   : > { %v2031_v2 = vsel %vm2030_vm8, %v1998_v58, %v1705_v8  ;;  %v2015_v28 = vsel %vm1997_vm9, %v1982_v6, %v3691_v10  ;;  %v736_v58 = vld [vmem:[#allocation2 + $0x151] sm:$0xff]  ;;  %v1917_v8 = vsel %vm1898_vm5, %v1884_v53, %v3678_v24  ;;  %v737_v6 = vld [vmem:[#allocation2 + $0x159] sm:$0xff] }
 0x18e   : > { %1336 = vrot.lane.b32.xlu0 %v750_v9, %s2844_s8  ;;  %2701 = vmatprep.mubr.msk.f32.mxu0 %vm2068_vm10, %v2031_v2  ;;  %v752_v2 = vld [vmem:[#allocation2 + $0x92] sm:$0xff] }
 0x18f   : > { %1748 = vrot.lane.b32.xlu1 %v766_v1, %s2847_s25 }
 0x190   : > { %v1707_v25 = vpop.permute.xlu0 %1706  ;;  %v3733_v13 = vpop.permute.xlu1 %1230 }
 0x191   : > { %v2032_v36 = vsel %vm2030_vm8, %v1999_v42, %v1707_v25  ;;  %v1868_v42 = vsel %vm1865_vm4, %v1835_v60, %v3512_v32  ;;  %v706_v60 = vld [vmem:[#allocation2 + $0x168] sm:$0xff] }
 0x192   : > { %1718 = vrot.lane.b32.xlu0 %v751_v48, %s2847_s25  ;;  %2702 = vmatmul.mubr.msk.f32.vlgmr.msra.gmra.mrb[0].mxu0 %vm2068_vm10, %v2032_v36  ;;  %v1901_v45 = vsel %vm1898_vm5, %v1868_v42, %v3633_v26 }
 0x193   : > { %1242 = vrot.lane.b32.xlu1 %v735_v34, %s2843_s7  ;;  %v767_v34 = vld [vmem:[#allocation2 + $0x142] sm:$0xff]  ;;  %v1934_v32 = vsel %vm1931_vm6, %v1901_v45, %v3719_v3 }
 0x194   : > { %v3743_v9 = vpop.permute.xlu0 %1326  ;;  %v1357_v17 = vpop.permute.xlu1 %1356 }
 0x195   : > { %v1950_v54 = vsel %vm1931_vm6, %v1917_v8, %v1357_v17  ;;  %v1836_v17 = vsel %vm1832_vm3, %v1803_v11, %v3390_v21  ;;  %v707_v11 = vld [vmem:[#allocation2 + $0x170] sm:$0xff] }
 0x196   : > { %1338 = vrot.lane.b32.xlu0 %v751_v48, %s2844_s8  ;;  %v1869_v59 = vsel %vm1865_vm4, %v1836_v17, %v3530_v0 }
 0x197   : > { %1368 = vrot.lane.b32.xlu1 %v766_v1, %s2844_s8  ;;  %v721_v1 = vld [vmem:[#allocation2 + $0x99] sm:$0xff]  ;;  %v1902_v26 = vsel %vm1898_vm5, %v1869_v59, %v3647_v31  ;;  %v723_v59 = vld [vmem:[#allocation2 + $0xb1] sm:$0xff] }
 0x198   : > { %v1453_v38 = vpop.permute.xlu0 %1452  ;;  %v1739_v20 = vpop.permute.xlu1 %1738  ;;  %v1935_v21 = vsel %vm1931_vm6, %v1902_v26, %v3743_v9  ;;  %v768_v31 = vld [vmem:[#allocation2 + $0x152] sm:$0xff]  ;;  %v738_v26 = vld [vmem:[#allocation2 + $0x169] sm:$0xff] }
 0x199   : > { %v2048_v63 = vsel %vm2030_vm8, %v2015_v28, %v1739_v20  ;;  %v1967_v39 = vsel %vm1964_vm7, %v1934_v32, %v1453_v38  ;;  %v4548_v9 = vld [vmem:[#allocation20_spill] sm:$0xff] }
 0x19a   : > { %1464 = vrot.lane.b32.xlu0 %v688_v33, %s2845_s9  ;;  %2726 = vmatmul.mubr.msk.f32.vlgmr.msra.gmra.mrb[0].mxu1 %vm2068_vm10, %v2048_v63 }
 0x19b   : > { %1750 = vrot.lane.b32.xlu1 %v767_v34, %s2847_s25 }
 0x19c   : > { %v1455_v41 = vpop.permute.xlu0 %1454  ;;  %v3761_v50 = vpop.permute.xlu1 %1358 }
 0x19d   : > { %v1968_v20 = vsel %vm1964_vm7, %v1935_v21, %v1455_v41 }
 0x19e   : > { %1466 = vrot.lane.b32.xlu0 %v689_v57, %s2845_s9 }
 0x19f   : > { %1370 = vrot.lane.b32.xlu1 %v767_v34, %s2844_s8 }
 0x1a0   : > { %v1581_v55 = vpop.permute.xlu0 %1580  ;;  %v1485_v10 = vpop.permute.xlu1 %1484 }
 0x1a1   : > { %v2000_v34 = vsel %vm1997_vm9, %v1967_v39, %v1581_v55  ;;  %v753_v55 = vld [vmem:[#allocation2 + $0x9a] sm:$0xff] }
 0x1a2   : > { %1592 = vrot.lane.b32.xlu0 %v720_v4, %s2846_s14 }
 0x1a3   : > { %1496 = vrot.lane.b32.xlu1 %v3356_v37, %s2845_s9 }
 0x1a4   : > { %v3768_v23 = vpop.permute.xlu0 %1232  ;;  %v1487_v5 = vpop.permute.xlu1 %1486 }
 0x1a6   : > { %1212 = vrot.lane.b32.xlu0 %v720_v4, %s2843_s7  ;;  %v4549_v4 = vld [vmem:[#allocation26_spill] sm:$0xff] }
 0x1a7   : > { %1498 = vrot.lane.b32.xlu1 %v3383_v30, %s2845_s9  ;;  %v1983_v30 = vsel %vm1964_vm7, %v1950_v54, %v1485_v10  ;;  %v1819_v41 = vsel %vm398_vm0, %v4549_v4, %v4548_v9 }
 0x1a8   : > { %v1615_v37 = vpop.permute.xlu0 %1614  ;;  %v1613_v47 = vpop.permute.xlu1 %1612  ;;  %v1852_v10 = vsel %vm1832_vm3, %v1819_v41, %v3458_v7 }
 0x1a9   : > { %v2016_v48 = vsel %vm1997_vm9, %v1983_v30, %v1613_v47  ;;  %v1885_v49 = vsel %vm1865_vm4, %v1852_v10, %v3592_v62  ;;  %v690_v62 = vld [vmem:[#allocation2 + $0xa8] sm:$0xff] }
 0x1aa   : > { %1594 = vrot.lane.b32.xlu0 %v721_v1, %s2846_s14  ;;  %v1918_v53 = vsel %vm1898_vm5, %v1885_v49, %v3733_v13 }
 0x1ab   : > { %1624 = vrot.lane.b32.xlu1 %v736_v58, %s2846_s14 }
 0x1ac   : > { %v1741_v24 = vpop.permute.xlu0 %1740  ;;  %v1583_v36 = vpop.permute.xlu1 %1582 }
 0x1ad   : > { %v2049_v25 = vsel %vm2030_vm8, %v2016_v48, %v1741_v24  ;;  %v2001_v0 = vsel %vm1997_vm9, %v1968_v20, %v1583_v36  ;;  %v4550_v24 = vld [vmem:[#allocation3_spill] sm:$0xff] }
 0x1ae   : > { %1720 = vrot.lane.b32.xlu0 %v752_v2, %s2847_s25  ;;  %2728 = vmatprep.mubr.msk.f32.mxu1 %vm2068_vm10, %v2049_v25  ;;  %v1804_v42 = vsel %vm398_vm0, %v3228_v22, %v4550_v24  ;;  %v4551_v25 = vld [vmem:[#allocation34_spill] sm:$0xff] }
 0x1af   : > { %1244 = vrot.lane.b32.xlu1 %v736_v58, %s2843_s7  ;;  %v1951_v58 = vsel %vm1931_vm6, %v1918_v53, %v3761_v50  ;;  %v1837_v36 = vsel %vm1832_vm3, %v1804_v42, %v4551_v25 }
 0x1b0   : > { %v1329_v33 = vpop.permute.xlu0 %1328  ;;  %v1709_v28 = vpop.permute.xlu1 %1708  ;;  %v1984_v8 = vsel %vm1964_vm7, %v1951_v58, %v1487_v5  ;;  %v691_v5 = vld [vmem:[#allocation2 + $0xb0] sm:$0xff]  ;;  %v1870_v44 = vsel %vm1865_vm4, %v1837_v36, %v3520_v40  ;;  %v724_v36 = vld [vmem:[#allocation2 + $0xc1] sm:$0xff] }
 0x1b1   : > { %v2033_v3 = vsel %vm2030_vm8, %v2000_v34, %v1709_v28  ;;  %v2017_v7 = vsel %vm1997_vm9, %v1984_v8, %v1615_v37  ;;  %v1903_v45 = vsel %vm1898_vm5, %v1870_v44, %v3639_v43  ;;  %v4552_v43 = vld [vmem:[#allocation18_spill] sm:$0xff] }
 0x1b2   : > { %1214 = vrot.lane.b32.xlu0 %v721_v1, %s2843_s7  ;;  %2704 = vmatprep.mubr.msk.f32.mxu0 %vm2068_vm10, %v2033_v3  ;;  %v1936_v32 = vsel %vm1931_vm6, %v1903_v45, %v1329_v33  ;;  %v1820_v33 = vsel %vm398_vm0, %v3309_v56, %v4552_v43  ;;  %v754_v28 = vld [vmem:[#allocation2 + $0xaa] sm:$0xff] }
 0x1b3   : > { %1626 = vrot.lane.b32.xlu1 %v737_v6, %s2846_s14  ;;  %v1853_v21 = vsel %vm1832_vm3, %v1820_v33, %v3442_v46  ;;  %v2796_v45 = vld [vmem:[#allocation2 + $0x48] sm:$0xff] }
 0x1b4   : > { %v1711_v38 = vpop.permute.xlu0 %1710  ;;  %v3822_v57 = vpop.permute.xlu1 %1234  ;;  %v1886_v20 = vsel %vm1865_vm4, %v1853_v21, %v3582_v27 }
 0x1b5   : > { %v2034_v63 = vsel %vm2030_vm8, %v2001_v0, %v1711_v38  ;;  %v4553_v38 = vld [vmem:[#allocation8_spill] sm:$0xff] }
 0x1b6   : > { %1340 = vrot.lane.b32.xlu0 %v752_v2, %s2844_s8  ;;  %2705 = vmatmul.mubr.msk.f32.gmra.mrb[2].mxu0 %vm2068_vm10, %v2034_v63  ;;  %v722_v2 = vld [vmem:[#allocation2 + $0xa9] sm:$0xff]  ;;  %v1919_v63 = vsel %vm1898_vm5, %v1886_v20, %v3768_v23 }
 0x1b7   : > { %1752 = vrot.lane.b32.xlu1 %v768_v31, %s2847_s25  ;;  %v725_v20 = vld [vmem:[#allocation2 + $0xc9] sm:$0xff] }
 0x1b8   : > { %v3832_v14 = vpop.permute.xlu0 %1330  ;;  %v1361_v1 = vpop.permute.xlu1 %1360 }
 0x1b9   : > { %v1952_v46 = vsel %vm1931_vm6, %v1919_v63, %v1361_v1 }
 0x1ba   : > { %1722 = vrot.lane.b32.xlu0 %v753_v55, %s2847_s25 }
 0x1bb   : > { %1246 = vrot.lane.b32.xlu1 %v737_v6, %s2843_s7 }
 0x1bc   : > { %v1457_v47 = vpop.permute.xlu0 %1456  ;;  %v1743_v54 = vpop.permute.xlu1 %1742 }
 0x1bd   : > { %v2050_v15 = vsel %vm2030_vm8, %v2017_v7, %v1743_v54  ;;  %v1969_v22 = vsel %vm1964_vm7, %v1936_v32, %v1457_v47  ;;  %v755_v47 = vld [vmem:[#allocation2 + $0xb2] sm:$0xff] }
 0x1be   : > { %1342 = vrot.lane.b32.xlu0 %v753_v55, %s2844_s8  ;;  %2729 = vmatmul.mubr.msk.f32.gmra.mrb[2].mxu1 %vm2068_vm10, %v2050_v15  ;;  %v4555_v15 = vld [vmem:[#allocation67_spill] sm:$0xff] }
 0x1bf   : > { %1372 = vrot.lane.b32.xlu1 %v768_v31, %s2844_s8  ;;  %v1805_v31 = vsel %vm398_vm0, %v3256_v35, %v4553_v38  ;;  %v739_v35 = vld [vmem:[#allocation2 + $0x171] sm:$0xff] }
 0x1c0   : > { %v1459_v13 = vpop.permute.xlu0 %1458  ;;  %v3848_v50 = vpop.permute.xlu1 %1362  ;;  %v1838_v56 = vsel %vm1832_vm3, %v1805_v31, %v3397_v19  ;;  %v740_v31 = vld [vmem:[#allocation2 + $0x181] sm:$0xff] }
 0x1c1   : > { %v1871_v27 = vsel %vm1865_vm4, %v1838_v56, %v3538_v18 }
 0x1c2   : > { %1468 = vrot.lane.b32.xlu0 %v690_v62, %s2845_s9  ;;  %v1904_v23 = vsel %vm1898_vm5, %v1871_v27, %v3652_v52  ;;  %v770_v52 = vld [vmem:[#allocation2 + $0x16a] sm:$0xff] }
 0x1c3   : > { %1754 = vrot.lane.b32.xlu1 %v769_v12, %s2847_s25  ;;  %v1937_v19 = vsel %vm1931_vm6, %v1904_v23, %v3832_v14  ;;  %v4554_v14 = vld [vmem:[#allocation22_spill] sm:$0xff] }
 0x1c4   : > { %v1585_v37 = vpop.permute.xlu0 %1584  ;;  %v1489_v30 = vpop.permute.xlu1 %1488  ;;  %v1970_v18 = vsel %vm1964_vm7, %v1937_v19, %v1459_v13  ;;  %v1821_v8 = vsel %vm398_vm0, %v3340_v29, %v4554_v14 }
 0x1c5   : > { %v2002_v39 = vsel %vm1997_vm9, %v1969_v22, %v1585_v37  ;;  %v1985_v9 = vsel %vm1964_vm7, %v1952_v46, %v1489_v30  ;;  %v1854_v7 = vsel %vm1832_vm3, %v1821_v8, %v3471_v51  ;;  %v4557_v22 = vld [vmem:[#allocation35_spill] sm:$0xff]  ;;  %v4565_v8 = vld [vmem:[#allocation58_spill] sm:$0xff] }
 0x1c6   : > { %1470 = vrot.lane.b32.xlu0 %v691_v5, %s2845_s9  ;;  %v1887_v62 = vsel %vm1865_vm4, %v1854_v7, %v4555_v15  ;;  %v4560_v46 = vld [vmem:[#allocation23_spill] sm:$0xff] }
 0x1c7   : > { %1374 = vrot.lane.b32.xlu1 %v769_v12, %s2844_s8  ;;  %v1920_v12 = vsel %vm1898_vm5, %v1887_v62, %v3822_v57  ;;  %v692_v57 = vld [vmem:[#allocation2 + $0xc0] sm:$0xff]  ;;  %v741_v62 = vld [vmem:[#allocation2 + $0x189] sm:$0xff] }
 0x1c8   : > { %v3854_v16 = vpop.permute.xlu0 %1204  ;;  %v3856_v48 = vpop.permute.xlu1 %1490  ;;  %v1953_v29 = vsel %vm1931_vm6, %v1920_v12, %v3848_v50  ;;  %v771_v50 = vld [vmem:[#allocation2 + $0x172] sm:$0xff] }
 0x1c9   : > { %v1986_v51 = vsel %vm1964_vm7, %v1953_v29, %v3856_v48  ;;  %v693_v48 = vld [vmem:[#allocation2 + $0xc8] sm:$0xff] }
 0x1ca   : > { %1596 = vrot.lane.b32.xlu0 %v722_v2, %s2846_s14 }
 0x1cb   : > { %1500 = vrot.lane.b32.xlu1 %v706_v60, %s2845_s9 }
 0x1cc   : > { %v1587_v61 = vpop.permute.xlu0 %1586  ;;  %v1617_v17 = vpop.permute.xlu1 %1616 }
 0x1cd   : > { %v2018_v41 = vsel %vm1997_vm9, %v1985_v9, %v1617_v17  ;;  %v2003_v49 = vsel %vm1997_vm9, %v1970_v18, %v1587_v61  ;;  %v708_v61 = vld [vmem:[#allocation2 + $0x180] sm:$0xff]  ;;  %v4556_v17 = vld [vmem:[#allocation4_spill] sm:$0xff]  ;;  %v4563_v18 = vld [vmem:[#allocation10_spill] sm:$0xff] }
 0x1ce   : > { %1216 = vrot.lane.b32.xlu0 %v722_v2, %s2843_s7  ;;  %v1806_v32 = vsel %vm398_vm0, %v2796_v45, %v4556_v17  ;;  %v756_v9 = vld [vmem:[#allocation2 + $0xc2] sm:$0xff] }
 0x1cf   : > { %1502 = vrot.lane.b32.xlu1 %v707_v11, %s2845_s9 }
 0x1d0   : > { %v1713_v6 = vpop.permute.xlu0 %1712  ;;  %v3875_v34 = vpop.permute.xlu1 %1236 }
 0x1d1   : > { %v2035_v40 = vsel %vm2030_vm8, %v2002_v39, %v1713_v6  ;;  %v4558_v39 = vld [vmem:[#allocation55_spill] sm:$0xff] }
 0x1d2   : > { %1598 = vrot.lane.b32.xlu0 %v723_v59, %s2846_s14  ;;  %2707 = vmatprep.mubr.msk.f32.mxu0 %vm2068_vm10, %v2035_v40  ;;  %v709_v40 = vld [vmem:[#allocation2 + $0x188] sm:$0xff] }
 0x1d3   : > { %1628 = vrot.lane.b32.xlu1 %v738_v26, %s2846_s14 }
 0x1d4   : > { %v3885_v3 = vpop.permute.xlu0 %1206  ;;  %v1619_v0 = vpop.permute.xlu1 %1618 }
 0x1d5   : > { %v2019_v37 = vsel %vm1997_vm9, %v1986_v51, %v1619_v0 }
 0x1d6   : > { %1724 = vrot.lane.b32.xlu0 %v754_v28, %s2847_s25 }
 0x1d7   : > { %1248 = vrot.lane.b32.xlu1 %v738_v26, %s2843_s7 }
 0x1d8   : > { %v3902_v4 = vpop.permute.xlu0 %1332  ;;  %v1745_v55 = vpop.permute.xlu1 %1744 }
 0x1d9   : > { %v2051_v10 = vsel %vm2030_vm8, %v2018_v41, %v1745_v55  ;;  %v4562_v41 = vld [vmem:[#allocation65_spill] sm:$0xff] }
 0x1da   : > { %1218 = vrot.lane.b32.xlu0 %v723_v59, %s2843_s7  ;;  %2731 = vmatprep.mubr.msk.f32.mxu1 %vm2068_vm10, %v2051_v10  ;;  %v1839_v59 = vsel %vm1832_vm3, %v1806_v32, %v4557_v22  ;;  %v2797_v10 = vld [vmem:[#allocation2 + $0x50] sm:$0xff] }
 0x1db   : > { %1630 = vrot.lane.b32.xlu1 %v739_v35, %s2846_s14  ;;  %v1872_v6 = vsel %vm1865_vm4, %v1839_v59, %v4558_v39 }
 0x1dc   : > { %v1715_v1 = vpop.permute.xlu0 %1714  ;;  %v3916_v58 = vpop.permute.xlu1 %1238  ;;  %v1905_v43 = vsel %vm1898_vm5, %v1872_v6, %v3854_v16  ;;  %v4559_v16 = vld [vmem:[#allocation19_spill] sm:$0xff] }
 0x1dd   : > { %v2036_v53 = vsel %vm2030_vm8, %v2003_v49, %v1715_v1  ;;  %v1822_v27 = vsel %vm398_vm0, %v4560_v46, %v4559_v16  ;;  %v1807_v49 = vsel %vm398_vm0, %v2797_v10, %v4563_v18  ;;  %v4569_v16 = vld [vmem:[#allocation7_spill] sm:$0xff] }
 0x1de   : > { %1344 = vrot.lane.b32.xlu0 %v754_v28, %s2844_s8  ;;  %2708 = vmatmul.mubr.msk.f32.gmra.mrb[4].mxu0 %vm2068_vm10, %v2036_v53  ;;  %v1938_v28 = vsel %vm1931_vm6, %v1905_v43, %v3902_v4  ;;  %v4561_v4 = vld [vmem:[#allocation45_spill] sm:$0xff] }
 0x1df   : > { %1756 = vrot.lane.b32.xlu1 %v770_v52, %s2847_s25 }
 0x1e0   : > { %v3926_v54 = vpop.permute.xlu0 %1334  ;;  %v3930_v13 = vpop.permute.xlu1 %1364 }
 0x1e2   : > { %1726 = vrot.lane.b32.xlu0 %v755_v47, %s2847_s25 }
 0x1e3   : > { %1250 = vrot.lane.b32.xlu1 %v739_v35, %s2843_s7  ;;  %v1855_v35 = vsel %vm1832_vm3, %v1822_v27, %v4561_v4  ;;  %v4570_v27 = vld [vmem:[#allocation36_spill] sm:$0xff]  ;;  %v727_v4 = vld [vmem:[#allocation2 + $0xe1] sm:$0xff] }
 0x1e4   : > { %v1461_v5 = vpop.permute.xlu0 %1460  ;;  %v1747_v30 = vpop.permute.xlu1 %1746  ;;  %v1888_v55 = vsel %vm1865_vm4, %v1855_v35, %v4562_v41  ;;  %v4571_v35 = vld [vmem:[#allocation56_spill] sm:$0xff] }
 0x1e5   : > { %v2052_v2 = vsel %vm2030_vm8, %v2019_v37, %v1747_v30  ;;  %v1971_v21 = vsel %vm1964_vm7, %v1938_v28, %v1461_v5  ;;  %v1921_v1 = vsel %vm1898_vm5, %v1888_v55, %v3875_v34 }
 0x1e6   : > { %1346 = vrot.lane.b32.xlu0 %v755_v47, %s2844_s8  ;;  %2732 = vmatmul.mubr.msk.f32.gmra.mrb[4].mxu1 %vm2068_vm10, %v2052_v2  ;;  %v1954_v14 = vsel %vm1931_vm6, %v1921_v1, %v3930_v13 }
 0x1e7   : > { %1376 = vrot.lane.b32.xlu1 %v770_v52, %s2844_s8  ;;  %v4564_v52 = vld [vmem:[#allocation38_spill] sm:$0xff] }
 0x1e8   : > { %v1463_v60 = vpop.permute.xlu0 %1462  ;;  %v3945_v24 = vpop.permute.xlu1 %1366  ;;  %v1840_v53 = vsel %vm1832_vm3, %v1807_v49, %v4564_v52  ;;  %v758_v52 = vld [vmem:[#allocation2 + $0xda] sm:$0xff] }
 0x1e9   : > { %v1873_v47 = vsel %vm1865_vm4, %v1840_v53, %v4565_v8  ;;  %v742_v8 = vld [vmem:[#allocation2 + $0x199] sm:$0xff] }
 0x1ea   : > { %1472 = vrot.lane.b32.xlu0 %v692_v57, %s2845_s9  ;;  %v1906_v34 = vsel %vm1898_vm5, %v1873_v47, %v3885_v3  ;;  %v772_v3 = vld [vmem:[#allocation2 + $0x182] sm:$0xff] }
 0x1eb   : > { %1758 = vrot.lane.b32.xlu1 %v771_v50, %s2847_s25  ;;  %v1939_v51 = vsel %vm1931_vm6, %v1906_v34, %v3926_v54  ;;  %v2798_v54 = vld [vmem:[#allocation2 + $0x110] sm:$0xff]  ;;  %v759_v34 = vld [vmem:[#allocation2 + $0xe2] sm:$0xff] }
 0x1ec   : > { %v1589_v42 = vpop.permute.xlu0 %1588  ;;  %v1493_v25 = vpop.permute.xlu1 %1492  ;;  %v1972_v5 = vsel %vm1964_vm7, %v1939_v51, %v1463_v60 }
 0x1ed   : > { %v2004_v0 = vsel %vm1997_vm9, %v1971_v21, %v1589_v42  ;;  %v1987_v7 = vsel %vm1964_vm7, %v1954_v14, %v1493_v25  ;;  %v4567_v42 = vld [vmem:[#allocation48_spill] sm:$0xff] }
 0x1ee   : > { %1474 = vrot.lane.b32.xlu0 %v693_v48, %s2845_s9  ;;  %v757_v48 = vld [vmem:[#allocation2 + $0xca] sm:$0xff] }
 0x1ef   : > { %1378 = vrot.lane.b32.xlu1 %v771_v50, %s2844_s8  ;;  %v4566_v50 = vld [vmem:[#allocation25_spill] sm:$0xff] }
 0x1f0   : > { %v3951_v44 = vpop.permute.xlu0 %1208  ;;  %v3953_v11 = vpop.permute.xlu1 %1494  ;;  %v1823_v60 = vsel %vm398_vm0, %v2798_v54, %v4566_v50 }
 0x1f1   : > { %v1856_v25 = vsel %vm1832_vm3, %v1823_v60, %v4567_v42  ;;  %v4576_v60 = vld [vmem:[#allocation40_spill] sm:$0xff] }
 0x1f2   : > { %1600 = vrot.lane.b32.xlu0 %v724_v36, %s2846_s14 }
 0x1f3   : > { %1504 = vrot.lane.b32.xlu1 %v708_v61, %s2845_s9  ;;  %v4568_v61 = vld [vmem:[#allocation69_spill] sm:$0xff] }
 0x1f4   : > { %v1591_v26 = vpop.permute.xlu0 %1590  ;;  %v1621_v33 = vpop.permute.xlu1 %1620  ;;  %v1889_v45 = vsel %vm1865_vm4, %v1856_v25, %v4568_v61  ;;  %v4577_v25 = vld [vmem:[#allocation60_spill] sm:$0xff] }
 0x1f5   : > { %v2020_v12 = vsel %vm1997_vm9, %v1987_v7, %v1621_v33  ;;  %v2005_v37 = vsel %vm1997_vm9, %v1972_v5, %v1591_v26  ;;  %v1922_v32 = vsel %vm1898_vm5, %v1889_v45, %v3916_v58  ;;  %v694_v58 = vld [vmem:[#allocation2 + $0xd8] sm:$0xff]  ;;  %v4574_v5 = vld [vmem:[#allocation66_spill] sm:$0xff] }
 0x1f6   : > { %1220 = vrot.lane.b32.xlu0 %v724_v36, %s2843_s7  ;;  %v1955_v22 = vsel %vm1931_vm6, %v1922_v32, %v3945_v24  ;;  %v773_v24 = vld [vmem:[#allocation2 + $0x18a] sm:$0xff] }
 0x1f7   : > { %1506 = vrot.lane.b32.xlu1 %v709_v40, %s2845_s9  ;;  %v1988_v59 = vsel %vm1964_vm7, %v1955_v22, %v3953_v11  ;;  %v695_v11 = vld [vmem:[#allocation2 + $0xe0] sm:$0xff] }
 0x1f8   : > { %v1717_v38 = vpop.permute.xlu0 %1716  ;;  %v3972_v56 = vpop.permute.xlu1 %1240  ;;  %v774_v22 = vld [vmem:[#allocation2 + $0x19a] sm:$0xff] }
 0x1f9   : > { %v2037_v63 = vsel %vm2030_vm8, %v2004_v0, %v1717_v38  ;;  %v710_v38 = vld [vmem:[#allocation2 + $0x198] sm:$0xff] }
 0x1fa   : > { %1602 = vrot.lane.b32.xlu0 %v725_v20, %s2846_s14  ;;  %2710 = vmatprep.mubr.msk.f32.mxu0 %vm2068_vm10, %v2037_v63  ;;  %v2799_v63 = vld [vmem:[#allocation2 + $0x60] sm:$0xff] }
 0x1fb   : > { %1632 = vrot.lane.b32.xlu1 %v740_v31, %s2846_s14  ;;  %v1808_v46 = vsel %vm398_vm0, %v2799_v63, %v4569_v16  ;;  %v4580_v63 = vld [vmem:[#allocation71_spill] sm:$0xff] }
 0x1fc   : > { %v3982_v23 = vpop.permute.xlu0 %1210 }
 0x1fd   : > { %v1623_v19 = vpop.permute.xlu1 %1622 }
 0x1fe   : > { %1728 = vrot.lane.b32.xlu0 %v756_v9, %s2847_s25  ;;  %v2021_v6 = vsel %vm1997_vm9, %v1988_v59, %v1623_v19  ;;  %v711_v19 = vld [vmem:[#allocation2 + $0x1a0] sm:$0xff] }
 0x1ff   : > { %1252 = vrot.lane.b32.xlu1 %v740_v31, %s2843_s7 }
 0x200   : > { %v3999_v15 = vpop.permute.xlu0 %1336 }
 0x201   : > { %v1749_v29 = vpop.permute.xlu1 %1748 }
 0x202   : > { %v2053_v13 = vsel %vm2030_vm8, %v2020_v12, %v1749_v29  ;;  %1222 = vrot.lane.b32.xlu0 %v725_v20, %s2843_s7  ;;  %v726_v20 = vld [vmem:[#allocation2 + $0xd9] sm:$0xff]  ;;  %v4573_v12 = vld [vmem:[#allocation46_spill] sm:$0xff] }
 0x203   : > { %1634 = vrot.lane.b32.xlu1 %v741_v62, %s2846_s14  ;;  %2734 = vmatprep.mubr.msk.f32.mxu1 %vm2068_vm10, %v2053_v13  ;;  %v743_v13 = vld [vmem:[#allocation2 + $0x1a1] sm:$0xff] }
 0x204   : > { %v1719_v30 = vpop.permute.xlu0 %1718 }
 0x205   : > { %v2038_v2 = vsel %vm2030_vm8, %v2005_v37, %v1719_v30  ;;  %v4013_v57 = vpop.permute.xlu1 %1242 }
 0x206   : > { %1348 = vrot.lane.b32.xlu0 %v756_v9, %s2844_s8  ;;  %2711 = vmatmul.mubr.msk.f32.gmra.mrb[6].mxu0 %vm2068_vm10, %v2038_v2  ;;  %v1841_v9 = vsel %vm1832_vm3, %v1808_v46, %v4570_v27  ;;  %v4575_v2 = vld [vmem:[#allocation13_spill] sm:$0xff] }
 0x207   : > { %1760 = vrot.lane.b32.xlu1 %v772_v3, %s2847_s25  ;;  %v1874_v41 = vsel %vm1865_vm4, %v1841_v9, %v4571_v35 }
 0x208   : > { %v4022_v36 = vpop.permute.xlu0 %1338  ;;  %v1907_v10 = vsel %vm1898_vm5, %v1874_v41, %v3951_v44  ;;  %v2800_v44 = vld [vmem:[#allocation2 + $0x120] sm:$0xff] }
 0x209   : > { %v4026_v17 = vpop.permute.xlu1 %1368  ;;  %v1940_v49 = vsel %vm1931_vm6, %v1907_v10, %v3999_v15  ;;  %v4572_v15 = vld [vmem:[#allocation21_spill] sm:$0xff] }
 0x20a   : > { %1730 = vrot.lane.b32.xlu0 %v757_v48, %s2847_s25 }
 0x20b   : > { %1254 = vrot.lane.b32.xlu1 %v741_v62, %s2843_s7  ;;  %v1824_v62 = vsel %vm398_vm0, %v2800_v44, %v4572_v15  ;;  %s4206_s7 = scalar_lea.vmem %s4466_s5, %s2956_s22 }
 0x20c   : > { %v1465_v39 = vpop.permute.xlu0 %1464  ;;  %v1857_v29 = vsel %vm1832_vm3, %v1824_v62, %v4573_v12 }
 0x20d   : > { %v1751_v26 = vpop.permute.xlu1 %1750  ;;  %v1973_v1 = vsel %vm1964_vm7, %v1940_v49, %v1465_v39  ;;  %v1890_v37 = vsel %vm1865_vm4, %v1857_v29, %v4574_v5 }
 0x20e   : > { %v2054_v40 = vsel %vm2030_vm8, %v2021_v6, %v1751_v26  ;;  %1350 = vrot.lane.b32.xlu0 %v757_v48, %s2844_s8  ;;  %v1923_v50 = vsel %vm1898_vm5, %v1890_v37, %v3972_v56 }
 0x20f   : > { %1380 = vrot.lane.b32.xlu1 %v772_v3, %s2844_s8  ;;  %2735 = vmatmul.mubr.msk.f32.gmra.mrb[6].mxu1 %vm2068_vm10, %v2054_v40  ;;  %v2801_v3 = vld [vmem:[#allocation2 + $0x68] sm:$0xff]  ;;  %v1956_v42 = vsel %vm1931_vm6, %v1923_v50, %v4026_v17  ;;  %v4585_v50 = vld [vmem:[#allocation47_spill] sm:$0xff] }
 0x210   : > { %v4041_v43 = vpop.permute.xlu0 %1466  ;;  %v1809_v54 = vsel %vm398_vm0, %v2801_v3, %v4575_v2  ;;  %v2804_v3 = vld [vmem:[#allocation2 + $0x138] sm:$0xff] }
 0x211   : > { %v4043_v33 = vpop.permute.xlu1 %1370  ;;  %v1842_v48 = vsel %vm1832_vm3, %v1809_v54, %v4576_v60  ;;  %v4584_v2 = vld [vmem:[#allocation24_spill] sm:$0xff] }
 0x212   : > { %1476 = vrot.lane.b32.xlu0 %v694_v58, %s2845_s9  ;;  %v1875_v61 = vsel %vm1865_vm4, %v1842_v48, %v4577_v25  ;;  %v1826_v54 = vsel %vm398_vm0, %v2804_v3, %v4584_v2  ;;  %v4586_v48 = vld [vmem:[#allocation68_spill] sm:$0xff]  ;;  %v4594_v2 = vld [vmem:[#allocation39_spill] sm:$0xff] }
 0x213   : > { %1762 = vrot.lane.b32.xlu1 %v773_v24, %s2847_s25  ;;  %v1908_v56 = vsel %vm1898_vm5, %v1875_v61, %v3982_v23  ;;  %v2805_v61 = vld [vmem:[#allocation2 + $0x80] sm:$0xff] }
 0x214   : > { %v1593_v28 = vpop.permute.xlu0 %1592  ;;  %v1941_v6 = vsel %vm1931_vm6, %v1908_v56, %v4022_v36  ;;  %v2802_v36 = vld [vmem:[#allocation2 + $0x128] sm:$0xff] }
 0x215   : > { %v1497_v21 = vpop.permute.xlu1 %1496  ;;  %v2006_v53 = vsel %vm1997_vm9, %v1973_v1, %v1593_v28  ;;  %v1974_v26 = vsel %vm1964_vm7, %v1941_v6, %v4041_v43  ;;  %v4578_v28 = vld [vmem:[#allocation28_spill] sm:$0xff]  ;;  %v4579_v43 = vld [vmem:[#allocation50_spill] sm:$0xff] }
 0x216   : > { %1478 = vrot.lane.b32.xlu0 %v695_v11, %s2845_s9  ;;  %v1989_v45 = vsel %vm1964_vm7, %v1956_v42, %v1497_v21  ;;  %v1825_v21 = vsel %vm398_vm0, %v2802_v36, %v4578_v28  ;;  %v4588_v56 = vld [vmem:[#allocation42_spill] sm:$0xff] }
 0x217   : > { %1382 = vrot.lane.b32.xlu1 %v773_v24, %s2844_s8  ;;  %v775_v24 = vld [vmem:[#allocation2 + $0x1a2] sm:$0xff] }
 0x218   : > { %v4049_v0 = vpop.permute.xlu0 %1212  ;;  %v4589_v6 = vld [vmem:[#allocation62_spill] sm:$0xff] }
 0x219   : > { %v4051_v31 = vpop.permute.xlu1 %1498 }
 0x21a   : > { %1604 = vrot.lane.b32.xlu0 %v726_v20, %s2846_s14  ;;  %v1858_v20 = vsel %vm1832_vm3, %v1825_v21, %v4579_v43 }
 0x21b   : > { %1508 = vrot.lane.b32.xlu1 %v710_v38, %s2845_s9  ;;  %v1891_v16 = vsel %vm1865_vm4, %v1858_v20, %v4580_v63 }
 0x21c   : > { %v1595_v55 = vpop.permute.xlu0 %1594  ;;  %v1924_v27 = vsel %vm1898_vm5, %v1891_v16, %v4013_v57  ;;  %v4590_v16 = vld [vmem:[#allocation30_spill] sm:$0xff] }
 0x21d   : > { %v1625_v18 = vpop.permute.xlu1 %1624  ;;  %v2007_v40 = vsel %vm1997_vm9, %v1974_v26, %v1595_v55  ;;  %v1957_v9 = vsel %vm1931_vm6, %v1924_v27, %v4043_v33  ;;  %v4581_v33 = vld [vmem:[#allocation9_spill] sm:$0xff] }
 0x21e   : > { %1606 = vrot.lane.b32.xlu0 %v727_v4, %s2846_s14  ;;  %v2022_v59 = vsel %vm1997_vm9, %v1989_v45, %v1625_v18  ;;  %v1990_v4 = vsel %vm1964_vm7, %v1957_v9, %v4051_v31  ;;  %v4582_v31 = vld [vmem:[#allocation37_spill] sm:$0xff]  ;;  %v4587_v45 = vld [vmem:[#allocation15_spill] sm:$0xff] }
 0x21f   : > { %1510 = vrot.lane.b32.xlu1 %v711_v19, %s2845_s9 }
 0x220   : > { %v1721_v14 = vpop.permute.xlu0 %1720 }
 0x221   : > { %v2039_v47 = vsel %vm2030_vm8, %v2006_v53, %v1721_v14  ;;  %v4070_v7 = vpop.permute.xlu1 %1244  ;;  %v2803_v53 = vld [vmem:[#allocation2 + $0x78] sm:$0xff] }
 0x222   : > { %1732 = vrot.lane.b32.xlu0 %v758_v52, %s2847_s25  ;;  %2713 = vmatprep.mubr.msk.f32.mxu0 %vm2068_vm10, %v2039_v47  ;;  %v1810_v14 = vsel %vm398_vm0, %v2803_v53, %v4581_v33  ;;  %v4583_v47 = vld [vmem:[#allocation57_spill] sm:$0xff] }
 0x223   : > { %1636 = vrot.lane.b32.xlu1 %v742_v8, %s2846_s14  ;;  %v1843_v8 = vsel %vm1832_vm3, %v1810_v14, %v4582_v31 }
 0x224   : > { %v4079_v51 = vpop.permute.xlu0 %1214  ;;  %v1876_v44 = vsel %vm1865_vm4, %v1843_v8, %v4583_v47 }
 0x225   : > { %v1627_v30 = vpop.permute.xlu1 %1626  ;;  %v1909_v62 = vsel %vm1898_vm5, %v1876_v44, %v4049_v0  ;;  %v1859_v0 = vsel %vm1832_vm3, %v1826_v54, %v4585_v50  ;;  %v4595_v50 = vld [vmem:[#allocation59_spill] sm:$0xff] }
 0x226   : > { %1734 = vrot.lane.b32.xlu0 %v759_v34, %s2847_s25  ;;  %v2023_v41 = vsel %vm1997_vm9, %v1990_v4, %v1627_v30  ;;  %v1892_v42 = vsel %vm1865_vm4, %v1859_v0, %v4586_v48  ;;  %v4592_v4 = vld [vmem:[#allocation73_spill] sm:$0xff] }
 0x227   : > { %1638 = vrot.lane.b32.xlu1 %v743_v13, %s2846_s14 }
 0x228   : > { %v1341_v32 = vpop.permute.xlu0 %1340 }
 0x229   : > { %v1753_v39 = vpop.permute.xlu1 %1752  ;;  %v1942_v12 = vsel %vm1931_vm6, %v1909_v62, %v1341_v32  ;;  %v1811_v32 = vsel %vm398_vm0, %v2805_v61, %v4587_v45 }
 0x22a   : > { %v2055_v17 = vsel %vm2030_vm8, %v2022_v59, %v1753_v39  ;;  %v1844_v59 = vsel %vm1832_vm3, %v1811_v32, %v4588_v56 }
 0x22b   : > { %1764 = vrot.lane.b32.xlu1 %v774_v22, %s2847_s25  ;;  %2737 = vmatprep.mubr.msk.f32.mxu1 %vm2068_vm10, %v2055_v17  ;;  %v1925_v22 = vsel %vm1898_vm5, %v1892_v42, %v4070_v7  ;;  %v1877_v17 = vsel %vm1865_vm4, %v1844_v59, %v4589_v6 }
 0x22c   : > { %v1723_v58 = vpop.permute.xlu0 %1722 }
 0x22d   : > { %v2040_v23 = vsel %vm2030_vm8, %v2007_v40, %v1723_v58  ;;  %v4108_v11 = vpop.permute.xlu1 %1246  ;;  %v1910_v58 = vsel %vm1898_vm5, %v1877_v17, %v4079_v51  ;;  %v2806_v51 = vld [vmem:[#allocation2 + $0x140] sm:$0xff] }
 0x22e   : > { %2714 = vmatmul.mubr.msk.f32.gmra.mrb[8].mxu0 %vm2068_vm10, %v2040_v23 }
 0x22f   : > { %1766 = vrot.lane.b32.xlu1 %v775_v24, %s2847_s25 }
 0x230   : > { %v1343_v38 = vpop.permute.xlu0 %1342 }
 0x231   : > { %v1373_v46 = vpop.permute.xlu1 %1372  ;;  %v1943_v36 = vsel %vm1931_vm6, %v1910_v58, %v1343_v38  ;;  %v4591_v38 = vld [vmem:[#allocation52_spill] sm:$0xff]  ;;  %v2808_v58 = vld [vmem:[#allocation2 + $0x150] sm:$0xff] }
 0x232   : > { %v1958_v39 = vsel %vm1931_vm6, %v1925_v22, %v1373_v46  ;;  %v1827_v46 = vsel %vm398_vm0, %v2806_v51, %v4590_v16  ;;  %v2809_v51 = vld [vmem:[#allocation2 + $0x98] sm:$0xff] }
 0x233   : > { %v1860_v27 = vsel %vm1832_vm3, %v1827_v46, %v4591_v38  ;;  %v4599_v16 = vld [vmem:[#allocation16_spill] sm:$0xff] }
 0x234   : > { %v1469_v35 = vpop.permute.xlu0 %1468  ;;  %v1813_v46 = vsel %vm398_vm0, %v2809_v51, %v4599_v16 }
 0x235   : > { %v1755_v55 = vpop.permute.xlu1 %1754  ;;  %v1975_v29 = vsel %vm1964_vm7, %v1942_v12, %v1469_v35  ;;  %v1893_v35 = vsel %vm1865_vm4, %v1860_v27, %v4592_v4  ;;  %v4600_v27 = vld [vmem:[#allocation43_spill] sm:$0xff] }
 0x236   : > { %v2056_v19 = vsel %vm2030_vm8, %v2023_v41, %v1755_v55  ;;  %v1926_v55 = vsel %vm1898_vm5, %v1893_v35, %v4108_v11  ;;  %v4194_v11 = vld [vmem:[%s4464_s3] ss:$0 sm:$0xff]  ;;  %v1846_v4 = vsel %vm1832_vm3, %v1813_v46, %v4600_v27 }
 0x237   : > { %2738 = vmatmul.mubr.msk.f32.gmra.mrb[8].mxu1 %vm2068_vm10, %v2056_v19 }
 0x238   : > { %v1471_v10 = vpop.permute.xlu0 %1470 }
 0x239   : > { %v1375_v18 = vpop.permute.xlu1 %1374  ;;  %v1976_v28 = vsel %vm1964_vm7, %v1943_v36, %v1471_v10  ;;  %v4597_v36 = vld [vmem:[#allocation49_spill] sm:$0xff] }
 0x23a   : > { %v1959_v19 = vsel %vm1931_vm6, %v1926_v55, %v1375_v18  ;;  %v4601_v55 = vld [vmem:[#allocation63_spill] sm:$0xff] }
 0x23c   : > { %v1597_v49 = vpop.permute.xlu0 %1596 }
 0x23d   : > { %v1501_v1 = vpop.permute.xlu1 %1500  ;;  %v2008_v13 = vsel %vm1997_vm9, %v1975_v29, %v1597_v49 }
 0x23e   : > { %v1991_v26 = vsel %vm1964_vm7, %v1958_v39, %v1501_v1 }
 0x240   : > { %v4127_v52 = vpop.permute.xlu0 %1216 }
 0x241   : > { %v1503_v57 = vpop.permute.xlu1 %1502 }
 0x242   : > { %v1992_v10 = vsel %vm1964_vm7, %v1959_v19, %v1503_v57  ;;  %v4199_v57 = vld [vmem:[%s4465_s4] ss:$0 sm:$0xff]  ;;  %v1879_v19 = vsel %vm1865_vm4, %v1846_v4, %v4601_v55 }
 0x244   : > { %v1599_v15 = vpop.permute.xlu0 %1598 }
 0x245   : > { %v1629_v34 = vpop.permute.xlu1 %1628  ;;  %v2009_v21 = vsel %vm1997_vm9, %v1976_v28, %v1599_v15 }
 0x246   : > { %v2024_v24 = vsel %vm1997_vm9, %v1991_v26, %v1629_v34 }
 0x248   : > { %v1725_v5 = vpop.permute.xlu0 %1724 }
 0x249   : > { %v2041_v37 = vsel %vm2030_vm8, %v2008_v13, %v1725_v5  ;;  %v4141_v30 = vpop.permute.xlu1 %1248  ;;  %v2807_v5 = vld [vmem:[#allocation2 + $0x90] sm:$0xff] }
 0x24a   : > { %2716 = vmatprep.mubr.msk.f32.mxu0 %vm2068_vm10, %v2041_v37  ;;  %v4593_v37 = vld [vmem:[#allocation12_spill] sm:$0xff] }
 0x24b   : > { %v1812_v3 = vsel %vm398_vm0, %v2807_v5, %v4593_v37 }
 0x24c   : > { %v4148_v60 = vpop.permute.xlu0 %1218  ;;  %v1845_v54 = vsel %vm1832_vm3, %v1812_v3, %v4594_v2 }
 0x24d   : > { %v1631_v25 = vpop.permute.xlu1 %1630  ;;  %v1878_v0 = vsel %vm1865_vm4, %v1845_v54, %v4595_v50 }
 0x24e   : > { %v2025_v1 = vsel %vm1997_vm9, %v1992_v10, %v1631_v25  ;;  %v1911_v42 = vsel %vm1898_vm5, %v1878_v0, %v4127_v52 }
 0x250   : > { %v1345_v40 = vpop.permute.xlu0 %1344 }
 0x251   : > { %v1757_v23 = vpop.permute.xlu1 %1756  ;;  %v1944_v61 = vsel %vm1931_vm6, %v1911_v42, %v1345_v40 }
 0x252   : > { %v2057_v7 = vsel %vm2030_vm8, %v2024_v24, %v1757_v23  ;;  %v4596_v24 = vld [vmem:[#allocation27_spill] sm:$0xff] }
 0x253   : > { %2740 = vmatprep.mubr.msk.f32.mxu1 %vm2068_vm10, %v2057_v7  ;;  %v1828_v23 = vsel %vm398_vm0, %v2808_v58, %v4596_v24  ;;  %v4607_v24 = vld [vmem:[#allocation61_spill] sm:$0xff] }
 0x254   : > { %v1727_v43 = vpop.permute.xlu0 %1726  ;;  %v1861_v7 = vsel %vm1832_vm3, %v1828_v23, %v4597_v36 }
 0x255   : > { %v2042_v20 = vsel %vm2030_vm8, %v2009_v21, %v1727_v43  ;;  %v4171_v63 = vpop.permute.xlu1 %1250  ;;  %v4598_v21 = vld [vmem:[#allocation70_spill] sm:$0xff] }
 0x256   : > { %2717 = vmatmul.mubr.msk.f32.gmra.mrb[10].mxu0 %vm2068_vm10, %v2042_v20  ;;  %v1894_v43 = vsel %vm1865_vm4, %v1861_v7, %v4598_v21 }
 0x257   : > { %v1927_v38 = vsel %vm1898_vm5, %v1894_v43, %v4141_v30  ;;  %v2812_v43 = vld [vmem:[#allocation2 + $0xb0] sm:$0xff] }
 0x258   : > { %v4178_v9 = vpop.permute.xlu0 %1346 }
 0x259   : > { %v1377_v41 = vpop.permute.xlu1 %1376 }
 0x25a   : > { %v1960_v35 = vsel %vm1931_vm6, %v1927_v38, %v1377_v41  ;;  %v4609_v38 = vld [vmem:[#allocation44_spill] sm:$0xff] }
 0x25c   : > { %v1473_v49 = vpop.permute.xlu0 %1472 }
 0x25d   : > { %v1759_v53 = vpop.permute.xlu1 %1758  ;;  %v1977_v32 = vsel %vm1964_vm7, %v1944_v61, %v1473_v49 }
 0x25e   : > { %v2058_v33 = vsel %vm2030_vm8, %v2025_v1, %v1759_v53  ;;  %v1912_v1 = vsel %vm1898_vm5, %v1879_v19, %v4148_v60  ;;  %v2810_v60 = vld [vmem:[#allocation2 + $0x158] sm:$0xff] }
 0x25f   : > { %2741 = vmatmul.mubr.msk.f32.gmra.mrb[10].mxu1 %vm2068_vm10, %v2058_v33  ;;  %v1945_v30 = vsel %vm1931_vm6, %v1912_v1, %v4178_v9  ;;  %v4603_v9 = vld [vmem:[#allocation53_spill] sm:$0xff]  ;;  %v4610_v19 = vld [vmem:[#allocation64_spill] sm:$0xff] }
 0x260   : > { %v1475_v14 = vpop.permute.xlu0 %1474 }
 0x261   : > { %v4189_v31 = vpop.permute.xlu1 %1378 }
 0x264   : > { %v1601_v18 = vpop.permute.xlu0 %1600 }
 0x265   : > { %v1505_v8 = vpop.permute.xlu1 %1504  ;;  %v2703_v47 = vpop.f32.mrb[0].mxu0  ;;  %v2010_v59 = vsel %vm1997_vm9, %v1977_v32, %v1601_v18 }
 0x266   : > { %v2402_v44 = vmul.f32 %v2703_v47, %v4194_v11  ;;  %v2235_v15 = vpop.f32.mrb[1].mxu0  ;;  %v1993_v10 = vsel %vm1964_vm7, %v1960_v35, %v1505_v8  ;;  %v1978_v47 = vsel %vm1964_vm7, %v1945_v30, %v1475_v14  ;;  %v4604_v14 = vld [vmem:[#allocation74_spill] sm:$0xff] }
 0x267   : > { %v2401_v62 = vmul.f32 %v4194_v11, %v2235_v15 }
 0x268   : > { %v2441_v34 = vadd.f32 %v4199_v57, %v2402_v44  ;;  %v4210_v12 = vpop.permute.xlu0 %1220 }
 0x269   : > { %v2440_v29 = vadd.f32 %v4199_v57, %v2401_v62  ;;  %v1507_v13 = vpop.permute.xlu1 %1506  ;;  %v4602_v62 = vld [vmem:[#allocation31_spill] sm:$0xff] }
 0x26a   : > { %2473 = vst.msk [vmem:[%s4206_s7 + $0x8] sm:$0xff] %vm398_vm0, %v2441_v34  ;;  %v1829_v34 = vsel %vm398_vm0, %v2810_v60, %v4602_v62 }
 0x26b   : > { %2472 = vst.msk [vmem:[%s4206_s7] sm:$0xff] %vm398_vm0, %v2440_v29  ;;  %v1862_v29 = vsel %vm1832_vm3, %v1829_v34, %v4603_v9 }
 0x26c   : > { %v1603_v48 = vpop.permute.xlu0 %1602  ;;  %v1895_v37 = vsel %vm1865_vm4, %v1862_v29, %v4604_v14 }
 0x26d   : > { %v1633_v25 = vpop.permute.xlu1 %1632  ;;  %v2727_v45 = vpop.f32.mrb[0].mxu1  ;;  %v2011_v41 = vsel %vm1997_vm9, %v1978_v47, %v1603_v48  ;;  %v1928_v2 = vsel %vm1898_vm5, %v1895_v37, %v4171_v63 }
 0x26e   : > { %v2418_v22 = vmul.f32 %v2727_v45, %v4194_v11  ;;  %v2315_v56 = vpop.f32.mrb[1].mxu1  ;;  %v2026_v53 = vsel %vm1997_vm9, %v1993_v10, %v1633_v25  ;;  %v1961_v54 = vsel %vm1931_vm6, %v1928_v2, %v4189_v31 }
 0x26f   : > { %v2417_v39 = vmul.f32 %v4194_v11, %v2315_v56  ;;  %v1994_v50 = vsel %vm1964_vm7, %v1961_v54, %v1507_v13 }
 0x270   : > { %v1729_v6 = vpop.permute.xlu0 %1728  ;;  %v2457_v17 = vadd.f32 %v4199_v57, %v2418_v22 }
 0x271   : > { %v2043_v52 = vsel %vm2030_vm8, %v2010_v59, %v1729_v6  ;;  %v4232_v26 = vpop.permute.xlu1 %1252  ;;  %v2456_v40 = vadd.f32 %v4199_v57, %v2417_v39  ;;  %v2811_v6 = vld [vmem:[#allocation2 + $0xa8] sm:$0xff] }
 0x272   : > { %2719 = vmatprep.mubr.msk.f32.mxu0 %vm2068_vm10, %v2043_v52  ;;  %2489 = vst.msk [vmem:[%s4206_s7 + $0x88] sm:$0xff] %vm398_vm0, %v2457_v17  ;;  %v4605_v17 = vld [vmem:[#allocation14_spill] sm:$0xff] }
 0x273   : > { %2488 = vst.msk [vmem:[%s4206_s7 + $0x80] sm:$0xff] %vm398_vm0, %v2456_v40  ;;  %v1814_v52 = vsel %vm398_vm0, %v2811_v6, %v4605_v17  ;;  %v4606_v40 = vld [vmem:[#allocation41_spill] sm:$0xff] }
 0x274   : > { %v4244_v28 = vpop.permute.xlu0 %1222  ;;  %v1847_v58 = vsel %vm1832_vm3, %v1814_v52, %v4606_v40 }
 0x275   : > { %v1635_v20 = vpop.permute.xlu1 %1634  ;;  %v1880_v23 = vsel %vm1865_vm4, %v1847_v58, %v4607_v24 }
 0x276   : > { %v2027_v48 = vsel %vm1997_vm9, %v1994_v50, %v1635_v20  ;;  %v1913_v7 = vsel %vm1898_vm5, %v1880_v23, %v4210_v12  ;;  %v4608_v20 = vld [vmem:[#allocation17_spill] sm:$0xff]  ;;  %v2814_v50 = vld [vmem:[#allocation2 + $0x170] sm:$0xff] }
 0x277   : > { %v1815_v51 = vsel %vm398_vm0, %v2812_v43, %v4608_v20 }
 0x278   : > { %v1349_v49 = vpop.permute.xlu0 %1348  ;;  %v1848_v27 = vsel %vm1832_vm3, %v1815_v51, %v4609_v38 }
 0x279   : > { %v1761_v33 = vpop.permute.xlu1 %1760  ;;  %v1946_v16 = vsel %vm1931_vm6, %v1913_v7, %v1349_v49  ;;  %v1881_v12 = vsel %vm1865_vm4, %v1848_v27, %v4610_v19 }
 0x27a   : > { %v2059_v18 = vsel %vm2030_vm8, %v2026_v53, %v1761_v33  ;;  %v1914_v49 = vsel %vm1898_vm5, %v1881_v12, %v4244_v28  ;;  %v4612_v28 = vld [vmem:[#allocation51_spill] sm:$0xff] }
 0x27b   : > { %2743 = vmatprep.mubr.msk.f32.mxu1 %vm2068_vm10, %v2059_v18 }
 0x27c   : > { %v1731_v44 = vpop.permute.xlu0 %1730 }
 0x27d   : > { %v2044_v8 = vsel %vm2030_vm8, %v2011_v41, %v1731_v44  ;;  %v4268_v15 = vpop.permute.xlu1 %1254  ;;  %v2813_v44 = vld [vmem:[#allocation2 + $0x168] sm:$0xff] }
 0x27e   : > { %2720 = vmatmul.mubr.msk.f32.gmra.mrb[12].mxu0 %vm2068_vm10, %v2044_v8  ;;  %v4611_v8 = vld [vmem:[#allocation29_spill] sm:$0xff] }
 0x27f   : > { %v1830_v60 = vsel %vm398_vm0, %v2813_v44, %v4611_v8 }
 0x280   : > { %v1351_v5 = vpop.permute.xlu0 %1350  ;;  %v1863_v34 = vsel %vm1832_vm3, %v1830_v60, %v4612_v28 }
 0x281   : > { %v4277_v3 = vpop.permute.xlu1 %1380  ;;  %v1947_v47 = vsel %vm1931_vm6, %v1914_v49, %v1351_v5  ;;  %v4613_v5 = vld [vmem:[#allocation72_spill] sm:$0xff] }
 0x282   : > { %v1896_v14 = vsel %vm1865_vm4, %v1863_v34, %v4613_v5 }
 0x283   : > { %v1929_v54 = vsel %vm1898_vm5, %v1896_v14, %v4232_v26 }
 0x284   : > { %v1477_v0 = vpop.permute.xlu0 %1476 }
 0x285   : > { %v1763_v42 = vpop.permute.xlu1 %1762  ;;  %v1979_v4 = vsel %vm1964_vm7, %v1946_v16, %v1477_v0  ;;  %v4614_v0 = vld [vmem:[#allocation33_spill] sm:$0xff] }
 0x286   : > { %v2060_v25 = vsel %vm2030_vm8, %v2027_v48, %v1763_v42  ;;  %v1831_v48 = vsel %vm398_vm0, %v2814_v50, %v4614_v0  ;;  %v1962_v42 = vsel %vm1931_vm6, %v1929_v54, %v4277_v3 }
 0x287   : > { %2744 = vmatmul.mubr.msk.f32.gmra.mrb[12].mxu1 %vm2068_vm10, %v2060_v25  ;;  %v4615_v25 = vld [vmem:[#allocation54_spill] sm:$0xff] }
 0x288   : > { %v1479_v61 = vpop.permute.xlu0 %1478 }
 0x289   : > { %v1383_v45 = vpop.permute.xlu1 %1382  ;;  %v2706_v32 = vpop.f32.mrb[2].mxu0  ;;  %v1980_v62 = vsel %vm1964_vm7, %v1947_v47, %v1479_v61  ;;  %v1864_v61 = vsel %vm1832_vm3, %v1831_v48, %v4615_v25 }
 0x28a   : > { %v2404_v63 = vmul.f32 %v2706_v32, %v4194_v11  ;;  %v2245_v22 = vpop.f32.mrb[3].mxu0 }
 0x28b   : > { %v2403_v31 = vmul.f32 %v4194_v11, %v2245_v22 }
 0x28c   : > { %v2443_v13 = vadd.f32 %v4199_v57, %v2404_v63  ;;  %v1605_v56 = vpop.permute.xlu0 %1604  ;;  %v4616_v63 = vld [vmem:[#allocation75_spill] sm:$0xff] }
 0x28d   : > { %v2442_v59 = vadd.f32 %v4199_v57, %v2403_v31  ;;  %v1509_v39 = vpop.permute.xlu1 %1508  ;;  %v2012_v10 = vsel %vm1997_vm9, %v1979_v4, %v1605_v56  ;;  %v1897_v22 = vsel %vm1865_vm4, %v1864_v61, %v4616_v63 }
 0x28e   : > { %2475 = vst.msk [vmem:[%s4206_s7 + $0x18] sm:$0xff] %vm398_vm0, %v2443_v13  ;;  %v1995_v32 = vsel %vm1964_vm7, %v1962_v42, %v1509_v39  ;;  %v1930_v13 = vsel %vm1898_vm5, %v1897_v22, %v4268_v15 }
 0x28f   : > { %2474 = vst.msk [vmem:[%s4206_s7 + $0x10] sm:$0xff] %vm398_vm0, %v2442_v59  ;;  %v1963_v3 = vsel %vm1931_vm6, %v1930_v13, %v1383_v45 }
 0x290   : > { %v1607_v36 = vpop.permute.xlu0 %1606 }
 0x291   : > { %v1511_v21 = vpop.permute.xlu1 %1510  ;;  %v2730_v46 = vpop.f32.mrb[2].mxu1  ;;  %v2013_v9 = vsel %vm1997_vm9, %v1980_v62, %v1607_v36 }
 0x292   : > { %v2420_v35 = vmul.f32 %v2730_v46, %v4194_v11  ;;  %v2325_v55 = vpop.f32.mrb[3].mxu1  ;;  %v1996_v59 = vsel %vm1964_vm7, %v1963_v3, %v1511_v21 }
 0x293   : > { %v2419_v1 = vmul.f32 %v4194_v11, %v2325_v55 }
 0x294   : > { %v1733_v53 = vpop.permute.xlu0 %1732  ;;  %v2459_v33 = vadd.f32 %v4199_v57, %v2420_v35 }
 0x295   : > { %v2045_v30 = vsel %vm2030_vm8, %v2012_v10, %v1733_v53  ;;  %v1637_v18 = vpop.permute.xlu1 %1636  ;;  %v2458_v41 = vadd.f32 %v4199_v57, %v2419_v1 }
 0x296   : > { %2722 = vmatprep.mubr.msk.f32.mxu0 %vm2068_vm10, %v2045_v30  ;;  %2491 = vst.msk [vmem:[%s4206_s7 + $0x98] sm:$0xff] %vm398_vm0, %v2459_v33  ;;  %v2028_v31 = vsel %vm1997_vm9, %v1995_v32, %v1637_v18 }
 0x297   : > { %2490 = vst.msk [vmem:[%s4206_s7 + $0x90] sm:$0xff] %vm398_vm0, %v2458_v41 }
 0x298   : > { %v1735_v29 = vpop.permute.xlu0 %1734 }
 0x299   : > { %v2046_v37 = vsel %vm2030_vm8, %v2013_v9, %v1735_v29  ;;  %v1639_v2 = vpop.permute.xlu1 %1638 }
 0x29a   : > { %2723 = vmatmul.mubr.msk.f32.gmra.mrb[14].mxu0 %vm2068_vm10, %v2046_v37  ;;  %v2029_v39 = vsel %vm1997_vm9, %v1996_v59, %v1639_v2 }
 0x29d   : > { %v1765_v26 = vpop.permute.xlu1 %1764 }
 0x29e   : > { %v2061_v56 = vsel %vm2030_vm8, %v2028_v31, %v1765_v26 }
 0x29f   : > { %2746 = vmatprep.mubr.msk.f32.mxu1 %vm2068_vm10, %v2061_v56 }
 0x2a1   : > { %v1767_v6 = vpop.permute.xlu1 %1766 }
 0x2a2   : > { %v2062_v17 = vsel %vm2030_vm8, %v2029_v39, %v1767_v6 }
 0x2a3   : > { %2747 = vmatmul.mubr.msk.f32.gmra.mrb[14].mxu1 %vm2068_vm10, %v2062_v17 }
 0x2b1   : > { %v2709_v52 = vpop.f32.mrb[4].mxu0 }
 0x2b2   : > { %v2406_v15 = vmul.f32 %v2709_v52, %v4194_v11  ;;  %v2255_v40 = vpop.f32.mrb[5].mxu0 }
 0x2b3   : > { %v2405_v58 = vmul.f32 %v4194_v11, %v2255_v40 }
 0x2b4   : > { %v2445_v45 = vadd.f32 %v4199_v57, %v2406_v15 }
 0x2b5   : > { %v2444_v24 = vadd.f32 %v4199_v57, %v2405_v58 }
 0x2b6   : > { %2477 = vst.msk [vmem:[%s4206_s7 + $0x28] sm:$0xff] %vm398_vm0, %v2445_v45 }
 0x2b7   : > { %2476 = vst.msk [vmem:[%s4206_s7 + $0x20] sm:$0xff] %vm398_vm0, %v2444_v24 }
 0x2b9   : > { %v2733_v23 = vpop.f32.mrb[4].mxu1 }
 0x2ba   : > { %v2422_v36 = vmul.f32 %v2733_v23, %v4194_v11  ;;  %v2335_v7 = vpop.f32.mrb[5].mxu1 }
 0x2bb   : > { %v2421_v21 = vmul.f32 %v4194_v11, %v2335_v7 }
 0x2bc   : > { %v2461_v43 = vadd.f32 %v4199_v57, %v2422_v36 }
 0x2bd   : > { %v2460_v20 = vadd.f32 %v4199_v57, %v2421_v21 }
 0x2be   : > { %2493 = vst.msk [vmem:[%s4206_s7 + $0xa8] sm:$0xff] %vm398_vm0, %v2461_v43 }
 0x2bf   : > { %2492 = vst.msk [vmem:[%s4206_s7 + $0xa0] sm:$0xff] %vm398_vm0, %v2460_v20 }
 0x2d9   : > { %v2712_v51 = vpop.f32.mrb[6].mxu0 }
 0x2da   : > { %v2408_v16 = vmul.f32 %v2712_v51, %v4194_v11  ;;  %v2265_v46 = vpop.f32.mrb[7].mxu0 }
 0x2db   : > { %v2407_v38 = vmul.f32 %v4194_v11, %v2265_v46 }
 0x2dc   : > { %v2447_v27 = vadd.f32 %v4199_v57, %v2408_v16 }
 0x2dd   : > { %v2446_v4 = vadd.f32 %v4199_v57, %v2407_v38 }
 0x2de   : > { %2479 = vst.msk [vmem:[%s4206_s7 + $0x38] sm:$0xff] %vm398_vm0, %v2447_v27 }
 0x2df   : > { %2478 = vst.msk [vmem:[%s4206_s7 + $0x30] sm:$0xff] %vm398_vm0, %v2446_v4 }
 0x2e2   : > { %v2736_v35 = vpop.f32.mrb[6].mxu1 }
 0x2e3   : > { %v2424_v55 = vmul.f32 %v2736_v35, %v4194_v11  ;;  %v2345_v19 = vpop.f32.mrb[7].mxu1 }
 0x2e4   : > { %v2423_v12 = vmul.f32 %v4194_v11, %v2345_v19 }
 0x2e5   : > { %v2463_v10 = vadd.f32 %v4199_v57, %v2424_v55 }
 0x2e6   : > { %v2462_v1 = vadd.f32 %v4199_v57, %v2423_v12 }
 0x2e7   : > { %2495 = vst.msk [vmem:[%s4206_s7 + $0xb8] sm:$0xff] %vm398_vm0, %v2463_v10 }
 0x2e8   : > { %2494 = vst.msk [vmem:[%s4206_s7 + $0xb0] sm:$0xff] %vm398_vm0, %v2462_v1 }
 0x301   : > { %v2715_v53 = vpop.f32.mrb[8].mxu0 }
 0x302   : > { %v2410_v49 = vmul.f32 %v2715_v53, %v4194_v11  ;;  %v2275_v33 = vpop.f32.mrb[9].mxu0 }
 0x303   : > { %v2409_v30 = vmul.f32 %v4194_v11, %v2275_v33 }
 0x304   : > { %v2449_v18 = vadd.f32 %v4199_v57, %v2410_v49 }
 0x305   : > { %v2448_v47 = vadd.f32 %v4199_v57, %v2409_v30 }
 0x306   : > { %2481 = vst.msk [vmem:[%s4206_s7 + $0x48] sm:$0xff] %vm398_vm0, %v2449_v18 }
 0x307   : > { %2480 = vst.msk [vmem:[%s4206_s7 + $0x40] sm:$0xff] %vm398_vm0, %v2448_v47 }
 0x30a   : > { %v2739_v41 = vpop.f32.mrb[8].mxu1 }
 0x30b   : > { %v2426_v44 = vmul.f32 %v2739_v41, %v4194_v11  ;;  %v2355_v8 = vpop.f32.mrb[9].mxu1 }
 0x30c   : > { %v2425_v60 = vmul.f32 %v4194_v11, %v2355_v8 }
 0x30d   : > { %v2465_v62 = vadd.f32 %v4199_v57, %v2426_v44 }
 0x30e   : > { %v2464_v28 = vadd.f32 %v4199_v57, %v2425_v60 }
 0x30f   : > { %2497 = vst.msk [vmem:[%s4206_s7 + $0xc8] sm:$0xff] %vm398_vm0, %v2465_v62 }
 0x310   : > { %2496 = vst.msk [vmem:[%s4206_s7 + $0xc0] sm:$0xff] %vm398_vm0, %v2464_v28 }
 0x329   : > { %v2718_v34 = vpop.f32.mrb[10].mxu0 }
 0x32a   : > { %v2412_v9 = vmul.f32 %v2718_v34, %v4194_v11  ;;  %v2285_v29 = vpop.f32.mrb[11].mxu0 }
 0x32b   : > { %v2411_v5 = vmul.f32 %v4194_v11, %v2285_v29 }
 0x32c   : > { %v2451_v14 = vadd.f32 %v4199_v57, %v2412_v9 }
 0x32d   : > { %v2450_v37 = vadd.f32 %v4199_v57, %v2411_v5 }
 0x32e   : > { %2483 = vst.msk [vmem:[%s4206_s7 + $0x58] sm:$0xff] %vm398_vm0, %v2451_v14 }
 0x32f   : > { %2482 = vst.msk [vmem:[%s4206_s7 + $0x50] sm:$0xff] %vm398_vm0, %v2450_v37 }
 0x332   : > { %v2742_v2 = vpop.f32.mrb[10].mxu1 }
 0x333   : > { %v2428_v54 = vmul.f32 %v2742_v2, %v4194_v11  ;;  %v2365_v50 = vpop.f32.mrb[11].mxu1 }
 0x334   : > { %v2427_v0 = vmul.f32 %v4194_v11, %v2365_v50 }
 0x335   : > { %v2467_v48 = vadd.f32 %v4199_v57, %v2428_v54 }
 0x336   : > { %v2466_v42 = vadd.f32 %v4199_v57, %v2427_v0 }
 0x337   : > { %2499 = vst.msk [vmem:[%s4206_s7 + $0xd8] sm:$0xff] %vm398_vm0, %v2467_v48 }
 0x338   : > { %2498 = vst.msk [vmem:[%s4206_s7 + $0xd0] sm:$0xff] %vm398_vm0, %v2466_v42 }
 0x351   : > { %v2721_v25 = vpop.f32.mrb[12].mxu0 }
 0x352   : > { %v2414_v61 = vmul.f32 %v2721_v25, %v4194_v11  ;;  %v2295_v32 = vpop.f32.mrb[13].mxu0 }
 0x353   : > { %v2413_v63 = vmul.f32 %v4194_v11, %v2295_v32 }
 0x354   : > { %v2453_v22 = vadd.f32 %v4199_v57, %v2414_v61 }
 0x355   : > { %v2452_v31 = vadd.f32 %v4199_v57, %v2413_v63 }
 0x356   : > { %2485 = vst.msk [vmem:[%s4206_s7 + $0x68] sm:$0xff] %vm398_vm0, %v2453_v22 }
 0x357   : > { %2484 = vst.msk [vmem:[%s4206_s7 + $0x60] sm:$0xff] %vm398_vm0, %v2452_v31 }
 0x35a   : > { %v2745_v26 = vpop.f32.mrb[12].mxu1 }
 0x35b   : > { %v2430_v13 = vmul.f32 %v2745_v26, %v4194_v11  ;;  %v2375_v56 = vpop.f32.mrb[13].mxu1 }
 0x35c   : > { %v2429_v3 = vmul.f32 %v4194_v11, %v2375_v56 }
 0x35d   : > { %v2469_v59 = vadd.f32 %v4199_v57, %v2430_v13 }
 0x35e   : > { %v2468_v39 = vadd.f32 %v4199_v57, %v2429_v3 }
 0x35f   : > { %2501 = vst.msk [vmem:[%s4206_s7 + $0xe8] sm:$0xff] %vm398_vm0, %v2469_v59 }
 0x360   : > { %2500 = vst.msk [vmem:[%s4206_s7 + $0xe0] sm:$0xff] %vm398_vm0, %v2468_v39 }
 0x36d   : > { %v2724_v6 = vpop.f32.mrb[14].mxu0 }
 0x36e   : > { %v2416_v17 = vmul.f32 %v2724_v6, %v4194_v11  ;;  %v2305_v52 = vpop.f32.mrb[15].mxu0 }
 0x36f   : > { %v2415_v15 = vmul.f32 %v4194_v11, %v2305_v52 }
 0x370   : > { %v2455_v40 = vadd.f32 %v4199_v57, %v2416_v17 }
 0x371   : > { %v2454_v58 = vadd.f32 %v4199_v57, %v2415_v15 }
 0x372   : > { %2487 = vst.msk [vmem:[%s4206_s7 + $0x78] sm:$0xff] %vm398_vm0, %v2455_v40 }
 0x373   : > { %2486 = vst.msk [vmem:[%s4206_s7 + $0x70] sm:$0xff] %vm398_vm0, %v2454_v58 }
 0x376   : > { %v2748_v45 = vpop.f32.mrb[14].mxu1 }
 0x377   : > { %v2432_v24 = vmul.f32 %v2748_v45, %v4194_v11  ;;  %v2385_v23 = vpop.f32.mrb[15].mxu1 }
 0x378   : > { %v2431_v36 = vmul.f32 %v4194_v11, %v2385_v23 }
 0x379   : > { %v2471_v7 = vadd.f32 %v4199_v57, %v2432_v24 }
 0x37a   : > { %v2470_v21 = vadd.f32 %v4199_v57, %v2431_v36 }
 0x37b   : > { %2503 = vst.msk [vmem:[%s4206_s7 + $0xf8] sm:$0xff] %vm398_vm0, %v2471_v7 }
 0x37c   : > { %2502 = vst.msk [vmem:[%s4206_s7 + $0xf0] sm:$0xff] %vm398_vm0, %v2470_v21 }
 0x37d PF: > { %s15_s20 = sadd.s32 1, %s2837_s20   ;;  %s4617_s18 = smov %s2833_s19 }
 0x37e   : > { %p12_p5 = scmp.ge.s32.totalorder %s15_s20, 4   ;;  %s4618_s19 = smov %s4620_s21 }
 0x380   :  { %14 = sbr.rel (!%p12_p5) target bundleno = 2 (0x2), region = 75 }

</bundles_post_ra>
